<compile_context>
chip_gen: v5e
topology: v5e:2x2
jax: 0.10.0
libtpu: 0.0.40
codegen_flags: <defaults>
</compile_context>

<pallas_src>
import jax
import jax.numpy as jnp
from jax import lax
from jax.experimental import pallas as pl
from jax.experimental.pallas import tpu as pltpu

EPS = 1e-3                       # BatchNorm2d eps in the reference module
C1X1 = 256                       # Cout of each of the three fused 1x1 convs
VMEM_LIMIT = 32 * 1024 * 1024    # safe on v5e / v6e / v7x, >> actual use


def _round_up(v, m):
    return ((v + m - 1) // m) * m


def _choose_m_tiling(m, max_tile=256, min_tiles=1):
    """Pick a sublane-aligned M tile; >=min_tiles tiles (megacore sharding)."""
    ntiles = max(min_tiles, -(-m // max_tile))
    tile = _round_up(-(-m // ntiles), 8)
    return tile, ntiles * tile


# ----------------------------- Pallas kernels ------------------------------ #

def _matmul_bias_relu_kernel(x_ref, w_ref, bias_ref, o_ref):
    # x: (TM, K) bf16, w: (K, Cout) bf16 (BN scale pre-folded), bias: (1, Cout) f32.
    acc = jnp.dot(x_ref[...], w_ref[...], preferred_element_type=jnp.float32)
    o_ref[...] = jnp.maximum(acc + bias_ref[...], 0.0).astype(o_ref.dtype)


def _conv3x3_taps_kernel(taps_ref, w_ref, bias_ref, o_ref, acc_ref):
    # grid = (M tiles [parallel], 9 taps [arbitrary reduction]).
    t = pl.program_id(1)

    @pl.when(t == 0)
    def _():
        acc_ref[...] = jnp.zeros_like(acc_ref)

    acc_ref[...] += jnp.dot(taps_ref[0], w_ref[0],
                            preferred_element_type=jnp.float32)

    @pl.when(t == pl.num_programs(1) - 1)
    def _():
        o_ref[...] = jnp.maximum(acc_ref[...] + bias_ref[...],
                                 0.0).astype(o_ref.dtype)


def _final_stage_kernel(t01_ref, t2_ref, w0_ref, w1_ref, w2_ref,
                        b0_ref, b1_ref, b2_ref,
                        o0_ref, o1_ref, o2_ref,
                        acc0_ref, acc1_ref, acc2_ref):
    # All three stride-2 3x3 convs fused.
    # grid = (M tiles [parallel], 9 taps [arbitrary reduction]).
    t = pl.program_id(1)

    @pl.when(t == 0)
    def _():
        acc0_ref[...] = jnp.zeros_like(acc0_ref)
        acc1_ref[...] = jnp.zeros_like(acc1_ref)
        acc2_ref[...] = jnp.zeros_like(acc2_ref)

    t01 = t01_ref[0]                                    # (TM, 2*C1X1) bf16
    acc0_ref[...] += jnp.dot(t01[:, :C1X1], w0_ref[0],
                             preferred_element_type=jnp.float32)
    acc1_ref[...] += jnp.dot(t01[:, C1X1:], w1_ref[0],
                             preferred_element_type=jnp.float32)
    acc2_ref[...] += jnp.dot(t2_ref[0], w2_ref[0],
                             preferred_element_type=jnp.float32)

    @pl.when(t == pl.num_programs(1) - 1)
    def _():
        o0_ref[...] = jnp.maximum(acc0_ref[...] + b0_ref[...],
                                  0.0).astype(o0_ref.dtype)
        o1_ref[...] = jnp.maximum(acc1_ref[...] + b1_ref[...],
                                  0.0).astype(o1_ref.dtype)
        o2_ref[...] = jnp.maximum(acc2_ref[...] + b2_ref[...],
                                  0.0).astype(o2_ref.dtype)


# ---------------------------- pallas_call wrappers -------------------------- #

def fused_conv1x1(x2d, w, bias, tile_m):
    """All three 1x1 BasicConv2d heads as one (M,K)@(K,768) matmul + bias + ReLU."""
    M, K = x2d.shape
    Cout = w.shape[1]
    return pl.pallas_call(
        _matmul_bias_relu_kernel,
        out_shape=jax.ShapeDtypeStruct((M, Cout), jnp.bfloat16),
        grid=(M // tile_m,),
        in_specs=[
            pl.BlockSpec((tile_m, K), lambda i: (i, 0)),
            pl.BlockSpec((K, Cout), lambda i: (0, 0)),
            pl.BlockSpec((1, Cout), lambda i: (0, 0)),
        ],
        out_specs=pl.BlockSpec((tile_m, Cout), lambda i: (i, 0)),
        compiler_params=pltpu.CompilerParams(
            dimension_semantics=("parallel",),
            vmem_limit_bytes=VMEM_LIMIT),
    )(x2d, w, bias)


def conv3x3_from_taps(taps, w9, bias, tile_m, out_dtype=jnp.bfloat16):
    """3x3 conv as a 9-tap matmul reduction with a VMEM f32 accumulator."""
    T, M, Cin = taps.shape
    Cout = w9.shape[-1]
    return pl.pallas_call(
        _conv3x3_taps_kernel,
        out_shape=jax.ShapeDtypeStruct((M, Cout), out_dtype),
        grid=(M // tile_m, T),
        in_specs=[
            pl.BlockSpec((1, tile_m, Cin), lambda i, t: (t, i, 0)),
            pl.BlockSpec((1, Cin, Cout), lambda i, t: (t, 0, 0)),
            pl.BlockSpec((1, Cout), lambda i, t: (0, 0)),
        ],
        out_specs=pl.BlockSpec((tile_m, Cout), lambda i, t: (i, 0)),
        scratch_shapes=[pltpu.VMEM((tile_m, Cout), jnp.float32)],
        compiler_params=pltpu.CompilerParams(
            dimension_semantics=("parallel", "arbitrary"),
            vmem_limit_bytes=VMEM_LIMIT),
    )(taps, w9, bias)


def fused_final_stage(taps01, taps2, p0, p1, p2, tile_m):
    """b0_1 / b1_1 / b2_2 (all 3x3 stride-2) in one pallas_call, 3 outputs."""
    w0, b0 = p0
    w1, b1 = p1
    w2, b2 = p2
    T, M, C01 = taps01.shape
    Cin2 = taps2.shape[-1]
    c0, c1, c2 = w0.shape[-1], w1.shape[-1], w2.shape[-1]
    return pl.pallas_call(
        _final_stage_kernel,
        out_shape=(jax.ShapeDtypeStruct((M, c0), jnp.float32),
                   jax.ShapeDtypeStruct((M, c1), jnp.float32),
                   jax.ShapeDtypeStruct((M, c2), jnp.float32)),
        grid=(M // tile_m, T),
        in_specs=[
            pl.BlockSpec((1, tile_m, C01), lambda i, t: (t, i, 0)),
            pl.BlockSpec((1, tile_m, Cin2), lambda i, t: (t, i, 0)),
            pl.BlockSpec((1, w0.shape[1], c0), lambda i, t: (t, 0, 0)),
            pl.BlockSpec((1, w1.shape[1], c1), lambda i, t: (t, 0, 0)),
            pl.BlockSpec((1, w2.shape[1], c2), lambda i, t: (t, 0, 0)),
            pl.BlockSpec((1, c0), lambda i, t: (0, 0)),
            pl.BlockSpec((1, c1), lambda i, t: (0, 0)),
            pl.BlockSpec((1, c2), lambda i, t: (0, 0)),
        ],
        out_specs=[pl.BlockSpec((tile_m, c0), lambda i, t: (i, 0)),
                   pl.BlockSpec((tile_m, c1), lambda i, t: (i, 0)),
                   pl.BlockSpec((tile_m, c2), lambda i, t: (i, 0))],
        scratch_shapes=[pltpu.VMEM((tile_m, c0), jnp.float32),
                        pltpu.VMEM((tile_m, c1), jnp.float32),
                        pltpu.VMEM((tile_m, c2), jnp.float32)],
        compiler_params=pltpu.CompilerParams(
            dimension_semantics=("parallel", "arbitrary"),
            vmem_limit_bytes=VMEM_LIMIT),
    )(taps01, taps2, w0, w1, w2, b0, b1, b2)


# ------------------------------ JAX glue ----------------------------------- #

def _s2_windows(a):
    """3x3 / stride-2 / no-pad windows of an NHWC array (9 slices)."""
    N, H, W, C = a.shape
    Ho = (H - 3) // 2 + 1
    Wo = (W - 3) // 2 + 1
    slices = [a[:, kh:kh + 2 * (Ho - 1) + 1:2, kw:kw + 2 * (Wo - 1) + 1:2, :]
              for kh in range(3) for kw in range(3)]
    return slices, (N, Ho, Wo, C)


def _s2_taps(a):
    slices, (N, Ho, Wo, C) = _s2_windows(a)
    return jnp.stack([s.reshape(N * Ho * Wo, C) for s in slices], axis=0)


def _s1p1_taps(a):
    """3x3 / stride-1 / pad-1 tap tensor: (9, N*H*W, C)."""
    N, H, W, C = a.shape
    ap = jnp.pad(a, ((0, 0), (1, 1), (1, 1), (0, 0)))
    return jnp.stack([ap[:, kh:kh + H, kw:kw + W, :].reshape(N * H * W, C)
                      for kh in range(3) for kw in range(3)], axis=0)


def maxpool3x3_s2(x):
    """nn.MaxPool2d(3, stride=2), floor mode — chained jnp.maximum, no patch
    materialization and no extra pallas_call (mem-bound either way)."""
    slices, _ = _s2_windows(x)
    out = slices[0]
    for s in slices[1:]:
        out = jnp.maximum(out, s)
    return out


def mixed_7a(x, kp):
    N, H, W, Cin = x.shape
    Ho, Wo = (H - 3) // 2 + 1, (W - 3) // 2 + 1

    # --- fused 1x1 stage: single 1088 -> 768 matmul for branch0/1/2 heads -- #
    M1 = N * H * W
    tile1, M1p = _choose_m_tiling(M1, max_tile=256, min_tiles=2)
    x2d = x.astype(jnp.bfloat16).reshape(M1, Cin)
    if M1p != M1:
        x2d = jnp.pad(x2d, ((0, M1p - M1), (0, 0)))
    w1x1, b1x1 = kp["conv1x1_fused"]
    y2d = fused_conv1x1(x2d, w1x1, b1x1, tile_m=tile1)            # (M1p, 768)
    y = y2d[:M1].reshape(N, H, W, 3 * C1X1)

    # --- branch2 middle conv: 3x3 s1 p1, 256 -> 288 (Cout padded to 384) --- #
    w21, b21 = kp["b2_1"]
    taps21 = _s1p1_taps(y[..., 2 * C1X1:])                        # (9, M1, 256)
    if M1p != M1:
        taps21 = jnp.pad(taps21, ((0, 0), (0, M1p - M1), (0, 0)))
    u2_2d = conv3x3_from_taps(taps21, w21, b21, tile_m=tile1)
    u2 = u2_2d[:M1].reshape(N, H, W, w21.shape[-1])               # padded ch = 0

    # --- fused output stage: b0_1, b1_1, b2_2 (all 3x3 stride 2) ----------- #
    M2 = N * Ho * Wo
    tile2, M2p = _choose_m_tiling(M2, max_tile=256, min_tiles=1)
    taps01 = _s2_taps(y[..., :2 * C1X1])                          # (9, M2, 512)
    taps22 = _s2_taps(u2)                                         # (9, M2, 384)
    if M2p != M2:
        taps01 = jnp.pad(taps01, ((0, 0), (0, M2p - M2), (0, 0)))
        taps22 = jnp.pad(taps22, ((0, 0), (0, M2p - M2), (0, 0)))
    o0, o1, o2 = fused_final_stage(taps01, taps22,
                                   kp["b0_1"], kp["b1_1"], kp["b2_2"],
                                   tile_m=tile2)
    b0 = o0[:M2].reshape(N, Ho, Wo, -1)
    b1 = o1[:M2].reshape(N, Ho, Wo, -1)
    b2 = o2[:M2].reshape(N, Ho, Wo, -1)

    # --- branch3: max-pool 3x3 stride 2 (exact, f32, pure JAX) -------------- #
    b3 = maxpool3x3_s2(x)

    # channel order matches torch.cat((branch0, branch1, branch2, pool), 1)
    return jnp.concatenate([b0, b1, b2, b3], axis=-1)


# --------------------------- parameter init -------------------------------- #

def _init_bn(key, c):
    k1, k2, k3, k4 = jax.random.split(key, 4)
    gamma = jax.random.uniform(k1, (c,), minval=0.5, maxval=1.5)
    beta = 0.1 * jax.random.normal(k2, (c,))
    mean = 0.1 * jax.random.normal(k3, (c,))
    var = jax.random.uniform(k4, (c,), minval=0.5, maxval=1.5)
    scale = gamma / jnp.sqrt(var + EPS)
    bias = beta - mean * scale
    return scale.astype(jnp.float32), bias.astype(jnp.float32)


def _init_basic_conv(key, wshape, fan_in):
    """Conv (no bias) + eval-mode BN, with the BN scale folded into the conv
    weight (exact per-output-channel fold):  relu((x*W)*s + b) == relu(x*(W*s) + b)."""
    kw_, kb = jax.random.split(key)
    w = (jnp.sqrt(2.0 / fan_in) * jax.random.normal(kw_, wshape)).astype(jnp.float32)
    scale, bias = _init_bn(kb, wshape[-1])
    return (w * scale).astype(jnp.float32), bias


def make_params(key):
    """Natural-shape, f32, BN-folded parameters (used by the JAX reference)."""
    ks = jax.random.split(key, 7)
    return {
        "b0_0": _init_basic_conv(ks[0], (1088, C1X1), 1088),
        "b0_1": _init_basic_conv(ks[1], (3, 3, C1X1, 384), 9 * C1X1),
        "b1_0": _init_basic_conv(ks[2], (1088, C1X1), 1088),
        "b1_1": _init_basic_conv(ks[3], (3, 3, C1X1, 288), 9 * C1X1),
        "b2_0": _init_basic_conv(ks[4], (1088, C1X1), 1088),
        "b2_1": _init_basic_conv(ks[5], (3, 3, C1X1, 288), 9 * C1X1),
        "b2_2": _init_basic_conv(ks[6], (3, 3, 288, 320), 9 * 288),
    }


def _pack_3x3(w, bias, pad_cin_to=None, pad_cout_to=None):
    """(3,3,Cin,Cout) f32 -> (9,Cin,Cout) bf16 tap slab + (1,Cout) f32 bias,
    with optional zero padding of Cin / Cout for lane-dense layouts."""
    _, _, cin, cout = w.shape
    w9 = w.reshape(9, cin, cout)          # (kh, kw)-major: matches tap order
    if pad_cin_to is not None and pad_cin_to > cin:
        w9 = jnp.pad(w9, ((0, 0), (0, pad_cin_to - cin), (0, 0)))
    if pad_cout_to is not None and pad_cout_to > cout:
        w9 = jnp.pad(w9, ((0, 0), (0, 0), (0, pad_cout_to - cout)))
        bias = jnp.pad(bias, (0, pad_cout_to - cout))
    return w9.astype(jnp.bfloat16), bias.reshape(1, -1).astype(jnp.float32)


def prep_kernel_params(p):
    """Pack / pad / cast the natural-shape params for the Pallas kernels."""
    w00, b00 = p["b0_0"]
    w10, b10 = p["b1_0"]
    w20, b20 = p["b2_0"]
    return {
        # three identical-shape 1x1 convs (1088 -> 256 each), fused along Cout.
        "conv1x1_fused": (
            jnp.concatenate([w00, w10, w20], axis=-1).astype(jnp.bfloat16),
            jnp.concatenate([b00, b10, b20],
                            axis=-1).reshape(1, -1).astype(jnp.float32)),
        # branch0: 256 -> 384 (3x3 s2)
        "b0_1": _pack_3x3(*p["b0_1"]),
        # branch1: 256 -> 288 (3x3 s2)
        "b1_1": _pack_3x3(*p["b1_1"]),
        # branch2: 256 -> 288 (3x3 s1 p1, Cout zero-padded to 384 for
        #          lane-dense stores) then 288 -> 320 (3x3 s2, Cin padded to
        #          384 to consume the padded intermediate; zeros contribute 0)
        "b2_1": _pack_3x3(*p["b2_1"], pad_cout_to=384),
        "b2_2": _pack_3x3(*p["b2_2"], pad_cin_to=384),
    }


# --------------------------- pure-JAX reference ----------------------------- #

def _ref_conv1x1(xb, w, bias):
    y = jnp.einsum("nhwc,cd->nhwd", xb, w.astype(jnp.bfloat16),
                   preferred_element_type=jnp.float32)
    return jnp.maximum(y + bias, 0.0)


def _ref_conv3x3(xb, w, bias, stride, padding):
    y = lax.conv_general_dilated(
        xb, w.astype(jnp.bfloat16), window_strides=(stride, stride),
        padding=padding, dimension_numbers=("NHWC", "HWIO", "NHWC"),
        preferred_element_type=jnp.float32)
    return jnp.maximum(y + bias, 0.0)


def mixed_7a_ref(x, p):
    """Reference with the same bf16 quantization points as the kernel path."""
    xb = x.astype(jnp.bfloat16)
    h0 = _ref_conv1x1(xb, *p["b0_0"]).astype(jnp.bfloat16)
    h1 = _ref_conv1x1(xb, *p["b1_0"]).astype(jnp.bfloat16)
    h2 = _ref_conv1x1(xb, *p["b2_0"]).astype(jnp.bfloat16)
    b0 = _ref_conv3x3(h0, *p["b0_1"], stride=2, padding="VALID")
    b1 = _ref_conv3x3(h1, *p["b1_1"], stride=2, padding="VALID")
    u2 = _ref_conv3x3(h2, *p["b2_1"], stride=1,
                      padding="SAME").astype(jnp.bfloat16)
    b2 = _ref_conv3x3(u2, *p["b2_2"], stride=2, padding="VALID")
    b3 = maxpool3x3_s2(x)
    return jnp.concatenate([b0, b1, b2, b3], axis=-1)


# --------------------------------- main ------------------------------------ #

if __name__ == "__main__":
    key = jax.random.PRNGKey(0)
    k_params, k_x = jax.random.split(key)

    # Small spatial extent consistent with the module (channels fixed at 1088).
    N, H, W, Cin = 2, 9, 9, 1088
    x = jax.random.normal(k_x, (N, H, W, Cin), dtype=jnp.float32)   # NHWC
    params = make_params(k_params)
    kparams = prep_kernel_params(params)

    fwd = jax.jit(mixed_7a)
    out = jax.block_until_ready(fwd(x, kparams))

    # 3x3/s2 convs and maxpool(3, s=2) on 9x9 -> 4x4; channels 384+288+320+1088.
    assert out.shape == (N, 4, 4, 384 + 288 + 320 + 1088), out.shape
    assert out.dtype == jnp.float32
    assert bool(jnp.all(jnp.isfinite(out)))

    # correctness vs a pure-JAX reference using identical bf16 quantization.
    ref = jax.block_until_ready(jax.jit(mixed_7a_ref)(x, params))
    max_err = float(jnp.max(jnp.abs(out - ref)))
    ref_scale = float(jnp.max(jnp.abs(ref)))
    assert max_err <= 1e-2 * ref_scale + 1e-2, (max_err, ref_scale)

    print("KERNEL_OK")
</pallas_src>

<mosaic_0001>
module attributes {stable_mosaic.version = 11 : i64} {
  func.func @_matmul_bias_relu_kernel(%arg0: i32, %arg1: memref<88x1088xbf16, #tpu.memory_space<vmem>>, %arg2: memref<1088x768xbf16, #tpu.memory_space<vmem>>, %arg3: memref<1x768xf32, #tpu.memory_space<vmem>>, %arg4: memref<88x768xbf16, #tpu.memory_space<vmem>>) attributes {dimension_semantics = [#tpu.dimension_semantics<parallel>], iteration_bounds = array<i64: 2>, scalar_prefetch = 0 : i64, scratch_operands = 0 : i64, tpu.core_type = #tpu.core_type<tc>, window_params = [{transform_indices = @transform_0, window_bounds = array<i64: 88, 1088>}, {pipeline_mode = #tpu.pipeline_mode<synchronous>, transform_indices = @transform_1, window_bounds = array<i64: 1088, 768>}, {pipeline_mode = #tpu.pipeline_mode<synchronous>, transform_indices = @transform_2, window_bounds = array<i64: 1, 768>}, {transform_indices = @transform_3, window_bounds = array<i64: 88, 768>}]} {
    %c0 = arith.constant 0 : index
    %c0_0 = arith.constant 0 : index
    %0 = vector.load %arg1[%c0, %c0_0] : memref<88x1088xbf16, #tpu.memory_space<vmem>>, vector<88x1088xbf16>
    %c0_1 = arith.constant 0 : index
    %c0_2 = arith.constant 0 : index
    %1 = vector.load %arg2[%c0_1, %c0_2] : memref<1088x768xbf16, #tpu.memory_space<vmem>>, vector<1088x768xbf16>
    %cst = arith.constant dense<0.000000e+00> : vector<88x768xf32>
    %2 = tpu.matmul %0, %1, %cst {dimension_numbers = #tpu.dot_dimension_numbers<[1], [0], [0], [1], [0, 0, 1, 1], [], []>} : vector<88x1088xbf16>, vector<1088x768xbf16>, vector<88x768xf32> -> vector<88x768xf32>
    %c0_3 = arith.constant 0 : index
    %c0_4 = arith.constant 0 : index
    %3 = vector.load %arg3[%c0_3, %c0_4] : memref<1x768xf32, #tpu.memory_space<vmem>>, vector<1x768xf32>
    %4 = vector.broadcast %3 : vector<1x768xf32> to vector<88x768xf32>
    %5 = arith.addf %2, %4 : vector<88x768xf32>
    %cst_5 = arith.constant 0.000000e+00 : f32
    %6 = vector.broadcast %cst_5 : f32 to vector<88x768xf32>
    %7 = arith.maximumf %5, %6 : vector<88x768xf32>
    %8 = arith.truncf %7 : vector<88x768xf32> to vector<88x768xbf16>
    %c0_6 = arith.constant 0 : index
    %c0_7 = arith.constant 0 : index
    %9 = vector.load %arg4[%c0_6, %c0_7] : memref<88x768xbf16, #tpu.memory_space<vmem>>, vector<88x768xbf16>
    tpu.vector_store %arg4[%c0_6, %c0_7], %8 {strides = array<i32>} : memref<88x768xbf16, #tpu.memory_space<vmem>>, vector<88x768xbf16>,
    return
  }
  func.func @transform_0(%arg0: i32) -> (i32, i32) {
    %c0_i32 = arith.constant 0 : i32
    %c0_i32_0 = arith.constant 0 : i32
    return %arg0, %c0_i32 : i32, i32
  }
  func.func @transform_1(%arg0: i32) -> (i32, i32) {
    %c0_i32 = arith.constant 0 : i32
    %c0_i32_0 = arith.constant 0 : i32
    %c0_i32_1 = arith.constant 0 : i32
    return %c0_i32, %c0_i32_0 : i32, i32
  }
  func.func @transform_2(%arg0: i32) -> (i32, i32) {
    %c0_i32 = arith.constant 0 : i32
    %c0_i32_0 = arith.constant 0 : i32
    %c0_i32_1 = arith.constant 0 : i32
    return %c0_i32, %c0_i32_0 : i32, i32
  }
  func.func @transform_3(%arg0: i32) -> (i32, i32) {
    %c0_i32 = arith.constant 0 : i32
    %c0_i32_0 = arith.constant 0 : i32
    return %arg0, %c0_i32 : i32, i32
  }
}

module attributes {stable_mosaic.version = 11 : i64} {
  func.func @_conv3x3_taps_kernel(%arg0: i32, %arg1: i32, %arg2: memref<1x88x256xbf16, #tpu.memory_space<vmem>>, %arg3: memref<1x256x384xbf16, #tpu.memory_space<vmem>>, %arg4: memref<1x384xf32, #tpu.memory_space<vmem>>, %arg5: memref<88x384xbf16, #tpu.memory_space<vmem>>, %arg6: memref<88x384xf32, #tpu.memory_space<vmem>>) attributes {dimension_semantics = [#tpu.dimension_semantics<parallel>, #tpu.dimension_semantics<arbitrary>], iteration_bounds = array<i64: 2, 9>, scalar_prefetch = 0 : i64, scratch_operands = 1 : i64, tpu.core_type = #tpu.core_type<tc>, window_params = [{transform_indices = @transform_0, window_bounds = array<i64: 1, 88, 256>}, {transform_indices = @transform_1, window_bounds = array<i64: 1, 256, 384>}, {pipeline_mode = #tpu.pipeline_mode<synchronous>, transform_indices = @transform_2, window_bounds = array<i64: 1, 384>}, {transform_indices = @transform_3, window_bounds = array<i64: 88, 384>}]} {
    %c0_i32 = arith.constant 0 : i32
    %0 = arith.cmpi eq, %arg1, %c0_i32 : i32
    %1 = arith.extui %0 : i1 to i32
    %c0_i32_0 = arith.constant 0 : i32
    %2 = arith.cmpi ne, %1, %c0_i32_0 : i32
    scf.if %2 {
      %cst_11 = arith.constant 0.000000e+00 : f32
      %14 = vector.broadcast %cst_11 : f32 to vector<88x384xf32>
      %c0_12 = arith.constant 0 : index
      %c0_13 = arith.constant 0 : index
      %15 = vector.load %arg6[%c0_12, %c0_13] : memref<88x384xf32, #tpu.memory_space<vmem>>, vector<88x384xf32>
      tpu.vector_store %arg6[%c0_12, %c0_13], %14 {strides = array<i32>} : memref<88x384xf32, #tpu.memory_space<vmem>>, vector<88x384xf32>,
    } else {
    }
    %c0 = arith.constant 0 : index
    %c0_1 = arith.constant 0 : index
    %3 = vector.load %arg6[%c0, %c0_1] : memref<88x384xf32, #tpu.memory_space<vmem>>, vector<88x384xf32>
    %c0_2 = arith.constant 0 : index
    %c0_3 = arith.constant 0 : index
    %c0_4 = arith.constant 0 : index
    %4 = vector.load %arg2[%c0_2, %c0_3, %c0_4] : memref<1x88x256xbf16, #tpu.memory_space<vmem>>, vector<1x88x256xbf16>
    %5 = vector.shape_cast %4 : vector<1x88x256xbf16> to vector<88x256xbf16>
    %c0_5 = arith.constant 0 : index
    %c0_6 = arith.constant 0 : index
    %c0_7 = arith.constant 0 : index
    %6 = vector.load %arg3[%c0_5, %c0_6, %c0_7] : memref<1x256x384xbf16, #tpu.memory_space<vmem>>, vector<1x256x384xbf16>
    %7 = vector.shape_cast %6 : vector<1x256x384xbf16> to vector<256x384xbf16>
    %cst = arith.constant dense<0.000000e+00> : vector<88x384xf32>
    %8 = tpu.matmul %5, %7, %cst {dimension_numbers = #tpu.dot_dimension_numbers<[1], [0], [0], [1], [0, 0, 1, 1], [], []>} : vector<88x256xbf16>, vector<256x384xbf16>, vector<88x384xf32> -> vector<88x384xf32>
    %9 = arith.addf %3, %8 : vector<88x384xf32>
    %c0_8 = arith.constant 0 : index
    %c0_9 = arith.constant 0 : index
    %10 = vector.load %arg6[%c0_8, %c0_9] : memref<88x384xf32, #tpu.memory_space<vmem>>, vector<88x384xf32>
    tpu.vector_store %arg6[%c0_8, %c0_9], %9 {strides = array<i32>} : memref<88x384xf32, #tpu.memory_space<vmem>>, vector<88x384xf32>,
    %c8_i32 = arith.constant 8 : i32
    %11 = arith.cmpi eq, %arg1, %c8_i32 : i32
    %12 = arith.extui %11 : i1 to i32
    %c0_i32_10 = arith.constant 0 : i32
    %13 = arith.cmpi ne, %12, %c0_i32_10 : i32
    scf.if %13 {
      %c0_11 = arith.constant 0 : index
      %c0_12 = arith.constant 0 : index
      %14 = vector.load %arg6[%c0_11, %c0_12] : memref<88x384xf32, #tpu.memory_space<vmem>>, vector<88x384xf32>
      %c0_13 = arith.constant 0 : index
      %c0_14 = arith.constant 0 : index
      %15 = vector.load %arg4[%c0_13, %c0_14] : memref<1x384xf32, #tpu.memory_space<vmem>>, vector<1x384xf32>
      %16 = vector.broadcast %15 : vector<1x384xf32> to vector<88x384xf32>
      %17 = arith.addf %14, %16 : vector<88x384xf32>
      %cst_15 = arith.constant 0.000000e+00 : f32
      %18 = vector.broadcast %cst_15 : f32 to vector<88x384xf32>
      %19 = arith.maximumf %17, %18 : vector<88x384xf32>
      %20 = arith.truncf %19 : vector<88x384xf32> to vector<88x384xbf16>
      %c0_16 = arith.constant 0 : index
      %c0_17 = arith.constant 0 : index
      %21 = vector.load %arg5[%c0_16, %c0_17] : memref<88x384xbf16, #tpu.memory_space<vmem>>, vector<88x384xbf16>
      tpu.vector_store %arg5[%c0_16, %c0_17], %20 {strides = array<i32>} : memref<88x384xbf16, #tpu.memory_space<vmem>>, vector<88x384xbf16>,
    } else {
    }
    return
  }
  func.func @transform_0(%arg0: i32, %arg1: i32) -> (i32, i32, i32) {
    %c0_i32 = arith.constant 0 : i32
    %c0_i32_0 = arith.constant 0 : i32
    return %arg1, %arg0, %c0_i32 : i32, i32, i32
  }
  func.func @transform_1(%arg0: i32, %arg1: i32) -> (i32, i32, i32) {
    %c0_i32 = arith.constant 0 : i32
    %c0_i32_0 = arith.constant 0 : i32
    %c0_i32_1 = arith.constant 0 : i32
    return %arg1, %c0_i32, %c0_i32_0 : i32, i32, i32
  }
  func.func @transform_2(%arg0: i32, %arg1: i32) -> (i32, i32) {
    %c0_i32 = arith.constant 0 : i32
    %c0_i32_0 = arith.constant 0 : i32
    %c0_i32_1 = arith.constant 0 : i32
    return %c0_i32, %c0_i32_0 : i32, i32
  }
  func.func @transform_3(%arg0: i32, %arg1: i32) -> (i32, i32) {
    %c0_i32 = arith.constant 0 : i32
    %c0_i32_0 = arith.constant 0 : i32
    return %arg0, %c0_i32 : i32, i32
  }
}

module attributes {stable_mosaic.version = 11 : i64} {
  func.func @_final_stage_kernel(%arg0: i32, %arg1: i32, %arg2: memref<1x32x512xbf16, #tpu.memory_space<vmem>>, %arg3: memref<1x32x384xbf16, #tpu.memory_space<vmem>>, %arg4: memref<1x256x384xbf16, #tpu.memory_space<vmem>>, %arg5: memref<1x256x288xbf16, #tpu.memory_space<vmem>>, %arg6: memref<1x384x320xbf16, #tpu.memory_space<vmem>>, %arg7: memref<1x384xf32, #tpu.memory_space<vmem>>, %arg8: memref<1x288xf32, #tpu.memory_space<vmem>>, %arg9: memref<1x320xf32, #tpu.memory_space<vmem>>, %arg10: memref<32x384xf32, #tpu.memory_space<vmem>>, %arg11: memref<32x288xf32, #tpu.memory_space<vmem>>, %arg12: memref<32x320xf32, #tpu.memory_space<vmem>>, %arg13: memref<32x384xf32, #tpu.memory_space<vmem>>, %arg14: memref<32x288xf32, #tpu.memory_space<vmem>>, %arg15: memref<32x320xf32, #tpu.memory_space<vmem>>) attributes {dimension_semantics = [#tpu.dimension_semantics<parallel>, #tpu.dimension_semantics<arbitrary>], iteration_bounds = array<i64: 1, 9>, scalar_prefetch = 0 : i64, scratch_operands = 3 : i64, tpu.core_type = #tpu.core_type<tc>, window_params = [{transform_indices = @transform_0, window_bounds = array<i64: 1, 32, 512>}, {transform_indices = @transform_1, window_bounds = array<i64: 1, 32, 384>}, {transform_indices = @transform_2, window_bounds = array<i64: 1, 256, 384>}, {transform_indices = @transform_3, window_bounds = array<i64: 1, 256, 288>}, {transform_indices = @transform_4, window_bounds = array<i64: 1, 384, 320>}, {pipeline_mode = #tpu.pipeline_mode<synchronous>, transform_indices = @transform_5, window_bounds = array<i64: 1, 384>}, {pipeline_mode = #tpu.pipeline_mode<synchronous>, transform_indices = @transform_6, window_bounds = array<i64: 1, 288>}, {pipeline_mode = #tpu.pipeline_mode<synchronous>, transform_indices = @transform_7, window_bounds = array<i64: 1, 320>}, {transform_indices = @transform_8, window_bounds = array<i64: 32, 384>}, {transform_indices = @transform_9, window_bounds = array<i64: 32, 288>}, {transform_indices = @transform_10, window_bounds = array<i64: 32, 320>}]} {
    %c0_i32 = arith.constant 0 : i32
    %0 = arith.cmpi eq, %arg1, %c0_i32 : i32
    %1 = arith.extui %0 : i1 to i32
    %c0_i32_0 = arith.constant 0 : i32
    %2 = arith.cmpi ne, %1, %c0_i32_0 : i32
    scf.if %2 {
      %cst_30 = arith.constant 0.000000e+00 : f32
      %30 = vector.broadcast %cst_30 : f32 to vector<32x384xf32>
      %c0_31 = arith.constant 0 : index
      %c0_32 = arith.constant 0 : index
      %31 = vector.load %arg13[%c0_31, %c0_32] : memref<32x384xf32, #tpu.memory_space<vmem>>, vector<32x384xf32>
      tpu.vector_store %arg13[%c0_31, %c0_32], %30 {strides = array<i32>} : memref<32x384xf32, #tpu.memory_space<vmem>>, vector<32x384xf32>,
      %cst_33 = arith.constant 0.000000e+00 : f32
      %32 = vector.broadcast %cst_33 : f32 to vector<32x288xf32>
      %c0_34 = arith.constant 0 : index
      %c0_35 = arith.constant 0 : index
      %33 = vector.load %arg14[%c0_34, %c0_35] : memref<32x288xf32, #tpu.memory_space<vmem>>, vector<32x288xf32>
      tpu.vector_store %arg14[%c0_34, %c0_35], %32 {strides = array<i32>} : memref<32x288xf32, #tpu.memory_space<vmem>>, vector<32x288xf32>,
      %cst_36 = arith.constant 0.000000e+00 : f32
      %34 = vector.broadcast %cst_36 : f32 to vector<32x320xf32>
      %c0_37 = arith.constant 0 : index
      %c0_38 = arith.constant 0 : index
      %35 = vector.load %arg15[%c0_37, %c0_38] : memref<32x320xf32, #tpu.memory_space<vmem>>, vector<32x320xf32>
      tpu.vector_store %arg15[%c0_37, %c0_38], %34 {strides = array<i32>} : memref<32x320xf32, #tpu.memory_space<vmem>>, vector<32x320xf32>,
    } else {
    }
    %c0 = arith.constant 0 : index
    %c0_1 = arith.constant 0 : index
    %c0_2 = arith.constant 0 : index
    %3 = vector.load %arg2[%c0, %c0_1, %c0_2] : memref<1x32x512xbf16, #tpu.memory_space<vmem>>, vector<1x32x512xbf16>
    %4 = vector.shape_cast %3 : vector<1x32x512xbf16> to vector<32x512xbf16>
    %c0_3 = arith.constant 0 : index
    %c0_4 = arith.constant 0 : index
    %5 = vector.load %arg13[%c0_3, %c0_4] : memref<32x384xf32, #tpu.memory_space<vmem>>, vector<32x384xf32>
    %6 = vector.extract_strided_slice %4 {offsets = [0, 0], sizes = [32, 256], strides = [1, 1]} : vector<32x512xbf16> to vector<32x256xbf16>
    %c0_5 = arith.constant 0 : index
    %c0_6 = arith.constant 0 : index
    %c0_7 = arith.constant 0 : index
    %7 = vector.load %arg4[%c0_5, %c0_6, %c0_7] : memref<1x256x384xbf16, #tpu.memory_space<vmem>>, vector<1x256x384xbf16>
    %8 = vector.shape_cast %7 : vector<1x256x384xbf16> to vector<256x384xbf16>
    %cst = arith.constant dense<0.000000e+00> : vector<32x384xf32>
    %9 = tpu.matmul %6, %8, %cst {dimension_numbers = #tpu.dot_dimension_numbers<[1], [0], [0], [1], [0, 0, 1, 1], [], []>} : vector<32x256xbf16>, vector<256x384xbf16>, vector<32x384xf32> -> vector<32x384xf32>
    %10 = arith.addf %5, %9 : vector<32x384xf32>
    %c0_8 = arith.constant 0 : index
    %c0_9 = arith.constant 0 : index
    %11 = vector.load %arg13[%c0_8, %c0_9] : memref<32x384xf32, #tpu.memory_space<vmem>>, vector<32x384xf32>
    tpu.vector_store %arg13[%c0_8, %c0_9], %10 {strides = array<i32>} : memref<32x384xf32, #tpu.memory_space<vmem>>, vector<32x384xf32>,
    %c0_10 = arith.constant 0 : index
    %c0_11 = arith.constant 0 : index
    %12 = vector.load %arg14[%c0_10, %c0_11] : memref<32x288xf32, #tpu.memory_space<vmem>>, vector<32x288xf32>
    %13 = vector.extract_strided_slice %4 {offsets = [0, 256], sizes = [32, 256], strides = [1, 1]} : vector<32x512xbf16> to vector<32x256xbf16>
    %c0_12 = arith.constant 0 : index
    %c0_13 = arith.constant 0 : index
    %c0_14 = arith.constant 0 : index
    %14 = vector.load %arg5[%c0_12, %c0_13, %c0_14] : memref<1x256x288xbf16, #tpu.memory_space<vmem>>, vector<1x256x288xbf16>
    %15 = vector.shape_cast %14 : vector<1x256x288xbf16> to vector<256x288xbf16>
    %cst_15 = arith.constant dense<0.000000e+00> : vector<32x288xf32>
    %16 = tpu.matmul %13, %15, %cst_15 {dimension_numbers = #tpu.dot_dimension_numbers<[1], [0], [0], [1], [0, 0, 1, 1], [], []>} : vector<32x256xbf16>, vector<256x288xbf16>, vector<32x288xf32> -> vector<32x288xf32>
    %17 = arith.addf %12, %16 : vector<32x288xf32>
    %c0_16 = arith.constant 0 : index
    %c0_17 = arith.constant 0 : index
    %18 = vector.load %arg14[%c0_16, %c0_17] : memref<32x288xf32, #tpu.memory_space<vmem>>, vector<32x288xf32>
    tpu.vector_store %arg14[%c0_16, %c0_17], %17 {strides = array<i32>} : memref<32x288xf32, #tpu.memory_space<vmem>>, vector<32x288xf32>,
    %c0_18 = arith.constant 0 : index
    %c0_19 = arith.constant 0 : index
    %19 = vector.load %arg15[%c0_18, %c0_19] : memref<32x320xf32, #tpu.memory_space<vmem>>, vector<32x320xf32>
    %c0_20 = arith.constant 0 : index
    %c0_21 = arith.constant 0 : index
    %c0_22 = arith.constant 0 : index
    %20 = vector.load %arg3[%c0_20, %c0_21, %c0_22] : memref<1x32x384xbf16, #tpu.memory_space<vmem>>, vector<1x32x384xbf16>
    %21 = vector.shape_cast %20 : vector<1x32x384xbf16> to vector<32x384xbf16>
    %c0_23 = arith.constant 0 : index
    %c0_24 = arith.constant 0 : index
    %c0_25 = arith.constant 0 : index
    %22 = vector.load %arg6[%c0_23, %c0_24, %c0_25] : memref<1x384x320xbf16, #tpu.memory_space<vmem>>, vector<1x384x320xbf16>
    %23 = vector.shape_cast %22 : vector<1x384x320xbf16> to vector<384x320xbf16>
    %cst_26 = arith.constant dense<0.000000e+00> : vector<32x320xf32>
    %24 = tpu.matmul %21, %23, %cst_26 {dimension_numbers = #tpu.dot_dimension_numbers<[1], [0], [0], [1], [0, 0, 1, 1], [], []>} : vector<32x384xbf16>, vector<384x320xbf16>, vector<32x320xf32> -> vector<32x320xf32>
    %25 = arith.addf %19, %24 : vector<32x320xf32>
    %c0_27 = arith.constant 0 : index
    %c0_28 = arith.constant 0 : index
    %26 = vector.load %arg15[%c0_27, %c0_28] : memref<32x320xf32, #tpu.memory_space<vmem>>, vector<32x320xf32>
    tpu.vector_store %arg15[%c0_27, %c0_28], %25 {strides = array<i32>} : memref<32x320xf32, #tpu.memory_space<vmem>>, vector<32x320xf32>,
    %c8_i32 = arith.constant 8 : i32
    %27 = arith.cmpi eq, %arg1, %c8_i32 : i32
    %28 = arith.extui %27 : i1 to i32
    %c0_i32_29 = arith.constant 0 : i32
    %29 = arith.cmpi ne, %28, %c0_i32_29 : i32
    scf.if %29 {
      %c0_30 = arith.constant 0 : index
      %c0_31 = arith.constant 0 : index
      %30 = vector.load %arg13[%c0_30, %c0_31] : memref<32x384xf32, #tpu.memory_space<vmem>>, vector<32x384xf32>
      %c0_32 = arith.constant 0 : index
      %c0_33 = arith.constant 0 : index
      %31 = vector.load %arg7[%c0_32, %c0_33] : memref<1x384xf32, #tpu.memory_space<vmem>>, vector<1x384xf32>
      %32 = vector.broadcast %31 : vector<1x384xf32> to vector<32x384xf32>
      %33 = arith.addf %30, %32 : vector<32x384xf32>
      %cst_34 = arith.constant 0.000000e+00 : f32
      %34 = vector.broadcast %cst_34 : f32 to vector<32x384xf32>
      %35 = arith.maximumf %33, %34 : vector<32x384xf32>
      %c0_35 = arith.constant 0 : index
      %c0_36 = arith.constant 0 : index
      %36 = vector.load %arg10[%c0_35, %c0_36] : memref<32x384xf32, #tpu.memory_space<vmem>>, vector<32x384xf32>
      tpu.vector_store %arg10[%c0_35, %c0_36], %35 {strides = array<i32>} : memref<32x384xf32, #tpu.memory_space<vmem>>, vector<32x384xf32>,
      %c0_37 = arith.constant 0 : index
      %c0_38 = arith.constant 0 : index
      %37 = vector.load %arg14[%c0_37, %c0_38] : memref<32x288xf32, #tpu.memory_space<vmem>>, vector<32x288xf32>
      %c0_39 = arith.constant 0 : index
      %c0_40 = arith.constant 0 : index
      %38 = vector.load %arg8[%c0_39, %c0_40] : memref<1x288xf32, #tpu.memory_space<vmem>>, vector<1x288xf32>
      %39 = vector.broadcast %38 : vector<1x288xf32> to vector<32x288xf32>
      %40 = arith.addf %37, %39 : vector<32x288xf32>
      %cst_41 = arith.constant 0.000000e+00 : f32
      %41 = vector.broadcast %cst_41 : f32 to vector<32x288xf32>
      %42 = arith.maximumf %40, %41 : vector<32x288xf32>
      %c0_42 = arith.constant 0 : index
      %c0_43 = arith.constant 0 : index
      %43 = vector.load %arg11[%c0_42, %c0_43] : memref<32x288xf32, #tpu.memory_space<vmem>>, vector<32x288xf32>
      tpu.vector_store %arg11[%c0_42, %c0_43], %42 {strides = array<i32>} : memref<32x288xf32, #tpu.memory_space<vmem>>, vector<32x288xf32>,
      %c0_44 = arith.constant 0 : index
      %c0_45 = arith.constant 0 : index
      %44 = vector.load %arg15[%c0_44, %c0_45] : memref<32x320xf32, #tpu.memory_space<vmem>>, vector<32x320xf32>
      %c0_46 = arith.constant 0 : index
      %c0_47 = arith.constant 0 : index
      %45 = vector.load %arg9[%c0_46, %c0_47] : memref<1x320xf32, #tpu.memory_space<vmem>>, vector<1x320xf32>
      %46 = vector.broadcast %45 : vector<1x320xf32> to vector<32x320xf32>
      %47 = arith.addf %44, %46 : vector<32x320xf32>
      %cst_48 = arith.constant 0.000000e+00 : f32
      %48 = vector.broadcast %cst_48 : f32 to vector<32x320xf32>
      %49 = arith.maximumf %47, %48 : vector<32x320xf32>
      %c0_49 = arith.constant 0 : index
      %c0_50 = arith.constant 0 : index
      %50 = vector.load %arg12[%c0_49, %c0_50] : memref<32x320xf32, #tpu.memory_space<vmem>>, vector<32x320xf32>
      tpu.vector_store %arg12[%c0_49, %c0_50], %49 {strides = array<i32>} : memref<32x320xf32, #tpu.memory_space<vmem>>, vector<32x320xf32>,
    } else {
    }
    return
  }
  func.func @transform_0(%arg0: i32, %arg1: i32) -> (i32, i32, i32) {
    %c0_i32 = arith.constant 0 : i32
    %c0_i32_0 = arith.constant 0 : i32
    return %arg1, %arg0, %c0_i32 : i32, i32, i32
  }
  func.func @transform_1(%arg0: i32, %arg1: i32) -> (i32, i32, i32) {
    %c0_i32 = arith.constant 0 : i32
    %c0_i32_0 = arith.constant 0 : i32
    return %arg1, %arg0, %c0_i32 : i32, i32, i32
  }
  func.func @transform_2(%arg0: i32, %arg1: i32) -> (i32, i32, i32) {
    %c0_i32 = arith.constant 0 : i32
    %c0_i32_0 = arith.constant 0 : i32
    %c0_i32_1 = arith.constant 0 : i32
    return %arg1, %c0_i32, %c0_i32_0 : i32, i32, i32
  }
  func.func @transform_3(%arg0: i32, %arg1: i32) -> (i32, i32, i32) {
    %c0_i32 = arith.constant 0 : i32
    %c0_i32_0 = arith.constant 0 : i32
    %c0_i32_1 = arith.constant 0 : i32
    return %arg1, %c0_i32, %c0_i32_0 : i32, i32, i32
  }
  func.func @transform_4(%arg0: i32, %arg1: i32) -> (i32, i32, i32) {
    %c0_i32 = arith.constant 0 : i32
    %c0_i32_0 = arith.constant 0 : i32
    %c0_i32_1 = arith.constant 0 : i32
    return %arg1, %c0_i32, %c0_i32_0 : i32, i32, i32
  }
  func.func @transform_5(%arg0: i32, %arg1: i32) -> (i32, i32) {
    %c0_i32 = arith.constant 0 : i32
    %c0_i32_0 = arith.constant 0 : i32
    %c0_i32_1 = arith.constant 0 : i32
    return %c0_i32, %c0_i32_0 : i32, i32
  }
  func.func @transform_6(%arg0: i32, %arg1: i32) -> (i32, i32) {
    %c0_i32 = arith.constant 0 : i32
    %c0_i32_0 = arith.constant 0 : i32
    %c0_i32_1 = arith.constant 0 : i32
    return %c0_i32, %c0_i32_0 : i32, i32
  }
  func.func @transform_7(%arg0: i32, %arg1: i32) -> (i32, i32) {
    %c0_i32 = arith.constant 0 : i32
    %c0_i32_0 = arith.constant 0 : i32
    %c0_i32_1 = arith.constant 0 : i32
    return %c0_i32, %c0_i32_0 : i32, i32
  }
  func.func @transform_8(%arg0: i32, %arg1: i32) -> (i32, i32) {
    %c0_i32 = arith.constant 0 : i32
    %c0_i32_0 = arith.constant 0 : i32
    return %arg0, %c0_i32 : i32, i32
  }
  func.func @transform_9(%arg0: i32, %arg1: i32) -> (i32, i32) {
    %c0_i32 = arith.constant 0 : i32
    %c0_i32_0 = arith.constant 0 : i32
    return %arg0, %c0_i32 : i32, i32
  }
  func.func @transform_10(%arg0: i32, %arg1: i32) -> (i32, i32) {
    %c0_i32 = arith.constant 0 : i32
    %c0_i32_0 = arith.constant 0 : i32
    return %arg0, %c0_i32 : i32, i32
  }
}

</mosaic_0001>

<bundles_post_ra>
// kernel: mixed_7a.3
= control target key start
LH: loop header
LB: loop body
LE: loop exit
PB: predicated region body
PF: predicated region fallthrough
CT: control target
= control target key end

     0   :  { %s7582_s12 = smov 0   ;;  %s11245_s0 = inlined_call_operand.vmem [shape: bf16[176,1088], index: 0, kind: input, shape index: {}]   ;;  %s11246_s1 = inlined_call_operand.vmem [shape: bf16[1088,768], index: 1, kind: input, shape index: {}]   ;;  %s11247_s2 = inlined_call_operand.vmem [shape: f32[1,768], index: 2, kind: input, shape index: {}]   ;;  %s11248_s3 = inlined_call_operand.vmem [shape: bf16[176,768], index: 3, kind: output, shape index: {}]  }
   0x1 LB: > { %s5214_s13 = sadd.s32 4294967295, %s7560_s12   ;;  %p5218_p0 = scmp.ge.s32.totalorder %s7560_s12, 1  ;;  %s7560_s12 = sphi %s7582_s12, %s13_s12  }
   0x2   : > { %p139_p1 = scmp.lt.s32.totalorder %s7560_s12, 3 }
   0x4   : > { %p140_p2 = pnand %p5218_p0, %p139_p1 }
   0x6   : > { %143 = sbr.rel (%p140_p2) target bundleno = 1470 (0x5be), region = 32 }
   0xb   : > { %v5571_v0 = vld [vmem:[%s11246_s1 + $0x150] sm:$0xf]  ;;  %v7161_v1 = vld [vmem:[%s11246_s1 + $0x164] sm:$0xf0]  ;;  %v5547_v5 = vld [vmem:[%s11246_s1 + $0x120] sm:$0xf] }
   0xc   : > { %v5763_v2 = vld [vmem:[%s11246_s1 + $0x2d0] sm:$0xf]  ;;  %v5572_v3 = vor.u32 %v7161_v1, %v5571_v0  ;;  %v7209_v4 = vld [vmem:[%s11246_s1 + $0x2e4] sm:$0xf0]  ;;  %v7155_v6 = vld [vmem:[%s11246_s1 + $0x134] sm:$0xf0] }
   0xd   : > { %v5764_v7 = vor.u32 %v7209_v4, %v5763_v2  ;;  %v5739_v8 = vld [vmem:[%s11246_s1 + $0x2a0] sm:$0xf]  ;;  %v7203_v9 = vld [vmem:[%s11246_s1 + $0x2b4] sm:$0xf0]  ;;  %v5548_v10 = vor.u32 %v7155_v6, %v5547_v5  ;;  %v5523_v12 = vld [vmem:[%s11246_s1 + $0xf0] sm:$0xf] }
   0xe   : > { %7524 = vmatpush.bf16.msra.mxu2 %v5572_v3  ;;  %2972 = vmatpush.bf16.msra.mxu0 %v5572_v3  ;;  %v5740_v11 = vor.u32 %v7203_v9, %v5739_v8  ;;  %v7149_v13 = vld [vmem:[%s11246_s1 + $0x104] sm:$0xf0]  ;;  %v5715_v14 = vld [vmem:[%s11246_s1 + $0x270] sm:$0xf]  ;;  %v5499_v18 = vld [vmem:[%s11246_s1 + $0xc0] sm:$0xf] }
   0xf   : > { %7532 = vmatpush.bf16.msra.mxu3 %v5764_v7  ;;  %3010 = vmatpush.bf16.msra.mxu1 %v5764_v7  ;;  %v7197_v15 = vld [vmem:[%s11246_s1 + $0x284] sm:$0xf0]  ;;  %v5524_v16 = vor.u32 %v7149_v13, %v5523_v12  ;;  %v7143_v19 = vld [vmem:[%s11246_s1 + $0xd4] sm:$0xf0]  ;;  %v5691_v20 = vld [vmem:[%s11246_s1 + $0x240] sm:$0xf] }
  0x10   : > { %v5716_v17 = vor.u32 %v7197_v15, %v5715_v14  ;;  %v7191_v21 = vld [vmem:[%s11246_s1 + $0x254] sm:$0xf0]  ;;  %s165_s21 = smul.u32 11, %s5214_s13  ;;  %v5500_v22 = vor.u32 %v7143_v19, %v5499_v18  ;;  %v5475_v24 = vld [vmem:[%s11246_s1 + $0x90] sm:$0xf]  ;;  %vm2953_vm0 = vcmask 523264  }
  0x11   : > { %v5692_v23 = vor.u32 %v7191_v21, %v5691_v20  ;;  %v7137_v25 = vld [vmem:[%s11246_s1 + $0xa4] sm:$0xf0]  ;;  %v5667_v26 = vld [vmem:[%s11246_s1 + $0x210] sm:$0xf]  ;;  %v5451_v30 = vld [vmem:[%s11246_s1 + $0x60] sm:$0xf] }
  0x12   : > { %7525 = vmatpush.bf16.msra.mxu2 %v5548_v10  ;;  %2973 = vmatpush.bf16.msra.mxu0 %v5548_v10  ;;  %p166_p3 = scmp.lt.s32.totalorder %s165_s21, 21  ;;  %v7185_v27 = vld [vmem:[%s11246_s1 + $0x224] sm:$0xf0]  ;;  %v5476_v28 = vor.u32 %v7137_v25, %v5475_v24  ;;  %v7131_v31 = vld [vmem:[%s11246_s1 + $0x74] sm:$0xf0] }
  0x13   : > { %7533 = vmatpush.bf16.msra.mxu3 %v5740_v11  ;;  %3011 = vmatpush.bf16.msra.mxu1 %v5740_v11  ;;  %v5668_v29 = vor.u32 %v7185_v27, %v5667_v26  ;;  %v5643_v32 = vld [vmem:[%s11246_s1 + $0x1e0] sm:$0xf]  ;;  %v7179_v33 = vld [vmem:[%s11246_s1 + $0x1f4] sm:$0xf0]  ;;  %v5452_v34 = vor.u32 %v7131_v31, %v5451_v30  ;;  %v5427_v36 = vld [vmem:[%s11246_s1 + $0x30] sm:$0xf] }
  0x14   : > { %s11525_s21 = smov (!%p166_p3, %s165_s21), 21  ;;  %v5644_v35 = vor.u32 %v7179_v33, %v5643_v32  ;;  %v7125_v37 = vld [vmem:[%s11246_s1 + $0x44] sm:$0xf0]  ;;  %v5619_v38 = vld [vmem:[%s11246_s1 + $0x1b0] sm:$0xf] }
  0x15   : > { %s7540_s10 = smul.u32 36, %s11525_s21  ;;  %v7173_v39 = vld [vmem:[%s11246_s1 + $0x1c4] sm:$0xf0]  ;;  %v5428_v40 = vor.u32 %v7125_v37, %v5427_v36  ;;  %v5403_v41 = vld [vmem:[%s11246_s1] sm:$0xf] }
  0x16   : > { %7526 = vmatpush.bf16.msra.mxu2 %v5524_v16  ;;  %2974 = vmatpush.bf16.msra.mxu0 %v5524_v16  ;;  %v5620_v42 = vor.u32 %v7173_v39, %v5619_v38  ;;  %v7119_v43 = vld [vmem:[%s11246_s1 + $0x14] sm:$0xf0]  ;;  %v5595_v44 = vld [vmem:[%s11246_s1 + $0x180] sm:$0xf]  ;;  %v5955_v46 = vld [vmem:[%s11246_s1 + $0x450] sm:$0xf] }
  0x17   : > { %7534 = vmatpush.bf16.msra.mxu3 %v5716_v17  ;;  %3012 = vmatpush.bf16.msra.mxu1 %v5716_v17  ;;  %s7685_s26 = scalar_lea.vmem %s11245_s0, %s7540_s10  ;;  %v7167_v45 = vld [vmem:[%s11246_s1 + $0x194] sm:$0xf0]  ;;  %v7257_v47 = vld [vmem:[%s11246_s1 + $0x464] sm:$0xf0]  ;;  %v6147_v48 = vld [vmem:[%s11246_s1 + $0x5d0] sm:$0xf]  ;;  %v5404_v52 = vor.u32 %v7119_v43, %v5403_v41 }
  0x18   : > { %v5331_v49 = vld [vmem:[%s7685_s26 + $0xd8] sm:$0xf]  ;;  %v7102_v50 = vld [vmem:[%s7685_s26 + $0xf8] sm:$0xf0]  ;;  %v7305_v51 = vld [vmem:[%s11246_s1 + $0x5e4] sm:$0xf0]  ;;  %v5596_v57 = vor.u32 %v7167_v45, %v5595_v44  ;;  %v5956_v62 = vor.u32 %v7257_v47, %v5955_v46 }
  0x19   : > { %v7098_v53 = vld [vmem:[%s7685_s26 + $0xdc] sm:$0xf]  ;;  %v5223_v54 = vld [vmem:[%s7685_s26] sm:$0xf]  ;;  %v7075_v55 = vld [vmem:[%s7685_s26 + $0x20] sm:$0xf0]  ;;  %v6148_v63 = vor.u32 %v7305_v51, %v6147_v48  ;;  %v7731_v3 = vor.u32 %v7102_v50, %v5331_v49 }
  0x1a   : > { %7527 = vmatpush.bf16.msra.mxu2 %v5500_v22  ;;  %2975 = vmatpush.bf16.msra.mxu0 %v5500_v22  ;;  %v6339_v56 = vld [vmem:[%s11246_s1 + $0x750] sm:$0xf]  ;;  %v5333_v58 = vld [vmem:[%s7685_s26 + $0xfc] sm:$0xf0]  ;;  %v7071_v59 = vld [vmem:[%s7685_s26 + $0x4] sm:$0xf]  ;;  %v7733_v4 = vor.u32 %v7075_v55, %v5223_v54 }
  0x1b   : > { %7535 = vmatpush.bf16.msra.mxu3 %v5692_v23  ;;  %3013 = vmatpush.bf16.msra.mxu1 %v5692_v23  ;;  %v5225_v60 = vld [vmem:[%s7685_s26 + $0x24] sm:$0xf0]  ;;  %v5931_v61 = vld [vmem:[%s11246_s1 + $0x420] sm:$0xf]  ;;  %v6531_v1 = vld [vmem:[%s11246_s1 + $0x8d0] sm:$0xf]  ;;  %v7744_v8 = vor.u32 %v7098_v53, %v5333_v58 }
  0x1c   : > { %v7353_v0 = vld [vmem:[%s11246_s1 + $0x764] sm:$0xf0]  ;;  %11360 = vst [vmem:[#allocation2_spill] sm:$0xff] %v7731_v3  ;;  %v7251_v5 = vld [vmem:[%s11246_s1 + $0x434] sm:$0xf0]  ;;  %v7746_v9 = vor.u32 %v7071_v59, %v5225_v60  ;;  %s7541_s8 = smul.u32 24, %s11525_s21 }
  0x1d   : > { %v7401_v2 = vld [vmem:[%s11246_s1 + $0x8e4] sm:$0xf0]  ;;  %11361 = vst [vmem:[#allocation3_spill] sm:$0xff] %v7733_v4  ;;  %v6123_v6 = vld [vmem:[%s11246_s1 + $0x5a0] sm:$0xf]  ;;  %v6340_v10 = vor.u32 %v7353_v0, %v6339_v56  ;;  %v5932_v14 = vor.u32 %v7251_v5, %v5931_v61 }
  0x1e   : > { %7528 = vmatpush.bf16.msra.mxu2 %v5476_v28  ;;  %2976 = vmatpush.bf16.msra.mxu0 %v5476_v28  ;;  %v7299_v7 = vld [vmem:[%s11246_s1 + $0x5b4] sm:$0xf0]  ;;  %11362 = vst [vmem:[#allocation4_spill] sm:$0xff] %v7744_v8  ;;  %v6532_v11 = vor.u32 %v7401_v2, %v6531_v1  ;;  %v5907_v12 = vld [vmem:[%s11246_s1 + $0x3f0] sm:$0xf]  ;;  %s9257_s25 = scalar_lea.vmem %s11248_s3, %s7541_s8 }
  0x1f   : > { %7536 = vmatpush.bf16.msra.mxu3 %v5668_v29  ;;  %3014 = vmatpush.bf16.msra.mxu1 %v5668_v29  ;;  %11363 = vst [vmem:[#allocation5_spill] sm:$0xff] %v7746_v9  ;;  %v6315_v13 = vld [vmem:[%s11246_s1 + $0x720] sm:$0xf]  ;;  %v6124_v15 = vor.u32 %v7299_v7, %v6123_v6  ;;  %v7347_v16 = vld [vmem:[%s11246_s1 + $0x734] sm:$0xf0] }
  0x20   : > { %v6507_v17 = vld [vmem:[%s11246_s1 + $0x8a0] sm:$0xf]  ;;  %v7395_v18 = vld [vmem:[%s11246_s1 + $0x8b4] sm:$0xf0]  ;;  %v7245_v19 = vld [vmem:[%s11246_s1 + $0x404] sm:$0xf0]  ;;  %v6316_v22 = vor.u32 %v7347_v16, %v6315_v13 }
  0x21   : > { %v6099_v20 = vld [vmem:[%s11246_s1 + $0x570] sm:$0xf]  ;;  %v7293_v21 = vld [vmem:[%s11246_s1 + $0x584] sm:$0xf0]  ;;  %v6508_v23 = vor.u32 %v7395_v18, %v6507_v17  ;;  %v5883_v24 = vld [vmem:[%s11246_s1 + $0x3c0] sm:$0xf]  ;;  %v5908_v26 = vor.u32 %v7245_v19, %v5907_v12 }
  0x22   : > { %7529 = vmatpush.bf16.msra.mxu2 %v5452_v34  ;;  %2977 = vmatpush.bf16.msra.mxu0 %v5452_v34  ;;  %v6291_v25 = vld [vmem:[%s11246_s1 + $0x6f0] sm:$0xf]  ;;  %v6100_v27 = vor.u32 %v7293_v21, %v6099_v20  ;;  %v7341_v28 = vld [vmem:[%s11246_s1 + $0x704] sm:$0xf0]  ;;  %v7239_v31 = vld [vmem:[%s11246_s1 + $0x3d4] sm:$0xf0] }
  0x23   : > { %7537 = vmatpush.bf16.msra.mxu3 %v5644_v35  ;;  %3015 = vmatpush.bf16.msra.mxu1 %v5644_v35  ;;  %v6483_v29 = vld [vmem:[%s11246_s1 + $0x870] sm:$0xf]  ;;  %v7389_v30 = vld [vmem:[%s11246_s1 + $0x884] sm:$0xf0]  ;;  %v6075_v32 = vld [vmem:[%s11246_s1 + $0x540] sm:$0xf]  ;;  %v6292_v34 = vor.u32 %v7341_v28, %v6291_v25 }
  0x24   : > { %v7287_v33 = vld [vmem:[%s11246_s1 + $0x554] sm:$0xf0]  ;;  %v6484_v35 = vor.u32 %v7389_v30, %v6483_v29  ;;  %v5859_v36 = vld [vmem:[%s11246_s1 + $0x390] sm:$0xf]  ;;  %v6267_v37 = vld [vmem:[%s11246_s1 + $0x6c0] sm:$0xf] }
  0x25   : > { %v5367_v38 = vld [vmem:[%s7685_s26 + $0x120] sm:$0xf]  ;;  %v7111_v39 = vld [vmem:[%s7685_s26 + $0x140] sm:$0xf0]  ;;  %v6076_v41 = vor.u32 %v7287_v33, %v6075_v32  ;;  %v7383_v44 = vld [vmem:[%s11246_s1 + $0x854] sm:$0xf0] }
  0x26   : > { %7530 = vmatpush.bf16.msra.mxu2 %v5428_v40  ;;  %2978 = vmatpush.bf16.msra.mxu0 %v5428_v40  ;;  %v5884_v40 = vor.u32 %v7239_v31, %v5883_v24  ;;  %v6459_v43 = vld [vmem:[%s11246_s1 + $0x840] sm:$0xf]  ;;  %v7107_v45 = vld [vmem:[%s7685_s26 + $0x124] sm:$0xf]  ;;  %v5369_v46 = vld [vmem:[%s7685_s26 + $0x144] sm:$0xf0] }
  0x27   : > { %7538 = vmatpush.bf16.msra.mxu3 %v5620_v42  ;;  %3016 = vmatpush.bf16.msra.mxu1 %v5620_v42  ;;  %v7335_v42 = vld [vmem:[%s11246_s1 + $0x6d4] sm:$0xf0]  ;;  %v7233_v47 = vld [vmem:[%s11246_s1 + $0x3a4] sm:$0xf0]  ;;  %v6051_v48 = vld [vmem:[%s11246_s1 + $0x510] sm:$0xf]  ;;  %v6460_v55 = vor.u32 %v7383_v44, %v6459_v43  ;;  %v7860_v6 = vor.u32 %v7107_v45, %v5369_v46 }
  0x28   : > { %v7281_v49 = vld [vmem:[%s11246_s1 + $0x524] sm:$0xf0]  ;;  %v7084_v51 = vld [vmem:[%s7685_s26 + $0x68] sm:$0xf0]  ;;  %v5261_v53 = vld [vmem:[%s7685_s26 + $0x6c] sm:$0xf0]  ;;  %v6268_v54 = vor.u32 %v7335_v42, %v6267_v37  ;;  %v5860_v58 = vor.u32 %v7233_v47, %v5859_v36 }
  0x29   : > { %v5259_v50 = vld [vmem:[%s7685_s26 + $0x48] sm:$0xf]  ;;  %v5835_v56 = vld [vmem:[%s11246_s1 + $0x360] sm:$0xf]  ;;  %v6052_v59 = vor.u32 %v7281_v49, %v6051_v48  ;;  %v6435_v61 = vld [vmem:[%s11246_s1 + $0x810] sm:$0xf] }
  0x2a   : > { %7531 = vmatpush.bf16.msra.mxu2 %v5404_v52  ;;  %2979 = vmatpush.bf16.msra.mxu0 %v5404_v52  ;;  %v7080_v52 = vld [vmem:[%s7685_s26 + $0x4c] sm:$0xf]  ;;  %v7329_v60 = vld [vmem:[%s11246_s1 + $0x6a4] sm:$0xf0]  ;;  %v7849_v0 = vor.u32 %v7084_v51, %v5259_v50  ;;  %v7227_v1 = vld [vmem:[%s11246_s1 + $0x374] sm:$0xf0] }
  0x2b   : > { %7539 = vmatpush.bf16.msra.mxu3 %v5596_v57  ;;  %3017 = vmatpush.bf16.msra.mxu1 %v5596_v57  ;;  %v6243_v57 = vld [vmem:[%s11246_s1 + $0x690] sm:$0xf]  ;;  %v6027_v2 = vld [vmem:[%s11246_s1 + $0x4e0] sm:$0xf]  ;;  %v7275_v5 = vld [vmem:[%s11246_s1 + $0x4f4] sm:$0xf0]  ;;  %v7862_v7 = vor.u32 %v7080_v52, %v5261_v53 }
  0x2c   : > { %11365 = vst [vmem:[#allocation7_spill] sm:$0xff] %v7849_v0  ;;  %v5811_v12 = vld [vmem:[%s11246_s1 + $0x330] sm:$0xf]  ;;  %v6219_v13 = vld [vmem:[%s11246_s1 + $0x660] sm:$0xf] }
  0x2d   : > { %2995 = vmatmul.bf16.vlgmr.msra.gmra.mxu2 %v7731_v3  ;;  %2980 = vmatmul.bf16.vlgmr.msra.gmra.mxu0 %v7733_v4  ;;  %11366 = vst [vmem:[#allocation8_spill] sm:$0xff] %v7860_v6  ;;  %v7323_v16 = vld [vmem:[%s11246_s1 + $0x674] sm:$0xf0]  ;;  %v6411_v17 = vld [vmem:[%s11246_s1 + $0x7e0] sm:$0xf] }
  0x2e   : > { %3048 = vmatpush.bf16.msrb.mxu2 %v5956_v62  ;;  %3033 = vmatmul.bf16.vlgmr.msra.gmra.mxu3 %v7744_v8  ;;  %v7377_v62 = vld [vmem:[%s11246_s1 + $0x824] sm:$0xf0]  ;;  %11367 = vst [vmem:[#allocation9_spill] sm:$0xff] %v7862_v7  ;;  %v7371_v18 = vld [vmem:[%s11246_s1 + $0x7f4] sm:$0xf0] }
  0x2f   : > { %3086 = vmatpush.bf16.msrb.mxu3 %v6148_v63  ;;  %3018 = vmatmul.bf16.vlgmr.msra.gmra.mxu1 %v7746_v9  ;;  %v7847_v63 = vor.u32 %v7111_v39, %v5367_v38  ;;  %v7221_v19 = vld [vmem:[%s11246_s1 + $0x344] sm:$0xf0]  ;;  %v6003_v20 = vld [vmem:[%s11246_s1 + $0x4b0] sm:$0xf]  ;;  %v5787_v24 = vld [vmem:[%s11246_s1 + $0x300] sm:$0xf] }
  0x30   : > { %3124 = vmatpush.bf16.msrb.mxu0 %v6340_v10  ;;  %3162 = vmatpush.bf16.msrb.mxu1 %v6532_v11  ;;  %v6244_v10 = vor.u32 %v7329_v60, %v6243_v57  ;;  %v6436_v11 = vor.u32 %v7377_v62, %v6435_v61  ;;  %v7269_v21 = vld [vmem:[%s11246_s1 + $0x4c4] sm:$0xf0]  ;;  %v7215_v25 = vld [vmem:[%s11246_s1 + $0x314] sm:$0xf0]  ;;  %v5812_v28 = vor.u32 %v7221_v19, %v5811_v12  ;;  %v6387_v31 = vld [vmem:[%s11246_s1 + $0x7b0] sm:$0xf] }
  0x31   : > { %11364 = vst [vmem:[#allocation6_spill] sm:$0xff] %v7847_v63  ;;  %v6004_v29 = vor.u32 %v7269_v21, %v6003_v20  ;;  %v7317_v30 = vld [vmem:[%s11246_s1 + $0x644] sm:$0xf0]  ;;  %v5979_v33 = vld [vmem:[%s11246_s1 + $0x480] sm:$0xf]  ;;  %v5788_v43 = vor.u32 %v7215_v25, %v5787_v24 }
  0x32   : > { %3049 = vmatpush.bf16.msrb.mxu2 %v5932_v14  ;;  %v5836_v14 = vor.u32 %v7227_v1, %v5835_v56  ;;  %v7365_v32 = vld [vmem:[%s11246_s1 + $0x7c4] sm:$0xf0]  ;;  %v6915_v37 = vld [vmem:[%s11246_s1 + $0xbd0] sm:$0xf]  ;;  %v7311_v42 = vld [vmem:[%s11246_s1 + $0x614] sm:$0xf0] }
  0x33   : > { %3087 = vmatpush.bf16.msrb.mxu3 %v6124_v15  ;;  %v6028_v15 = vor.u32 %v7275_v5, %v6027_v2  ;;  %v7449_v36 = vld [vmem:[%s11246_s1 + $0xa64] sm:$0xf0]  ;;  %v6363_v45 = vld [vmem:[%s11246_s1 + $0x780] sm:$0xf]  ;;  %v7359_v46 = vld [vmem:[%s11246_s1 + $0x794] sm:$0xf0] }
  0x34   : > { %3125 = vmatpush.bf16.msrb.mxu0 %v6316_v22  ;;  %3163 = vmatpush.bf16.msrb.mxu1 %v6508_v23  ;;  %v6220_v22 = vor.u32 %v7323_v16, %v6219_v13  ;;  %v6412_v23 = vor.u32 %v7371_v18, %v6411_v17  ;;  %v7497_v38 = vld [vmem:[%s11246_s1 + $0xbe4] sm:$0xf0]  ;;  %v7011_v47 = vld [vmem:[%s11246_s1 + $0xc90] sm:$0xf]  ;;  %v7158_v52 = vld [vmem:[%s11246_s1 + $0x154] sm:$0xf]  ;;  %v6364_v60 = vor.u32 %v7359_v46, %v6363_v45 }
  0x35   : > { %v6916_v50 = vor.u32 %v7497_v38, %v6915_v37  ;;  %v7521_v51 = vld [vmem:[%s11246_s1 + $0xca4] sm:$0xf0]  ;;  %v5573_v53 = vld [vmem:[%s11246_s1 + $0x168] sm:$0xf0]  ;;  %v7093_v56 = vld [vmem:[%s7685_s26 + $0xb0] sm:$0xf0] }
  0x36   : > { %3050 = vmatpush.bf16.msrb.mxu2 %v5908_v26  ;;  %v6195_v26 = vld [vmem:[%s11246_s1 + $0x630] sm:$0xf]  ;;  %v7089_v57 = vld [vmem:[%s7685_s26 + $0x94] sm:$0xf]  ;;  %v6699_v61 = vld [vmem:[%s11246_s1 + $0xa20] sm:$0xf]  ;;  %v7012_v62 = vor.u32 %v7521_v51, %v7011_v47  ;;  %v5576_v1 = vor.u32 %v7158_v52, %v5573_v53 }
  0x37   : > { %3088 = vmatpush.bf16.msrb.mxu3 %v6100_v27  ;;  %v230_v27 = vld [vmem:[%s7685_s26 + $0x168] sm:$0xff]  ;;  %v6196_v39 = vor.u32 %v7317_v30, %v6195_v26  ;;  %v7443_v2 = vld [vmem:[%s11246_s1 + $0xa34] sm:$0xf0]  ;;  %v6891_v5 = vld [vmem:[%s11246_s1 + $0xba0] sm:$0xf] }
  0x38   : > { %3126 = vmatpush.bf16.msrb.mxu0 %v6292_v34  ;;  %3164 = vmatpush.bf16.msrb.mxu1 %v6484_v35  ;;  %v7263_v34 = vld [vmem:[%s11246_s1 + $0x494] sm:$0xf0]  ;;  %v6723_v35 = vld [vmem:[%s11246_s1 + $0xa50] sm:$0xf]  ;;  %v802_v48 = vunpack.c.l.b16 %v230_v27  ;;  %v7152_v17 = vld [vmem:[%s11246_s1 + $0x124] sm:$0xf] }
  0x39   : > { %v5980_v44 = vor.u32 %v7263_v34, %v5979_v33  ;;  %v6724_v49 = vor.u32 %v7449_v36, %v6723_v35  ;;  %v5549_v18 = vld [vmem:[%s11246_s1 + $0x138] sm:$0xf0]  ;;  %v6675_v19 = vld [vmem:[%s11246_s1 + $0x9f0] sm:$0xf]  ;;  %v7437_v20 = vld [vmem:[%s11246_s1 + $0xa04] sm:$0xf0] }
  0x3a   : > { %3051 = vmatpush.bf16.msrb.mxu2 %v5884_v40  ;;  %v6388_v40 = vor.u32 %v7365_v32, %v6387_v31  ;;  %v5552_v21 = vor.u32 %v7152_v17, %v5549_v18  ;;  %v7485_v24 = vld [vmem:[%s11246_s1 + $0xb84] sm:$0xf0]  ;;  %v7077_v30 = vld [vmem:[%s7685_s26 + $0x30] sm:$0xf0]  ;;  %v5233_v31 = vld [vmem:[%s7685_s26 + $0x2c] sm:$0xf0] }
  0x3b   : > { %3089 = vmatpush.bf16.msrb.mxu3 %v6076_v41  ;;  %v6171_v41 = vld [vmem:[%s11246_s1 + $0x600] sm:$0xf]  ;;  %v5231_v26 = vld [vmem:[%s7685_s26 + $0x8] sm:$0xf]  ;;  %v7073_v32 = vld [vmem:[%s7685_s26 + $0x14] sm:$0xf] }
  0x3c   : > { %3127 = vmatpush.bf16.msrb.mxu0 %v6268_v54  ;;  %3165 = vmatpush.bf16.msrb.mxu1 %v6460_v55  ;;  %v803_v54 = vunpack.c.h.b16 %v230_v27  ;;  %v5295_v55 = vld [vmem:[%s7685_s26 + $0x90] sm:$0xf]  ;;  %v7076_v27 = vld [vmem:[%s7685_s26 + $0x28] sm:$0xf0]  ;;  %v5241_v33 = vld [vmem:[%s7685_s26 + $0x34] sm:$0xf0] }
  0x3d   : > { %3000 = vmatmul.bf16.gmra.mxu2 %v7847_v63  ;;  %2985 = vmatmul.bf16.gmra.mxu0 %v7849_v0  ;;  %v7971_v12 = vor.u32 %v7093_v56, %v5295_v55  ;;  %v8007_v34 = vor.u32 %v7076_v27, %v5231_v26  ;;  %v8013_v37 = vor.u32 %v7073_v32, %v5241_v33  ;;  %v6987_v38 = vld [vmem:[%s11246_s1 + $0xc60] sm:$0xf]  ;;  %v7431_v45 = vld [vmem:[%s11246_s1 + $0x9d4] sm:$0xf0]  ;;  %v5267_v53 = vld [vmem:[%s7685_s26 + $0x50] sm:$0xf] }
  0x3e   : > { %3052 = vmatpush.bf16.msrb.mxu2 %v5860_v58  ;;  %3038 = vmatmul.bf16.gmra.mxu3 %v7860_v6  ;;  %v5297_v58 = vld [vmem:[%s7685_s26 + $0xb4] sm:$0xf0]  ;;  %v7973_v13 = vpack.c.b16 %v803_v54, %v803_v54  ;;  %v6843_v46 = vld [vmem:[%s11246_s1 + $0xb40] sm:$0xf]  ;;  %v7085_v54 = vld [vmem:[%s7685_s26 + $0x70] sm:$0xf0] }
  0x3f   : > { %3090 = vmatpush.bf16.msrb.mxu3 %v6052_v59  ;;  %3023 = vmatmul.bf16.gmra.mxu1 %v7862_v7  ;;  %v6172_v59 = vor.u32 %v7311_v42, %v6171_v41  ;;  %11369 = vst [vmem:[#allocation11_spill] sm:$0xff] %v7971_v12  ;;  %v7146_v41 = vld [vmem:[%s11246_s1 + $0xf4] sm:$0xf]  ;;  %v5525_v42 = vld [vmem:[%s11246_s1 + $0x108] sm:$0xf0] }
  0x40   : > { %3128 = vmatpush.bf16.msrb.mxu0 %v6244_v10  ;;  %3166 = vmatpush.bf16.msrb.mxu1 %v6436_v11  ;;  %v7491_v10 = vld [vmem:[%s11246_s1 + $0xbb4] sm:$0xf0]  ;;  %v7969_v11 = vpack.c.b16 %v802_v48, %v802_v48  ;;  %11370 = vst [vmem:[#allocation12_spill] sm:$0xff] %v7973_v13  ;;  %v7081_v55 = vld [vmem:[%s7685_s26 + $0x54] sm:$0xf] }
  0x41   : > { %v6892_v16 = vor.u32 %v7491_v10, %v6891_v5  ;;  %11372 = vst [vmem:[#allocation14_spill] sm:$0xff] %v8007_v34  ;;  %v7479_v48 = vld [vmem:[%s11246_s1 + $0xb54] sm:$0xf0]  ;;  %v6627_v5 = vld [vmem:[%s11246_s1 + $0x990] sm:$0xf] }
  0x42   : > { %3053 = vmatpush.bf16.msrb.mxu2 %v5836_v14  ;;  %11368 = vst [vmem:[#allocation10_spill] sm:$0xff] %v7969_v11  ;;  %v7975_v14 = vor.u32 %v7089_v57, %v5297_v58  ;;  %v6844_v51 = vor.u32 %v7479_v48, %v6843_v46  ;;  %v5275_v56 = vld [vmem:[%s7685_s26 + $0x58] sm:$0xf]  ;;  %v7086_v57 = vld [vmem:[%s7685_s26 + $0x78] sm:$0xf0] }
  0x43   : > { %3091 = vmatpush.bf16.msrb.mxu3 %v6028_v15  ;;  %v6700_v15 = vor.u32 %v7443_v2, %v6699_v61  ;;  %11375 = vst [vmem:[#allocation17_spill] sm:$0xff] %v8013_v37  ;;  %v5269_v58 = vld [vmem:[%s7685_s26 + $0x74] sm:$0xf0]  ;;  %v8057_v61 = vor.u32 %v7085_v54, %v5267_v53  ;;  %v7425_v10 = vld [vmem:[%s11246_s1 + $0x9a4] sm:$0xf0] }
  0x44   : > { %3129 = vmatpush.bf16.msrb.mxu0 %v6220_v22  ;;  %3167 = vmatpush.bf16.msrb.mxu1 %v6412_v23  ;;  %11371 = vst [vmem:[#allocation13_spill] sm:$0xff] %v7975_v14  ;;  %v6676_v22 = vor.u32 %v7437_v20, %v6675_v19  ;;  %v6867_v23 = vld [vmem:[%s11246_s1 + $0xb70] sm:$0xf]  ;;  %v7473_v17 = vld [vmem:[%s11246_s1 + $0xb24] sm:$0xf0] }
  0x45   : > { %v6868_v25 = vor.u32 %v7485_v24, %v6867_v23  ;;  %11376 = vst [vmem:[#allocation18_spill] sm:$0xff] %v8057_v61  ;;  %v6963_v19 = vld [vmem:[%s11246_s1 + $0xc30] sm:$0xf]  ;;  %v7509_v20 = vld [vmem:[%s11246_s1 + $0xc44] sm:$0xf0] }
  0x46   : > { %3054 = vmatpush.bf16.msrb.mxu2 %v5812_v28  ;;  %v7072_v28 = vld [vmem:[%s7685_s26 + $0xc] sm:$0xf]  ;;  %v6603_v24 = vld [vmem:[%s11246_s1 + $0x960] sm:$0xf]  ;;  %v7094_v32 = vld [vmem:[%s7685_s26 + $0xb8] sm:$0xf0] }
  0x47   : > { %3092 = vmatpush.bf16.msrb.mxu3 %v6004_v29  ;;  %v5239_v29 = vld [vmem:[%s7685_s26 + $0x10] sm:$0xf]  ;;  %v8011_v36 = vor.u32 %v7072_v28, %v5233_v31  ;;  %v5477_v23 = vld [vmem:[%s11246_s1 + $0xa8] sm:$0xf0]  ;;  %v6795_v28 = vld [vmem:[%s11246_s1 + $0xae0] sm:$0xf] }
  0x48   : > { %3130 = vmatpush.bf16.msrb.mxu0 %v6196_v39  ;;  %3168 = vmatpush.bf16.msrb.mxu1 %v6388_v40  ;;  %v8009_v35 = vor.u32 %v7077_v30, %v5239_v29  ;;  %v7515_v39 = vld [vmem:[%s11246_s1 + $0xc74] sm:$0xf0]  ;;  %v7090_v33 = vld [vmem:[%s7685_s26 + $0x9c] sm:$0xf]  ;;  %v6771_v53 = vld [vmem:[%s11246_s1 + $0xab0] sm:$0xf] }
  0x49   : > { %11374 = vst [vmem:[#allocation16_spill] sm:$0xff] %v8011_v36  ;;  %v6988_v40 = vor.u32 %v7515_v39, %v6987_v38  ;;  %v7467_v29 = vld [vmem:[%s11246_s1 + $0xaf4] sm:$0xf0]  ;;  %v5311_v38 = vld [vmem:[%s7685_s26 + $0xa0] sm:$0xf] }
  0x4a   : > { %3055 = vmatpush.bf16.msrb.mxu2 %v5788_v43  ;;  %11373 = vst [vmem:[#allocation15_spill] sm:$0xff] %v8009_v35  ;;  %v5528_v43 = vor.u32 %v7146_v41, %v5525_v42  ;;  %v6796_v30 = vor.u32 %v7467_v29, %v6795_v28  ;;  %v5303_v31 = vld [vmem:[%s7685_s26 + $0x98] sm:$0xf]  ;;  %v7095_v39 = vld [vmem:[%s7685_s26 + $0xc0] sm:$0xf0] }
  0x4b   : > { %3093 = vmatpush.bf16.msrb.mxu3 %v5980_v44  ;;  %v6651_v44 = vld [vmem:[%s11246_s1 + $0x9c0] sm:$0xf]  ;;  %v7091_v41 = vld [vmem:[%s7685_s26 + $0xa4] sm:$0xf]  ;;  %v5313_v42 = vld [vmem:[%s7685_s26 + $0xc4] sm:$0xf0] }
  0x4c   : > { %3131 = vmatpush.bf16.msrb.mxu0 %v6172_v59  ;;  %3169 = vmatpush.bf16.msrb.mxu1 %v6364_v60  ;;  %v6652_v47 = vor.u32 %v7431_v45, %v6651_v44  ;;  %v7082_v59 = vld [vmem:[%s7685_s26 + $0x5c] sm:$0xf]  ;;  %v5277_v60 = vld [vmem:[%s7685_s26 + $0x7c] sm:$0xf0]  ;;  %v8115_v44 = vor.u32 %v7095_v39, %v5311_v38  ;;  %v8119_v46 = vor.u32 %v7091_v41, %v5313_v42  ;;  %v7461_v54 = vld [vmem:[%s11246_s1 + $0xac4] sm:$0xf0] }
  0x4d   : > { %3005 = vmatmul.bf16.gmra.mxu2 %v7969_v11  ;;  %2990 = vmatmul.bf16.gmra.mxu0 %v7971_v12  ;;  %v8063_v2 = vor.u32 %v7082_v59, %v5277_v60  ;;  %v5453_v48 = vld [vmem:[%s11246_s1 + $0x78] sm:$0xf0]  ;;  %v5347_v59 = vld [vmem:[%s7685_s26 + $0xe8] sm:$0xf]  ;;  %v7104_v60 = vld [vmem:[%s7685_s26 + $0x108] sm:$0xf0] }
  0x4e   : > { %3200 = vmatpush.bf16.msra.mxu2 %v6724_v49  ;;  %3043 = vmatmul.bf16.gmra.mxu3 %v7973_v13  ;;  %v7140_v49 = vld [vmem:[%s11246_s1 + $0xc4] sm:$0xf]  ;;  %11381 = vst [vmem:[#allocation23_spill] sm:$0xff] %v8115_v44  ;;  %v6747_v28 = vld [vmem:[%s11246_s1 + $0xa80] sm:$0xf] }
  0x4f   : > { %3238 = vmatpush.bf16.msra.mxu3 %v6916_v50  ;;  %3028 = vmatmul.bf16.gmra.mxu1 %v7975_v14  ;;  %v5501_v50 = vld [vmem:[%s11246_s1 + $0xd8] sm:$0xf0]  ;;  %11379 = vst [vmem:[#allocation21_spill] sm:$0xff] %v8063_v2  ;;  %v7455_v29 = vld [vmem:[%s11246_s1 + $0xa94] sm:$0xf0] }
  0x50   : > { %3280 = vmatpush.bf16.msra.mxu0 %v7012_v62  ;;  %3314 = vmatpush.bf16.msra.mxu1 %v5576_v1  ;;  %v5504_v52 = vor.u32 %v7140_v49, %v5501_v50  ;;  %v8059_v62 = vor.u32 %v7086_v57, %v5275_v56  ;;  %v8061_v1 = vor.u32 %v7081_v55, %v5269_v58  ;;  %v6579_v49 = vld [vmem:[%s11246_s1 + $0x930] sm:$0xf]  ;;  %v7413_v50 = vld [vmem:[%s11246_s1 + $0x944] sm:$0xf0]  ;;  %v5339_v56 = vld [vmem:[%s7685_s26 + $0xe0] sm:$0xf] }
  0x51   : > { %11382 = vst [vmem:[#allocation24_spill] sm:$0xff] %v8119_v46  ;;  %v6772_v55 = vor.u32 %v7461_v54, %v6771_v53  ;;  %v7103_v57 = vld [vmem:[%s7685_s26 + $0x100] sm:$0xf0]  ;;  %v7108_v38 = vld [vmem:[%s7685_s26 + $0x12c] sm:$0xf] }
  0x52   : > { %3201 = vmatpush.bf16.msra.mxu2 %v6700_v15  ;;  %11377 = vst [vmem:[#allocation19_spill] sm:$0xff] %v8059_v62  ;;  %v6819_v15 = vld [vmem:[%s11246_s1 + $0xb10] sm:$0xf]  ;;  %v7099_v58 = vld [vmem:[%s7685_s26 + $0xe4] sm:$0xf] }
  0x53   : > { %3239 = vmatpush.bf16.msra.mxu3 %v6892_v16  ;;  %11378 = vst [vmem:[#allocation20_spill] sm:$0xff] %v8061_v1  ;;  %v6628_v16 = vor.u32 %v7425_v10, %v6627_v5  ;;  %v6820_v18 = vor.u32 %v7473_v17, %v6819_v15  ;;  %v5341_v5 = vld [vmem:[%s7685_s26 + $0x104] sm:$0xf0]  ;;  %v7100_v10 = vld [vmem:[%s7685_s26 + $0xec] sm:$0xf]  ;;  %v8153_v17 = vor.u32 %v7104_v60, %v5347_v59 }
  0x54   : > { %3315 = vmatpush.bf16.msra.mxu1 %v5552_v21  ;;  %3281 = vmatpush.bf16.msra.mxu0 %v6988_v40  ;;  %v7134_v21 = vld [vmem:[%s11246_s1 + $0x94] sm:$0xf]  ;;  %v5305_v40 = vld [vmem:[%s7685_s26 + $0xbc] sm:$0xf0]  ;;  %v5349_v15 = vld [vmem:[%s7685_s26 + $0x10c] sm:$0xf0] }
  0x55   : > { %v5480_v26 = vor.u32 %v7134_v21, %v5477_v23  ;;  %v8117_v45 = vor.u32 %v7090_v33, %v5305_v40  ;;  %11384 = vst [vmem:[#allocation26_spill] sm:$0xff] %v8153_v17  ;;  %v7503_v21 = vld [vmem:[%s11246_s1 + $0xc14] sm:$0xf0]  ;;  %v7122_v23 = vld [vmem:[%s11246_s1 + $0x34] sm:$0xf]  ;;  %v6748_v33 = vor.u32 %v7455_v29, %v6747_v28 }
  0x56   : > { %3202 = vmatpush.bf16.msra.mxu2 %v6676_v22  ;;  %v6964_v22 = vor.u32 %v7509_v20, %v6963_v19  ;;  %v8157_v19 = vor.u32 %v7100_v10, %v5349_v15  ;;  %v6939_v20 = vld [vmem:[%s11246_s1 + $0xc00] sm:$0xf]  ;;  %v5383_v39 = vld [vmem:[%s7685_s26 + $0x130] sm:$0xf]  ;;  %v7113_v40 = vld [vmem:[%s7685_s26 + $0x150] sm:$0xf0] }
  0x57   : > { %3240 = vmatpush.bf16.msra.mxu3 %v6868_v25  ;;  %v7419_v25 = vld [vmem:[%s11246_s1 + $0x974] sm:$0xf0]  ;;  %v5377_v41 = vld [vmem:[%s7685_s26 + $0x14c] sm:$0xf0]  ;;  %v7109_v42 = vld [vmem:[%s7685_s26 + $0x134] sm:$0xf] }
  0x58   : > { %3316 = vmatpush.bf16.msra.mxu1 %v5528_v43  ;;  %v6604_v27 = vor.u32 %v7419_v25, %v6603_v24  ;;  %3282 = vmatpush.bf16.msra.mxu0 %v6964_v22  ;;  %v8113_v43 = vor.u32 %v7094_v32, %v5303_v31  ;;  %11385 = vst [vmem:[#allocation27_spill] sm:$0xff] %v8157_v19  ;;  %v5429_v24 = vld [vmem:[%s11246_s1 + $0x48] sm:$0xf0]  ;;  %v6555_v25 = vld [vmem:[%s11246_s1 + $0x900] sm:$0xf]  ;;  %v232_v10 = vld [vmem:[%s7685_s26 + $0x178] sm:$0xff] }
  0x59   : > { %v6940_v22 = vor.u32 %v7503_v21, %v6939_v20  ;;  %v7112_v31 = vld [vmem:[%s7685_s26 + $0x148] sm:$0xf0]  ;;  %v5405_v53 = vld [vmem:[%s11246_s1 + $0x18] sm:$0xf0]  ;;  %v806_v20 = vunpack.c.l.b16 %v232_v10  ;;  %v7302_v21 = vld [vmem:[%s11246_s1 + $0x5d4] sm:$0xf] }
  0x5a   : > { %3203 = vmatpush.bf16.msra.mxu2 %v6652_v47  ;;  %11380 = vst [vmem:[#allocation22_spill] sm:$0xff] %v8113_v43  ;;  %v7128_v47 = vld [vmem:[%s11246_s1 + $0x64] sm:$0xf]  ;;  %v5957_v59 = vld [vmem:[%s11246_s1 + $0x468] sm:$0xf0] }
  0x5b   : > { %3241 = vmatpush.bf16.msra.mxu3 %v6844_v51  ;;  %v5456_v51 = vor.u32 %v7128_v47, %v5453_v48  ;;  %v5385_v47 = vld [vmem:[%s7685_s26 + $0x154] sm:$0xf0]  ;;  %v8240_v29 = vpack.c.b16 %v806_v20, %v806_v20  ;;  %v7296_v20 = vld [vmem:[%s11246_s1 + $0x5a4] sm:$0xf] }
  0x5c   : > { %3317 = vmatpush.bf16.msra.mxu1 %v5504_v52  ;;  %v6580_v52 = vor.u32 %v7413_v50, %v6579_v49  ;;  %3283 = vmatpush.bf16.msra.mxu0 %v6940_v22  ;;  %v8197_v49 = vor.u32 %v7113_v40, %v5383_v39  ;;  %v8199_v50 = vor.u32 %v7108_v38, %v5377_v41  ;;  %v6149_v22 = vld [vmem:[%s11246_s1 + $0x5e8] sm:$0xf0]  ;;  %v7350_v39 = vld [vmem:[%s11246_s1 + $0x754] sm:$0xf]  ;;  %v7200_v41 = vld [vmem:[%s11246_s1 + $0x2a4] sm:$0xf] }
  0x5d   : > { %3056 = vmatmul.bf16.vlgmr.msrb.gmra.mxu2 %v8007_v34  ;;  %3132 = vmatmul.bf16.vlgmr.msrb.gmra.mxu0 %v8009_v35  ;;  %11391 = vst [vmem:[#allocation33_spill] sm:$0xff] %v8240_v29  ;;  %v6341_v40 = vld [vmem:[%s11246_s1 + $0x768] sm:$0xf0] }
  0x5e   : > { %3094 = vmatmul.bf16.vlgmr.msrb.gmra.mxu3 %v8011_v36  ;;  %3204 = vmatpush.bf16.msra.mxu2 %v6628_v16  ;;  %v8151_v16 = vor.u32 %v7103_v57, %v5339_v56  ;;  %11387 = vst [vmem:[#allocation29_spill] sm:$0xff] %v8197_v49  ;;  %v5765_v56 = vld [vmem:[%s11246_s1 + $0x2e8] sm:$0xf0] }
  0x5f   : > { %3170 = vmatmul.bf16.vlgmr.msrb.gmra.mxu1 %v8013_v37  ;;  %3242 = vmatpush.bf16.msra.mxu3 %v6820_v18  ;;  %v8155_v18 = vor.u32 %v7099_v58, %v5341_v5  ;;  %11388 = vst [vmem:[#allocation30_spill] sm:$0xff] %v8199_v50  ;;  %v7254_v58 = vld [vmem:[%s11246_s1 + $0x454] sm:$0xf] }
  0x60   : > { %3318 = vmatpush.bf16.msra.mxu1 %v5480_v26  ;;  %11383 = vst [vmem:[#allocation25_spill] sm:$0xff] %v8151_v16  ;;  %v5432_v26 = vor.u32 %v7122_v23, %v5429_v24  ;;  %v5960_v60 = vor.u32 %v7254_v58, %v5957_v59  ;;  %v231_v5 = vld [vmem:[%s7685_s26 + $0x170] sm:$0xff]  ;;  %v643_v23 = vld [vmem:[%s11247_s2] sm:$0x3f] }
  0x61   : > { %v804_v15 = vunpack.c.l.b16 %v231_v5  ;;  %v805_v24 = vunpack.c.h.b16 %v231_v5 }
  0x62   : > { %3205 = vmatpush.bf16.msra.mxu2 %v6604_v27  ;;  %v7407_v27 = vld [vmem:[%s11246_s1 + $0x914] sm:$0xf0] }
  0x63   : > { %3243 = vmatpush.bf16.msra.mxu3 %v6796_v30  ;;  %v5375_v30 = vld [vmem:[%s7685_s26 + $0x128] sm:$0xf]  ;;  %v6556_v32 = vor.u32 %v7407_v27, %v6555_v25  ;;  %v807_v25 = vunpack.c.h.b16 %v232_v10  ;;  %v8236_v27 = vperm.slane %v643_v23, 0  ;;  %v8238_v28 = vpack.c.b16 %v804_v15, %v804_v15  ;;  %v5247_v23 = vld [vmem:[%s7685_s26 + $0x18] sm:$0xf] }
  0x64   : > { %3319 = vmatpush.bf16.msra.mxu1 %v5456_v51  ;;  %v8195_v48 = vor.u32 %v7112_v31, %v5375_v30  ;;  %v8201_v51 = vor.u32 %v7109_v42, %v5385_v47  ;;  %v8242_v31 = vpack.c.b16 %v805_v24, %v805_v24  ;;  %v6344_v42 = vor.u32 %v7350_v39, %v6341_v40  ;;  %v5741_v47 = vld [vmem:[%s11246_s1 + $0x2b8] sm:$0xf0]  ;;  %v5717_v39 = vld [vmem:[%s11246_s1 + $0x288] sm:$0xf0]  ;;  %v7242_v40 = vld [vmem:[%s11246_s1 + $0x3f4] sm:$0xf] }
  0x65   : > { %11390 = vst [vmem:[#allocation32_spill] sm:$0xff] %v8238_v28  ;;  %v7078_v24 = vld [vmem:[%s7685_s26 + $0x38] sm:$0xf0] }
  0x66   : > { %3206 = vmatpush.bf16.msra.mxu2 %v6580_v52  ;;  %11386 = vst [vmem:[#allocation28_spill] sm:$0xff] %v8195_v48  ;;  %v7116_v52 = vld [vmem:[%s11246_s1 + $0x4] sm:$0xf] }
  0x67   : > { %3244 = vmatpush.bf16.msra.mxu3 %v6772_v55  ;;  %11389 = vst [vmem:[#allocation31_spill] sm:$0xff] %v8201_v51  ;;  %v5408_v54 = vor.u32 %v7116_v52, %v5405_v53  ;;  %v7206_v55 = vld [vmem:[%s11246_s1 + $0x2d4] sm:$0xf]  ;;  %v7248_v52 = vld [vmem:[%s11246_s1 + $0x424] sm:$0xf] }
  0x68   : > { %3320 = vmatpush.bf16.msra.mxu1 %v5432_v26  ;;  %v5768_v57 = vor.u32 %v7206_v55, %v5765_v56  ;;  %v6152_v26 = vor.u32 %v7302_v21, %v6149_v22  ;;  %11392 = vst [vmem:[#allocation34_spill] sm:$0xff] %v8242_v31  ;;  %v5933_v53 = vld [vmem:[%s11246_s1 + $0x438] sm:$0xf0]  ;;  %v5744_v55 = vor.u32 %v7200_v41, %v5741_v47  ;;  %v7344_v22 = vld [vmem:[%s11246_s1 + $0x724] sm:$0xf] }
  0x69   : > { %v5936_v56 = vor.u32 %v7248_v52, %v5933_v53  ;;  %v6125_v21 = vld [vmem:[%s11246_s1 + $0x5b8] sm:$0xf0]  ;;  %v5255_v41 = vld [vmem:[%s7685_s26 + $0x20] sm:$0xf]  ;;  %v5909_v52 = vld [vmem:[%s11246_s1 + $0x408] sm:$0xf0] }
  0x6a   : > { %3207 = vmatpush.bf16.msra.mxu2 %v6556_v32  ;;  %3428 = vmatpush.bf16.msrb.mxu0 %v6152_v26  ;;  %v8244_v32 = vpack.c.b16 %v807_v25, %v807_v25  ;;  %v6128_v25 = vor.u32 %v7296_v20, %v6125_v21  ;;  %v6317_v26 = vld [vmem:[%s11246_s1 + $0x738] sm:$0xf0] }
  0x6b   : > { %3245 = vmatpush.bf16.msra.mxu3 %v6748_v33  ;;  %v7074_v53 = vld [vmem:[%s7685_s26 + $0x1c] sm:$0xf] }
  0x6c   : > { %3321 = vmatpush.bf16.msra.mxu1 %v5408_v54  ;;  %11393 = vst [vmem:[#allocation35_spill] sm:$0xff] %v8244_v32 }
  0x6d   : > { %3061 = vmatmul.bf16.gmra.mxu2 %v8057_v61  ;;  %3137 = vmatmul.bf16.gmra.mxu0 %v8059_v62 }
  0x6e   : > { %3099 = vmatmul.bf16.gmra.mxu3 %v8061_v1  ;;  %3352 = vmatpush.bf16.msrb.mxu2 %v5768_v57 }
  0x6f   : > { %3175 = vmatmul.bf16.gmra.mxu1 %v8063_v2  ;;  %3390 = vmatpush.bf16.msrb.mxu3 %v5960_v60 }
  0x70   : > { %3466 = vmatpush.bf16.msrb.mxu1 %v6344_v42  ;;  %v7079_v42 = vld [vmem:[%s7685_s26 + $0x40] sm:$0xf0]  ;;  %3429 = vmatpush.bf16.msrb.mxu0 %v6128_v25 }
  0x72   : > { %3353 = vmatpush.bf16.msrb.mxu2 %v5744_v55  ;;  %v5249_v55 = vld [vmem:[%s7685_s26 + $0x3c] sm:$0xf0] }
  0x73   : > { %3391 = vmatpush.bf16.msrb.mxu3 %v5936_v56  ;;  %v5912_v56 = vor.u32 %v7242_v40, %v5909_v52  ;;  %v8312_v20 = vor.u32 %v7074_v53, %v5249_v55  ;;  %v5283_v53 = vld [vmem:[%s7685_s26 + $0x60] sm:$0xf]  ;;  %v7087_v55 = vld [vmem:[%s7685_s26 + $0x80] sm:$0xf0] }
  0x75   : > { %11396 = vst [vmem:[#allocation38_spill] sm:$0xff] %v8312_v20 }
  0x77   : > { %3392 = vmatpush.bf16.msrb.mxu3 %v5912_v56  ;;  %v5291_v56 = vld [vmem:[%s7685_s26 + $0x68] sm:$0xf] }
  0x7d   : > { %3066 = vmatmul.bf16.gmra.mxu2 %v8113_v43  ;;  %3142 = vmatmul.bf16.gmra.mxu0 %v8115_v44 }
  0x7e   : > { %3104 = vmatmul.bf16.gmra.mxu3 %v8117_v45 }
  0x7f   : > { %3180 = vmatmul.bf16.gmra.mxu1 %v8119_v46 }
  0x8d   : > { %3071 = vmatmul.bf16.gmra.mxu2 %v8151_v16  ;;  %3147 = vmatmul.bf16.gmra.mxu0 %v8153_v17 }
  0x8e   : > { %3109 = vmatmul.bf16.gmra.mxu3 %v8155_v18 }
  0x8f   : > { %3185 = vmatmul.bf16.gmra.mxu1 %v8157_v19 }
  0x9d   : > { %3076 = vmatmul.bf16.gmra.mxu2 %v8195_v48  ;;  %3152 = vmatmul.bf16.gmra.mxu0 %v8197_v49 }
  0x9e   : > { %3114 = vmatmul.bf16.gmra.mxu3 %v8199_v50 }
  0x9f   : > { %3190 = vmatmul.bf16.gmra.mxu1 %v8201_v51 }
  0xaa   : > { %v2981_v30 = vpop.f32.mrf.mxu0 }
  0xab   : > { %v2982_v33 = vadd.f32 %v2981_v30, %v8236_v27 }
  0xac   : > { %v3019_v38 = vpop.f32.mrf.mxu1 }
  0xad   : > { %v8265_v54 = vadd.f32 %v3019_v38, %v2982_v33  ;;  %3081 = vmatmul.bf16.gmra.mxu2 %v8238_v28  ;;  %3157 = vmatmul.bf16.gmra.mxu0 %v8240_v29  ;;  %v6320_v33 = vor.u32 %v7344_v22, %v6317_v26  ;;  %v7194_v38 = vld [vmem:[%s11246_s1 + $0x274] sm:$0xf] }
  0xae   : > { %3119 = vmatmul.bf16.gmra.mxu3 %v8242_v31  ;;  %v5720_v47 = vor.u32 %v7194_v38, %v5717_v39 }
  0xaf   : > { %3195 = vmatmul.bf16.gmra.mxu1 %v8244_v32 }
  0xb0   : > { %v2996_v57 = vpop.f32.mrf.mxu2  ;;  %3467 = vmatpush.bf16.msrb.mxu1 %v6320_v33  ;;  %3354 = vmatpush.bf16.msrb.mxu2 %v5720_v47 }
  0xb1   : > { %v2997_v58 = vadd.f32 %v2996_v57, %v8236_v27  ;;  %v3034_v59 = vpop.f32.mrf.mxu3 }
  0xb2   : > { %v2983_v60 = vpop.f32.mrf.mxu0 }
  0xb3   : > { %v8272_v5 = vadd.f32 %v3034_v59, %v2997_v58  ;;  %v2984_v10 = vadd.f32 %v2983_v60, %v8236_v27  ;;  %v8308_v60 = vor.u32 %v7078_v24, %v5247_v23  ;;  %v7290_v23 = vld [vmem:[%s11246_s1 + $0x574] sm:$0xf]  ;;  %v6101_v24 = vld [vmem:[%s11246_s1 + $0x588] sm:$0xf0] }
  0xb4   : > { %v3021_v15 = vpop.f32.mrf.mxu1  ;;  %v6104_v33 = vor.u32 %v7290_v23, %v6101_v24  ;;  %v5693_v23 = vld [vmem:[%s11246_s1 + $0x258] sm:$0xf0]  ;;  %v7236_v24 = vld [vmem:[%s11246_s1 + $0x3c4] sm:$0xf] }
  0xb5   : > { %v8289_v30 = vadd.f32 %v3021_v15, %v2984_v10  ;;  %11394 = vst [vmem:[#allocation36_spill] sm:$0xff] %v8308_v60  ;;  %v8310_v10 = vor.u32 %v7079_v42, %v5255_v41 }
  0xb6   : > { %3430 = vmatpush.bf16.msrb.mxu0 %v6104_v33  ;;  %v5885_v33 = vld [vmem:[%s11246_s1 + $0x3d8] sm:$0xf0] }
  0xb7   : > { %11395 = vst [vmem:[#allocation37_spill] sm:$0xff] %v8310_v10 }
  0xb8   : > { %v2998_v57 = vpop.f32.mrf.mxu2 }
  0xb9   : > { %v2999_v58 = vadd.f32 %v2998_v57, %v8236_v27  ;;  %v3036_v59 = vpop.f32.mrf.mxu3  ;;  %v7088_v57 = vld [vmem:[%s7685_s26 + $0x88] sm:$0xf0] }
  0xba   : > { %v2986_v15 = vpop.f32.mrf.mxu0 }
  0xbb   : > { %v8314_v21 = vadd.f32 %v3036_v59, %v2999_v58  ;;  %v2987_v22 = vadd.f32 %v2986_v15, %v8236_v27  ;;  %v7338_v59 = vld [vmem:[%s11246_s1 + $0x6f4] sm:$0xf]  ;;  %v6293_v15 = vld [vmem:[%s11246_s1 + $0x708] sm:$0xf0] }
  0xbc   : > { %v3024_v25 = vpop.f32.mrf.mxu1 }
  0xbd   : > { %v8317_v26 = vadd.f32 %v3024_v25, %v2987_v22  ;;  %3208 = vmatmul.bf16.vlgmr.msra.gmra.mxu2 %v8308_v60  ;;  %7033 = vmatmul.msk.bf16.vlgmr.msra.gmra.mxu0 %vm2953_vm0, %v8310_v10  ;;  %v7188_v22 = vld [vmem:[%s11246_s1 + $0x244] sm:$0xf]  ;;  %v6296_v25 = vor.u32 %v7338_v59, %v6293_v15  ;;  %v8361_v15 = vor.u32 %v7087_v55, %v5283_v53  ;;  %v6077_v55 = vld [vmem:[%s11246_s1 + $0x558] sm:$0xf0] }
  0xbe   : > { %3246 = vmatmul.bf16.vlgmr.msra.gmra.mxu3 %v8312_v20  ;;  %v7284_v53 = vld [vmem:[%s11246_s1 + $0x544] sm:$0xf] }
  0xbf   : > { %3322 = vmatmul.bf16.vlgmr.msra.gmra.mxu1 %v7733_v4  ;;  %11397 = vst [vmem:[#allocation39_spill] sm:$0xff] %v8361_v15  ;;  %v8363_v4 = vor.u32 %v7088_v57, %v5291_v56  ;;  %v6269_v56 = vld [vmem:[%s11246_s1 + $0x6d8] sm:$0xf0]  ;;  %v7182_v57 = vld [vmem:[%s11246_s1 + $0x214] sm:$0xf] }
  0xc0   : > { %v3001_v38 = vpop.f32.mrf.mxu2  ;;  %3468 = vmatpush.bf16.msrb.mxu1 %v6296_v25  ;;  %v5669_v25 = vld [vmem:[%s11246_s1 + $0x228] sm:$0xf0] }
  0xc1   : > { %v3002_v39 = vadd.f32 %v3001_v38, %v8236_v27  ;;  %v3039_v40 = vpop.f32.mrf.mxu3  ;;  %v7083_v38 = vld [vmem:[%s7685_s26 + $0x64] sm:$0xf]  ;;  %11398 = vst [vmem:[#allocation40_spill] sm:$0xff] %v8363_v4 }
  0xc2   : > { %v2988_v41 = vpop.f32.mrf.mxu0 }
  0xc3   : > { %v8331_v42 = vadd.f32 %v3039_v40, %v3002_v39  ;;  %v2989_v47 = vadd.f32 %v2988_v41, %v8236_v27  ;;  %v5285_v39 = vld [vmem:[%s7685_s26 + $0x84] sm:$0xf0]  ;;  %v5696_v40 = vor.u32 %v7188_v22, %v5693_v23  ;;  %v5888_v41 = vor.u32 %v7236_v24, %v5885_v33 }
  0xc4   : > { %v3026_v52 = vpop.f32.mrf.mxu1  ;;  %v8365_v51 = vor.u32 %v7083_v38, %v5285_v39  ;;  %v5672_v33 = vor.u32 %v7182_v57, %v5669_v25  ;;  %v7230_v38 = vld [vmem:[%s11246_s1 + $0x394] sm:$0xf]  ;;  %v5861_v39 = vld [vmem:[%s11246_s1 + $0x3a8] sm:$0xf0] }
  0xc5   : > { %v8338_v58 = vadd.f32 %v3026_v52, %v2989_v47  ;;  %3355 = vmatpush.bf16.msrb.mxu2 %v5696_v40  ;;  %3393 = vmatpush.bf16.msrb.mxu3 %v5888_v41  ;;  %v5864_v41 = vor.u32 %v7230_v38, %v5861_v39  ;;  %v6053_v57 = vld [vmem:[%s11246_s1 + $0x528] sm:$0xf0] }
  0xc6   : > { %11399 = vst [vmem:[#allocation41_spill] sm:$0xff] %v8365_v51  ;;  %v7096_v25 = vld [vmem:[%s7685_s26 + $0xc8] sm:$0xf0] }
  0xc7   : > { %v7092_v39 = vld [vmem:[%s7685_s26 + $0xac] sm:$0xf] }
  0xc8   : > { %v3003_v47 = vpop.f32.mrf.mxu2 }
  0xc9   : > { %v3004_v52 = vadd.f32 %v3003_v47, %v8236_v27  ;;  %v3041_v59 = vpop.f32.mrf.mxu3  ;;  %3356 = vmatpush.bf16.msrb.mxu2 %v5672_v33  ;;  %3394 = vmatpush.bf16.msrb.mxu3 %v5864_v41  ;;  %v7097_v33 = vld [vmem:[%s7685_s26 + $0xd0] sm:$0xf0] }
  0xca   : > { %v2991_v32 = vpop.f32.mrf.mxu0 }
  0xcb   : > { %v8367_v19 = vadd.f32 %v3041_v59, %v3004_v52  ;;  %v2992_v46 = vadd.f32 %v2991_v32, %v8236_v27  ;;  %v7332_v32 = vld [vmem:[%s11246_s1 + $0x6c4] sm:$0xf] }
  0xcc   : > { %v3029_v22 = vpop.f32.mrf.mxu1  ;;  %v6272_v24 = vor.u32 %v7332_v32, %v6269_v56  ;;  %v7278_v56 = vld [vmem:[%s11246_s1 + $0x514] sm:$0xf] }
  0xcd   : > { %v8370_v23 = vadd.f32 %v3029_v22, %v2992_v46  ;;  %3213 = vmatmul.bf16.gmra.mxu2 %v8361_v15  ;;  %7034 = vmatmul.msk.bf16.gmra.mxu0 %vm2953_vm0, %v8363_v4  ;;  %v6080_v46 = vor.u32 %v7284_v53, %v6077_v55  ;;  %v6056_v38 = vor.u32 %v7278_v56, %v6053_v57  ;;  %v7326_v56 = vld [vmem:[%s11246_s1 + $0x694] sm:$0xf]  ;;  %v7176_v57 = vld [vmem:[%s11246_s1 + $0x1e4] sm:$0xf]  ;;  %v7106_v4 = vld [vmem:[%s7685_s26 + $0x118] sm:$0xf0] }
  0xce   : > { %3251 = vmatmul.bf16.gmra.mxu3 %v8365_v51  ;;  %3469 = vmatpush.bf16.msrb.mxu1 %v6272_v24  ;;  %v5327_v24 = vld [vmem:[%s7685_s26 + $0xb0] sm:$0xf]  ;;  %v7101_v51 = vld [vmem:[%s7685_s26 + $0xf4] sm:$0xf] }
  0xcf   : > { %3327 = vmatmul.bf16.gmra.mxu1 %v7849_v0  ;;  %3431 = vmatpush.bf16.msrb.mxu0 %v6080_v46  ;;  %v5319_v46 = vld [vmem:[%s7685_s26 + $0xa8] sm:$0xf] }
  0xd0   : > { %v3006_v40 = vpop.f32.mrf.mxu2 }
  0xd1   : > { %v3007_v47 = vadd.f32 %v3006_v40, %v8236_v27  ;;  %v3044_v52 = vpop.f32.mrf.mxu3  ;;  %v5321_v40 = vld [vmem:[%s7685_s26 + $0xcc] sm:$0xf0] }
  0xd2   : > { %v2993_v59 = vpop.f32.mrf.mxu0 }
  0xd3   : > { %v8402_v22 = vadd.f32 %v3044_v52, %v3007_v47  ;;  %v2994_v53 = vadd.f32 %v2993_v59, %v8236_v27  ;;  %3432 = vmatpush.bf16.msrb.mxu0 %v6056_v38  ;;  %v8419_v47 = vor.u32 %v7096_v25, %v5319_v46  ;;  %v8421_v52 = vor.u32 %v7097_v33, %v5327_v24  ;;  %v6245_v46 = vld [vmem:[%s11246_s1 + $0x6a8] sm:$0xf0]  ;;  %v5645_v24 = vld [vmem:[%s11246_s1 + $0x1f8] sm:$0xf0]  ;;  %v7224_v33 = vld [vmem:[%s11246_s1 + $0x364] sm:$0xf] }
  0xd4   : > { %v3031_v55 = vpop.f32.mrf.mxu1  ;;  %v6248_v25 = vor.u32 %v7326_v56, %v6245_v46  ;;  %v5837_v38 = vld [vmem:[%s11246_s1 + $0x378] sm:$0xf0] }
  0xd5   : > { %v8405_v32 = vadd.f32 %v3031_v55, %v2994_v53  ;;  %11400 = vst [vmem:[#allocation42_spill] sm:$0xff] %v8419_v47  ;;  %v8423_v53 = vor.u32 %v7092_v39, %v5321_v40  ;;  %v5648_v39 = vor.u32 %v7176_v57, %v5645_v24  ;;  %v5840_v40 = vor.u32 %v7224_v33, %v5837_v38  ;;  %v7272_v57 = vld [vmem:[%s11246_s1 + $0x4e4] sm:$0xf]  ;;  %v6221_v33 = vld [vmem:[%s11246_s1 + $0x678] sm:$0xf0] }
  0xd6   : > { %11401 = vst [vmem:[#allocation43_spill] sm:$0xff] %v8421_v52  ;;  %3470 = vmatpush.bf16.msrb.mxu1 %v6248_v25  ;;  %v7320_v25 = vld [vmem:[%s11246_s1 + $0x664] sm:$0xf]  ;;  %v5357_v38 = vld [vmem:[%s7685_s26 + $0x114] sm:$0xf0] }
  0xd7   : > { %11402 = vst [vmem:[#allocation44_spill] sm:$0xff] %v8423_v53  ;;  %3357 = vmatpush.bf16.msrb.mxu2 %v5648_v39  ;;  %3395 = vmatpush.bf16.msrb.mxu3 %v5840_v40  ;;  %v6224_v39 = vor.u32 %v7320_v25, %v6221_v33 }
  0xd8   : > { %v3008_v41 = vpop.f32.mrf.mxu2 }
  0xd9   : > { %v3046_v27 = vpop.f32.mrf.mxu3 }
  0xda   : > { %v3133_v59 = vpop.f32.mrf.mxu0  ;;  %3471 = vmatpush.bf16.msrb.mxu1 %v6224_v39  ;;  %v5399_v39 = vld [vmem:[%s7685_s26 + $0x140] sm:$0xf] }
  0xdc   : > { %v3171_v55 = vpop.f32.mrf.mxu1 }
  0xdd   : > { %3218 = vmatmul.bf16.gmra.mxu2 %v8419_v47  ;;  %7035 = vmatmul.msk.bf16.gmra.mxu0 %vm2953_vm0, %v8421_v52  ;;  %v5355_v52 = vld [vmem:[%s7685_s26 + $0xf0] sm:$0xf]  ;;  %v7105_v47 = vld [vmem:[%s7685_s26 + $0x110] sm:$0xf0] }
  0xde   : > { %3256 = vmatmul.bf16.gmra.mxu3 %v8423_v53  ;;  %v5363_v53 = vld [vmem:[%s7685_s26 + $0xf8] sm:$0xf]  ;;  %v8482_v60 = vor.u32 %v7105_v47, %v5355_v52 }
  0xdf   : > { %3332 = vmatmul.bf16.gmra.mxu1 %v7971_v12  ;;  %v8484_v25 = vor.u32 %v7106_v4, %v5363_v53  ;;  %v7266_v4 = vld [vmem:[%s11246_s1 + $0x4b4] sm:$0xf] }
  0xe0   : > { %v3057_v41 = vpop.f32.mrf.mxu2  ;;  %11403 = vst [vmem:[#allocation45_spill] sm:$0xff] %v8482_v60 }
  0xe1   : > { %v3058_v27 = vadd.f32 %v3057_v41, %v8265_v54  ;;  %v3095_v56 = vpop.f32.mrf.mxu3  ;;  %v6029_v54 = vld [vmem:[%s11246_s1 + $0x4f8] sm:$0xf0]  ;;  %v7218_v41 = vld [vmem:[%s11246_s1 + $0x334] sm:$0xf]  ;;  %11404 = vst [vmem:[#allocation46_spill] sm:$0xff] %v8484_v25 }
  0xe2   : > { %v3135_v46 = vpop.f32.mrf.mxu0  ;;  %v6032_v24 = vor.u32 %v7272_v57, %v6029_v54 }
  0xe3   : > { %v3096_v12 = vadd.f32 %v3095_v56, %v3058_v27  ;;  %v5813_v27 = vld [vmem:[%s11246_s1 + $0x348] sm:$0xf0] }
  0xe4   : > { %v3173_v0 = vpop.f32.mrf.mxu1  ;;  %3433 = vmatpush.bf16.msrb.mxu0 %v6032_v24  ;;  %v5816_v54 = vor.u32 %v7218_v41, %v5813_v27  ;;  %v5391_v24 = vld [vmem:[%s7685_s26 + $0x138] sm:$0xf]  ;;  %v7164_v27 = vld [vmem:[%s11246_s1 + $0x184] sm:$0xf] }
  0xe5   : > { %v3134_v15 = vadd.f32 %v3133_v59, %v3096_v12  ;;  %v7170_v12 = vld [vmem:[%s11246_s1 + $0x1b4] sm:$0xf]  ;;  %v5621_v59 = vld [vmem:[%s11246_s1 + $0x1c8] sm:$0xf0] }
  0xe6   : > { %v5624_v40 = vor.u32 %v7170_v12, %v5621_v59  ;;  %v8486_v12 = vor.u32 %v7101_v51, %v5357_v38  ;;  %3396 = vmatpush.bf16.msrb.mxu3 %v5816_v54  ;;  %v7114_v38 = vld [vmem:[%s7685_s26 + $0x158] sm:$0xf0] }
  0xe7   : > { %v8479_v56 = vadd.f32 %v3171_v55, %v3134_v15  ;;  %v5597_v54 = vld [vmem:[%s11246_s1 + $0x198] sm:$0xf0] }
  0xe8   : > { %v3059_v57 = vpop.f32.mrf.mxu2  ;;  %3358 = vmatpush.bf16.msrb.mxu2 %v5624_v40  ;;  %11405 = vst [vmem:[#allocation47_spill] sm:$0xff] %v8486_v12  ;;  %v7115_v40 = vld [vmem:[%s7685_s26 + $0x160] sm:$0xf0] }
  0xe9   : > { %v3060_v2 = vadd.f32 %v3059_v57, %v8289_v30  ;;  %v3097_v10 = vpop.f32.mrf.mxu3 }
  0xea   : > { %v3138_v33 = vpop.f32.mrf.mxu0 }
  0xeb   : > { %v3098_v59 = vadd.f32 %v3097_v10, %v3060_v2  ;;  %v6005_v2 = vld [vmem:[%s11246_s1 + $0x4c8] sm:$0xf0] }
  0xec   : > { %v3176_v20 = vpop.f32.mrf.mxu1  ;;  %v6008_v51 = vor.u32 %v7266_v4, %v6005_v2  ;;  %v5393_v4 = vld [vmem:[%s7685_s26 + $0x15c] sm:$0xf0]  ;;  %v5600_v2 = vor.u32 %v7164_v27, %v5597_v54 }
  0xed   : > { %v3136_v15 = vadd.f32 %v3135_v46, %v3098_v59  ;;  %3223 = vmatmul.bf16.gmra.mxu2 %v8482_v60  ;;  %7036 = vmatmul.msk.bf16.gmra.mxu0 %vm2953_vm0, %v8484_v25  ;;  %v5789_v59 = vld [vmem:[%s11246_s1 + $0x318] sm:$0xf0] }
  0xee   : > { %3261 = vmatmul.bf16.gmra.mxu3 %v8486_v12  ;;  %3434 = vmatpush.bf16.msrb.mxu0 %v6008_v51 }
  0xef   : > { %3337 = vmatmul.bf16.gmra.mxu1 %v7731_v3  ;;  %v8499_v30 = vadd.f32 %v3173_v0, %v3136_v15  ;;  %v7314_v0 = vld [vmem:[%s11246_s1 + $0x634] sm:$0xf]  ;;  %v7110_v15 = vld [vmem:[%s7685_s26 + $0x13c] sm:$0xf]  ;;  %3359 = vmatpush.bf16.msrb.mxu2 %v5600_v2  ;;  %v7260_v3 = vld [vmem:[%s11246_s1 + $0x484] sm:$0xf] }
  0xf0   : > { %v3062_v10 = vpop.f32.mrf.mxu2  ;;  %v8539_v27 = vor.u32 %v7110_v15, %v5393_v4  ;;  %v6725_v15 = vld [vmem:[%s11246_s1 + $0xa68] sm:$0xf0] }
  0xf1   : > { %v3063_v47 = vadd.f32 %v3062_v10, %v8317_v26  ;;  %v3100_v52 = vpop.f32.mrf.mxu3  ;;  %v6197_v26 = vld [vmem:[%s11246_s1 + $0x648] sm:$0xf0] }
  0xf2   : > { %v3140_v53 = vpop.f32.mrf.mxu0  ;;  %v6200_v57 = vor.u32 %v7314_v0, %v6197_v26  ;;  %v8529_v0 = vor.u32 %v7114_v38, %v5391_v24  ;;  %v8531_v26 = vor.u32 %v7115_v40, %v5399_v39  ;;  %11408 = vst [vmem:[#allocation50_spill] sm:$0xff] %v8539_v27  ;;  %v7308_v24 = vld [vmem:[%s11246_s1 + $0x604] sm:$0xf]  ;;  %v6173_v38 = vld [vmem:[%s11246_s1 + $0x618] sm:$0xf0] }
  0xf3   : > { %v3101_v55 = vadd.f32 %v3100_v52, %v3063_v47  ;;  %v6176_v39 = vor.u32 %v7308_v24, %v6173_v38 }
  0xf4   : > { %v3178_v46 = vpop.f32.mrf.mxu1  ;;  %3472 = vmatpush.bf16.msrb.mxu1 %v6200_v57  ;;  %11406 = vst [vmem:[#allocation48_spill] sm:$0xff] %v8529_v0 }
  0xf5   : > { %v3139_v41 = vadd.f32 %v3138_v33, %v3101_v55  ;;  %v7212_v33 = vld [vmem:[%s11246_s1 + $0x304] sm:$0xf]  ;;  %11407 = vst [vmem:[#allocation49_spill] sm:$0xff] %v8531_v26 }
  0xf6   : > { %v5792_v51 = vor.u32 %v7212_v33, %v5789_v59  ;;  %v6533_v33 = vld [vmem:[%s11246_s1 + $0x8e8] sm:$0xf0] }
  0xf7   : > { %v8526_v10 = vadd.f32 %v3176_v20, %v3139_v41  ;;  %v5981_v20 = vld [vmem:[%s11246_s1 + $0x498] sm:$0xf0] }
  0xf8   : > { %v3064_v47 = vpop.f32.mrf.mxu2  ;;  %3397 = vmatpush.bf16.msrb.mxu3 %v5792_v51  ;;  %v5984_v57 = vor.u32 %v7260_v3, %v5981_v20  ;;  %v7398_v3 = vld [vmem:[%s11246_s1 + $0x8d4] sm:$0xf]  ;;  %3473 = vmatpush.bf16.msrb.mxu1 %v6176_v39  ;;  %v233_v20 = vld [vmem:[%s7685_s26 + $0x180] sm:$0xff] }
  0xf9   : > { %v3065_v52 = vadd.f32 %v3064_v47, %v8338_v58  ;;  %v3102_v55 = vpop.f32.mrf.mxu3  ;;  %v6536_v59 = vor.u32 %v7398_v3, %v6533_v33  ;;  %v808_v39 = vunpack.c.l.b16 %v233_v20 }
  0xfa   : > { %v3143_v41 = vpop.f32.mrf.mxu0  ;;  %3435 = vmatpush.bf16.msrb.mxu0 %v5984_v57  ;;  %v234_v57 = vld [vmem:[%s7685_s26 + $0x188] sm:$0xf] }
  0xfb   : > { %v3103_v58 = vadd.f32 %v3102_v55, %v3065_v52  ;;  %3504 = vmatpush.bf16.msra.mxu2 %v6536_v59  ;;  %v810_v3 = vunpack.c.l.b16 %v234_v57 }
  0xfc   : > { %v3181_v54 = vpop.f32.mrf.mxu1 }
  0xfd   : > { %v3141_v40 = vadd.f32 %v3140_v53, %v3103_v58  ;;  %3228 = vmatmul.bf16.gmra.mxu2 %v8529_v0  ;;  %7037 = vmatmul.msk.bf16.gmra.mxu0 %vm2953_vm0, %v8531_v26  ;;  %v7446_v53 = vld [vmem:[%s11246_s1 + $0xa54] sm:$0xf] }
  0xfe   : > { %3266 = vmatmul.bf16.gmra.mxu3 %v8539_v27  ;;  %v6728_v51 = vor.u32 %v7446_v53, %v6725_v15 }
  0xff   : > { %3342 = vmatmul.bf16.gmra.mxu1 %v7847_v63  ;;  %v8564_v4 = vadd.f32 %v3178_v46, %v3141_v40  ;;  %v7494_v46 = vld [vmem:[%s11246_s1 + $0xbd4] sm:$0xf]  ;;  %v6917_v40 = vld [vmem:[%s11246_s1 + $0xbe8] sm:$0xf0] }
 0x100   : > { %v3067_v2 = vpop.f32.mrf.mxu2  ;;  %3542 = vmatpush.bf16.msra.mxu3 %v6728_v51  ;;  %v6920_v33 = vor.u32 %v7494_v46, %v6917_v40  ;;  %v8580_v51 = vpack.c.b16 %v810_v3, %v810_v3  ;;  %v6701_v3 = vld [vmem:[%s11246_s1 + $0xa38] sm:$0xf0] }
 0x101   : > { %v3068_v47 = vadd.f32 %v3067_v2, %v8370_v23  ;;  %v3105_v52 = vpop.f32.mrf.mxu3  ;;  %v809_v23 = vunpack.c.h.b16 %v233_v20  ;;  %v7392_v20 = vld [vmem:[%s11246_s1 + $0x8a4] sm:$0xf] }
 0x102   : > { %v3145_v55 = vpop.f32.mrf.mxu0  ;;  %3580 = vmatpush.bf16.msra.mxu0 %v6920_v33  ;;  %11410 = vst [vmem:[#allocation52_spill] sm:$0xff] %v8580_v51 }
 0x103   : > { %v3106_v58 = vadd.f32 %v3105_v52, %v3068_v47  ;;  %v8582_v52 = vpack.c.b16 %v809_v23, %v809_v23 }
 0x104   : > { %v3183_v24 = vpop.f32.mrf.mxu1 }
 0x105   : > { %v3144_v38 = vadd.f32 %v3143_v41, %v3106_v58  ;;  %v8578_v41 = vpack.c.b16 %v808_v39, %v808_v39  ;;  %11411 = vst [vmem:[#allocation53_spill] sm:$0xff] %v8582_v52  ;;  %v7440_v39 = vld [vmem:[%s11246_s1 + $0xa24] sm:$0xf] }
 0x106   : > { %v6704_v40 = vor.u32 %v7440_v39, %v6701_v3 }
 0x107   : > { %v8575_v53 = vadd.f32 %v3181_v54, %v3144_v38  ;;  %11409 = vst [vmem:[#allocation51_spill] sm:$0xff] %v8578_v41  ;;  %v7013_v54 = vld [vmem:[%s11246_s1 + $0xca8] sm:$0xf0]  ;;  %v6509_v38 = vld [vmem:[%s11246_s1 + $0x8b8] sm:$0xf0] }
 0x108   : > { %v3069_v59 = vpop.f32.mrf.mxu2  ;;  %v6512_v46 = vor.u32 %v7392_v20, %v6509_v38  ;;  %3543 = vmatpush.bf16.msra.mxu3 %v6704_v40  ;;  %v6485_v20 = vld [vmem:[%s11246_s1 + $0x888] sm:$0xf0] }
 0x109   : > { %v3070_v15 = vadd.f32 %v3069_v59, %v8405_v32  ;;  %v3107_v2 = vpop.f32.mrf.mxu3  ;;  %v7518_v32 = vld [vmem:[%s11246_s1 + $0xc94] sm:$0xf] }
 0x10a   : > { %v3148_v47 = vpop.f32.mrf.mxu0  ;;  %3505 = vmatpush.bf16.msra.mxu2 %v6512_v46 }
 0x10b   : > { %v3108_v57 = vadd.f32 %v3107_v2, %v3070_v15 }
 0x10c   : > { %v3186_v58 = vpop.f32.mrf.mxu1 }
 0x10d   : > { %v3146_v63 = vadd.f32 %v3145_v55, %v3108_v57  ;;  %3233 = vmatmul.bf16.gmra.mxu2 %v8578_v41  ;;  %7038 = vmatmul.msk.bf16.gmra.mxu0 %vm2953_vm0, %v8580_v51  ;;  %v7016_v55 = vor.u32 %v7518_v32, %v7013_v54 }
 0x10e   : > { %3271 = vmatmul.bf16.gmra.mxu3 %v8582_v52 }
 0x10f   : > { %3347 = vmatmul.bf16.gmra.mxu1 %v7969_v11  ;;  %v8607_v23 = vadd.f32 %v3183_v24, %v3146_v63  ;;  %v7488_v11 = vld [vmem:[%s11246_s1 + $0xba4] sm:$0xf]  ;;  %v6893_v63 = vld [vmem:[%s11246_s1 + $0xbb8] sm:$0xf0]  ;;  %v7386_v24 = vld [vmem:[%s11246_s1 + $0x874] sm:$0xf] }
 0x110   : > { %v3072_v33 = vpop.f32.mrf.mxu2  ;;  %3622 = vmatpush.bf16.msra.mxu1 %v7016_v55  ;;  %v6677_v55 = vld [vmem:[%s11246_s1 + $0xa08] sm:$0xf0]  ;;  %v6488_v38 = vor.u32 %v7386_v24, %v6485_v20 }
 0x111   : > { %v3073_v59 = vadd.f32 %v3072_v33, %v8272_v5  ;;  %v3110_v15 = vpop.f32.mrf.mxu3  ;;  %v6896_v5 = vor.u32 %v7488_v11, %v6893_v63 }
 0x112   : > { %v3150_v2 = vpop.f32.mrf.mxu0  ;;  %3506 = vmatpush.bf16.msra.mxu2 %v6488_v38 }
 0x113   : > { %v3111_v57 = vadd.f32 %v3110_v15, %v3073_v59  ;;  %3581 = vmatpush.bf16.msra.mxu0 %v6896_v5 }
 0x114   : > { %v3188_v32 = vpop.f32.mrf.mxu1 }
 0x115   : > { %v3149_v54 = vadd.f32 %v3148_v47, %v3111_v57  ;;  %v7434_v47 = vld [vmem:[%s11246_s1 + $0x9f4] sm:$0xf] }
 0x116   : > { %v6680_v39 = vor.u32 %v7434_v47, %v6677_v55 }
 0x117   : > { %v8628_v3 = vadd.f32 %v3186_v58, %v3149_v54  ;;  %v7482_v58 = vld [vmem:[%s11246_s1 + $0xb74] sm:$0xf] }
 0x118   : > { %v3074_v46 = vpop.f32.mrf.mxu2  ;;  %3544 = vmatpush.bf16.msra.mxu3 %v6680_v39  ;;  %v7512_v39 = vld [vmem:[%s11246_s1 + $0xc64] sm:$0xf] }
 0x119   : > { %v3075_v11 = vadd.f32 %v3074_v46, %v8314_v21  ;;  %v3112_v40 = vpop.f32.mrf.mxu3  ;;  %v6869_v21 = vld [vmem:[%s11246_s1 + $0xb88] sm:$0xf0]  ;;  %v6989_v46 = vld [vmem:[%s11246_s1 + $0xc78] sm:$0xf0] }
 0x11a   : > { %v3153_v33 = vpop.f32.mrf.mxu0  ;;  %v6872_v54 = vor.u32 %v7482_v58, %v6869_v21 }
 0x11b   : > { %v3113_v59 = vadd.f32 %v3112_v40, %v3075_v11  ;;  %v6992_v40 = vor.u32 %v7512_v39, %v6989_v46 }
 0x11c   : > { %v3191_v15 = vpop.f32.mrf.mxu1  ;;  %3582 = vmatpush.bf16.msra.mxu0 %v6872_v54 }
 0x11d   : > { %v3151_v57 = vadd.f32 %v3150_v2, %v3113_v59  ;;  %3360 = vmatmul.bf16.vlgmr.msrb.gmra.mxu2 %v7746_v9  ;;  %3436 = vmatmul.bf16.vlgmr.msrb.gmra.mxu0 %v8011_v36  ;;  %v7428_v59 = vld [vmem:[%s11246_s1 + $0x9c4] sm:$0xf] }
 0x11e   : > { %3398 = vmatmul.bf16.vlgmr.msrb.gmra.mxu3 %v8007_v34  ;;  %3623 = vmatpush.bf16.msra.mxu1 %v6992_v40  ;;  %v7422_v40 = vld [vmem:[%s11246_s1 + $0x994] sm:$0xf] }
 0x11f   : > { %3474 = vmatmul.bf16.vlgmr.msrb.gmra.mxu1 %v8009_v35  ;;  %v8641_v63 = vadd.f32 %v3188_v32, %v3151_v57  ;;  %v7380_v32 = vld [vmem:[%s11246_s1 + $0x844] sm:$0xf]  ;;  %v6653_v57 = vld [vmem:[%s11246_s1 + $0x9d8] sm:$0xf0] }
 0x120   : > { %v3077_v2 = vpop.f32.mrf.mxu2  ;;  %v11415_v35 = vld [vmem:[#allocation37_spill] sm:$0xff] }
 0x121   : > { %v3078_v24 = vadd.f32 %v3077_v2, %v8331_v42  ;;  %v3115_v5 = vpop.f32.mrf.mxu3 }
 0x122   : > { %v3155_v20 = vpop.f32.mrf.mxu0 }
 0x123   : > { %v3116_v47 = vadd.f32 %v3115_v5, %v3078_v24 }
 0x124   : > { %v3193_v55 = vpop.f32.mrf.mxu1 }
 0x125   : > { %v3154_v38 = vadd.f32 %v3153_v33, %v3116_v47  ;;  %v6461_v33 = vld [vmem:[%s11246_s1 + $0x858] sm:$0xf0] }
 0x126   : > { %v6464_v54 = vor.u32 %v7380_v32, %v6461_v33  ;;  %v6629_v33 = vld [vmem:[%s11246_s1 + $0x9a8] sm:$0xf0] }
 0x127   : > { %v8653_v11 = vadd.f32 %v3191_v15, %v3154_v38  ;;  %v6656_v15 = vor.u32 %v7428_v59, %v6653_v57  ;;  %v6845_v38 = vld [vmem:[%s11246_s1 + $0xb58] sm:$0xf0] }
 0x128   : > { %v3079_v42 = vpop.f32.mrf.mxu2  ;;  %3507 = vmatpush.bf16.msra.mxu2 %v6464_v54 }
 0x129   : > { %v3080_v58 = vadd.f32 %v3079_v42, %v8367_v19  ;;  %v3117_v21 = vpop.f32.mrf.mxu3  ;;  %3545 = vmatpush.bf16.msra.mxu3 %v6656_v15  ;;  %v7476_v19 = vld [vmem:[%s11246_s1 + $0xb44] sm:$0xf]  ;;  %v6437_v42 = vld [vmem:[%s11246_s1 + $0x828] sm:$0xf0] }
 0x12a   : > { %v3158_v2 = vpop.f32.mrf.mxu0  ;;  %v6848_v32 = vor.u32 %v7476_v19, %v6845_v38  ;;  %v6821_v19 = vld [vmem:[%s11246_s1 + $0xb28] sm:$0xf0] }
 0x12b   : > { %v3118_v24 = vadd.f32 %v3117_v21, %v3080_v58 }
 0x12c   : > { %v3196_v5 = vpop.f32.mrf.mxu1  ;;  %3583 = vmatpush.bf16.msra.mxu0 %v6848_v32 }
 0x12d   : > { %v3156_v47 = vadd.f32 %v3155_v20, %v3118_v24  ;;  %3365 = vmatmul.bf16.gmra.mxu2 %v7862_v7  ;;  %3441 = vmatmul.bf16.gmra.mxu0 %v8061_v1  ;;  %v7374_v20 = vld [vmem:[%s11246_s1 + $0x814] sm:$0xf] }
 0x12e   : > { %3403 = vmatmul.bf16.gmra.mxu3 %v8057_v61  ;;  %v6440_v58 = vor.u32 %v7374_v20, %v6437_v42 }
 0x12f   : > { %3479 = vmatmul.bf16.gmra.mxu1 %v8059_v62  ;;  %v8678_v39 = vadd.f32 %v3193_v55, %v3156_v47  ;;  %v6632_v55 = vor.u32 %v7422_v40, %v6629_v33  ;;  %v7470_v47 = vld [vmem:[%s11246_s1 + $0xb14] sm:$0xf]  ;;  %v7368_v40 = vld [vmem:[%s11246_s1 + $0x7e4] sm:$0xf] }
 0x130   : > { %v3082_v46 = vpop.f32.mrf.mxu2  ;;  %3508 = vmatpush.bf16.msra.mxu2 %v6440_v58  ;;  %v6824_v20 = vor.u32 %v7470_v47, %v6821_v19  ;;  %v7416_v58 = vld [vmem:[%s11246_s1 + $0x964] sm:$0xf] }
 0x131   : > { %v3083_v59 = vadd.f32 %v3082_v46, %v8402_v22  ;;  %v3120_v57 = vpop.f32.mrf.mxu3  ;;  %3546 = vmatpush.bf16.msra.mxu3 %v6632_v55  ;;  %v6605_v55 = vld [vmem:[%s11246_s1 + $0x978] sm:$0xf0] }
 0x132   : > { %v3160_v21 = vpop.f32.mrf.mxu0  ;;  %3584 = vmatpush.bf16.msra.mxu0 %v6824_v20 }
 0x133   : > { %v3121_v54 = vadd.f32 %v3120_v57, %v3083_v59  ;;  %v6413_v57 = vld [vmem:[%s11246_s1 + $0x7f8] sm:$0xf0] }
 0x134   : > { %v3198_v15 = vpop.f32.mrf.mxu1 }
 0x135   : > { %v3159_v24 = vadd.f32 %v3158_v2, %v3121_v54  ;;  %v7506_v2 = vld [vmem:[%s11246_s1 + $0xc34] sm:$0xf]  ;;  %v6416_v15 = vor.u32 %v7368_v40, %v6413_v57 }
 0x136   : > { %v7362_v40 = vld [vmem:[%s11246_s1 + $0x7b4] sm:$0xf] }
 0x137   : > { %v8696_v38 = vadd.f32 %v3196_v5, %v3159_v24  ;;  %v6965_v5 = vld [vmem:[%s11246_s1 + $0xc48] sm:$0xf0]  ;;  %v6608_v24 = vor.u32 %v7416_v58, %v6605_v55  ;;  %3509 = vmatpush.bf16.msra.mxu2 %v6416_v15 }
 0x138   : > { %v3084_v22 = vpop.f32.mrf.mxu2  ;;  %v6968_v59 = vor.u32 %v7506_v2, %v6965_v5  ;;  %v6581_v55 = vld [vmem:[%s11246_s1 + $0x948] sm:$0xf0] }
 0x139   : > { %v3122_v46 = vpop.f32.mrf.mxu3  ;;  %3547 = vmatpush.bf16.msra.mxu3 %v6608_v24 }
 0x13a   : > { %v3285_v42 = vpop.f32.mrf.mxu0  ;;  %3624 = vmatpush.bf16.msra.mxu1 %v6968_v59  ;;  %v7464_v46 = vld [vmem:[%s11246_s1 + $0xae4] sm:$0xf] }
 0x13c   : > { %v8698_v32 = vpop.f32.mrf.mxu1 }
 0x13d   : > { %3370 = vmatmul.bf16.gmra.mxu2 %v7975_v14  ;;  %3446 = vmatmul.bf16.gmra.mxu0 %v8117_v45 }
 0x13e   : > { %3408 = vmatmul.bf16.gmra.mxu3 %v8113_v43 }
 0x13f   : > { %3484 = vmatmul.bf16.gmra.mxu1 %v8115_v44 }
 0x140   : > { %v3209_v33 = vpop.f32.mrf.mxu2 }
 0x141   : > { %v3210_v21 = vadd.f32 %v3209_v33, %v8479_v56  ;;  %v3247_v54 = vpop.f32.mrf.mxu3  ;;  %v6797_v56 = vld [vmem:[%s11246_s1 + $0xaf8] sm:$0xf0]  ;;  %v6389_v33 = vld [vmem:[%s11246_s1 + $0x7c8] sm:$0xf0] }
 0x142   : > { %v3287_v47 = vpop.f32.mrf.mxu0  ;;  %v6800_v5 = vor.u32 %v7464_v46, %v6797_v56  ;;  %v6392_v58 = vor.u32 %v7362_v40, %v6389_v33  ;;  %v6773_v46 = vld [vmem:[%s11246_s1 + $0xac8] sm:$0xf0] }
 0x143   : > { %v3248_v19 = vadd.f32 %v3247_v54, %v3210_v21 }
 0x144   : > { %v8723_v22 = vpop.f32.mrf.mxu1  ;;  %3585 = vmatpush.bf16.msra.mxu0 %v6800_v5  ;;  %3510 = vmatpush.bf16.msra.mxu2 %v6392_v58  ;;  %v6941_v58 = vld [vmem:[%s11246_s1 + $0xc18] sm:$0xf0] }
 0x145   : > { %v8725_v20 = vadd.f32 %v3285_v42, %v3248_v19  ;;  %v7410_v42 = vld [vmem:[%s11246_s1 + $0x934] sm:$0xf] }
 0x146   : > { %v6584_v54 = vor.u32 %v7410_v42, %v6581_v55 }
 0x148   : > { %v3211_v2 = vpop.f32.mrf.mxu2  ;;  %3548 = vmatpush.bf16.msra.mxu3 %v6584_v54 }
 0x149   : > { %v3212_v59 = vadd.f32 %v3211_v2, %v8499_v30  ;;  %v3249_v57 = vpop.f32.mrf.mxu3  ;;  %v7458_v30 = vld [vmem:[%s11246_s1 + $0xab4] sm:$0xf] }
 0x14a   : > { %v3290_v21 = vpop.f32.mrf.mxu0  ;;  %v6776_v2 = vor.u32 %v7458_v30, %v6773_v46 }
 0x14b   : > { %v3250_v15 = vadd.f32 %v3249_v57, %v3212_v59  ;;  %v7500_v57 = vld [vmem:[%s11246_s1 + $0xc04] sm:$0xf] }
 0x14c   : > { %v8746_v24 = vpop.f32.mrf.mxu1  ;;  %3586 = vmatpush.bf16.msra.mxu0 %v6776_v2  ;;  %v6944_v54 = vor.u32 %v7500_v57, %v6941_v58  ;;  %v6557_v2 = vld [vmem:[%s11246_s1 + $0x918] sm:$0xf0] }
 0x14d   : > { %v8748_v19 = vadd.f32 %v3287_v47, %v3250_v15  ;;  %3375 = vmatmul.bf16.gmra.mxu2 %v7744_v8  ;;  %3451 = vmatmul.bf16.gmra.mxu0 %v8155_v18  ;;  %v6365_v15 = vld [vmem:[%s11246_s1 + $0x798] sm:$0xf0] }
 0x14e   : > { %3413 = vmatmul.bf16.gmra.mxu3 %v8151_v16  ;;  %3625 = vmatpush.bf16.msra.mxu1 %v6944_v54  ;;  %v5579_v54 = vld [vmem:[%s11246_s1 + $0x158] sm:$0xf] }
 0x14f   : > { %3489 = vmatmul.bf16.gmra.mxu1 %v8153_v17 }
 0x150   : > { %v3214_v56 = vpop.f32.mrf.mxu2 }
 0x151   : > { %v3215_v47 = vadd.f32 %v3214_v56, %v8526_v10  ;;  %v3252_v5 = vpop.f32.mrf.mxu3  ;;  %v7356_v10 = vld [vmem:[%s11246_s1 + $0x784] sm:$0xf] }
 0x152   : > { %v3292_v40 = vpop.f32.mrf.mxu0  ;;  %v6368_v56 = vor.u32 %v7356_v10, %v6365_v15  ;;  %v7162_v10 = vld [vmem:[%s11246_s1 + $0x16c] sm:$0xf0] }
 0x153   : > { %v3253_v33 = vadd.f32 %v3252_v5, %v3215_v47  ;;  %v7452_v47 = vld [vmem:[%s11246_s1 + $0xa84] sm:$0xf]  ;;  %v6749_v5 = vld [vmem:[%s11246_s1 + $0xa98] sm:$0xf0] }
 0x154   : > { %v8761_v42 = vpop.f32.mrf.mxu1  ;;  %v6752_v58 = vor.u32 %v7452_v47, %v6749_v5  ;;  %3511 = vmatpush.bf16.msra.mxu2 %v6368_v56 }
 0x155   : > { %v8763_v59 = vadd.f32 %v3290_v21, %v3253_v33  ;;  %v7404_v21 = vld [vmem:[%s11246_s1 + $0x904] sm:$0xf] }
 0x156   : > { %v6560_v57 = vor.u32 %v7404_v21, %v6557_v2  ;;  %3587 = vmatpush.bf16.msra.mxu0 %v6752_v58  ;;  %v5580_v21 = vor.u32 %v7162_v10, %v5579_v54  ;;  %v5963_v58 = vld [vmem:[%s11246_s1 + $0x458] sm:$0xf]  ;;  %v7258_v54 = vld [vmem:[%s11246_s1 + $0x46c] sm:$0xf0] }
 0x158   : > { %v3216_v55 = vpop.f32.mrf.mxu2  ;;  %3549 = vmatpush.bf16.msra.mxu3 %v6560_v57  ;;  %3656 = vmatpush.bf16.msrb.mxu2 %v5580_v21 }
 0x159   : > { %v3217_v30 = vadd.f32 %v3216_v55, %v8564_v4  ;;  %v3254_v46 = vpop.f32.mrf.mxu3 }
 0x15a   : > { %v3295_v33 = vpop.f32.mrf.mxu0 }
 0x15b   : > { %v3255_v17 = vadd.f32 %v3254_v46, %v3217_v30 }
 0x15c   : > { %v8790_v4 = vpop.f32.mrf.mxu1 }
 0x15d   : > { %v8792_v55 = vadd.f32 %v3292_v40, %v3255_v17  ;;  %3380 = vmatmul.bf16.gmra.mxu2 %v7860_v6  ;;  %3456 = vmatmul.bf16.gmra.mxu0 %v8199_v50  ;;  %v5771_v17 = vld [vmem:[%s11246_s1 + $0x2d8] sm:$0xf]  ;;  %v7210_v40 = vld [vmem:[%s11246_s1 + $0x2ec] sm:$0xf0] }
 0x15e   : > { %3418 = vmatmul.bf16.gmra.mxu3 %v8195_v48  ;;  %v5772_v56 = vor.u32 %v7210_v40, %v5771_v17 }
 0x15f   : > { %3494 = vmatmul.bf16.gmra.mxu1 %v8197_v49 }
 0x160   : > { %v3219_v15 = vpop.f32.mrf.mxu2  ;;  %3694 = vmatpush.bf16.msrb.mxu3 %v5772_v56 }
 0x161   : > { %v3220_v30 = vadd.f32 %v3219_v15, %v8575_v53  ;;  %v3257_v46 = vpop.f32.mrf.mxu3  ;;  %v5964_v53 = vor.u32 %v7258_v54, %v5963_v58  ;;  %v7156_v58 = vld [vmem:[%s11246_s1 + $0x13c] sm:$0xf0]  ;;  %v5747_v54 = vld [vmem:[%s11246_s1 + $0x2a8] sm:$0xf] }
 0x162   : > { %v3297_v2 = vpop.f32.mrf.mxu0 }
 0x163   : > { %v3258_v47 = vadd.f32 %v3257_v46, %v3220_v30  ;;  %3732 = vmatpush.bf16.msrb.mxu0 %v5964_v53  ;;  %v7306_v46 = vld [vmem:[%s11246_s1 + $0x5ec] sm:$0xf0] }
 0x164   : > { %v8811_v5 = vpop.f32.mrf.mxu1 }
 0x165   : > { %v8813_v57 = vadd.f32 %v3295_v33, %v3258_v47 }
 0x168   : > { %v3221_v10 = vpop.f32.mrf.mxu2 }
 0x169   : > { %v3222_v15 = vadd.f32 %v3221_v10, %v8607_v23  ;;  %v3259_v17 = vpop.f32.mrf.mxu3  ;;  %v6155_v23 = vld [vmem:[%s11246_s1 + $0x5d8] sm:$0xf] }
 0x16a   : > { %v3300_v21 = vpop.f32.mrf.mxu0  ;;  %v6156_v47 = vor.u32 %v7306_v46, %v6155_v23 }
 0x16b   : > { %v3260_v40 = vadd.f32 %v3259_v17, %v3222_v15  ;;  %v7204_v17 = vld [vmem:[%s11246_s1 + $0x2bc] sm:$0xf0] }
 0x16c   : > { %v8822_v30 = vpop.f32.mrf.mxu1  ;;  %3770 = vmatpush.bf16.msrb.mxu1 %v6156_v47  ;;  %v5748_v23 = vor.u32 %v7204_v17, %v5747_v54  ;;  %v6131_v47 = vld [vmem:[%s11246_s1 + $0x5a8] sm:$0xf]  ;;  %v7300_v54 = vld [vmem:[%s11246_s1 + $0x5bc] sm:$0xf0]  ;;  %v7150_v17 = vld [vmem:[%s11246_s1 + $0x10c] sm:$0xf0] }
 0x16d   : > { %v8824_v33 = vadd.f32 %v3297_v2, %v3260_v40  ;;  %3385 = vmatmul.bf16.gmra.mxu2 %v7973_v13  ;;  %3461 = vmatmul.bf16.gmra.mxu0 %v8242_v31  ;;  %v5555_v2 = vld [vmem:[%s11246_s1 + $0x128] sm:$0xf] }
 0x16e   : > { %3423 = vmatmul.bf16.gmra.mxu3 %v8238_v28  ;;  %v5556_v15 = vor.u32 %v7156_v58, %v5555_v2 }
 0x16f   : > { %3499 = vmatmul.bf16.gmra.mxu1 %v8240_v29  ;;  %3695 = vmatpush.bf16.msrb.mxu3 %v5748_v23  ;;  %v5723_v23 = vld [vmem:[%s11246_s1 + $0x278] sm:$0xf] }
 0x170   : > { %v3224_v56 = vpop.f32.mrf.mxu2  ;;  %3657 = vmatpush.bf16.msrb.mxu2 %v5556_v15  ;;  %v6132_v15 = vor.u32 %v7300_v54, %v6131_v47  ;;  %v11413_v47 = vld [vmem:[#allocation38_spill] sm:$0xff]  ;;  %v11414_v54 = vld [vmem:[#allocation36_spill] sm:$0xff] }
 0x171   : > { %v3225_v10 = vadd.f32 %v3224_v56, %v8628_v3  ;;  %v3262_v53 = vpop.f32.mrf.mxu3  ;;  %v5939_v3 = vld [vmem:[%s11246_s1 + $0x428] sm:$0xf]  ;;  %v7252_v56 = vld [vmem:[%s11246_s1 + $0x43c] sm:$0xf0] }
 0x172   : > { %v3302_v40 = vpop.f32.mrf.mxu0  ;;  %v5940_v58 = vor.u32 %v7252_v56, %v5939_v3  ;;  %3771 = vmatpush.bf16.msrb.mxu1 %v6132_v15 }
 0x173   : > { %v3263_v46 = vadd.f32 %v3262_v53, %v3225_v10 }
 0x174   : > { %v8849_v29 = vpop.f32.mrf.mxu1  ;;  %3733 = vmatpush.bf16.msrb.mxu0 %v5940_v58  ;;  %v5915_v58 = vld [vmem:[%s11246_s1 + $0x3f8] sm:$0xf] }
 0x175   : > { %v8851_v49 = vadd.f32 %v3300_v21, %v3263_v46  ;;  %v5531_v21 = vld [vmem:[%s11246_s1 + $0xf8] sm:$0xf]  ;;  %v7198_v46 = vld [vmem:[%s11246_s1 + $0x28c] sm:$0xf0] }
 0x176   : > { %v5532_v56 = vor.u32 %v7150_v17, %v5531_v21  ;;  %v5724_v44 = vor.u32 %v7198_v46, %v5723_v23  ;;  %v7246_v21 = vld [vmem:[%s11246_s1 + $0x40c] sm:$0xf0]  ;;  %v6107_v46 = vld [vmem:[%s11246_s1 + $0x578] sm:$0xf] }
 0x178   : > { %v3226_v2 = vpop.f32.mrf.mxu2  ;;  %3658 = vmatpush.bf16.msrb.mxu2 %v5532_v56  ;;  %3696 = vmatpush.bf16.msrb.mxu3 %v5724_v44  ;;  %v5916_v44 = vor.u32 %v7246_v21, %v5915_v58  ;;  %v7294_v56 = vld [vmem:[%s11246_s1 + $0x58c] sm:$0xf0]  ;;  %v7144_v21 = vld [vmem:[%s11246_s1 + $0xdc] sm:$0xf0] }
 0x179   : > { %v3227_v10 = vadd.f32 %v3226_v2, %v8641_v63  ;;  %v3264_v53 = vpop.f32.mrf.mxu3  ;;  %v6108_v58 = vor.u32 %v7294_v56, %v6107_v46 }
 0x17a   : > { %v3305_v3 = vpop.f32.mrf.mxu0  ;;  %3734 = vmatpush.bf16.msrb.mxu0 %v5916_v44  ;;  %v7192_v44 = vld [vmem:[%s11246_s1 + $0x25c] sm:$0xf0] }
 0x17b   : > { %v3265_v62 = vadd.f32 %v3264_v53, %v3227_v10  ;;  %3772 = vmatpush.bf16.msrb.mxu1 %v6108_v58  ;;  %v11420_v58 = vld [vmem:[#allocation39_spill] sm:$0xff] }
 0x17c   : > { %v8878_v63 = vpop.f32.mrf.mxu1 }
 0x17d   : > { %v8880_v2 = vadd.f32 %v3302_v40, %v3265_v62  ;;  %3512 = vmatmul.bf16.vlgmr.msra.gmra.mxu2 %v8013_v37  ;;  %3588 = vmatmul.bf16.vlgmr.msra.gmra.mxu0 %v11413_v47  ;;  %v11418_v47 = vld [vmem:[#allocation21_spill] sm:$0xff] }
 0x17e   : > { %3550 = vmatmul.bf16.vlgmr.msra.gmra.mxu3 %v11414_v54  ;;  %v11419_v37 = vld [vmem:[#allocation41_spill] sm:$0xff]  ;;  %v5843_v54 = vld [vmem:[%s11246_s1 + $0x368] sm:$0xf] }
 0x17f   : > { %11412 = vst [vmem:[#allocation54_spill] sm:$0xff] %v8880_v2  ;;  %7039 = vmatmul.msk.bf16.vlgmr.msra.gmra.mxu1 %vm2953_vm0, %v11415_v35 }
 0x180   : > { %v3229_v62 = vpop.f32.mrf.mxu2 }
 0x181   : > { %v3230_v40 = vadd.f32 %v3229_v62, %v8653_v11  ;;  %v3267_v10 = vpop.f32.mrf.mxu3  ;;  %v5507_v11 = vld [vmem:[%s11246_s1 + $0xc8] sm:$0xf] }
 0x182   : > { %v3307_v53 = vpop.f32.mrf.mxu0  ;;  %v5508_v62 = vor.u32 %v7144_v21, %v5507_v11  ;;  %v5891_v11 = vld [vmem:[%s11246_s1 + $0x3c8] sm:$0xf] }
 0x183   : > { %v3268_v15 = vadd.f32 %v3267_v10, %v3230_v40 }
 0x184   : > { %v8894_v17 = vpop.f32.mrf.mxu1  ;;  %3659 = vmatpush.bf16.msrb.mxu2 %v5508_v62  ;;  %v7138_v62 = vld [vmem:[%s11246_s1 + $0xac] sm:$0xf0] }
 0x185   : > { %v8896_v23 = vadd.f32 %v3305_v3, %v3268_v15  ;;  %v5699_v3 = vld [vmem:[%s11246_s1 + $0x248] sm:$0xf] }
 0x186   : > { %v5700_v40 = vor.u32 %v7192_v44, %v5699_v3  ;;  %v7288_v3 = vld [vmem:[%s11246_s1 + $0x55c] sm:$0xf0]  ;;  %v5483_v44 = vld [vmem:[%s11246_s1 + $0x98] sm:$0xf] }
 0x187   : > { %11416 = vst [vmem:[#allocation55_spill] sm:$0xff] %v8896_v23 }
 0x188   : > { %v3231_v10 = vpop.f32.mrf.mxu2  ;;  %3697 = vmatpush.bf16.msrb.mxu3 %v5700_v40 }
 0x189   : > { %v3232_v15 = vadd.f32 %v3231_v10, %v8678_v39  ;;  %v3269_v35 = vpop.f32.mrf.mxu3  ;;  %v7240_v39 = vld [vmem:[%s11246_s1 + $0x3dc] sm:$0xf0]  ;;  %v5484_v10 = vor.u32 %v7138_v62, %v5483_v44  ;;  %v5867_v62 = vld [vmem:[%s11246_s1 + $0x398] sm:$0xf] }
 0x18a   : > { %v3310_v46 = vpop.f32.mrf.mxu0  ;;  %v5892_v21 = vor.u32 %v7240_v39, %v5891_v11 }
 0x18b   : > { %v3270_v56 = vadd.f32 %v3269_v35, %v3232_v15  ;;  %v6083_v35 = vld [vmem:[%s11246_s1 + $0x548] sm:$0xf]  ;;  %v5675_v15 = vld [vmem:[%s11246_s1 + $0x218] sm:$0xf]  ;;  %3660 = vmatpush.bf16.msrb.mxu2 %v5484_v10  ;;  %v11424_v10 = vld [vmem:[#allocation44_spill] sm:$0xff] }
 0x18c   : > { %v8917_v23 = vpop.f32.mrf.mxu1  ;;  %v6084_v40 = vor.u32 %v7288_v3, %v6083_v35  ;;  %3735 = vmatpush.bf16.msrb.mxu0 %v5892_v21  ;;  %v7234_v21 = vld [vmem:[%s11246_s1 + $0x3ac] sm:$0xf0] }
 0x18d   : > { %v8919_v2 = vadd.f32 %v3307_v53, %v3270_v56  ;;  %3517 = vmatmul.bf16.gmra.mxu2 %v11418_v47  ;;  %3593 = vmatmul.bf16.gmra.mxu0 %v11419_v37  ;;  %v11421_v53 = vld [vmem:[#allocation40_spill] sm:$0xff] }
 0x18e   : > { %3555 = vmatmul.bf16.gmra.mxu3 %v11420_v58  ;;  %v7186_v56 = vld [vmem:[%s11246_s1 + $0x22c] sm:$0xf0]  ;;  %3773 = vmatpush.bf16.msrb.mxu1 %v6084_v40 }
 0x18f   : > { %11417 = vst [vmem:[#allocation56_spill] sm:$0xff] %v8919_v2  ;;  %7040 = vmatmul.msk.bf16.gmra.mxu1 %vm2953_vm0, %v11421_v53  ;;  %v5676_v39 = vor.u32 %v7186_v56, %v5675_v15  ;;  %v5868_v15 = vor.u32 %v7234_v21, %v5867_v62  ;;  %v11426_v62 = vld [vmem:[#allocation43_spill] sm:$0xff] }
 0x190   : > { %v3234_v11 = vpop.f32.mrf.mxu2 }
 0x191   : > { %v3235_v53 = vadd.f32 %v3234_v11, %v8696_v38  ;;  %v3272_v2 = vpop.f32.mrf.mxu3  ;;  %3698 = vmatpush.bf16.msrb.mxu3 %v5676_v39  ;;  %3736 = vmatpush.bf16.msrb.mxu0 %v5868_v15  ;;  %v6059_v11 = vld [vmem:[%s11246_s1 + $0x518] sm:$0xf]  ;;  %v7282_v39 = vld [vmem:[%s11246_s1 + $0x52c] sm:$0xf0]  ;;  %v7132_v15 = vld [vmem:[%s11246_s1 + $0x7c] sm:$0xf0] }
 0x192   : > { %v3312_v37 = vpop.f32.mrf.mxu0  ;;  %v6060_v21 = vor.u32 %v7282_v39, %v6059_v11 }
 0x193   : > { %v3273_v35 = vadd.f32 %v3272_v2, %v3235_v53  ;;  %v7550_v37 = vld [vmem:[%s11247_s2] sm:$0x3f]  ;;  %v11423_v53 = vld [vmem:[#allocation24_spill] sm:$0xff] }
 0x194   : > { %v3350_v3 = vpop.f32.mrf.mxu1  ;;  %v8962_v2 = vperm.slane %v7550_v37, 1  ;;  %3774 = vmatpush.bf16.msrb.mxu1 %v6060_v21 }
 0x195   : > { %v8951_v44 = vadd.f32 %v3310_v46, %v3273_v35  ;;  %v5459_v35 = vld [vmem:[%s11246_s1 + $0x68] sm:$0xf]  ;;  %v11425_v3 = vld [vmem:[#allocation42_spill] sm:$0xff] }
 0x196   : > { %v3324_v37 = vadd.f32 %v8698_v32, %v8962_v2  ;;  %v7228_v32 = vld [vmem:[%s11246_s1 + $0x37c] sm:$0xf0] }
 0x197   : > { %11422 = vst [vmem:[#allocation57_spill] sm:$0xff] %v8951_v44 }
 0x198   : > { %v3236_v56 = vpop.f32.mrf.mxu2 }
 0x199   : > { %v3274_v38 = vpop.f32.mrf.mxu3  ;;  %v5651_v56 = vld [vmem:[%s11246_s1 + $0x1e8] sm:$0xf] }
 0x19a   : > { %v3437_v40 = vpop.f32.mrf.mxu0  ;;  %v7180_v38 = vld [vmem:[%s11246_s1 + $0x1fc] sm:$0xf0] }
 0x19c   : > { %v3475_v46 = vpop.f32.mrf.mxu1 }
 0x19d   : > { %3522 = vmatmul.bf16.gmra.mxu2 %v11423_v53  ;;  %3598 = vmatmul.bf16.gmra.mxu0 %v11424_v10  ;;  %v5460_v10 = vor.u32 %v7132_v15, %v5459_v35  ;;  %v5652_v53 = vor.u32 %v7180_v38, %v5651_v56  ;;  %v6035_v35 = vld [vmem:[%s11246_s1 + $0x4e8] sm:$0xf]  ;;  %v7174_v56 = vld [vmem:[%s11246_s1 + $0x1cc] sm:$0xf0] }
 0x19e   : > { %3560 = vmatmul.bf16.gmra.mxu3 %v11425_v3 }
 0x19f   : > { %7041 = vmatmul.msk.bf16.gmra.mxu1 %vm2953_vm0, %v11426_v62  ;;  %3661 = vmatpush.bf16.msrb.mxu2 %v5460_v10  ;;  %v3326_v10 = vadd.f32 %v8723_v22, %v8962_v2 }
 0x1a0   : > { %v3361_v3 = vpop.f32.mrf.mxu2  ;;  %3699 = vmatpush.bf16.msrb.mxu3 %v5652_v53  ;;  %v7276_v53 = vld [vmem:[%s11246_s1 + $0x4fc] sm:$0xf0] }
 0x1a1   : > { %v3362_v11 = vadd.f32 %v3361_v3, %v3324_v37  ;;  %v3399_v39 = vpop.f32.mrf.mxu3  ;;  %v5844_v3 = vor.u32 %v7228_v32, %v5843_v54  ;;  %v6036_v21 = vor.u32 %v7276_v53, %v6035_v35  ;;  %v5627_v54 = vld [vmem:[%s11246_s1 + $0x1b8] sm:$0xf] }
 0x1a2   : > { %v3439_v62 = vpop.f32.mrf.mxu0 }
 0x1a3   : > { %v3400_v44 = vadd.f32 %v3399_v39, %v3362_v11  ;;  %3737 = vmatpush.bf16.msrb.mxu0 %v5844_v3  ;;  %v5628_v11 = vor.u32 %v7174_v56, %v5627_v54  ;;  %3775 = vmatpush.bf16.msrb.mxu1 %v6036_v21 }
 0x1a4   : > { %v3477_v47 = vpop.f32.mrf.mxu1 }
 0x1a5   : > { %v3438_v58 = vadd.f32 %v3437_v40, %v3400_v44  ;;  %v5435_v44 = vld [vmem:[%s11246_s1 + $0x38] sm:$0xf]  ;;  %v7126_v40 = vld [vmem:[%s11246_s1 + $0x4c] sm:$0xf0]  ;;  %3700 = vmatpush.bf16.msrb.mxu3 %v5628_v11 }
 0x1a6   : > { %v5436_v15 = vor.u32 %v7126_v40, %v5435_v44  ;;  %v11427_v40 = vld [vmem:[#allocation27_spill] sm:$0xff] }
 0x1a7   : > { %v9015_v38 = vadd.f32 %v3475_v46, %v3438_v58  ;;  %v5819_v58 = vld [vmem:[%s11246_s1 + $0x338] sm:$0xf]  ;;  %v7222_v46 = vld [vmem:[%s11246_s1 + $0x34c] sm:$0xf0] }
 0x1a8   : > { %v3363_v37 = vpop.f32.mrf.mxu2  ;;  %3662 = vmatpush.bf16.msrb.mxu2 %v5436_v15  ;;  %v5820_v3 = vor.u32 %v7222_v46, %v5819_v58  ;;  %v7168_v58 = vld [vmem:[%s11246_s1 + $0x19c] sm:$0xf0]  ;;  %v3331_v46 = vadd.f32 %v8761_v42, %v8962_v2 }
 0x1a9   : > { %v3364_v39 = vadd.f32 %v3363_v37, %v3326_v10  ;;  %v3401_v32 = vpop.f32.mrf.mxu3 }
 0x1aa   : > { %v3442_v22 = vpop.f32.mrf.mxu0  ;;  %3738 = vmatpush.bf16.msrb.mxu0 %v5820_v3 }
 0x1ab   : > { %v3402_v35 = vadd.f32 %v3401_v32, %v3364_v39  ;;  %v6011_v32 = vld [vmem:[%s11246_s1 + $0x4b8] sm:$0xf] }
 0x1ac   : > { %v3480_v53 = vpop.f32.mrf.mxu1 }
 0x1ad   : > { %v3440_v44 = vadd.f32 %v3439_v62, %v3402_v35  ;;  %3527 = vmatmul.bf16.gmra.mxu2 %v11427_v40  ;;  %3603 = vmatmul.bf16.gmra.mxu0 %v8486_v12  ;;  %v3329_v62 = vadd.f32 %v8746_v24, %v8962_v2  ;;  %v7270_v35 = vld [vmem:[%s11246_s1 + $0x4cc] sm:$0xf0]  ;;  %v5411_v24 = vld [vmem:[%s11246_s1 + $0x8] sm:$0xf] }
 0x1ae   : > { %3565 = vmatmul.bf16.gmra.mxu3 %v8482_v60 }
 0x1af   : > { %7042 = vmatmul.msk.bf16.gmra.mxu1 %vm2953_vm0, %v8484_v25  ;;  %v9030_v10 = vadd.f32 %v3477_v47, %v3440_v44  ;;  %v6012_v47 = vor.u32 %v7270_v35, %v6011_v32  ;;  %v7120_v44 = vld [vmem:[%s11246_s1 + $0x1c] sm:$0xf0]  ;;  %v5795_v32 = vld [vmem:[%s11246_s1 + $0x308] sm:$0xf] }
 0x1b0   : > { %v3366_v21 = vpop.f32.mrf.mxu2  ;;  %v7216_v35 = vld [vmem:[%s11246_s1 + $0x31c] sm:$0xf0] }
 0x1b1   : > { %v3367_v15 = vadd.f32 %v3366_v21, %v3329_v62  ;;  %v3404_v54 = vpop.f32.mrf.mxu3  ;;  %v5412_v62 = vor.u32 %v7120_v44, %v5411_v24  ;;  %3776 = vmatpush.bf16.msrb.mxu1 %v6012_v47  ;;  %v5796_v42 = vor.u32 %v7216_v35, %v5795_v32 }
 0x1b2   : > { %v3444_v56 = vpop.f32.mrf.mxu0 }
 0x1b3   : > { %v3405_v37 = vadd.f32 %v3404_v54, %v3367_v15  ;;  %3663 = vmatpush.bf16.msrb.mxu2 %v5412_v62  ;;  %3739 = vmatpush.bf16.msrb.mxu0 %v5796_v42  ;;  %v7354_v62 = vld [vmem:[%s11246_s1 + $0x76c] sm:$0xf0] }
 0x1b4   : > { %v3482_v11 = vpop.f32.mrf.mxu1 }
 0x1b5   : > { %v3443_v39 = vadd.f32 %v3442_v22, %v3405_v37  ;;  %v5603_v22 = vld [vmem:[%s11246_s1 + $0x188] sm:$0xf] }
 0x1b6   : > { %v5604_v3 = vor.u32 %v7168_v58, %v5603_v22  ;;  %v11428_v58 = vld [vmem:[#allocation31_spill] sm:$0xff] }
 0x1b7   : > { %v9052_v21 = vadd.f32 %v3480_v53, %v3443_v39  ;;  %v5987_v53 = vld [vmem:[%s11246_s1 + $0x488] sm:$0xf]  ;;  %v7264_v39 = vld [vmem:[%s11246_s1 + $0x49c] sm:$0xf0] }
 0x1b8   : > { %v3368_v15 = vpop.f32.mrf.mxu2  ;;  %3701 = vmatpush.bf16.msrb.mxu3 %v5604_v3  ;;  %v5988_v47 = vor.u32 %v7264_v39, %v5987_v53  ;;  %v3334_v3 = vadd.f32 %v8790_v4, %v8962_v2  ;;  %v6731_v4 = vld [vmem:[%s11246_s1 + $0xa58] sm:$0xf] }
 0x1b9   : > { %v3369_v54 = vadd.f32 %v3368_v15, %v3331_v46  ;;  %v3406_v37 = vpop.f32.mrf.mxu3  ;;  %v6347_v46 = vld [vmem:[%s11246_s1 + $0x758] sm:$0xf] }
 0x1ba   : > { %v3447_v25 = vpop.f32.mrf.mxu0  ;;  %3777 = vmatpush.bf16.msrb.mxu1 %v5988_v47  ;;  %v6348_v15 = vor.u32 %v7354_v62, %v6347_v46  ;;  %v7450_v47 = vld [vmem:[%s11246_s1 + $0xa6c] sm:$0xf0] }
 0x1bb   : > { %v3407_v24 = vadd.f32 %v3406_v37, %v3369_v54  ;;  %v7402_v54 = vld [vmem:[%s11246_s1 + $0x8ec] sm:$0xf0] }
 0x1bc   : > { %v3485_v44 = vpop.f32.mrf.mxu1  ;;  %3808 = vmatpush.bf16.msra.mxu2 %v6348_v15 }
 0x1bd   : > { %v3445_v22 = vadd.f32 %v3444_v56, %v3407_v24  ;;  %3532 = vmatmul.bf16.gmra.mxu2 %v11428_v58  ;;  %3608 = vmatmul.bf16.gmra.mxu0 %v8539_v27  ;;  %v6539_v56 = vld [vmem:[%s11246_s1 + $0x8d8] sm:$0xf] }
 0x1be   : > { %3570 = vmatmul.bf16.gmra.mxu3 %v8529_v0  ;;  %v6540_v35 = vor.u32 %v7402_v54, %v6539_v56 }
 0x1bf   : > { %7043 = vmatmul.msk.bf16.gmra.mxu1 %vm2953_vm0, %v8531_v26  ;;  %v9085_v37 = vadd.f32 %v3482_v11, %v3445_v22  ;;  %v6732_v11 = vor.u32 %v7450_v47, %v6731_v4  ;;  %v3336_v22 = vadd.f32 %v8811_v5, %v8962_v2  ;;  %v6323_v5 = vld [vmem:[%s11246_s1 + $0x728] sm:$0xf]  ;;  %v3339_v4 = vadd.f32 %v8822_v30, %v8962_v2  ;;  %v7444_v30 = vld [vmem:[%s11246_s1 + $0xa3c] sm:$0xf0] }
 0x1c0   : > { %v3371_v32 = vpop.f32.mrf.mxu2  ;;  %3846 = vmatpush.bf16.msra.mxu3 %v6540_v35  ;;  %v11429_v35 = vld [vmem:[#allocation35_spill] sm:$0xff] }
 0x1c1   : > { %v3372_v42 = vadd.f32 %v3371_v32, %v3334_v3  ;;  %v3409_v24 = vpop.f32.mrf.mxu3  ;;  %3884 = vmatpush.bf16.msra.mxu0 %v6732_v11 }
 0x1c2   : > { %v3449_v53 = vpop.f32.mrf.mxu0 }
 0x1c3   : > { %v3410_v39 = vadd.f32 %v3409_v24, %v3372_v42  ;;  %v6923_v42 = vld [vmem:[%s11246_s1 + $0xbd8] sm:$0xf]  ;;  %v7348_v24 = vld [vmem:[%s11246_s1 + $0x73c] sm:$0xf0] }
 0x1c4   : > { %v3487_v26 = vpop.f32.mrf.mxu1  ;;  %v6324_v47 = vor.u32 %v7348_v24, %v6323_v5  ;;  %v7492_v5 = vld [vmem:[%s11246_s1 + $0xbbc] sm:$0xf0]  ;;  %v3341_v24 = vadd.f32 %v8849_v29, %v8962_v2 }
 0x1c5   : > { %v3448_v27 = vadd.f32 %v3447_v25, %v3410_v39  ;;  %v7396_v39 = vld [vmem:[%s11246_s1 + $0x8bc] sm:$0xf0] }
 0x1c6   : > { %3809 = vmatpush.bf16.msra.mxu2 %v6324_v47 }
 0x1c7   : > { %v9095_v46 = vadd.f32 %v3485_v44, %v3448_v27  ;;  %v7498_v27 = vld [vmem:[%s11246_s1 + $0xbec] sm:$0xf0] }
 0x1c8   : > { %v3373_v62 = vpop.f32.mrf.mxu2  ;;  %v6924_v44 = vor.u32 %v7498_v27, %v6923_v42 }
 0x1c9   : > { %v3374_v56 = vadd.f32 %v3373_v62, %v3336_v22  ;;  %v3411_v3 = vpop.f32.mrf.mxu3 }
 0x1ca   : > { %v3452_v15 = vpop.f32.mrf.mxu0  ;;  %3922 = vmatpush.bf16.msra.mxu1 %v6924_v44  ;;  %v7342_v44 = vld [vmem:[%s11246_s1 + $0x70c] sm:$0xf0] }
 0x1cb   : > { %v3412_v25 = vadd.f32 %v3411_v3, %v3374_v56 }
 0x1cc   : > { %v3490_v54 = vpop.f32.mrf.mxu1 }
 0x1cd   : > { %v3450_v32 = vadd.f32 %v3449_v53, %v3412_v25  ;;  %3537 = vmatmul.bf16.gmra.mxu2 %v11429_v35  ;;  %3613 = vmatmul.bf16.gmra.mxu0 %v8582_v52  ;;  %v6515_v53 = vld [vmem:[%s11246_s1 + $0x8a8] sm:$0xf] }
 0x1ce   : > { %3575 = vmatmul.bf16.gmra.mxu3 %v8578_v41  ;;  %v6516_v11 = vor.u32 %v7396_v39, %v6515_v53  ;;  %v6707_v52 = vld [vmem:[%s11246_s1 + $0xa28] sm:$0xf] }
 0x1cf   : > { %7044 = vmatmul.msk.bf16.gmra.mxu1 %vm2953_vm0, %v8580_v51  ;;  %v9122_v22 = vadd.f32 %v3487_v26, %v3450_v32  ;;  %v6899_v26 = vld [vmem:[%s11246_s1 + $0xba8] sm:$0xf]  ;;  %v6708_v32 = vor.u32 %v7444_v30, %v6707_v52  ;;  %v6491_v52 = vld [vmem:[%s11246_s1 + $0x878] sm:$0xf] }
 0x1d0   : > { %v3376_v62 = vpop.f32.mrf.mxu2  ;;  %3847 = vmatpush.bf16.msra.mxu3 %v6516_v11  ;;  %v6900_v53 = vor.u32 %v7492_v5, %v6899_v26  ;;  %v11430_v5 = vld [vmem:[#allocation3_spill] sm:$0xff] }
 0x1d1   : > { %v3377_v56 = vadd.f32 %v3376_v62, %v3339_v4  ;;  %v3414_v3 = vpop.f32.mrf.mxu3  ;;  %v7390_v4 = vld [vmem:[%s11246_s1 + $0x88c] sm:$0xf0]  ;;  %3885 = vmatpush.bf16.msra.mxu0 %v6708_v32  ;;  %v3344_v32 = vadd.f32 %v8878_v63, %v8962_v2 }
 0x1d2   : > { %v3454_v25 = vpop.f32.mrf.mxu0  ;;  %v6492_v62 = vor.u32 %v7390_v4, %v6491_v52  ;;  %3923 = vmatpush.bf16.msra.mxu1 %v6900_v53 }
 0x1d3   : > { %v3415_v42 = vadd.f32 %v3414_v3, %v3377_v56 }
 0x1d4   : > { %v3492_v27 = vpop.f32.mrf.mxu1  ;;  %3848 = vmatpush.bf16.msra.mxu3 %v6492_v62  ;;  %v3346_v62 = vadd.f32 %v8894_v17, %v8962_v2  ;;  %v7486_v17 = vld [vmem:[%s11246_s1 + $0xb8c] sm:$0xf0] }
 0x1d5   : > { %v3453_v51 = vadd.f32 %v3452_v15, %v3415_v42  ;;  %v6299_v15 = vld [vmem:[%s11246_s1 + $0x6f8] sm:$0xf] }
 0x1d6   : > { %v6300_v39 = vor.u32 %v7342_v44, %v6299_v15 }
 0x1d7   : > { %v9150_v47 = vadd.f32 %v3490_v54, %v3453_v51  ;;  %v6683_v51 = vld [vmem:[%s11246_s1 + $0x9f8] sm:$0xf]  ;;  %v7438_v54 = vld [vmem:[%s11246_s1 + $0xa0c] sm:$0xf0] }
 0x1d8   : > { %v3378_v11 = vpop.f32.mrf.mxu2  ;;  %3810 = vmatpush.bf16.msra.mxu2 %v6300_v39 }
 0x1d9   : > { %v3379_v56 = vadd.f32 %v3378_v11, %v3341_v24  ;;  %v3416_v3 = vpop.f32.mrf.mxu3 }
 0x1da   : > { %v3457_v29 = vpop.f32.mrf.mxu0 }
 0x1db   : > { %v3417_v42 = vadd.f32 %v3416_v3, %v3379_v56 }
 0x1dc   : > { %v3495_v30 = vpop.f32.mrf.mxu1 }
 0x1dd   : > { %v3455_v26 = vadd.f32 %v3454_v25, %v3417_v42  ;;  %3664 = vmatmul.bf16.vlgmr.msrb.gmra.mxu2 %v11430_v5  ;;  %3740 = vmatmul.bf16.vlgmr.msrb.gmra.mxu0 %v8007_v34  ;;  %v6684_v25 = vor.u32 %v7438_v54, %v6683_v51  ;;  %v11431_v54 = vld [vmem:[#allocation7_spill] sm:$0xff] }
 0x1de   : > { %3702 = vmatmul.bf16.vlgmr.msrb.gmra.mxu3 %v7746_v9 }
 0x1df   : > { %3778 = vmatmul.bf16.vlgmr.msrb.gmra.mxu1 %v8011_v36  ;;  %v9164_v15 = vadd.f32 %v3492_v27, %v3455_v26  ;;  %3886 = vmatpush.bf16.msra.mxu0 %v6684_v25  ;;  %v6467_v25 = vld [vmem:[%s11246_s1 + $0x848] sm:$0xf] }
 0x1e0   : > { %v3381_v44 = vpop.f32.mrf.mxu2 }
 0x1e1   : > { %v3382_v24 = vadd.f32 %v3381_v44, %v3344_v32  ;;  %v3419_v53 = vpop.f32.mrf.mxu3  ;;  %v7336_v32 = vld [vmem:[%s11246_s1 + $0x6dc] sm:$0xf0] }
 0x1e2   : > { %v3459_v39 = vpop.f32.mrf.mxu0  ;;  %v7384_v44 = vld [vmem:[%s11246_s1 + $0x85c] sm:$0xf0] }
 0x1e3   : > { %v3420_v52 = vadd.f32 %v3419_v53, %v3382_v24  ;;  %v3349_v24 = vadd.f32 %v8917_v23, %v8962_v2  ;;  %v7432_v23 = vld [vmem:[%s11246_s1 + $0x9dc] sm:$0xf0]  ;;  %v6851_v2 = vld [vmem:[%s11246_s1 + $0xb48] sm:$0xf] }
 0x1e4   : > { %v3497_v4 = vpop.f32.mrf.mxu1 }
 0x1e5   : > { %v3458_v11 = vadd.f32 %v3457_v29, %v3420_v52  ;;  %v6875_v29 = vld [vmem:[%s11246_s1 + $0xb78] sm:$0xf] }
 0x1e7   : > { %v9168_v56 = vadd.f32 %v3495_v30, %v3458_v11  ;;  %v6275_v30 = vld [vmem:[%s11246_s1 + $0x6c8] sm:$0xf] }
 0x1e8   : > { %v3383_v3 = vpop.f32.mrf.mxu2  ;;  %v6276_v53 = vor.u32 %v7336_v32, %v6275_v30  ;;  %v7330_v30 = vld [vmem:[%s11246_s1 + $0x6ac] sm:$0xf0] }
 0x1e9   : > { %v3384_v42 = vadd.f32 %v3383_v3, %v3346_v62  ;;  %v3421_v36 = vpop.f32.mrf.mxu3 }
 0x1ea   : > { %v3462_v63 = vpop.f32.mrf.mxu0  ;;  %3811 = vmatpush.bf16.msra.mxu2 %v6276_v53 }
 0x1eb   : > { %v3422_v51 = vadd.f32 %v3421_v36, %v3384_v42  ;;  %v6876_v36 = vor.u32 %v7486_v17, %v6875_v29 }
 0x1ec   : > { %v3500_v27 = vpop.f32.mrf.mxu1 }
 0x1ed   : > { %v3460_v26 = vadd.f32 %v3459_v39, %v3422_v51  ;;  %3669 = vmatmul.bf16.gmra.mxu2 %v11431_v54  ;;  %3745 = vmatmul.bf16.gmra.mxu0 %v8057_v61  ;;  %v6468_v39 = vor.u32 %v7384_v44, %v6467_v25  ;;  %v6443_v25 = vld [vmem:[%s11246_s1 + $0x818] sm:$0xf] }
 0x1ee   : > { %3707 = vmatmul.bf16.gmra.mxu3 %v7862_v7  ;;  %3924 = vmatpush.bf16.msra.mxu1 %v6876_v36 }
 0x1ef   : > { %3783 = vmatmul.bf16.gmra.mxu1 %v8061_v1  ;;  %v9194_v52 = vadd.f32 %v3497_v4, %v3460_v26  ;;  %3849 = vmatpush.bf16.msra.mxu3 %v6468_v39  ;;  %v6659_v1 = vld [vmem:[%s11246_s1 + $0x9c8] sm:$0xf]  ;;  %v7480_v26 = vld [vmem:[%s11246_s1 + $0xb5c] sm:$0xf0] }
 0x1f0   : > { %v3386_v11 = vpop.f32.mrf.mxu2  ;;  %v6660_v4 = vor.u32 %v7432_v23, %v6659_v1  ;;  %v6852_v36 = vor.u32 %v7480_v26, %v6851_v2  ;;  %v7378_v1 = vld [vmem:[%s11246_s1 + $0x82c] sm:$0xf0] }
 0x1f1   : > { %v3387_v62 = vadd.f32 %v3386_v11, %v3349_v24  ;;  %v3424_v3 = vpop.f32.mrf.mxu3  ;;  %v6444_v53 = vor.u32 %v7378_v1, %v6443_v25  ;;  %v6419_v1 = vld [vmem:[%s11246_s1 + $0x7e8] sm:$0xf] }
 0x1f2   : > { %v3464_v42 = vpop.f32.mrf.mxu0  ;;  %3887 = vmatpush.bf16.msra.mxu0 %v6660_v4  ;;  %3925 = vmatpush.bf16.msra.mxu1 %v6852_v36  ;;  %v7474_v36 = vld [vmem:[%s11246_s1 + $0xb2c] sm:$0xf0] }
 0x1f3   : > { %v3425_v51 = vadd.f32 %v3424_v3, %v3387_v62  ;;  %3850 = vmatpush.bf16.msra.mxu3 %v6444_v53  ;;  %v11432_v3 = vld [vmem:[#allocation11_spill] sm:$0xff]  ;;  %v6635_v42 = vld [vmem:[%s11246_s1 + $0x998] sm:$0xf] }
 0x1f4   : > { %v3502_v29 = vpop.f32.mrf.mxu1 }
 0x1f5   : > { %v3463_v17 = vadd.f32 %v3462_v63, %v3425_v51  ;;  %v6251_v63 = vld [vmem:[%s11246_s1 + $0x698] sm:$0xf] }
 0x1f6   : > { %v6252_v32 = vor.u32 %v7330_v30, %v6251_v63  ;;  %v6827_v30 = vld [vmem:[%s11246_s1 + $0xb18] sm:$0xf] }
 0x1f7   : > { %v9220_v44 = vadd.f32 %v3500_v27, %v3463_v17  ;;  %v7426_v27 = vld [vmem:[%s11246_s1 + $0x9ac] sm:$0xf0]  ;;  %v6828_v25 = vor.u32 %v7474_v36, %v6827_v30  ;;  %v11433_v36 = vld [vmem:[#allocation2_spill] sm:$0xff] }
 0x1f8   : > { %v3388_v24 = vpop.f32.mrf.mxu2  ;;  %3812 = vmatpush.bf16.msra.mxu2 %v6252_v32  ;;  %v6636_v51 = vor.u32 %v7426_v27, %v6635_v42  ;;  %v6227_v32 = vld [vmem:[%s11246_s1 + $0x668] sm:$0xf]  ;;  %v5024_v27 = vmax.f32 %v8725_v20, 0.0 }
 0x1f9   : > { %v3426_v39 = vpop.f32.mrf.mxu3  ;;  %v7372_v24 = vld [vmem:[%s11246_s1 + $0x7fc] sm:$0xf0]  ;;  %3926 = vmatpush.bf16.msra.mxu1 %v6828_v25  ;;  %v6611_v20 = vld [vmem:[%s11246_s1 + $0x968] sm:$0xf] }
 0x1fa   : > { %v3589_v11 = vpop.f32.mrf.mxu0  ;;  %3888 = vmatpush.bf16.msra.mxu0 %v6636_v51  ;;  %v7468_v25 = vld [vmem:[%s11246_s1 + $0xafc] sm:$0xf0] }
 0x1fc   : > { %v3627_v62 = vpop.f32.mrf.mxu1 }
 0x1fd   : > { %3674 = vmatmul.bf16.gmra.mxu2 %v11432_v3  ;;  %3750 = vmatmul.bf16.gmra.mxu0 %v8113_v43 }
 0x1fe   : > { %3712 = vmatmul.bf16.gmra.mxu3 %v7975_v14 }
 0x1ff   : > { %3788 = vmatmul.bf16.gmra.mxu1 %v8117_v45 }
 0x200   : > { %v3513_v29 = vpop.f32.mrf.mxu2 }
 0x201   : > { %v3514_v17 = vadd.f32 %v3513_v29, %v9015_v38  ;;  %v3551_v23 = vpop.f32.mrf.mxu3  ;;  %v7324_v38 = vld [vmem:[%s11246_s1 + $0x67c] sm:$0xf0] }
 0x202   : > { %v3591_v2 = vpop.f32.mrf.mxu0  ;;  %v6228_v39 = vor.u32 %v7324_v38, %v6227_v32  ;;  %v6803_v32 = vld [vmem:[%s11246_s1 + $0xae8] sm:$0xf]  ;;  %v6203_v38 = vld [vmem:[%s11246_s1 + $0x638] sm:$0xf] }
 0x203   : > { %v3552_v4 = vadd.f32 %v3551_v23, %v3514_v17 }
 0x204   : > { %v3629_v26 = vpop.f32.mrf.mxu1  ;;  %3813 = vmatpush.bf16.msra.mxu2 %v6228_v39 }
 0x205   : > { %v3590_v63 = vadd.f32 %v3589_v11, %v3552_v4  ;;  %v6420_v11 = vor.u32 %v7372_v24, %v6419_v1  ;;  %v7318_v1 = vld [vmem:[%s11246_s1 + $0x64c] sm:$0xf0] }
 0x206   : > { %v6204_v39 = vor.u32 %v7318_v1, %v6203_v38  ;;  %v6779_v38 = vld [vmem:[%s11246_s1 + $0xab8] sm:$0xf]  ;;  %v7462_v1 = vld [vmem:[%s11246_s1 + $0xacc] sm:$0xf0] }
 0x207   : > { %v3628_v53 = vadd.f32 %v3627_v62, %v3590_v63  ;;  %3851 = vmatpush.bf16.msra.mxu3 %v6420_v11  ;;  %v6395_v11 = vld [vmem:[%s11246_s1 + $0x7b8] sm:$0xf] }
 0x208   : > { %v3515_v42 = vpop.f32.mrf.mxu2  ;;  %3814 = vmatpush.bf16.msra.mxu2 %v6204_v39  ;;  %v7312_v39 = vld [vmem:[%s11246_s1 + $0x61c] sm:$0xf0] }
 0x209   : > { %v5025_v51 = vmax.f32 %v3628_v53, 0.0  ;;  %v3516_v29 = vadd.f32 %v3515_v42, %v9030_v10  ;;  %v3553_v17 = vpop.f32.mrf.mxu3  ;;  %v7420_v10 = vld [vmem:[%s11246_s1 + $0x97c] sm:$0xf0]  ;;  %v6804_v53 = vor.u32 %v7468_v25, %v6803_v32  ;;  %v7366_v42 = vld [vmem:[%s11246_s1 + $0x7cc] sm:$0xf0] }
 0x20a   : > { %v3594_v23 = vpop.f32.mrf.mxu0 }
 0x20b   : > { %v5090_v62 = vpack.c.bf16 %v5025_v51, %v5024_v27  ;;  %v3554_v4 = vadd.f32 %v3553_v17, %v3516_v29  ;;  %v6396_v51 = vor.u32 %v7366_v42, %v6395_v11  ;;  %v5030_v29 = vmax.f32 %v8748_v19, 0.0  ;;  %3927 = vmatpush.bf16.msra.mxu1 %v6804_v53  ;;  %v7414_v19 = vld [vmem:[%s11246_s1 + $0x94c] sm:$0xf0]  ;;  %v6179_v53 = vld [vmem:[%s11246_s1 + $0x608] sm:$0xf] }
 0x20c   : > { %v3632_v63 = vpop.f32.mrf.mxu1  ;;  %v5036_v11 = vmax.f32 %v8763_v59, 0.0  ;;  %v7408_v59 = vld [vmem:[%s11246_s1 + $0x91c] sm:$0xf0] }
 0x20d   : > { %5123 = vst [vmem:[%s9257_s25] sm:$0xff] %v5090_v62  ;;  %v3592_v30 = vadd.f32 %v3591_v2, %v3554_v4  ;;  %3679 = vmatmul.bf16.gmra.mxu2 %v11433_v36  ;;  %3755 = vmatmul.bf16.gmra.mxu0 %v8151_v16  ;;  %v6612_v2 = vor.u32 %v7420_v10, %v6611_v20 }
 0x20e   : > { %3717 = vmatmul.bf16.gmra.mxu3 %v7744_v8 }
 0x20f   : > { %3793 = vmatmul.bf16.gmra.mxu1 %v8155_v18  ;;  %v3630_v24 = vadd.f32 %v3629_v26, %v3592_v30  ;;  %3889 = vmatpush.bf16.msra.mxu0 %v6612_v2  ;;  %v6587_v2 = vld [vmem:[%s11246_s1 + $0x938] sm:$0xf] }
 0x210   : > { %v3518_v27 = vpop.f32.mrf.mxu2  ;;  %3852 = vmatpush.bf16.msra.mxu3 %v6396_v51  ;;  %v6588_v25 = vor.u32 %v7414_v19, %v6587_v2  ;;  %v6755_v19 = vld [vmem:[%s11246_s1 + $0xa88] sm:$0xf] }
 0x211   : > { %v5031_v17 = vmax.f32 %v3630_v24, 0.0  ;;  %v3519_v62 = vadd.f32 %v3518_v27, %v9052_v21  ;;  %v3556_v26 = vpop.f32.mrf.mxu3 }
 0x212   : > { %v3596_v4 = vpop.f32.mrf.mxu0 }
 0x213   : > { %v5093_v30 = vpack.c.bf16 %v5031_v17, %v5030_v29  ;;  %v3557_v20 = vadd.f32 %v3556_v26, %v3519_v62  ;;  %3890 = vmatpush.bf16.msra.mxu0 %v6588_v25  ;;  %v6180_v29 = vor.u32 %v7312_v39, %v6179_v53  ;;  %v7360_v17 = vld [vmem:[%s11246_s1 + $0x79c] sm:$0xf0]  ;;  %v6563_v62 = vld [vmem:[%s11246_s1 + $0x908] sm:$0xf]  ;;  %v5042_v53 = vmax.f32 %v8792_v55, 0.0 }
 0x214   : > { %v3634_v10 = vpop.f32.mrf.mxu1  ;;  %v6564_v2 = vor.u32 %v7408_v59, %v6563_v62  ;;  %v7456_v25 = vld [vmem:[%s11246_s1 + $0xa9c] sm:$0xf0]  ;;  %v7159_v55 = vld [vmem:[%s11246_s1 + $0x15c] sm:$0xf] }
 0x215   : > { %5126 = vst [vmem:[%s9257_s25 + $0x18] sm:$0xff] %v5093_v30  ;;  %v3595_v32 = vadd.f32 %v3594_v23, %v3557_v20  ;;  %v6780_v23 = vor.u32 %v7462_v1, %v6779_v38  ;;  %3815 = vmatpush.bf16.msra.mxu2 %v6180_v29  ;;  %v11434_v1 = vld [vmem:[#allocation6_spill] sm:$0xff] }
 0x217   : > { %v3633_v21 = vadd.f32 %v3632_v63, %v3595_v32  ;;  %v6371_v63 = vld [vmem:[%s11246_s1 + $0x788] sm:$0xf]  ;;  %3928 = vmatpush.bf16.msra.mxu1 %v6780_v23  ;;  %3891 = vmatpush.bf16.msra.mxu0 %v6564_v2 }
 0x218   : > { %v3520_v24 = vpop.f32.mrf.mxu2  ;;  %v6372_v30 = vor.u32 %v7360_v17, %v6371_v63  ;;  %v7019_v17 = vld [vmem:[%s11246_s1 + $0xc98] sm:$0xf] }
 0x219   : > { %v5037_v42 = vmax.f32 %v3633_v21, 0.0  ;;  %v3521_v27 = vadd.f32 %v3520_v24, %v9085_v37  ;;  %v3558_v51 = vpop.f32.mrf.mxu3  ;;  %v6756_v21 = vor.u32 %v7456_v25, %v6755_v19 }
 0x21a   : > { %v3599_v26 = vpop.f32.mrf.mxu0  ;;  %3853 = vmatpush.bf16.msra.mxu3 %v6372_v30 }
 0x21b   : > { %v5096_v20 = vpack.c.bf16 %v5037_v42, %v5036_v11  ;;  %v3559_v37 = vadd.f32 %v3558_v51, %v3521_v27  ;;  %3929 = vmatpush.bf16.msra.mxu1 %v6756_v21 }
 0x21c   : > { %v3637_v32 = vpop.f32.mrf.mxu1 }
 0x21d   : > { %5129 = vst [vmem:[%s9257_s25 + $0x30] sm:$0xff] %v5096_v20  ;;  %v3597_v38 = vadd.f32 %v3596_v4, %v3559_v37  ;;  %3684 = vmatmul.bf16.gmra.mxu2 %v11434_v1  ;;  %3760 = vmatmul.bf16.gmra.mxu0 %v8195_v48  ;;  %v5048_v20 = vmax.f32 %v8813_v57, 0.0  ;;  %v5773_v57 = vld [vmem:[%s11246_s1 + $0x2f0] sm:$0xf0] }
 0x21e   : > { %3722 = vmatmul.bf16.gmra.mxu3 %v7860_v6 }
 0x21f   : > { %3798 = vmatmul.bf16.gmra.mxu1 %v8199_v50  ;;  %v3635_v24 = vadd.f32 %v3634_v10, %v3597_v38  ;;  %v7522_v10 = vld [vmem:[%s11246_s1 + $0xcac] sm:$0xf0] }
 0x220   : > { %v3523_v23 = vpop.f32.mrf.mxu2  ;;  %v7020_v62 = vor.u32 %v7522_v10, %v7019_v17 }
 0x221   : > { %v5043_v39 = vmax.f32 %v3635_v24, 0.0  ;;  %v3524_v63 = vadd.f32 %v3523_v23, %v9095_v46  ;;  %v3561_v11 = vpop.f32.mrf.mxu3  ;;  %v5581_v46 = vld [vmem:[%s11246_s1 + $0x170] sm:$0xf0] }
 0x222   : > { %v3601_v4 = vpop.f32.mrf.mxu0  ;;  %3964 = vmatpush.bf16.msrb.mxu2 %v7020_v62 }
 0x223   : > { %v5099_v42 = vpack.c.bf16 %v5043_v39, %v5042_v53  ;;  %v3562_v27 = vadd.f32 %v3561_v11, %v3524_v63  ;;  %v11435_v53 = vld [vmem:[#allocation10_spill] sm:$0xff]  ;;  %v5054_v11 = vmax.f32 %v8824_v33, 0.0  ;;  %v7153_v33 = vld [vmem:[%s11246_s1 + $0x12c] sm:$0xf] }
 0x224   : > { %v3639_v51 = vpop.f32.mrf.mxu1 }
 0x225   : > { %5132 = vst [vmem:[%s9257_s25 + $0x48] sm:$0xff] %v5099_v42  ;;  %v3600_v29 = vadd.f32 %v3599_v26, %v3562_v27  ;;  %v5584_v26 = vor.u32 %v7159_v55, %v5581_v46  ;;  %v7255_v46 = vld [vmem:[%s11246_s1 + $0x45c] sm:$0xf] }
 0x227   : > { %v3638_v30 = vadd.f32 %v3637_v32, %v3600_v29  ;;  %3998 = vmatpush.bf16.msrb.mxu3 %v5584_v26  ;;  %v7207_v32 = vld [vmem:[%s11246_s1 + $0x2dc] sm:$0xf] }
 0x228   : > { %v3525_v59 = vpop.f32.mrf.mxu2 }
 0x229   : > { %v5049_v37 = vmax.f32 %v3638_v30, 0.0  ;;  %v3526_v2 = vadd.f32 %v3525_v59, %v9122_v22  ;;  %v3563_v19 = vpop.f32.mrf.mxu3  ;;  %v5776_v22 = vor.u32 %v7207_v32, %v5773_v57 }
 0x22a   : > { %v3604_v25 = vpop.f32.mrf.mxu0 }
 0x22b   : > { %v5102_v21 = vpack.c.bf16 %v5049_v37, %v5048_v20  ;;  %v3564_v38 = vadd.f32 %v3563_v19, %v3526_v2  ;;  %4036 = vmatpush.bf16.msrb.mxu0 %v5776_v22  ;;  %v5060_v37 = vmax.f32 %v8851_v49, 0.0  ;;  %v11436_v22 = vld [vmem:[#allocation15_spill] sm:$0xff]  ;;  %v5749_v49 = vld [vmem:[%s11246_s1 + $0x2c0] sm:$0xf0] }
 0x22c   : > { %v3642_v24 = vpop.f32.mrf.mxu1 }
 0x22d   : > { %5135 = vst [vmem:[%s9257_s25 + $0x60] sm:$0xff] %v5102_v21  ;;  %v3602_v23 = vadd.f32 %v3601_v4, %v3564_v38  ;;  %3689 = vmatmul.bf16.gmra.mxu2 %v11435_v53  ;;  %3765 = vmatmul.bf16.gmra.mxu0 %v8238_v28 }
 0x22e   : > { %3727 = vmatmul.bf16.gmra.mxu3 %v7973_v13 }
 0x22f   : > { %3803 = vmatmul.bf16.gmra.mxu1 %v8242_v31  ;;  %v3640_v39 = vadd.f32 %v3639_v51, %v3602_v23  ;;  %v5965_v51 = vld [vmem:[%s11246_s1 + $0x470] sm:$0xf0] }
 0x230   : > { %v3528_v63 = vpop.f32.mrf.mxu2  ;;  %v5968_v30 = vor.u32 %v7255_v46, %v5965_v51  ;;  %v5533_v46 = vld [vmem:[%s11246_s1 + $0x110] sm:$0xf0] }
 0x231   : > { %v5055_v4 = vmax.f32 %v3640_v39, 0.0  ;;  %v3529_v42 = vadd.f32 %v3528_v63, %v9150_v47  ;;  %v3566_v27 = vpop.f32.mrf.mxu3  ;;  %v5557_v47 = vld [vmem:[%s11246_s1 + $0x140] sm:$0xf0]  ;;  %v11437_v39 = vld [vmem:[#allocation36_spill] sm:$0xff] }
 0x232   : > { %v3606_v29 = vpop.f32.mrf.mxu0  ;;  %v5560_v59 = vor.u32 %v7153_v33, %v5557_v47  ;;  %4074 = vmatpush.bf16.msrb.mxu1 %v5968_v30  ;;  %v11439_v63 = vld [vmem:[#allocation38_spill] sm:$0xff]  ;;  %v5725_v47 = vld [vmem:[%s11246_s1 + $0x290] sm:$0xf0] }
 0x233   : > { %v5105_v17 = vpack.c.bf16 %v5055_v4, %v5054_v11  ;;  %v3567_v10 = vadd.f32 %v3566_v27, %v3529_v42  ;;  %v7249_v4 = vld [vmem:[%s11246_s1 + $0x42c] sm:$0xf]  ;;  %v5941_v42 = vld [vmem:[%s11246_s1 + $0x440] sm:$0xf0]  ;;  %v6995_v27 = vld [vmem:[%s11246_s1 + $0xc68] sm:$0xf] }
 0x234   : > { %v3644_v62 = vpop.f32.mrf.mxu1  ;;  %3999 = vmatpush.bf16.msrb.mxu3 %v5560_v59 }
 0x235   : > { %5138 = vst [vmem:[%s9257_s25 + $0x78] sm:$0xff] %v5105_v17  ;;  %v3605_v55 = vadd.f32 %v3604_v25, %v3567_v10  ;;  %v5944_v17 = vor.u32 %v7249_v4, %v5941_v42  ;;  %v7516_v10 = vld [vmem:[%s11246_s1 + $0xc7c] sm:$0xf0]  ;;  %v7141_v4 = vld [vmem:[%s11246_s1 + $0xcc] sm:$0xf] }
 0x236   : > { %v6996_v30 = vor.u32 %v7516_v10, %v6995_v27  ;;  %v5509_v42 = vld [vmem:[%s11246_s1 + $0xe0] sm:$0xf0] }
 0x237   : > { %v3643_v26 = vadd.f32 %v3642_v24, %v3605_v55  ;;  %v7201_v24 = vld [vmem:[%s11246_s1 + $0x2ac] sm:$0xf]  ;;  %v7147_v55 = vld [vmem:[%s11246_s1 + $0xfc] sm:$0xf]  ;;  %4075 = vmatpush.bf16.msrb.mxu1 %v5944_v17 }
 0x238   : > { %v3530_v20 = vpop.f32.mrf.mxu2  ;;  %v5752_v11 = vor.u32 %v7201_v24, %v5749_v49  ;;  %v5536_v33 = vor.u32 %v7147_v55, %v5533_v46  ;;  %3965 = vmatpush.bf16.msrb.mxu2 %v6996_v30  ;;  %v7243_v49 = vld [vmem:[%s11246_s1 + $0x3fc] sm:$0xf]  ;;  %v11441_v17 = vld [vmem:[#allocation55_spill] sm:$0xff] }
 0x239   : > { %v5061_v2 = vmax.f32 %v3643_v26, 0.0  ;;  %v3531_v19 = vadd.f32 %v3530_v20, %v9164_v15  ;;  %v3568_v25 = vpop.f32.mrf.mxu3  ;;  %v11438_v15 = vld [vmem:[#allocation17_spill] sm:$0xff]  ;;  %v11440_v26 = vld [vmem:[#allocation54_spill] sm:$0xff]  ;;  %v5072_v10 = vmax.f32 %v11441_v17, 0.0 }
 0x23a   : > { %v3609_v21 = vpop.f32.mrf.mxu0  ;;  %4037 = vmatpush.bf16.msrb.mxu0 %v5752_v11  ;;  %v5066_v59 = vmax.f32 %v11440_v26, 0.0  ;;  %4000 = vmatpush.bf16.msrb.mxu3 %v5536_v33 }
 0x23b   : > { %v5108_v38 = vpack.c.bf16 %v5061_v2, %v5060_v37  ;;  %v3569_v23 = vadd.f32 %v3568_v25, %v3531_v19 }
 0x23c   : > { %v3647_v32 = vpop.f32.mrf.mxu1 }
 0x23d   : > { %5141 = vst [vmem:[%s9257_s25 + $0x90] sm:$0xff] %v5108_v38  ;;  %v3607_v57 = vadd.f32 %v3606_v29, %v3569_v23  ;;  %3816 = vmatmul.bf16.vlgmr.msra.gmra.mxu2 %v11436_v22  ;;  %3892 = vmatmul.bf16.vlgmr.msra.gmra.mxu0 %v11437_v39 }
 0x23e   : > { %3854 = vmatmul.bf16.vlgmr.msra.gmra.mxu3 %v11438_v15 }
 0x23f   : > { %3930 = vmatmul.bf16.vlgmr.msra.gmra.mxu1 %v11439_v63  ;;  %v3645_v29 = vadd.f32 %v3644_v62, %v3607_v57  ;;  %v7195_v62 = vld [vmem:[%s11246_s1 + $0x27c] sm:$0xf] }
 0x240   : > { %v3533_v51 = vpop.f32.mrf.mxu2  ;;  %v5728_v19 = vor.u32 %v7195_v62, %v5725_v47 }
 0x241   : > { %v5067_v20 = vmax.f32 %v3645_v29, 0.0  ;;  %v3534_v37 = vadd.f32 %v3533_v51, %v9168_v56  ;;  %v3571_v2 = vpop.f32.mrf.mxu3  ;;  %v5917_v56 = vld [vmem:[%s11246_s1 + $0x410] sm:$0xf0] }
 0x242   : > { %v3611_v25 = vpop.f32.mrf.mxu0  ;;  %4038 = vmatpush.bf16.msrb.mxu0 %v5728_v19  ;;  %v5920_v11 = vor.u32 %v7243_v49, %v5917_v56  ;;  %v7510_v56 = vld [vmem:[%s11246_s1 + $0xc4c] sm:$0xf0] }
 0x243   : > { %v5111_v38 = vpack.c.bf16 %v5067_v20, %v5066_v59  ;;  %v3572_v23 = vadd.f32 %v3571_v2, %v3534_v37  ;;  %v11442_v59 = vld [vmem:[#allocation19_spill] sm:$0xff]  ;;  %v11444_v37 = vld [vmem:[#allocation21_spill] sm:$0xff] }
 0x244   : > { %v3649_v57 = vpop.f32.mrf.mxu1  ;;  %4076 = vmatpush.bf16.msrb.mxu1 %v5920_v11  ;;  %v11443_v20 = vld [vmem:[#allocation39_spill] sm:$0xff]  ;;  %v11445_v2 = vld [vmem:[#allocation41_spill] sm:$0xff] }
 0x245   : > { %5144 = vst [vmem:[%s9257_s25 + $0xa8] sm:$0xff] %v5111_v38  ;;  %v3610_v24 = vadd.f32 %v3609_v21, %v3572_v23  ;;  %v5512_v21 = vor.u32 %v7141_v4, %v5509_v42  ;;  %v5893_v38 = vld [vmem:[%s11246_s1 + $0x3e0] sm:$0xf0]  ;;  %v6971_v23 = vld [vmem:[%s11246_s1 + $0xc38] sm:$0xf] }
 0x246   : > { %v7135_v11 = vld [vmem:[%s11246_s1 + $0x9c] sm:$0xf]  ;;  %v5485_v4 = vld [vmem:[%s11246_s1 + $0xb0] sm:$0xf0] }
 0x247   : > { %v3648_v27 = vadd.f32 %v3647_v32, %v3610_v24  ;;  %4001 = vmatpush.bf16.msrb.mxu3 %v5512_v21  ;;  %v7189_v32 = vld [vmem:[%s11246_s1 + $0x24c] sm:$0xf]  ;;  %v5488_v21 = vor.u32 %v7135_v11, %v5485_v4 }
 0x248   : > { %v3535_v29 = vpop.f32.mrf.mxu2 }
 0x249   : > { %v5073_v55 = vmax.f32 %v3648_v27, 0.0  ;;  %v3536_v46 = vadd.f32 %v3535_v29, %v9194_v52  ;;  %v3573_v51 = vpop.f32.mrf.mxu3  ;;  %v5701_v52 = vld [vmem:[%s11246_s1 + $0x260] sm:$0xf0]  ;;  %v6972_v27 = vor.u32 %v7510_v56, %v6971_v23  ;;  %v11446_v29 = vld [vmem:[#allocation56_spill] sm:$0xff] }
 0x24a   : > { %v3614_v30 = vpop.f32.mrf.mxu0  ;;  %v5704_v19 = vor.u32 %v7189_v32, %v5701_v52  ;;  %v7183_v32 = vld [vmem:[%s11246_s1 + $0x21c] sm:$0xf]  ;;  %v5677_v52 = vld [vmem:[%s11246_s1 + $0x230] sm:$0xf0] }
 0x24b   : > { %v5114_v33 = vpack.c.bf16 %v5073_v55, %v5072_v10  ;;  %v3574_v62 = vadd.f32 %v3573_v51, %v3536_v46  ;;  %3966 = vmatpush.bf16.msrb.mxu2 %v6972_v27  ;;  %4002 = vmatpush.bf16.msrb.mxu3 %v5488_v21  ;;  %v9476_v27 = vld [vmem:[%s11247_s2] sm:$0x3f]  ;;  %v7231_v21 = vld [vmem:[%s11246_s1 + $0x39c] sm:$0xf] }
 0x24c   : > { %v3652_v47 = vpop.f32.mrf.mxu1  ;;  %4039 = vmatpush.bf16.msrb.mxu0 %v5704_v19 }
 0x24d   : > { %5147 = vst [vmem:[%s9257_s25 + $0xc0] sm:$0xff] %v5114_v33  ;;  %v3612_v26 = vadd.f32 %v3611_v25, %v3574_v62  ;;  %3821 = vmatmul.bf16.gmra.mxu2 %v11442_v59  ;;  %3897 = vmatmul.bf16.gmra.mxu0 %v11443_v20  ;;  %v7237_v25 = vld [vmem:[%s11246_s1 + $0x3cc] sm:$0xf] }
 0x24e   : > { %3859 = vmatmul.bf16.gmra.mxu3 %v11444_v37  ;;  %v5896_v49 = vor.u32 %v7237_v25, %v5893_v38  ;;  %v11447_v38 = vld [vmem:[#allocation57_spill] sm:$0xff] }
 0x24f   : > { %3935 = vmatmul.bf16.gmra.mxu1 %v11445_v2  ;;  %v3650_v24 = vadd.f32 %v3649_v57, %v3612_v26  ;;  %v5078_v57 = vmax.f32 %v11446_v29, 0.0  ;;  %v5084_v23 = vmax.f32 %v11447_v38, 0.0  ;;  %v5869_v29 = vld [vmem:[%s11246_s1 + $0x3b0] sm:$0xf0]  ;;  %v5653_v38 = vld [vmem:[%s11246_s1 + $0x200] sm:$0xf0] }
 0x250   : > { %v3538_v42 = vpop.f32.mrf.mxu2  ;;  %4077 = vmatpush.bf16.msrb.mxu1 %v5896_v49 }
 0x251   : > { %v5079_v17 = vmax.f32 %v3650_v24, 0.0  ;;  %v3539_v10 = vadd.f32 %v3538_v42, %v9220_v44  ;;  %v3576_v55 = vpop.f32.mrf.mxu3  ;;  %v5680_v44 = vor.u32 %v7183_v32, %v5677_v52  ;;  %v11449_v42 = vld [vmem:[#allocation42_spill] sm:$0xff] }
 0x252   : > { %v3616_v46 = vpop.f32.mrf.mxu0 }
 0x253   : > { %v5117_v51 = vpack.c.bf16 %v5079_v17, %v5078_v57  ;;  %v3577_v33 = vadd.f32 %v3576_v55, %v3539_v10  ;;  %4040 = vmatpush.bf16.msrb.mxu0 %v5680_v44  ;;  %v11450_v57 = vld [vmem:[#allocation24_spill] sm:$0xff]  ;;  %v5872_v10 = vor.u32 %v7231_v21, %v5869_v29  ;;  %v7129_v55 = vld [vmem:[%s11246_s1 + $0x6c] sm:$0xf]  ;;  %v5461_v46 = vld [vmem:[%s11246_s1 + $0x80] sm:$0xf0] }
 0x254   : > { %v3654_v62 = vpop.f32.mrf.mxu1  ;;  %v11451_v17 = vld [vmem:[#allocation44_spill] sm:$0xff] }
 0x255   : > { %5150 = vst [vmem:[%s9257_s25 + $0xd8] sm:$0xff] %v5117_v51  ;;  %v3615_v26 = vadd.f32 %v3614_v30, %v3577_v33  ;;  %v11448_v30 = vld [vmem:[#allocation23_spill] sm:$0xff]  ;;  %v5464_v51 = vor.u32 %v7129_v55, %v5461_v46  ;;  %4078 = vmatpush.bf16.msrb.mxu1 %v5872_v10  ;;  %v7123_v10 = vld [vmem:[%s11246_s1 + $0x3c] sm:$0xf]  ;;  %v5437_v55 = vld [vmem:[%s11246_s1 + $0x50] sm:$0xf0] }
 0x257   : > { %v3653_v19 = vadd.f32 %v3652_v47, %v3615_v26  ;;  %v9479_v47 = vperm.slane %v9476_v27, 2  ;;  %4003 = vmatpush.bf16.msrb.mxu3 %v5464_v51 }
 0x258   : > { %v3540_v25 = vpop.f32.mrf.mxu2 }
 0x259   : > { %v5085_v24 = vmax.f32 %v3653_v19, 0.0  ;;  %v3578_v49 = vpop.f32.mrf.mxu3  ;;  %v7177_v25 = vld [vmem:[%s11246_s1 + $0x1ec] sm:$0xf] }
 0x25a   : > { %v3741_v56 = vpop.f32.mrf.mxu0  ;;  %v5845_v49 = vld [vmem:[%s11246_s1 + $0x380] sm:$0xf0] }
 0x25b   : > { %v5120_v11 = vpack.c.bf16 %v5085_v24, %v5084_v23  ;;  %v7225_v23 = vld [vmem:[%s11246_s1 + $0x36c] sm:$0xf]  ;;  %v5656_v24 = vor.u32 %v7177_v25, %v5653_v38 }
 0x25c   : > { %v3779_v4 = vpop.f32.mrf.mxu1  ;;  %v5848_v21 = vor.u32 %v7225_v23, %v5845_v49  ;;  %v11452_v49 = vld [vmem:[#allocation26_spill] sm:$0xff] }
 0x25d   : > { %5153 = vst [vmem:[%s9257_s25 + $0xf0] sm:$0xff] %v5120_v11  ;;  %3826 = vmatmul.bf16.gmra.mxu2 %v11448_v30  ;;  %3902 = vmatmul.bf16.gmra.mxu0 %v11449_v42  ;;  %v7504_v11 = vld [vmem:[%s11246_s1 + $0xc1c] sm:$0xf0] }
 0x25e   : > { %3864 = vmatmul.bf16.gmra.mxu3 %v11450_v57  ;;  %4041 = vmatpush.bf16.msrb.mxu0 %v5656_v24 }
 0x25f   : > { %3940 = vmatmul.bf16.gmra.mxu1 %v11451_v17 }
 0x260   : > { %v3665_v33 = vpop.f32.mrf.mxu2  ;;  %4079 = vmatpush.bf16.msrb.mxu1 %v5848_v21 }
 0x261   : > { %v3666_v62 = vadd.f32 %v3665_v33, %v9479_v47  ;;  %v3703_v26 = vpop.f32.mrf.mxu3  ;;  %v5440_v33 = vor.u32 %v7123_v10, %v5437_v55 }
 0x262   : > { %v3743_v32 = vpop.f32.mrf.mxu0 }
 0x263   : > { %v3704_v52 = vadd.f32 %v3703_v26, %v3666_v62  ;;  %4004 = vmatpush.bf16.msrb.mxu3 %v5440_v33  ;;  %v7219_v33 = vld [vmem:[%s11246_s1 + $0x33c] sm:$0xf] }
 0x264   : > { %v3781_v44 = vpop.f32.mrf.mxu1 }
 0x265   : > { %v3742_v19 = vadd.f32 %v3741_v56, %v3704_v52  ;;  %v6947_v56 = vld [vmem:[%s11246_s1 + $0xc08] sm:$0xf] }
 0x266   : > { %v6948_v29 = vor.u32 %v7504_v11, %v6947_v56 }
 0x267   : > { %v9520_v46 = vadd.f32 %v3779_v4, %v3742_v19  ;;  %v7171_v4 = vld [vmem:[%s11246_s1 + $0x1bc] sm:$0xf]  ;;  %v5629_v19 = vld [vmem:[%s11246_s1 + $0x1d0] sm:$0xf0] }
 0x268   : > { %v3667_v51 = vpop.f32.mrf.mxu2  ;;  %3967 = vmatpush.bf16.msrb.mxu2 %v6948_v29  ;;  %v5632_v24 = vor.u32 %v7171_v4, %v5629_v19 }
 0x269   : > { %v3668_v62 = vadd.f32 %v3667_v51, %v9479_v47  ;;  %v3705_v26 = vpop.f32.mrf.mxu3 }
 0x26a   : > { %v3746_v52 = vpop.f32.mrf.mxu0  ;;  %4042 = vmatpush.bf16.msrb.mxu0 %v5632_v24 }
 0x26b   : > { %v3706_v25 = vadd.f32 %v3705_v26, %v3668_v62  ;;  %v5821_v62 = vld [vmem:[%s11246_s1 + $0x350] sm:$0xf0] }
 0x26c   : > { %v3784_v38 = vpop.f32.mrf.mxu1  ;;  %v5824_v26 = vor.u32 %v7219_v33, %v5821_v62 }
 0x26d   : > { %v3744_v23 = vadd.f32 %v3743_v32, %v3706_v25  ;;  %3831 = vmatmul.bf16.gmra.mxu2 %v11452_v49  ;;  %3907 = vmatmul.bf16.gmra.mxu0 %v8482_v60  ;;  %v5413_v25 = vld [vmem:[%s11246_s1 + $0x20] sm:$0xf0] }
 0x26e   : > { %3869 = vmatmul.bf16.gmra.mxu3 %v11427_v40  ;;  %4080 = vmatpush.bf16.msrb.mxu1 %v5824_v26 }
 0x26f   : > { %3945 = vmatmul.bf16.gmra.mxu1 %v8486_v12  ;;  %v9533_v56 = vadd.f32 %v3781_v44, %v3744_v23  ;;  %v7117_v44 = vld [vmem:[%s11246_s1 + $0xc] sm:$0xf] }
 0x270   : > { %v3670_v32 = vpop.f32.mrf.mxu2  ;;  %v5416_v23 = vor.u32 %v7117_v44, %v5413_v25  ;;  %v11453_v25 = vld [vmem:[#allocation29_spill] sm:$0xff] }
 0x271   : > { %v3671_v11 = vadd.f32 %v3670_v32, %v9479_v47  ;;  %v3708_v21 = vpop.f32.mrf.mxu3  ;;  %v7165_v32 = vld [vmem:[%s11246_s1 + $0x18c] sm:$0xf] }
 0x272   : > { %v3748_v29 = vpop.f32.mrf.mxu0  ;;  %4005 = vmatpush.bf16.msrb.mxu3 %v5416_v23  ;;  %v11454_v23 = vld [vmem:[#allocation50_spill] sm:$0xff] }
 0x273   : > { %v3709_v10 = vadd.f32 %v3708_v21, %v3671_v11  ;;  %v5605_v11 = vld [vmem:[%s11246_s1 + $0x1a0] sm:$0xf0] }
 0x274   : > { %v3786_v55 = vpop.f32.mrf.mxu1 }
 0x275   : > { %v3747_v51 = vadd.f32 %v3746_v52, %v3709_v10  ;;  %v5608_v10 = vor.u32 %v7165_v32, %v5605_v11  ;;  %v6349_v32 = vld [vmem:[%s11246_s1 + $0x770] sm:$0xf0] }
 0x277   : > { %v9548_v4 = vadd.f32 %v3784_v38, %v3747_v51  ;;  %v7213_v38 = vld [vmem:[%s11246_s1 + $0x30c] sm:$0xf]  ;;  %v5797_v51 = vld [vmem:[%s11246_s1 + $0x320] sm:$0xf0]  ;;  %4043 = vmatpush.bf16.msrb.mxu0 %v5608_v10 }
 0x278   : > { %v3672_v52 = vpop.f32.mrf.mxu2  ;;  %v5800_v44 = vor.u32 %v7213_v38, %v5797_v51 }
 0x279   : > { %v3673_v19 = vadd.f32 %v3672_v52, %v9479_v47  ;;  %v3710_v24 = vpop.f32.mrf.mxu3  ;;  %v7303_v52 = vld [vmem:[%s11246_s1 + $0x5dc] sm:$0xf] }
 0x27a   : > { %v3751_v21 = vpop.f32.mrf.mxu0  ;;  %4081 = vmatpush.bf16.msrb.mxu1 %v5800_v44  ;;  %v7399_v44 = vld [vmem:[%s11246_s1 + $0x8dc] sm:$0xf] }
 0x27b   : > { %v3711_v33 = vadd.f32 %v3710_v24, %v3673_v19  ;;  %v6157_v19 = vld [vmem:[%s11246_s1 + $0x5f0] sm:$0xf0] }
 0x27c   : > { %v3789_v62 = vpop.f32.mrf.mxu1  ;;  %v6160_v24 = vor.u32 %v7303_v52, %v6157_v19 }
 0x27d   : > { %v3749_v26 = vadd.f32 %v3748_v29, %v3711_v33  ;;  %3836 = vmatmul.bf16.gmra.mxu2 %v11453_v25  ;;  %3912 = vmatmul.bf16.gmra.mxu0 %v8529_v0  ;;  %v7351_v29 = vld [vmem:[%s11246_s1 + $0x75c] sm:$0xf] }
 0x27e   : > { %3874 = vmatmul.bf16.gmra.mxu3 %v11428_v58  ;;  %v6352_v33 = vor.u32 %v7351_v29, %v6349_v32  ;;  %4112 = vmatpush.bf16.msra.mxu2 %v6160_v24 }
 0x27f   : > { %3950 = vmatmul.bf16.gmra.mxu1 %v11454_v23  ;;  %v9579_v11 = vadd.f32 %v3786_v55, %v3749_v26  ;;  %v6541_v55 = vld [vmem:[%s11246_s1 + $0x8f0] sm:$0xf0] }
 0x280   : > { %v3675_v10 = vpop.f32.mrf.mxu2  ;;  %4150 = vmatpush.bf16.msra.mxu3 %v6352_v33  ;;  %v6544_v26 = vor.u32 %v7399_v44, %v6541_v55  ;;  %v6133_v44 = vld [vmem:[%s11246_s1 + $0x5c0] sm:$0xf0]  ;;  %v7345_v55 = vld [vmem:[%s11246_s1 + $0x72c] sm:$0xf] }
 0x281   : > { %v3676_v38 = vadd.f32 %v3675_v10, %v9479_v47  ;;  %v3713_v51 = vpop.f32.mrf.mxu3 }
 0x282   : > { %v3753_v23 = vpop.f32.mrf.mxu0  ;;  %4188 = vmatpush.bf16.msra.mxu0 %v6544_v26  ;;  %v6325_v26 = vld [vmem:[%s11246_s1 + $0x740] sm:$0xf0] }
 0x283   : > { %v3714_v12 = vadd.f32 %v3713_v51, %v3676_v38  ;;  %v7447_v38 = vld [vmem:[%s11246_s1 + $0xa5c] sm:$0xf] }
 0x284   : > { %v3791_v17 = vpop.f32.mrf.mxu1  ;;  %v11456_v51 = vld [vmem:[#allocation53_spill] sm:$0xff] }
 0x285   : > { %v3752_v2 = vadd.f32 %v3751_v21, %v3714_v12  ;;  %v11455_v21 = vld [vmem:[#allocation33_spill] sm:$0xff] }
 0x287   : > { %v9588_v52 = vadd.f32 %v3789_v62, %v3752_v2  ;;  %v6733_v2 = vld [vmem:[%s11246_s1 + $0xa70] sm:$0xf0]  ;;  %v7297_v62 = vld [vmem:[%s11246_s1 + $0x5ac] sm:$0xf] }
 0x288   : > { %v3677_v19 = vpop.f32.mrf.mxu2 }
 0x289   : > { %v3678_v29 = vadd.f32 %v3677_v19, %v9479_v47  ;;  %v3715_v24 = vpop.f32.mrf.mxu3  ;;  %v6136_v19 = vor.u32 %v7297_v62, %v6133_v44 }
 0x28a   : > { %v3756_v32 = vpop.f32.mrf.mxu0 }
 0x28b   : > { %v3716_v10 = vadd.f32 %v3715_v24, %v3678_v29  ;;  %v6328_v29 = vor.u32 %v7345_v55, %v6325_v26  ;;  %4113 = vmatpush.bf16.msra.mxu2 %v6136_v19  ;;  %v7339_v26 = vld [vmem:[%s11246_s1 + $0x6fc] sm:$0xf] }
 0x28c   : > { %v3794_v33 = vpop.f32.mrf.mxu1 }
 0x28d   : > { %v3754_v12 = vadd.f32 %v3753_v23, %v3716_v10  ;;  %3841 = vmatmul.bf16.gmra.mxu2 %v11455_v21  ;;  %3917 = vmatmul.bf16.gmra.mxu0 %v8578_v41  ;;  %v6736_v23 = vor.u32 %v7447_v38, %v6733_v2 }
 0x28e   : > { %3879 = vmatmul.bf16.gmra.mxu3 %v11429_v35  ;;  %v7393_v35 = vld [vmem:[%s11246_s1 + $0x8ac] sm:$0xf] }
 0x28f   : > { %3955 = vmatmul.bf16.gmra.mxu1 %v11456_v51  ;;  %v9613_v24 = vadd.f32 %v3791_v17, %v3754_v12  ;;  %4151 = vmatpush.bf16.msra.mxu3 %v6328_v29  ;;  %v6517_v17 = vld [vmem:[%s11246_s1 + $0x8c0] sm:$0xf0]  ;;  %v7441_v12 = vld [vmem:[%s11246_s1 + $0xa2c] sm:$0xf] }
 0x290   : > { %v3680_v10 = vpop.f32.mrf.mxu2  ;;  %4226 = vmatpush.bf16.msra.mxu1 %v6736_v23  ;;  %v6520_v62 = vor.u32 %v7393_v35, %v6517_v17  ;;  %v6709_v23 = vld [vmem:[%s11246_s1 + $0xa40] sm:$0xf0]  ;;  %v6301_v35 = vld [vmem:[%s11246_s1 + $0x710] sm:$0xf0] }
 0x291   : > { %v3681_v38 = vadd.f32 %v3680_v10, %v9479_v47  ;;  %v3718_v2 = vpop.f32.mrf.mxu3  ;;  %v6712_v44 = vor.u32 %v7441_v12, %v6709_v23  ;;  %v6304_v10 = vor.u32 %v7339_v26, %v6301_v35 }
 0x292   : > { %v3758_v51 = vpop.f32.mrf.mxu0  ;;  %4189 = vmatpush.bf16.msra.mxu0 %v6520_v62 }
 0x293   : > { %v3719_v63 = vadd.f32 %v3718_v2, %v3681_v38  ;;  %4152 = vmatpush.bf16.msra.mxu3 %v6304_v10 }
 0x294   : > { %v3796_v41 = vpop.f32.mrf.mxu1  ;;  %4227 = vmatpush.bf16.msra.mxu1 %v6712_v44 }
 0x295   : > { %v3757_v21 = vadd.f32 %v3756_v32, %v3719_v63  ;;  %v7291_v63 = vld [vmem:[%s11246_s1 + $0x57c] sm:$0xf]  ;;  %v6109_v32 = vld [vmem:[%s11246_s1 + $0x590] sm:$0xf0] }
 0x296   : > { %v6112_v55 = vor.u32 %v7291_v63, %v6109_v32  ;;  %v11457_v32 = vld [vmem:[#allocation37_spill] sm:$0xff] }
 0x297   : > { %v9640_v19 = vadd.f32 %v3794_v33, %v3757_v21  ;;  %v7387_v33 = vld [vmem:[%s11246_s1 + $0x87c] sm:$0xf]  ;;  %v6493_v21 = vld [vmem:[%s11246_s1 + $0x890] sm:$0xf0] }
 0x298   : > { %v3682_v29 = vpop.f32.mrf.mxu2  ;;  %4114 = vmatpush.bf16.msra.mxu2 %v6112_v55  ;;  %v6496_v62 = vor.u32 %v7387_v33, %v6493_v21  ;;  %v6085_v33 = vld [vmem:[%s11246_s1 + $0x560] sm:$0xf0] }
 0x299   : > { %v3683_v38 = vadd.f32 %v3682_v29, %v9479_v47  ;;  %v3720_v2 = vpop.f32.mrf.mxu3  ;;  %v6277_v21 = vld [vmem:[%s11246_s1 + $0x6e0] sm:$0xf0] }
 0x29a   : > { %v3761_v17 = vpop.f32.mrf.mxu0  ;;  %4190 = vmatpush.bf16.msra.mxu0 %v6496_v62 }
 0x29b   : > { %v3721_v12 = vadd.f32 %v3720_v2, %v3683_v38  ;;  %v7435_v2 = vld [vmem:[%s11246_s1 + $0x9fc] sm:$0xf] }
 0x29c   : > { %v3799_v23 = vpop.f32.mrf.mxu1 }
 0x29d   : > { %v3759_v63 = vadd.f32 %v3758_v51, %v3721_v12  ;;  %7045 = vmatmul.msk.bf16.vlgmr.msrb.gmra.mxu2 %vm2953_vm0, %v11457_v32  ;;  %4044 = vmatmul.bf16.vlgmr.msrb.gmra.mxu0 %v7746_v9  ;;  %v6685_v12 = vld [vmem:[%s11246_s1 + $0xa10] sm:$0xf0] }
 0x29e   : > { %4006 = vmatmul.bf16.vlgmr.msrb.gmra.mxu3 %v11430_v5  ;;  %v11458_v5 = vld [vmem:[#allocation40_spill] sm:$0xff] }
 0x29f   : > { %4082 = vmatmul.bf16.vlgmr.msrb.gmra.mxu1 %v8007_v34  ;;  %v9654_v44 = vadd.f32 %v3796_v41, %v3759_v63  ;;  %v7285_v41 = vld [vmem:[%s11246_s1 + $0x54c] sm:$0xf]  ;;  %v6688_v63 = vor.u32 %v7435_v2, %v6685_v12 }
 0x2a0   : > { %v3685_v51 = vpop.f32.mrf.mxu2  ;;  %v6088_v62 = vor.u32 %v7285_v41, %v6085_v33  ;;  %v7429_v41 = vld [vmem:[%s11246_s1 + $0x9cc] sm:$0xf]  ;;  %v6061_v33 = vld [vmem:[%s11246_s1 + $0x530] sm:$0xf0] }
 0x2a1   : > { %v3686_v55 = vadd.f32 %v3685_v51, %v9479_v47  ;;  %v3723_v26 = vpop.f32.mrf.mxu3  ;;  %4228 = vmatpush.bf16.msra.mxu1 %v6688_v63  ;;  %v7279_v63 = vld [vmem:[%s11246_s1 + $0x51c] sm:$0xf] }
 0x2a2   : > { %v3763_v35 = vpop.f32.mrf.mxu0  ;;  %4115 = vmatpush.bf16.msra.mxu2 %v6088_v62  ;;  %v7327_v62 = vld [vmem:[%s11246_s1 + $0x69c] sm:$0xf] }
 0x2a3   : > { %v3724_v29 = vadd.f32 %v3723_v26, %v3686_v55 }
 0x2a4   : > { %v3801_v10 = vpop.f32.mrf.mxu1 }
 0x2a5   : > { %v3762_v38 = vadd.f32 %v3761_v17, %v3724_v29  ;;  %v7333_v17 = vld [vmem:[%s11246_s1 + $0x6cc] sm:$0xf] }
 0x2a6   : > { %v6280_v51 = vor.u32 %v7333_v17, %v6277_v21  ;;  %v6064_v21 = vor.u32 %v7279_v63, %v6061_v33 }
 0x2a7   : > { %v9675_v55 = vadd.f32 %v3799_v23, %v3762_v38  ;;  %v7381_v23 = vld [vmem:[%s11246_s1 + $0x84c] sm:$0xf]  ;;  %v6469_v38 = vld [vmem:[%s11246_s1 + $0x860] sm:$0xf0] }
 0x2a8   : > { %v3687_v26 = vpop.f32.mrf.mxu2  ;;  %4153 = vmatpush.bf16.msra.mxu3 %v6280_v51  ;;  %v6253_v51 = vld [vmem:[%s11246_s1 + $0x6b0] sm:$0xf0]  ;;  %4116 = vmatpush.bf16.msra.mxu2 %v6064_v21 }
 0x2a9   : > { %v3688_v29 = vadd.f32 %v3687_v26, %v9479_v47  ;;  %v3725_v2 = vpop.f32.mrf.mxu3 }
 0x2aa   : > { %v3766_v12 = vpop.f32.mrf.mxu0 }
 0x2ab   : > { %v3726_v34 = vadd.f32 %v3725_v2, %v3688_v29  ;;  %v6256_v2 = vor.u32 %v7327_v62, %v6253_v51  ;;  %v11459_v51 = vld [vmem:[#allocation43_spill] sm:$0xff] }
 0x2ac   : > { %v3804_v9 = vpop.f32.mrf.mxu1 }
 0x2ad   : > { %v3764_v32 = vadd.f32 %v3763_v35, %v3726_v34  ;;  %7046 = vmatmul.msk.bf16.gmra.mxu2 %vm2953_vm0, %v11458_v5  ;;  %4049 = vmatmul.bf16.gmra.mxu0 %v7862_v7  ;;  %v6472_v34 = vor.u32 %v7381_v23, %v6469_v38  ;;  %v6661_v35 = vld [vmem:[%s11246_s1 + $0x9e0] sm:$0xf0] }
 0x2ae   : > { %4011 = vmatmul.bf16.gmra.mxu3 %v11431_v54  ;;  %v6664_v17 = vor.u32 %v7429_v41, %v6661_v35 }
 0x2af   : > { %4087 = vmatmul.bf16.gmra.mxu1 %v8057_v61  ;;  %v9707_v26 = vadd.f32 %v3801_v10, %v3764_v32  ;;  %4191 = vmatpush.bf16.msra.mxu0 %v6472_v34  ;;  %v7375_v61 = vld [vmem:[%s11246_s1 + $0x81c] sm:$0xf]  ;;  %v6445_v32 = vld [vmem:[%s11246_s1 + $0x830] sm:$0xf0] }
 0x2b0   : > { %v3690_v29 = vpop.f32.mrf.mxu2  ;;  %4229 = vmatpush.bf16.msra.mxu1 %v6664_v17  ;;  %4154 = vmatpush.bf16.msra.mxu3 %v6256_v2  ;;  %v6448_v10 = vor.u32 %v7375_v61, %v6445_v32  ;;  %v6637_v61 = vld [vmem:[%s11246_s1 + $0x9b0] sm:$0xf0]  ;;  %v6037_v2 = vld [vmem:[%s11246_s1 + $0x500] sm:$0xf0] }
 0x2b1   : > { %v3691_v23 = vadd.f32 %v3690_v29, %v9479_v47  ;;  %v3728_v38 = vpop.f32.mrf.mxu3 }
 0x2b2   : > { %v3768_v41 = vpop.f32.mrf.mxu0 }
 0x2b3   : > { %v3729_v35 = vadd.f32 %v3728_v38, %v3691_v23  ;;  %4192 = vmatpush.bf16.msra.mxu0 %v6448_v10  ;;  %v7321_v23 = vld [vmem:[%s11246_s1 + $0x66c] sm:$0xf]  ;;  %v6229_v38 = vld [vmem:[%s11246_s1 + $0x680] sm:$0xf0] }
 0x2b4   : > { %v3806_v63 = vpop.f32.mrf.mxu1 }
 0x2b5   : > { %v3767_v33 = vadd.f32 %v3766_v12, %v3729_v35  ;;  %v7423_v12 = vld [vmem:[%s11246_s1 + $0x99c] sm:$0xf]  ;;  %v6232_v35 = vor.u32 %v7321_v23, %v6229_v38  ;;  %v6013_v23 = vld [vmem:[%s11246_s1 + $0x4d0] sm:$0xf0] }
 0x2b6   : > { %v6640_v29 = vor.u32 %v7423_v12, %v6637_v61  ;;  %v7369_v61 = vld [vmem:[%s11246_s1 + $0x7ec] sm:$0xf] }
 0x2b7   : > { %v9716_v34 = vadd.f32 %v3804_v9, %v3767_v33  ;;  %v7273_v9 = vld [vmem:[%s11246_s1 + $0x4ec] sm:$0xf]  ;;  %4155 = vmatpush.bf16.msra.mxu3 %v6232_v35  ;;  %v7315_v35 = vld [vmem:[%s11246_s1 + $0x63c] sm:$0xf] }
 0x2b8   : > { %v3692_v47 = vpop.f32.mrf.mxu2  ;;  %v6040_v41 = vor.u32 %v7273_v9, %v6037_v2  ;;  %4230 = vmatpush.bf16.msra.mxu1 %v6640_v29  ;;  %v6421_v9 = vld [vmem:[%s11246_s1 + $0x800] sm:$0xf0]  ;;  %v7417_v29 = vld [vmem:[%s11246_s1 + $0x96c] sm:$0xf] }
 0x2b9   : > { %v3730_v17 = vpop.f32.mrf.mxu3  ;;  %v6613_v2 = vld [vmem:[%s11246_s1 + $0x980] sm:$0xf0] }
 0x2ba   : > { %v3893_v21 = vpop.f32.mrf.mxu0  ;;  %4117 = vmatpush.bf16.msra.mxu2 %v6040_v41  ;;  %v6616_v38 = vor.u32 %v7417_v29, %v6613_v2 }
 0x2bc   : > { %v3931_v62 = vpop.f32.mrf.mxu1  ;;  %4231 = vmatpush.bf16.msra.mxu1 %v6616_v38 }
 0x2bd   : > { %7047 = vmatmul.msk.bf16.gmra.mxu2 %vm2953_vm0, %v11459_v51  ;;  %4054 = vmatmul.bf16.gmra.mxu0 %v7975_v14 }
 0x2be   : > { %4016 = vmatmul.bf16.gmra.mxu3 %v11432_v3 }
 0x2bf   : > { %4092 = vmatmul.bf16.gmra.mxu1 %v8113_v43  ;;  %v11460_v43 = vld [vmem:[#allocation46_spill] sm:$0xff] }
 0x2c0   : > { %v3817_v63 = vpop.f32.mrf.mxu2 }
 0x2c1   : > { %v3818_v33 = vadd.f32 %v3817_v63, %v9520_v46  ;;  %v3855_v32 = vpop.f32.mrf.mxu3  ;;  %v6424_v46 = vor.u32 %v7369_v61, %v6421_v9  ;;  %v6205_v63 = vld [vmem:[%s11246_s1 + $0x650] sm:$0xf0] }
 0x2c2   : > { %v3895_v10 = vpop.f32.mrf.mxu0 }
 0x2c3   : > { %v3856_v47 = vadd.f32 %v3855_v32, %v3818_v33  ;;  %4193 = vmatpush.bf16.msra.mxu0 %v6424_v46 }
 0x2c4   : > { %v3933_v17 = vpop.f32.mrf.mxu1 }
 0x2c5   : > { %v3894_v12 = vadd.f32 %v3893_v21, %v3856_v47  ;;  %v7267_v21 = vld [vmem:[%s11246_s1 + $0x4bc] sm:$0xf]  ;;  %v6208_v47 = vor.u32 %v7315_v35, %v6205_v63 }
 0x2c6   : > { %v6016_v41 = vor.u32 %v7267_v21, %v6013_v23 }
 0x2c7   : > { %v9766_v33 = vadd.f32 %v3931_v62, %v3894_v12  ;;  %4156 = vmatpush.bf16.msra.mxu3 %v6208_v47  ;;  %v6397_v62 = vld [vmem:[%s11246_s1 + $0x7d0] sm:$0xf0] }
 0x2c8   : > { %v3819_v32 = vpop.f32.mrf.mxu2  ;;  %4118 = vmatpush.bf16.msra.mxu2 %v6016_v41 }
 0x2c9   : > { %v3820_v61 = vadd.f32 %v3819_v32, %v9533_v56  ;;  %v3857_v9 = vpop.f32.mrf.mxu3  ;;  %v7363_v56 = vld [vmem:[%s11246_s1 + $0x7bc] sm:$0xf] }
 0x2ca   : > { %v3898_v29 = vpop.f32.mrf.mxu0  ;;  %v6400_v12 = vor.u32 %v7363_v56, %v6397_v62 }
 0x2cb   : > { %v3858_v2 = vadd.f32 %v3857_v9, %v3820_v61  ;;  %v7411_v61 = vld [vmem:[%s11246_s1 + $0x93c] sm:$0xf]  ;;  %v6589_v9 = vld [vmem:[%s11246_s1 + $0x950] sm:$0xf0] }
 0x2cc   : > { %v3936_v21 = vpop.f32.mrf.mxu1  ;;  %4194 = vmatpush.bf16.msra.mxu0 %v6400_v12 }
 0x2cd   : > { %v3896_v23 = vadd.f32 %v3895_v10, %v3858_v2  ;;  %7048 = vmatmul.msk.bf16.gmra.mxu2 %vm2953_vm0, %v11460_v43  ;;  %4059 = vmatmul.bf16.gmra.mxu0 %v7744_v8  ;;  %v6592_v2 = vor.u32 %v7411_v61, %v6589_v9  ;;  %v6373_v61 = vld [vmem:[%s11246_s1 + $0x7a0] sm:$0xf0] }
 0x2ce   : > { %4021 = vmatmul.bf16.gmra.mxu3 %v11433_v36 }
 0x2cf   : > { %4097 = vmatmul.bf16.gmra.mxu1 %v8151_v16  ;;  %v9780_v46 = vadd.f32 %v3933_v17, %v3896_v23  ;;  %v7261_v17 = vld [vmem:[%s11246_s1 + $0x48c] sm:$0xf]  ;;  %v6181_v23 = vld [vmem:[%s11246_s1 + $0x620] sm:$0xf0] }
 0x2d0   : > { %v3822_v10 = vpop.f32.mrf.mxu2  ;;  %4232 = vmatpush.bf16.msra.mxu1 %v6592_v2 }
 0x2d1   : > { %v3823_v38 = vadd.f32 %v3822_v10, %v9548_v4  ;;  %v3860_v41 = vpop.f32.mrf.mxu3  ;;  %v5989_v4 = vld [vmem:[%s11246_s1 + $0x4a0] sm:$0xf0] }
 0x2d2   : > { %v3900_v35 = vpop.f32.mrf.mxu0  ;;  %v5992_v56 = vor.u32 %v7261_v17, %v5989_v4 }
 0x2d3   : > { %v3861_v63 = vadd.f32 %v3860_v41, %v3823_v38 }
 0x2d4   : > { %v3938_v32 = vpop.f32.mrf.mxu1  ;;  %4119 = vmatpush.bf16.msra.mxu2 %v5992_v56  ;;  %v7495_v56 = vld [vmem:[%s11246_s1 + $0xbdc] sm:$0xf] }
 0x2d5   : > { %v3899_v47 = vadd.f32 %v3898_v29, %v3861_v63  ;;  %v7309_v29 = vld [vmem:[%s11246_s1 + $0x60c] sm:$0xf] }
 0x2d6   : > { %v6184_v62 = vor.u32 %v7309_v29, %v6181_v23  ;;  %v7357_v63 = vld [vmem:[%s11246_s1 + $0x78c] sm:$0xf]  ;;  %v11461_v23 = vld [vmem:[#allocation49_spill] sm:$0xff] }
 0x2d7   : > { %v9801_v12 = vadd.f32 %v3936_v21, %v3899_v47  ;;  %v6376_v17 = vor.u32 %v7357_v63, %v6373_v61  ;;  %v7405_v47 = vld [vmem:[%s11246_s1 + $0x90c] sm:$0xf] }
 0x2d8   : > { %v3824_v10 = vpop.f32.mrf.mxu2  ;;  %4157 = vmatpush.bf16.msra.mxu3 %v6184_v62  ;;  %v6925_v62 = vld [vmem:[%s11246_s1 + $0xbf0] sm:$0xf0] }
 0x2d9   : > { %v3825_v38 = vadd.f32 %v3824_v10, %v9579_v11  ;;  %v3862_v41 = vpop.f32.mrf.mxu3  ;;  %v6565_v11 = vld [vmem:[%s11246_s1 + $0x920] sm:$0xf0]  ;;  %4195 = vmatpush.bf16.msra.mxu0 %v6376_v17  ;;  %v6928_v10 = vor.u32 %v7495_v56, %v6925_v62 }
 0x2da   : > { %v3903_v9 = vpop.f32.mrf.mxu0  ;;  %v6568_v2 = vor.u32 %v7405_v47, %v6565_v11 }
 0x2db   : > { %v3863_v4 = vadd.f32 %v3862_v41, %v3825_v38  ;;  %v7021_v38 = vld [vmem:[%s11246_s1 + $0xcb0] sm:$0xf0]  ;;  %4264 = vmatpush.bf16.msrb.mxu2 %v6928_v10 }
 0x2dc   : > { %v3941_v21 = vpop.f32.mrf.mxu1  ;;  %4233 = vmatpush.bf16.msra.mxu1 %v6568_v2  ;;  %v5587_v2 = vld [vmem:[%s11246_s1 + $0x160] sm:$0xf] }
 0x2dd   : > { %v3901_v29 = vadd.f32 %v3900_v35, %v3863_v4  ;;  %7049 = vmatmul.msk.bf16.gmra.mxu2 %vm2953_vm0, %v11461_v23  ;;  %4064 = vmatmul.bf16.gmra.mxu0 %v7860_v6  ;;  %v7519_v35 = vld [vmem:[%s11246_s1 + $0xc9c] sm:$0xf] }
 0x2de   : > { %4026 = vmatmul.bf16.gmra.mxu3 %v11434_v1  ;;  %v7024_v61 = vor.u32 %v7519_v35, %v7021_v38 }
 0x2df   : > { %4102 = vmatmul.bf16.gmra.mxu1 %v8195_v48  ;;  %v9833_v41 = vadd.f32 %v3938_v32, %v3901_v29  ;;  %v7163_v32 = vld [vmem:[%s11246_s1 + $0x174] sm:$0xf0] }
 0x2e0   : > { %v3827_v63 = vpop.f32.mrf.mxu2  ;;  %4306 = vmatpush.bf16.msrb.mxu3 %v7024_v61  ;;  %v5588_v29 = vor.u32 %v7163_v32, %v5587_v2  ;;  %v11462_v61 = vld [vmem:[#allocation52_spill] sm:$0xff] }
 0x2e1   : > { %v3828_v17 = vadd.f32 %v3827_v63, %v9588_v52  ;;  %v3865_v4 = vpop.f32.mrf.mxu3 }
 0x2e2   : > { %v3905_v47 = vpop.f32.mrf.mxu0  ;;  %4340 = vmatpush.bf16.msrb.mxu0 %v5588_v29 }
 0x2e3   : > { %v3866_v11 = vadd.f32 %v3865_v4, %v3828_v17  ;;  %v5779_v17 = vld [vmem:[%s11246_s1 + $0x2e0] sm:$0xf]  ;;  %v6901_v4 = vld [vmem:[%s11246_s1 + $0xbc0] sm:$0xf0] }
 0x2e4   : > { %v3943_v48 = vpop.f32.mrf.mxu1 }
 0x2e5   : > { %v3904_v16 = vadd.f32 %v3903_v9, %v3866_v11 }
 0x2e7   : > { %v9842_v56 = vadd.f32 %v3941_v21, %v3904_v16  ;;  %v7211_v16 = vld [vmem:[%s11246_s1 + $0x2f4] sm:$0xf0] }
 0x2e8   : > { %v3829_v62 = vpop.f32.mrf.mxu2  ;;  %v5780_v21 = vor.u32 %v7211_v16, %v5779_v17  ;;  %v5563_v17 = vld [vmem:[%s11246_s1 + $0x130] sm:$0xf]  ;;  %v7157_v16 = vld [vmem:[%s11246_s1 + $0x144] sm:$0xf0] }
 0x2e9   : > { %v3830_v52 = vadd.f32 %v3829_v62, %v9613_v24  ;;  %v3867_v35 = vpop.f32.mrf.mxu3  ;;  %v7489_v24 = vld [vmem:[%s11246_s1 + $0xbac] sm:$0xf] }
 0x2ea   : > { %v3908_v10 = vpop.f32.mrf.mxu0  ;;  %4378 = vmatpush.bf16.msrb.mxu1 %v5780_v21 }
 0x2eb   : > { %v3868_v38 = vadd.f32 %v3867_v35, %v3830_v52 }
 0x2ec   : > { %v3946_v63 = vpop.f32.mrf.mxu1 }
 0x2ed   : > { %v3906_v9 = vadd.f32 %v3905_v47, %v3868_v38  ;;  %7050 = vmatmul.msk.bf16.gmra.mxu2 %vm2953_vm0, %v11462_v61  ;;  %4069 = vmatmul.bf16.gmra.mxu0 %v7973_v13  ;;  %v6904_v47 = vor.u32 %v7489_v24, %v6901_v4  ;;  %v6877_v24 = vld [vmem:[%s11246_s1 + $0xb90] sm:$0xf0] }
 0x2ee   : > { %4031 = vmatmul.bf16.gmra.mxu3 %v11435_v53 }
 0x2ef   : > { %4107 = vmatmul.bf16.gmra.mxu1 %v8238_v28  ;;  %v9862_v11 = vadd.f32 %v3943_v48, %v3906_v9  ;;  %4265 = vmatpush.bf16.msrb.mxu2 %v6904_v47  ;;  %v5755_v48 = vld [vmem:[%s11246_s1 + $0x2b0] sm:$0xf]  ;;  %v5564_v9 = vor.u32 %v7157_v16, %v5563_v17  ;;  %v7513_v47 = vld [vmem:[%s11246_s1 + $0xc6c] sm:$0xf] }
 0x2f0   : > { %v3832_v2 = vpop.f32.mrf.mxu2  ;;  %v11463_v28 = vld [vmem:[#allocation16_spill] sm:$0xff] }
 0x2f1   : > { %v3833_v32 = vadd.f32 %v3832_v2, %v9640_v19  ;;  %v3870_v29 = vpop.f32.mrf.mxu3  ;;  %v7205_v19 = vld [vmem:[%s11246_s1 + $0x2c4] sm:$0xf0]  ;;  %v6997_v2 = vld [vmem:[%s11246_s1 + $0xc80] sm:$0xf0]  ;;  %4341 = vmatpush.bf16.msrb.mxu0 %v5564_v9 }
 0x2f2   : > { %v3910_v62 = vpop.f32.mrf.mxu0  ;;  %v5756_v21 = vor.u32 %v7205_v19, %v5755_v48 }
 0x2f3   : > { %v3871_v52 = vadd.f32 %v3870_v29, %v3833_v32 }
 0x2f4   : > { %v3948_v35 = vpop.f32.mrf.mxu1  ;;  %4379 = vmatpush.bf16.msrb.mxu1 %v5756_v21 }
 0x2f5   : > { %v3909_v38 = vadd.f32 %v3908_v10, %v3871_v52  ;;  %v7483_v10 = vld [vmem:[%s11246_s1 + $0xb7c] sm:$0xf]  ;;  %v7000_v52 = vor.u32 %v7513_v47, %v6997_v2 }
 0x2f6   : > { %v6880_v4 = vor.u32 %v7483_v10, %v6877_v24 }
 0x2f7   : > { %v9889_v32 = vadd.f32 %v3946_v63, %v3909_v38  ;;  %4307 = vmatpush.bf16.msrb.mxu3 %v7000_v52  ;;  %v7151_v63 = vld [vmem:[%s11246_s1 + $0x114] sm:$0xf0]  ;;  %v5731_v52 = vld [vmem:[%s11246_s1 + $0x280] sm:$0xf] }
 0x2f8   : > { %v3834_v29 = vpop.f32.mrf.mxu2  ;;  %4266 = vmatpush.bf16.msrb.mxu2 %v6880_v4 }
 0x2f9   : > { %v3835_v17 = vadd.f32 %v3834_v29, %v9654_v44  ;;  %v3872_v16 = vpop.f32.mrf.mxu3  ;;  %v5539_v44 = vld [vmem:[%s11246_s1 + $0x100] sm:$0xf] }
 0x2fa   : > { %v3913_v48 = vpop.f32.mrf.mxu0  ;;  %v5540_v38 = vor.u32 %v7151_v63, %v5539_v44 }
 0x2fb   : > { %v3873_v19 = vadd.f32 %v3872_v16, %v3835_v17  ;;  %v7199_v17 = vld [vmem:[%s11246_s1 + $0x294] sm:$0xf0] }
 0x2fc   : > { %v3951_v10 = vpop.f32.mrf.mxu1  ;;  %4342 = vmatpush.bf16.msrb.mxu0 %v5540_v38 }
 0x2fd   : > { %v3911_v24 = vadd.f32 %v3910_v62, %v3873_v19  ;;  %4120 = vmatmul.bf16.vlgmr.msra.gmra.mxu2 %v11463_v28  ;;  %4196 = vmatmul.bf16.vlgmr.msra.gmra.mxu0 %v11438_v15  ;;  %v5732_v19 = vor.u32 %v7199_v17, %v5731_v52  ;;  %v11464_v17 = vld [vmem:[#allocation20_spill] sm:$0xff] }
 0x2fe   : > { %4158 = vmatmul.bf16.vlgmr.msra.gmra.mxu3 %v11436_v22 }
 0x2ff   : > { %4234 = vmatmul.bf16.vlgmr.msra.gmra.mxu1 %v11437_v39  ;;  %v9902_v9 = vadd.f32 %v3948_v35, %v3911_v24  ;;  %v7477_v35 = vld [vmem:[%s11246_s1 + $0xb4c] sm:$0xf] }
 0x300   : > { %v3837_v62 = vpop.f32.mrf.mxu2  ;;  %4380 = vmatpush.bf16.msrb.mxu1 %v5732_v19  ;;  %v7471_v19 = vld [vmem:[%s11246_s1 + $0xb1c] sm:$0xf] }
 0x301   : > { %v3838_v21 = vadd.f32 %v3837_v62, %v9675_v55  ;;  %v3875_v4 = vpop.f32.mrf.mxu3  ;;  %v6853_v55 = vld [vmem:[%s11246_s1 + $0xb60] sm:$0xf0] }
 0x302   : > { %v3915_v47 = vpop.f32.mrf.mxu0  ;;  %v6856_v24 = vor.u32 %v7477_v35, %v6853_v55  ;;  %v7193_v35 = vld [vmem:[%s11246_s1 + $0x264] sm:$0xf0]  ;;  %v7507_v55 = vld [vmem:[%s11246_s1 + $0xc3c] sm:$0xf] }
 0x303   : > { %v3876_v2 = vadd.f32 %v3875_v4, %v3838_v21 }
 0x304   : > { %v3953_v29 = vpop.f32.mrf.mxu1  ;;  %4267 = vmatpush.bf16.msrb.mxu2 %v6856_v24 }
 0x305   : > { %v3914_v16 = vadd.f32 %v3913_v48, %v3876_v2  ;;  %v5515_v48 = vld [vmem:[%s11246_s1 + $0xd0] sm:$0xf]  ;;  %v7145_v2 = vld [vmem:[%s11246_s1 + $0xe4] sm:$0xf0] }
 0x307   : > { %v9917_v44 = vadd.f32 %v3951_v10, %v3914_v16  ;;  %v5707_v10 = vld [vmem:[%s11246_s1 + $0x250] sm:$0xf] }
 0x308   : > { %v3839_v63 = vpop.f32.mrf.mxu2  ;;  %v5708_v16 = vor.u32 %v7193_v35, %v5707_v10 }
 0x309   : > { %v3840_v38 = vadd.f32 %v3839_v63, %v9707_v26  ;;  %v3877_v62 = vpop.f32.mrf.mxu3  ;;  %v5516_v26 = vor.u32 %v7145_v2, %v5515_v48  ;;  %v6973_v63 = vld [vmem:[%s11246_s1 + $0xc50] sm:$0xf0] }
 0x30a   : > { %v3918_v21 = vpop.f32.mrf.mxu0  ;;  %4381 = vmatpush.bf16.msrb.mxu1 %v5708_v16 }
 0x30b   : > { %v3878_v4 = vadd.f32 %v3877_v62, %v3840_v38  ;;  %4343 = vmatpush.bf16.msrb.mxu0 %v5516_v26  ;;  %v5491_v26 = vld [vmem:[%s11246_s1 + $0xa0] sm:$0xf] }
 0x30c   : > { %v3956_v39 = vpop.f32.mrf.mxu1 }
 0x30d   : > { %v3916_v52 = vadd.f32 %v3915_v47, %v3878_v4  ;;  %4125 = vmatmul.bf16.gmra.mxu2 %v11464_v17  ;;  %4201 = vmatmul.bf16.gmra.mxu0 %v11444_v37  ;;  %v6829_v47 = vld [vmem:[%s11246_s1 + $0xb30] sm:$0xf0]  ;;  %v6976_v4 = vor.u32 %v7507_v55, %v6973_v63  ;;  %v7187_v63 = vld [vmem:[%s11246_s1 + $0x234] sm:$0xf0] }
 0x30e   : > { %4163 = vmatmul.bf16.gmra.mxu3 %v11442_v59  ;;  %v6832_v24 = vor.u32 %v7471_v19, %v6829_v47 }
 0x30f   : > { %4239 = vmatmul.bf16.gmra.mxu1 %v11443_v20  ;;  %v9948_v38 = vadd.f32 %v3953_v29, %v3916_v52  ;;  %4308 = vmatpush.bf16.msrb.mxu3 %v6976_v4  ;;  %v7139_v29 = vld [vmem:[%s11246_s1 + $0xb4] sm:$0xf0]  ;;  %v9975_v4 = vperm.slane %v9476_v27, 3  ;;  %v5467_v27 = vld [vmem:[%s11246_s1 + $0x70] sm:$0xf] }
 0x310   : > { %v3842_v62 = vpop.f32.mrf.mxu2  ;;  %4268 = vmatpush.bf16.msrb.mxu2 %v6832_v24  ;;  %v5492_v19 = vor.u32 %v7139_v29, %v5491_v26 }
 0x311   : > { %v3843_v48 = vadd.f32 %v3842_v62, %v9716_v34  ;;  %v3880_v2 = vpop.f32.mrf.mxu3  ;;  %v6805_v62 = vld [vmem:[%s11246_s1 + $0xb00] sm:$0xf0] }
 0x312   : > { %v3920_v10 = vpop.f32.mrf.mxu0  ;;  %4344 = vmatpush.bf16.msrb.mxu0 %v5492_v19 }
 0x313   : > { %v3881_v35 = vadd.f32 %v3880_v2, %v3843_v48 }
 0x314   : > { %v3958_v20 = vpop.f32.mrf.mxu1 }
 0x315   : > { %v3919_v52 = vadd.f32 %v3918_v21, %v3881_v35  ;;  %v5683_v20 = vld [vmem:[%s11246_s1 + $0x220] sm:$0xf]  ;;  %v7465_v21 = vld [vmem:[%s11246_s1 + $0xaec] sm:$0xf] }
 0x316   : > { %v6808_v48 = vor.u32 %v7465_v21, %v6805_v62  ;;  %v7501_v62 = vld [vmem:[%s11246_s1 + $0xc0c] sm:$0xf] }
 0x317   : > { %v9957_v16 = vadd.f32 %v3956_v39, %v3919_v52  ;;  %v5684_v39 = vor.u32 %v7187_v63, %v5683_v20  ;;  %v7181_v20 = vld [vmem:[%s11246_s1 + $0x204] sm:$0xf0]  ;;  %v6781_v63 = vld [vmem:[%s11246_s1 + $0xad0] sm:$0xf0] }
 0x318   : > { %v3844_v34 = vpop.f32.mrf.mxu2  ;;  %4269 = vmatpush.bf16.msrb.mxu2 %v6808_v48  ;;  %v6949_v48 = vld [vmem:[%s11246_s1 + $0xc20] sm:$0xf0] }
 0x319   : > { %v3882_v47 = vpop.f32.mrf.mxu3  ;;  %4382 = vmatpush.bf16.msrb.mxu1 %v5684_v39  ;;  %v7133_v34 = vld [vmem:[%s11246_s1 + $0x84] sm:$0xf0] }
 0x31a   : > { %v4045_v55 = vpop.f32.mrf.mxu0  ;;  %v5659_v47 = vld [vmem:[%s11246_s1 + $0x1f0] sm:$0xf] }
 0x31b   : > { %v5660_v21 = vor.u32 %v7181_v20, %v5659_v47 }
 0x31c   : > { %v4083_v24 = vpop.f32.mrf.mxu1 }
 0x31d   : > { %4130 = vmatmul.bf16.gmra.mxu2 %v8117_v45  ;;  %4206 = vmatmul.bf16.gmra.mxu0 %v11450_v57 }
 0x31e   : > { %4168 = vmatmul.bf16.gmra.mxu3 %v11448_v30  ;;  %4383 = vmatpush.bf16.msrb.mxu1 %v5660_v21 }
 0x31f   : > { %4244 = vmatmul.bf16.gmra.mxu1 %v11449_v42 }
 0x320   : > { %v3969_v2 = vpop.f32.mrf.mxu2 }
 0x321   : > { %v9979_v10 = vadd.f32 %v3969_v2, %v9766_v33  ;;  %v4007_v35 = vpop.f32.mrf.mxu3  ;;  %v5468_v33 = vor.u32 %v7133_v34, %v5467_v27 }
 0x322   : > { %v4008_v26 = vadd.f32 %v4007_v35, %v9975_v4  ;;  %v4047_v29 = vpop.f32.mrf.mxu0  ;;  %v6952_v35 = vor.u32 %v7501_v62, %v6949_v48 }
 0x323   : > { %4345 = vmatpush.bf16.msrb.mxu0 %v5468_v33 }
 0x324   : > { %v4085_v52 = vpop.f32.mrf.mxu1  ;;  %v4046_v19 = vadd.f32 %v4045_v55, %v4008_v26  ;;  %v7459_v55 = vld [vmem:[%s11246_s1 + $0xabc] sm:$0xf]  ;;  %4309 = vmatpush.bf16.msrb.mxu3 %v6952_v35 }
 0x325   : > { %v6784_v39 = vor.u32 %v7459_v55, %v6781_v63 }
 0x326   : > { %v10006_v2 = vadd.f32 %v4083_v24, %v4046_v19  ;;  %v7127_v24 = vld [vmem:[%s11246_s1 + $0x54] sm:$0xf0] }
 0x327   : > { %4270 = vmatpush.bf16.msrb.mxu2 %v6784_v39 }
 0x328   : > { %v3971_v26 = vpop.f32.mrf.mxu2 }
 0x329   : > { %v10009_v27 = vadd.f32 %v3971_v26, %v9780_v46  ;;  %v4009_v34 = vpop.f32.mrf.mxu3  ;;  %v5443_v46 = vld [vmem:[%s11246_s1 + $0x40] sm:$0xf] }
 0x32a   : > { %v4010_v47 = vadd.f32 %v4009_v34, %v9975_v4  ;;  %v4050_v20 = vpop.f32.mrf.mxu0  ;;  %v5444_v33 = vor.u32 %v7127_v24, %v5443_v46  ;;  %v5635_v34 = vld [vmem:[%s11246_s1 + $0x1c0] sm:$0xf] }
 0x32c   : > { %v4088_v55 = vpop.f32.mrf.mxu1  ;;  %v4048_v63 = vadd.f32 %v4047_v29, %v4010_v47  ;;  %4346 = vmatpush.bf16.msrb.mxu0 %v5444_v33 }
 0x32d   : > { %4135 = vmatmul.bf16.gmra.mxu2 %v8155_v18  ;;  %4211 = vmatmul.bf16.gmra.mxu0 %v11427_v40 }
 0x32e   : > { %4173 = vmatmul.bf16.gmra.mxu3 %v11452_v49  ;;  %v10022_v19 = vadd.f32 %v4085_v52, %v4048_v63  ;;  %v7175_v52 = vld [vmem:[%s11246_s1 + $0x1d4] sm:$0xf0]  ;;  %v6757_v63 = vld [vmem:[%s11246_s1 + $0xaa0] sm:$0xf0] }
 0x32f   : > { %4249 = vmatmul.bf16.gmra.mxu1 %v8482_v60  ;;  %v5636_v47 = vor.u32 %v7175_v52, %v5635_v34 }
 0x330   : > { %v3974_v29 = vpop.f32.mrf.mxu2 }
 0x331   : > { %v10025_v21 = vadd.f32 %v3974_v29, %v9801_v12  ;;  %v4012_v39 = vpop.f32.mrf.mxu3  ;;  %v7453_v12 = vld [vmem:[%s11246_s1 + $0xa8c] sm:$0xf]  ;;  %4384 = vmatpush.bf16.msrb.mxu1 %v5636_v47 }
 0x332   : > { %v4013_v62 = vadd.f32 %v4012_v39, %v9975_v4  ;;  %v4052_v48 = vpop.f32.mrf.mxu0  ;;  %v6760_v46 = vor.u32 %v7453_v12, %v6757_v63  ;;  %v5419_v39 = vld [vmem:[%s11246_s1 + $0x10] sm:$0xf] }
 0x333   : > { %v5611_v12 = vld [vmem:[%s11246_s1 + $0x190] sm:$0xf] }
 0x334   : > { %v4090_v35 = vpop.f32.mrf.mxu1  ;;  %v4051_v26 = vadd.f32 %v4050_v20, %v4013_v62  ;;  %4271 = vmatpush.bf16.msrb.mxu2 %v6760_v46  ;;  %v7121_v62 = vld [vmem:[%s11246_s1 + $0x24] sm:$0xf0]  ;;  %v5971_v46 = vld [vmem:[%s11246_s1 + $0x460] sm:$0xf] }
 0x336   : > { %v10040_v24 = vadd.f32 %v4088_v55, %v4051_v26  ;;  %v5420_v55 = vor.u32 %v7121_v62, %v5419_v39  ;;  %v7307_v62 = vld [vmem:[%s11246_s1 + $0x5f4] sm:$0xf0] }
 0x338   : > { %v3976_v20 = vpop.f32.mrf.mxu2  ;;  %4347 = vmatpush.bf16.msrb.mxu0 %v5420_v55 }
 0x339   : > { %v10043_v33 = vadd.f32 %v3976_v20, %v9833_v41  ;;  %v4014_v29 = vpop.f32.mrf.mxu3  ;;  %v7169_v41 = vld [vmem:[%s11246_s1 + $0x1a4] sm:$0xf0]  ;;  %v7259_v20 = vld [vmem:[%s11246_s1 + $0x474] sm:$0xf0] }
 0x33a   : > { %v4015_v34 = vadd.f32 %v4014_v29, %v9975_v4  ;;  %v4055_v52 = vpop.f32.mrf.mxu0  ;;  %v5612_v63 = vor.u32 %v7169_v41, %v5611_v12  ;;  %v5972_v39 = vor.u32 %v7259_v20, %v5971_v46 }
 0x33c   : > { %v4093_v26 = vpop.f32.mrf.mxu1  ;;  %v4053_v47 = vadd.f32 %v4052_v48, %v4015_v34  ;;  %v6163_v48 = vld [vmem:[%s11246_s1 + $0x5e0] sm:$0xf]  ;;  %4385 = vmatpush.bf16.msrb.mxu1 %v5612_v63  ;;  %4416 = vmatpush.bf16.msra.mxu2 %v5972_v39  ;;  %v7355_v63 = vld [vmem:[%s11246_s1 + $0x774] sm:$0xf0] }
 0x33d   : > { %4140 = vmatmul.bf16.gmra.mxu2 %v8199_v50  ;;  %4216 = vmatmul.bf16.gmra.mxu0 %v11428_v58  ;;  %v6164_v55 = vor.u32 %v7307_v62, %v6163_v48 }
 0x33e   : > { %4178 = vmatmul.bf16.gmra.mxu3 %v11453_v25  ;;  %v10071_v29 = vadd.f32 %v4090_v35, %v4053_v47  ;;  %v6355_v47 = vld [vmem:[%s11246_s1 + $0x760] sm:$0xf] }
 0x33f   : > { %4254 = vmatmul.bf16.gmra.mxu1 %v8529_v0  ;;  %4454 = vmatpush.bf16.msra.mxu3 %v6164_v55  ;;  %v6356_v46 = vor.u32 %v7355_v63, %v6355_v47  ;;  %v6547_v55 = vld [vmem:[%s11246_s1 + $0x8e0] sm:$0xf]  ;;  %v6139_v47 = vld [vmem:[%s11246_s1 + $0x5b0] sm:$0xf]  ;;  %v7301_v63 = vld [vmem:[%s11246_s1 + $0x5c4] sm:$0xf0] }
 0x340   : > { %v3979_v34 = vpop.f32.mrf.mxu2 }
 0x341   : > { %v10077_v12 = vadd.f32 %v3979_v34, %v9842_v56  ;;  %v4017_v41 = vpop.f32.mrf.mxu3  ;;  %4492 = vmatpush.bf16.msra.mxu0 %v6356_v46  ;;  %v11468_v46 = vld [vmem:[#allocation33_spill] sm:$0xff] }
 0x342   : > { %v4018_v0 = vadd.f32 %v4017_v41, %v9975_v4  ;;  %v4057_v60 = vpop.f32.mrf.mxu0  ;;  %v5947_v41 = vld [vmem:[%s11246_s1 + $0x430] sm:$0xf] }
 0x343   : > { %11465 = vst [vmem:[#allocation7_spill] sm:$0xff] %v10077_v12 }
 0x344   : > { %v4095_v42 = vpop.f32.mrf.mxu1  ;;  %v4056_v35 = vadd.f32 %v4055_v52, %v4018_v0 }
 0x346   : > { %v10086_v20 = vadd.f32 %v4093_v26, %v4056_v35  ;;  %v7403_v26 = vld [vmem:[%s11246_s1 + $0x8f4] sm:$0xf0] }
 0x347   : > { %v6548_v35 = vor.u32 %v7403_v26, %v6547_v55 }
 0x348   : > { %v3981_v56 = vpop.f32.mrf.mxu2 }
 0x349   : > { %v10089_v48 = vadd.f32 %v3981_v56, %v9862_v11  ;;  %v4019_v39 = vpop.f32.mrf.mxu3  ;;  %v11467_v11 = vld [vmem:[#allocation35_spill] sm:$0xff]  ;;  %4530 = vmatpush.bf16.msra.mxu1 %v6548_v35 }
 0x34a   : > { %v4020_v62 = vadd.f32 %v4019_v39, %v9975_v4  ;;  %v4060_v0 = vpop.f32.mrf.mxu0  ;;  %v11469_v56 = vld [vmem:[#allocation51_spill] sm:$0xff] }
 0x34b   : > { %11466 = vst [vmem:[#allocation11_spill] sm:$0xff] %v10089_v48 }
 0x34c   : > { %v4098_v52 = vpop.f32.mrf.mxu1  ;;  %v4058_v34 = vadd.f32 %v4057_v60, %v4020_v62  ;;  %v7253_v60 = vld [vmem:[%s11246_s1 + $0x444] sm:$0xf0]  ;;  %v6140_v62 = vor.u32 %v7301_v63, %v6139_v47  ;;  %v6115_v47 = vld [vmem:[%s11246_s1 + $0x580] sm:$0xf]  ;;  %v7295_v63 = vld [vmem:[%s11246_s1 + $0x594] sm:$0xf0] }
 0x34d   : > { %4145 = vmatmul.bf16.gmra.mxu2 %v8242_v31  ;;  %4221 = vmatmul.bf16.gmra.mxu0 %v11467_v11  ;;  %v5948_v39 = vor.u32 %v7253_v60, %v5947_v41  ;;  %v6331_v41 = vld [vmem:[%s11246_s1 + $0x730] sm:$0xf] }
 0x34e   : > { %4183 = vmatmul.bf16.gmra.mxu3 %v11468_v46  ;;  %v10114_v11 = vadd.f32 %v4095_v42, %v4058_v34  ;;  %v7349_v42 = vld [vmem:[%s11246_s1 + $0x744] sm:$0xf0]  ;;  %v6523_v34 = vld [vmem:[%s11246_s1 + $0x8b0] sm:$0xf] }
 0x34f   : > { %4259 = vmatmul.bf16.gmra.mxu1 %v11469_v56  ;;  %4417 = vmatpush.bf16.msra.mxu2 %v5948_v39  ;;  %v11472_v56 = vld [vmem:[#allocation38_spill] sm:$0xff] }
 0x350   : > { %v3984_v55 = vpop.f32.mrf.mxu2  ;;  %4455 = vmatpush.bf16.msra.mxu3 %v6140_v62  ;;  %v6116_v62 = vor.u32 %v7295_v63, %v6115_v47 }
 0x351   : > { %v10117_v26 = vadd.f32 %v3984_v55, %v9889_v32  ;;  %v4022_v31 = vpop.f32.mrf.mxu3  ;;  %v6332_v32 = vor.u32 %v7349_v42, %v6331_v41 }
 0x352   : > { %v4023_v48 = vadd.f32 %v4022_v31, %v9975_v4  ;;  %v4062_v12 = vpop.f32.mrf.mxu0  ;;  %v7397_v31 = vld [vmem:[%s11246_s1 + $0x8c4] sm:$0xf0] }
 0x353   : > { %11470 = vst [vmem:[#allocation2_spill] sm:$0xff] %v10117_v26  ;;  %v6524_v35 = vor.u32 %v7397_v31, %v6523_v34  ;;  %4493 = vmatpush.bf16.msra.mxu0 %v6332_v32  ;;  %v11473_v26 = vld [vmem:[#allocation3_spill] sm:$0xff]  ;;  %v7343_v32 = vld [vmem:[%s11246_s1 + $0x714] sm:$0xf0] }
 0x354   : > { %v4100_v58 = vpop.f32.mrf.mxu1  ;;  %v4061_v50 = vadd.f32 %v4060_v0, %v4023_v48  ;;  %v5923_v48 = vld [vmem:[%s11246_s1 + $0x400] sm:$0xf]  ;;  %v7247_v0 = vld [vmem:[%s11246_s1 + $0x414] sm:$0xf0]  ;;  %4456 = vmatpush.bf16.msra.mxu3 %v6116_v62 }
 0x355   : > { %v5924_v60 = vor.u32 %v7247_v0, %v5923_v48  ;;  %4531 = vmatpush.bf16.msra.mxu1 %v6524_v35 }
 0x356   : > { %v10144_v39 = vadd.f32 %v4098_v52, %v4061_v50  ;;  %v11474_v50 = vld [vmem:[#allocation37_spill] sm:$0xff] }
 0x357   : > { %4418 = vmatpush.bf16.msra.mxu2 %v5924_v60  ;;  %v11475_v52 = vld [vmem:[#allocation5_spill] sm:$0xff] }
 0x358   : > { %v3986_v55 = vpop.f32.mrf.mxu2 }
 0x359   : > { %v10147_v41 = vadd.f32 %v3986_v55, %v9902_v9  ;;  %v4024_v42 = vpop.f32.mrf.mxu3  ;;  %v6307_v9 = vld [vmem:[%s11246_s1 + $0x700] sm:$0xf] }
 0x35a   : > { %v4025_v34 = vadd.f32 %v4024_v42, %v9975_v4  ;;  %v4065_v31 = vpop.f32.mrf.mxu0 }
 0x35b   : > { %11471 = vst [vmem:[#allocation10_spill] sm:$0xff] %v10147_v41  ;;  %v11477_v41 = vld [vmem:[#allocation41_spill] sm:$0xff] }
 0x35c   : > { %v4103_v48 = vpop.f32.mrf.mxu1  ;;  %v4063_v0 = vadd.f32 %v4062_v12, %v4025_v34  ;;  %v6308_v12 = vor.u32 %v7343_v32, %v6307_v9  ;;  %v7241_v9 = vld [vmem:[%s11246_s1 + $0x3e4] sm:$0xf0] }
 0x35d   : > { %4272 = vmatmul.bf16.vlgmr.msrb.gmra.mxu2 %v11472_v56  ;;  %4348 = vmatmul.bf16.vlgmr.msrb.gmra.mxu0 %v11473_v26  ;;  %v7289_v32 = vld [vmem:[%s11246_s1 + $0x564] sm:$0xf0] }
 0x35e   : > { %7051 = vmatmul.msk.bf16.vlgmr.msrb.gmra.mxu3 %vm2953_vm0, %v11474_v50  ;;  %v10161_v35 = vadd.f32 %v4100_v58, %v4063_v0  ;;  %4494 = vmatpush.bf16.msra.mxu0 %v6308_v12  ;;  %v7391_v58 = vld [vmem:[%s11246_s1 + $0x894] sm:$0xf0] }
 0x35f   : > { %4386 = vmatmul.bf16.vlgmr.msrb.gmra.mxu1 %v11475_v52  ;;  %v6499_v52 = vld [vmem:[%s11246_s1 + $0x880] sm:$0xf] }
 0x360   : > { %v3989_v60 = vpop.f32.mrf.mxu2  ;;  %v6500_v0 = vor.u32 %v7391_v58, %v6499_v52 }
 0x361   : > { %v10164_v47 = vadd.f32 %v3989_v60, %v9917_v44  ;;  %v4027_v63 = vpop.f32.mrf.mxu3  ;;  %v5899_v44 = vld [vmem:[%s11246_s1 + $0x3d0] sm:$0xf] }
 0x362   : > { %v4028_v62 = vadd.f32 %v4027_v63, %v9975_v4  ;;  %v4067_v55 = vpop.f32.mrf.mxu0  ;;  %v5900_v60 = vor.u32 %v7241_v9, %v5899_v44  ;;  %4532 = vmatpush.bf16.msra.mxu1 %v6500_v0  ;;  %v5875_v44 = vld [vmem:[%s11246_s1 + $0x3a0] sm:$0xf]  ;;  %v7235_v0 = vld [vmem:[%s11246_s1 + $0x3b4] sm:$0xf0] }
 0x363   : > { %11476 = vst [vmem:[#allocation15_spill] sm:$0xff] %v10164_v47 }
 0x364   : > { %v4105_v42 = vpop.f32.mrf.mxu1  ;;  %v4066_v34 = vadd.f32 %v4065_v31, %v4028_v62  ;;  %v6091_v31 = vld [vmem:[%s11246_s1 + $0x550] sm:$0xf]  ;;  %4419 = vmatpush.bf16.msra.mxu2 %v5900_v60  ;;  %v6067_v60 = vld [vmem:[%s11246_s1 + $0x520] sm:$0xf] }
 0x365   : > { %v6092_v63 = vor.u32 %v7289_v32, %v6091_v31  ;;  %v5876_v32 = vor.u32 %v7235_v0, %v5875_v44  ;;  %v6259_v44 = vld [vmem:[%s11246_s1 + $0x6a0] sm:$0xf] }
 0x366   : > { %v10185_v12 = vadd.f32 %v4103_v48, %v4066_v34  ;;  %v6283_v48 = vld [vmem:[%s11246_s1 + $0x6d0] sm:$0xf] }
 0x367   : > { %4457 = vmatpush.bf16.msra.mxu3 %v6092_v63  ;;  %v6475_v34 = vld [vmem:[%s11246_s1 + $0x850] sm:$0xf]  ;;  %v7283_v63 = vld [vmem:[%s11246_s1 + $0x534] sm:$0xf0] }
 0x368   : > { %v3991_v62 = vpop.f32.mrf.mxu2  ;;  %4420 = vmatpush.bf16.msra.mxu2 %v5876_v32 }
 0x369   : > { %v10188_v52 = vadd.f32 %v3991_v62, %v9948_v38  ;;  %v4029_v58 = vpop.f32.mrf.mxu3  ;;  %v7337_v38 = vld [vmem:[%s11246_s1 + $0x6e4] sm:$0xf0] }
 0x36a   : > { %v4030_v47 = vadd.f32 %v4029_v58, %v9975_v4  ;;  %v4070_v26 = vpop.f32.mrf.mxu0  ;;  %v6068_v58 = vor.u32 %v7283_v63, %v6067_v60  ;;  %v11478_v63 = vld [vmem:[#allocation44_spill] sm:$0xff] }
 0x36c   : > { %v4108_v56 = vpop.f32.mrf.mxu1  ;;  %v4068_v50 = vadd.f32 %v4067_v55, %v4030_v47  ;;  %v6284_v47 = vor.u32 %v7337_v38, %v6283_v48  ;;  %v7385_v55 = vld [vmem:[%s11246_s1 + $0x864] sm:$0xf0]  ;;  %4458 = vmatpush.bf16.msra.mxu3 %v6068_v58 }
 0x36d   : > { %4277 = vmatmul.bf16.gmra.mxu2 %v11477_v41  ;;  %4353 = vmatmul.bf16.gmra.mxu0 %v11431_v54  ;;  %v6476_v31 = vor.u32 %v7385_v55, %v6475_v34 }
 0x36e   : > { %7052 = vmatmul.msk.bf16.gmra.mxu3 %vm2953_vm0, %v11458_v5  ;;  %v10214_v9 = vadd.f32 %v4105_v42, %v4068_v50  ;;  %4495 = vmatpush.bf16.msra.mxu0 %v6284_v47  ;;  %v7331_v47 = vld [vmem:[%s11246_s1 + $0x6b4] sm:$0xf0] }
 0x36f   : > { %4391 = vmatmul.bf16.gmra.mxu1 %v7862_v7  ;;  %v6260_v0 = vor.u32 %v7331_v47, %v6259_v44  ;;  %v11479_v7 = vld [vmem:[#allocation47_spill] sm:$0xff] }
 0x370   : > { %v3994_v62 = vpop.f32.mrf.mxu2  ;;  %4533 = vmatpush.bf16.msra.mxu1 %v6476_v31 }
 0x371   : > { %v10223_v48 = vadd.f32 %v3994_v62, %v9957_v16  ;;  %v4032_v38 = vpop.f32.mrf.mxu3  ;;  %v7379_v62 = vld [vmem:[%s11246_s1 + $0x834] sm:$0xf0] }
 0x372   : > { %v4033_v50 = vadd.f32 %v4032_v38, %v9975_v4  ;;  %v4072_v42 = vpop.f32.mrf.mxu0  ;;  %4496 = vmatpush.bf16.msra.mxu0 %v6260_v0  ;;  %v7229_v38 = vld [vmem:[%s11246_s1 + $0x384] sm:$0xf0] }
 0x373   : > { %v7277_v42 = vld [vmem:[%s11246_s1 + $0x504] sm:$0xf0] }
 0x374   : > { %v4110_v34 = vpop.f32.mrf.mxu1  ;;  %v4071_v55 = vadd.f32 %v4070_v26, %v4033_v50  ;;  %v6451_v26 = vld [vmem:[%s11246_s1 + $0x820] sm:$0xf]  ;;  %v6043_v50 = vld [vmem:[%s11246_s1 + $0x4f0] sm:$0xf] }
 0x375   : > { %v6452_v58 = vor.u32 %v7379_v62, %v6451_v26 }
 0x376   : > { %v10232_v16 = vadd.f32 %v4108_v56, %v4071_v55  ;;  %v5851_v56 = vld [vmem:[%s11246_s1 + $0x370] sm:$0xf]  ;;  %v6044_v55 = vor.u32 %v7277_v42, %v6043_v50  ;;  %v7223_v50 = vld [vmem:[%s11246_s1 + $0x354] sm:$0xf0] }
 0x377   : > { %v5852_v34 = vor.u32 %v7229_v38, %v5851_v56  ;;  %4534 = vmatpush.bf16.msra.mxu1 %v6452_v58  ;;  %v7325_v56 = vld [vmem:[%s11246_s1 + $0x684] sm:$0xf0]  ;;  %v6427_v58 = vld [vmem:[%s11246_s1 + $0x7f0] sm:$0xf] }
 0x378   : > { %v3996_v60 = vpop.f32.mrf.mxu2  ;;  %4459 = vmatpush.bf16.msra.mxu3 %v6044_v55  ;;  %v7373_v38 = vld [vmem:[%s11246_s1 + $0x804] sm:$0xf0]  ;;  %v6019_v55 = vld [vmem:[%s11246_s1 + $0x4c0] sm:$0xf] }
 0x379   : > { %v4034_v31 = vpop.f32.mrf.mxu3  ;;  %4421 = vmatpush.bf16.msra.mxu2 %v5852_v34  ;;  %v6428_v42 = vor.u32 %v7373_v38, %v6427_v58 }
 0x37a   : > { %v4197_v32 = vpop.f32.mrf.mxu0 }
 0x37b   : > { %4535 = vmatpush.bf16.msra.mxu1 %v6428_v42 }
 0x37c   : > { %v4235_v4 = vpop.f32.mrf.mxu1 }
 0x37d   : > { %4282 = vmatmul.bf16.gmra.mxu2 %v11478_v63  ;;  %4358 = vmatmul.bf16.gmra.mxu0 %v11432_v3 }
 0x37e   : > { %7053 = vmatmul.msk.bf16.gmra.mxu3 %vm2953_vm0, %v11459_v51 }
 0x37f   : > { %4396 = vmatmul.bf16.gmra.mxu1 %v7975_v14  ;;  %v6235_v14 = vld [vmem:[%s11246_s1 + $0x670] sm:$0xf] }
 0x380   : > { %v4121_v44 = vpop.f32.mrf.mxu2 }
 0x381   : > { %v4122_v47 = vadd.f32 %v4121_v44, %v10006_v2  ;;  %v4159_v0 = vpop.f32.mrf.mxu3  ;;  %v6236_v2 = vor.u32 %v7325_v56, %v6235_v14  ;;  %v7271_v14 = vld [vmem:[%s11246_s1 + $0x4d4] sm:$0xf0] }
 0x382   : > { %v4199_v60 = vpop.f32.mrf.mxu0 }
 0x383   : > { %v4160_v31 = vadd.f32 %v4159_v0, %v4122_v47  ;;  %4497 = vmatpush.bf16.msra.mxu0 %v6236_v2  ;;  %v6020_v0 = vor.u32 %v7271_v14, %v6019_v55 }
 0x384   : > { %v4237_v26 = vpop.f32.mrf.mxu1 }
 0x385   : > { %v4198_v62 = vadd.f32 %v4197_v32, %v4160_v31  ;;  %v5827_v32 = vld [vmem:[%s11246_s1 + $0x340] sm:$0xf]  ;;  %4460 = vmatpush.bf16.msra.mxu3 %v6020_v0 }
 0x386   : > { %v5828_v34 = vor.u32 %v7223_v50, %v5827_v32 }
 0x387   : > { %v10282_v44 = vadd.f32 %v4235_v4, %v4198_v62  ;;  %v7319_v4 = vld [vmem:[%s11246_s1 + $0x654] sm:$0xf0] }
 0x388   : > { %v4123_v47 = vpop.f32.mrf.mxu2  ;;  %4422 = vmatpush.bf16.msra.mxu2 %v5828_v34 }
 0x389   : > { %v4124_v31 = vadd.f32 %v4123_v47, %v10022_v19  ;;  %v4161_v56 = vpop.f32.mrf.mxu3  ;;  %v6211_v19 = vld [vmem:[%s11246_s1 + $0x640] sm:$0xf] }
 0x38a   : > { %v4202_v58 = vpop.f32.mrf.mxu0  ;;  %v6212_v62 = vor.u32 %v7319_v4, %v6211_v19 }
 0x38b   : > { %v4162_v38 = vadd.f32 %v4161_v56, %v4124_v31  ;;  %v6403_v31 = vld [vmem:[%s11246_s1 + $0x7c0] sm:$0xf]  ;;  %v7367_v56 = vld [vmem:[%s11246_s1 + $0x7d4] sm:$0xf0] }
 0x38c   : > { %v4240_v32 = vpop.f32.mrf.mxu1  ;;  %4498 = vmatpush.bf16.msra.mxu0 %v6212_v62 }
 0x38d   : > { %v4200_v50 = vadd.f32 %v4199_v60, %v4162_v38  ;;  %4287 = vmatmul.bf16.gmra.mxu2 %v11479_v7  ;;  %4363 = vmatmul.bf16.gmra.mxu0 %v11433_v36  ;;  %v6404_v38 = vor.u32 %v7367_v56, %v6403_v31  ;;  %v6187_v31 = vld [vmem:[%s11246_s1 + $0x610] sm:$0xf]  ;;  %v7313_v56 = vld [vmem:[%s11246_s1 + $0x624] sm:$0xf0] }
 0x38e   : > { %7054 = vmatmul.msk.bf16.gmra.mxu3 %vm2953_vm0, %v11460_v43 }
 0x38f   : > { %4401 = vmatmul.bf16.gmra.mxu1 %v7744_v8  ;;  %v10296_v2 = vadd.f32 %v4237_v26, %v4200_v50  ;;  %v5803_v26 = vld [vmem:[%s11246_s1 + $0x310] sm:$0xf]  ;;  %v7265_v50 = vld [vmem:[%s11246_s1 + $0x4a4] sm:$0xf0] }
 0x390   : > { %v4126_v60 = vpop.f32.mrf.mxu2  ;;  %4536 = vmatpush.bf16.msra.mxu1 %v6404_v38 }
 0x391   : > { %v4127_v42 = vadd.f32 %v4126_v60, %v10040_v24  ;;  %v4164_v34 = vpop.f32.mrf.mxu3  ;;  %v7217_v24 = vld [vmem:[%s11246_s1 + $0x324] sm:$0xf0] }
 0x392   : > { %v4204_v55 = vpop.f32.mrf.mxu0  ;;  %v5804_v19 = vor.u32 %v7217_v24, %v5803_v26 }
 0x393   : > { %v4165_v14 = vadd.f32 %v4164_v34, %v4127_v42 }
 0x394   : > { %v4242_v47 = vpop.f32.mrf.mxu1  ;;  %4423 = vmatpush.bf16.msra.mxu2 %v5804_v19  ;;  %v6739_v19 = vld [vmem:[%s11246_s1 + $0xa60] sm:$0xf] }
 0x395   : > { %v4203_v0 = vadd.f32 %v4202_v58, %v4165_v14  ;;  %v5995_v58 = vld [vmem:[%s11246_s1 + $0x490] sm:$0xf] }
 0x396   : > { %v5996_v4 = vor.u32 %v7265_v50, %v5995_v58  ;;  %v11480_v50 = vld [vmem:[#allocation50_spill] sm:$0xff] }
 0x397   : > { %v10317_v62 = vadd.f32 %v4240_v32, %v4203_v0  ;;  %v6188_v32 = vor.u32 %v7313_v56, %v6187_v31  ;;  %v6379_v0 = vld [vmem:[%s11246_s1 + $0x790] sm:$0xf] }
 0x398   : > { %v4128_v60 = vpop.f32.mrf.mxu2  ;;  %4461 = vmatpush.bf16.msra.mxu3 %v5996_v4  ;;  %v7451_v4 = vld [vmem:[%s11246_s1 + $0xa74] sm:$0xf0] }
 0x399   : > { %v4129_v42 = vadd.f32 %v4128_v60, %v10071_v29  ;;  %v4166_v34 = vpop.f32.mrf.mxu3  ;;  %v7361_v29 = vld [vmem:[%s11246_s1 + $0x7a4] sm:$0xf0]  ;;  %4499 = vmatpush.bf16.msra.mxu0 %v6188_v32  ;;  %v6740_v60 = vor.u32 %v7451_v4, %v6739_v19  ;;  %v7027_v32 = vld [vmem:[%s11246_s1 + $0xca0] sm:$0xf] }
 0x39a   : > { %v4207_v14 = vpop.f32.mrf.mxu0  ;;  %v6380_v38 = vor.u32 %v7361_v29, %v6379_v0 }
 0x39b   : > { %v4167_v26 = vadd.f32 %v4166_v34, %v4129_v42  ;;  %v7499_v42 = vld [vmem:[%s11246_s1 + $0xbf4] sm:$0xf0]  ;;  %4568 = vmatpush.bf16.msrb.mxu2 %v6740_v60 }
 0x39c   : > { %v4245_v24 = vpop.f32.mrf.mxu1  ;;  %4537 = vmatpush.bf16.msra.mxu1 %v6380_v38 }
 0x39d   : > { %v4205_v58 = vadd.f32 %v4204_v55, %v4167_v26  ;;  %4292 = vmatmul.bf16.gmra.mxu2 %v11480_v50  ;;  %4368 = vmatmul.bf16.gmra.mxu0 %v11434_v1  ;;  %v6931_v55 = vld [vmem:[%s11246_s1 + $0xbe0] sm:$0xf] }
 0x39e   : > { %7055 = vmatmul.msk.bf16.gmra.mxu3 %vm2953_vm0, %v11461_v23  ;;  %v6932_v56 = vor.u32 %v7499_v42, %v6931_v55 }
 0x39f   : > { %4406 = vmatmul.bf16.gmra.mxu1 %v7860_v6  ;;  %v10349_v34 = vadd.f32 %v4242_v47, %v4205_v58  ;;  %v7523_v47 = vld [vmem:[%s11246_s1 + $0xcb4] sm:$0xf0] }
 0x3a0   : > { %v4131_v31 = vpop.f32.mrf.mxu2  ;;  %4606 = vmatpush.bf16.msrb.mxu3 %v6932_v56  ;;  %v7028_v38 = vor.u32 %v7523_v47, %v7027_v32  ;;  %v7445_v56 = vld [vmem:[%s11246_s1 + $0xa44] sm:$0xf0] }
 0x3a1   : > { %v4132_v26 = vadd.f32 %v4131_v31, %v10086_v20  ;;  %v4169_v0 = vpop.f32.mrf.mxu3  ;;  %v7160_v31 = vld [vmem:[%s11246_s1 + $0x164] sm:$0xf] }
 0x3a2   : > { %v4209_v29 = vpop.f32.mrf.mxu0  ;;  %4648 = vmatpush.bf16.msrb.mxu0 %v7028_v38 }
 0x3a3   : > { %v4170_v6 = vadd.f32 %v4169_v0, %v4132_v26  ;;  %v6907_v26 = vld [vmem:[%s11246_s1 + $0xbb0] sm:$0xf]  ;;  %v7493_v0 = vld [vmem:[%s11246_s1 + $0xbc4] sm:$0xf0] }
 0x3a4   : > { %v4247_v8 = vpop.f32.mrf.mxu1  ;;  %v6908_v32 = vor.u32 %v7493_v0, %v6907_v26 }
 0x3a5   : > { %v4208_v1 = vadd.f32 %v4207_v14, %v4170_v6  ;;  %v11481_v14 = vld [vmem:[#allocation53_spill] sm:$0xff] }
 0x3a6   : > { %4607 = vmatpush.bf16.msrb.mxu3 %v6908_v32 }
 0x3a7   : > { %v10358_v58 = vadd.f32 %v4245_v24, %v4208_v1  ;;  %v5589_v1 = vld [vmem:[%s11246_s1 + $0x178] sm:$0xf0] }
 0x3a8   : > { %v4133_v19 = vpop.f32.mrf.mxu2  ;;  %v5592_v24 = vor.u32 %v7160_v31, %v5589_v1 }
 0x3a9   : > { %v4134_v20 = vadd.f32 %v4133_v19, %v10114_v11  ;;  %v4171_v4 = vpop.f32.mrf.mxu3  ;;  %v6715_v11 = vld [vmem:[%s11246_s1 + $0xa30] sm:$0xf] }
 0x3aa   : > { %v4212_v55 = vpop.f32.mrf.mxu0  ;;  %4682 = vmatpush.bf16.msrb.mxu1 %v5592_v24  ;;  %v7487_v24 = vld [vmem:[%s11246_s1 + $0xb94] sm:$0xf0] }
 0x3ab   : > { %v4172_v60 = vadd.f32 %v4171_v4, %v4134_v20 }
 0x3ac   : > { %v4250_v42 = vpop.f32.mrf.mxu1 }
 0x3ad   : > { %v4210_v6 = vadd.f32 %v4209_v29, %v4172_v60  ;;  %4297 = vmatmul.bf16.gmra.mxu2 %v11481_v14  ;;  %4373 = vmatmul.bf16.gmra.mxu0 %v11435_v53  ;;  %v6716_v29 = vor.u32 %v7445_v56, %v6715_v11  ;;  %v7439_v11 = vld [vmem:[%s11246_s1 + $0xa14] sm:$0xf0] }
 0x3ae   : > { %7056 = vmatmul.msk.bf16.gmra.mxu3 %vm2953_vm0, %v11462_v61 }
 0x3af   : > { %4411 = vmatmul.bf16.gmra.mxu1 %v7973_v13  ;;  %v10384_v47 = vadd.f32 %v4247_v8, %v4210_v6  ;;  %4569 = vmatpush.bf16.msrb.mxu2 %v6716_v29  ;;  %v7154_v13 = vld [vmem:[%s11246_s1 + $0x134] sm:$0xf]  ;;  %v5565_v8 = vld [vmem:[%s11246_s1 + $0x148] sm:$0xf0]  ;;  %v6691_v6 = vld [vmem:[%s11246_s1 + $0xa00] sm:$0xf] }
 0x3b0   : > { %v4136_v38 = vpop.f32.mrf.mxu2  ;;  %v6692_v56 = vor.u32 %v7439_v11, %v6691_v6 }
 0x3b1   : > { %v4137_v19 = vadd.f32 %v4136_v38, %v10144_v39  ;;  %v4174_v20 = vpop.f32.mrf.mxu3  ;;  %v5568_v39 = vor.u32 %v7154_v13, %v5565_v8  ;;  %v11482_v8 = vld [vmem:[#allocation14_spill] sm:$0xff] }
 0x3b2   : > { %v4214_v4 = vpop.f32.mrf.mxu0 }
 0x3b3   : > { %v4175_v60 = vadd.f32 %v4174_v20, %v4137_v19  ;;  %4683 = vmatpush.bf16.msrb.mxu1 %v5568_v39  ;;  %4570 = vmatpush.bf16.msrb.mxu2 %v6692_v56 }
 0x3b4   : > { %v4252_v31 = vpop.f32.mrf.mxu1 }
 0x3b5   : > { %v4213_v1 = vadd.f32 %v4212_v55, %v4175_v60  ;;  %v6883_v55 = vld [vmem:[%s11246_s1 + $0xb80] sm:$0xf] }
 0x3b6   : > { %v6884_v26 = vor.u32 %v7487_v24, %v6883_v55 }
 0x3b7   : > { %v10405_v0 = vadd.f32 %v4250_v42, %v4213_v1  ;;  %v7003_v42 = vld [vmem:[%s11246_s1 + $0xc70] sm:$0xf] }
 0x3b8   : > { %v4138_v29 = vpop.f32.mrf.mxu2  ;;  %4608 = vmatpush.bf16.msrb.mxu3 %v6884_v26 }
 0x3b9   : > { %v4139_v13 = vadd.f32 %v4138_v29, %v10161_v35  ;;  %v4176_v32 = vpop.f32.mrf.mxu3  ;;  %v7517_v35 = vld [vmem:[%s11246_s1 + $0xc84] sm:$0xf0] }
 0x3ba   : > { %v4217_v38 = vpop.f32.mrf.mxu0  ;;  %v7004_v1 = vor.u32 %v7517_v35, %v7003_v42  ;;  %v7481_v35 = vld [vmem:[%s11246_s1 + $0xb64] sm:$0xf0] }
 0x3bb   : > { %v4177_v19 = vadd.f32 %v4176_v32, %v4139_v13 }
 0x3bc   : > { %v4255_v20 = vpop.f32.mrf.mxu1  ;;  %4649 = vmatpush.bf16.msrb.mxu0 %v7004_v1 }
 0x3bd   : > { %v4215_v60 = vadd.f32 %v4214_v4, %v4177_v19  ;;  %4424 = vmatmul.bf16.vlgmr.msra.gmra.mxu2 %v11482_v8  ;;  %4500 = vmatmul.bf16.vlgmr.msra.gmra.mxu0 %v11436_v22 }
 0x3be   : > { %4462 = vmatmul.bf16.vlgmr.msra.gmra.mxu3 %v11463_v28 }
 0x3bf   : > { %4538 = vmatmul.bf16.vlgmr.msra.gmra.mxu1 %v11438_v15  ;;  %v10418_v6 = vadd.f32 %v4252_v31, %v4215_v60  ;;  %v7148_v31 = vld [vmem:[%s11246_s1 + $0x104] sm:$0xf]  ;;  %v6667_v60 = vld [vmem:[%s11246_s1 + $0x9d0] sm:$0xf] }
 0x3c0   : > { %v4141_v4 = vpop.f32.mrf.mxu2 }
 0x3c1   : > { %v4142_v39 = vadd.f32 %v4141_v4, %v10185_v12  ;;  %v4179_v11 = vpop.f32.mrf.mxu3  ;;  %v5541_v12 = vld [vmem:[%s11246_s1 + $0x118] sm:$0xf0] }
 0x3c2   : > { %v4219_v55 = vpop.f32.mrf.mxu0 }
 0x3c3   : > { %v4180_v24 = vadd.f32 %v4179_v11, %v4142_v39 }
 0x3c4   : > { %v4257_v56 = vpop.f32.mrf.mxu1 }
 0x3c5   : > { %v4218_v26 = vadd.f32 %v4217_v38, %v4180_v24  ;;  %v5544_v38 = vor.u32 %v7148_v31, %v5541_v12  ;;  %v5517_v12 = vld [vmem:[%s11246_s1 + $0xe8] sm:$0xf0] }
 0x3c7   : > { %v10421_v29 = vadd.f32 %v4255_v20, %v4218_v26  ;;  %v7433_v20 = vld [vmem:[%s11246_s1 + $0x9e4] sm:$0xf0]  ;;  %4684 = vmatpush.bf16.msrb.mxu1 %v5544_v38  ;;  %v11483_v26 = vld [vmem:[#allocation18_spill] sm:$0xff] }
 0x3c8   : > { %v4143_v13 = vpop.f32.mrf.mxu2  ;;  %v6668_v39 = vor.u32 %v7433_v20, %v6667_v60  ;;  %v6643_v60 = vld [vmem:[%s11246_s1 + $0x9a0] sm:$0xf] }
 0x3c9   : > { %v4144_v32 = vadd.f32 %v4143_v13, %v10214_v9  ;;  %v4181_v19 = vpop.f32.mrf.mxu3  ;;  %v6859_v9 = vld [vmem:[%s11246_s1 + $0xb50] sm:$0xf] }
 0x3ca   : > { %v4222_v42 = vpop.f32.mrf.mxu0  ;;  %v6860_v11 = vor.u32 %v7481_v35, %v6859_v9  ;;  %4571 = vmatpush.bf16.msrb.mxu2 %v6668_v39  ;;  %v7475_v9 = vld [vmem:[%s11246_s1 + $0xb34] sm:$0xf0] }
 0x3cb   : > { %v4182_v1 = vadd.f32 %v4181_v19, %v4144_v32 }
 0x3cc   : > { %v4260_v4 = vpop.f32.mrf.mxu1  ;;  %4609 = vmatpush.bf16.msrb.mxu3 %v6860_v11 }
 0x3cd   : > { %v4220_v24 = vadd.f32 %v4219_v55, %v4182_v1  ;;  %4429 = vmatmul.bf16.gmra.mxu2 %v11483_v26  ;;  %4505 = vmatmul.bf16.gmra.mxu0 %v11442_v59  ;;  %v7142_v55 = vld [vmem:[%s11246_s1 + $0xd4] sm:$0xf] }
 0x3ce   : > { %4467 = vmatmul.bf16.gmra.mxu3 %v11464_v17  ;;  %v5520_v20 = vor.u32 %v7142_v55, %v5517_v12 }
 0x3cf   : > { %4543 = vmatmul.bf16.gmra.mxu1 %v11444_v37  ;;  %v10446_v13 = vadd.f32 %v4257_v56, %v4220_v24  ;;  %v7427_v56 = vld [vmem:[%s11246_s1 + $0x9b4] sm:$0xf0] }
 0x3d0   : > { %v4146_v31 = vpop.f32.mrf.mxu2  ;;  %v6644_v39 = vor.u32 %v7427_v56, %v6643_v60  ;;  %4685 = vmatpush.bf16.msrb.mxu1 %v5520_v20 }
 0x3d1   : > { %v4147_v32 = vadd.f32 %v4146_v31, %v10232_v16  ;;  %v4184_v19 = vpop.f32.mrf.mxu3  ;;  %v6835_v16 = vld [vmem:[%s11246_s1 + $0xb20] sm:$0xf] }
 0x3d2   : > { %v4224_v38 = vpop.f32.mrf.mxu0  ;;  %v6836_v11 = vor.u32 %v7475_v9, %v6835_v16  ;;  %4572 = vmatpush.bf16.msrb.mxu2 %v6644_v39  ;;  %v7552_v31 = vld [vmem:[%s11247_s2] sm:$0x3f]  ;;  %v5493_v39 = vld [vmem:[%s11246_s1 + $0xb8] sm:$0xf0] }
 0x3d3   : > { %v4185_v35 = vadd.f32 %v4184_v19, %v4147_v32  ;;  %v10470_v55 = vperm.slane %v7552_v31, 4  ;;  %v6979_v32 = vld [vmem:[%s11246_s1 + $0xc40] sm:$0xf] }
 0x3d4   : > { %v4262_v1 = vpop.f32.mrf.mxu1  ;;  %4610 = vmatpush.bf16.msrb.mxu3 %v6836_v11  ;;  %v6619_v11 = vld [vmem:[%s11246_s1 + $0x970] sm:$0xf] }
 0x3d5   : > { %v4223_v24 = vadd.f32 %v4222_v42, %v4185_v35  ;;  %v7511_v42 = vld [vmem:[%s11246_s1 + $0xc54] sm:$0xf0]  ;;  %v7136_v1 = vld [vmem:[%s11246_s1 + $0xa4] sm:$0xf] }
 0x3d6   : > { %v6980_v60 = vor.u32 %v7511_v42, %v6979_v32  ;;  %v5496_v31 = vor.u32 %v7136_v1, %v5493_v39  ;;  %v7469_v32 = vld [vmem:[%s11246_s1 + $0xb04] sm:$0xf0] }
 0x3d7   : > { %v10472_v12 = vadd.f32 %v4260_v4, %v4223_v24  ;;  %v11484_v4 = vld [vmem:[#allocation22_spill] sm:$0xff] }
 0x3d8   : > { %v4148_v38 = vpop.f32.mrf.mxu2  ;;  %4650 = vmatpush.bf16.msrb.mxu0 %v6980_v60  ;;  %4686 = vmatpush.bf16.msrb.mxu1 %v5496_v31 }
 0x3d9   : > { %v4186_v37 = vpop.f32.mrf.mxu3  ;;  %v7421_v38 = vld [vmem:[%s11246_s1 + $0x984] sm:$0xf0] }
 0x3da   : > { %v4349_v19 = vpop.f32.mrf.mxu0 }
 0x3db   : > { %v4350_v20 = vadd.f32 %v4349_v19, %v10470_v55 }
 0x3dc   : > { %v4387_v56 = vpop.f32.mrf.mxu1 }
 0x3dd   : > { %v10481_v16 = vadd.f32 %v4387_v56, %v4350_v20  ;;  %4434 = vmatmul.bf16.gmra.mxu2 %v11484_v4  ;;  %4510 = vmatmul.bf16.gmra.mxu0 %v11448_v30  ;;  %v6620_v20 = vor.u32 %v7421_v38, %v6619_v11 }
 0x3de   : > { %4472 = vmatmul.bf16.gmra.mxu3 %v8117_v45 }
 0x3df   : > { %4548 = vmatmul.bf16.gmra.mxu1 %v11450_v57  ;;  %4573 = vmatpush.bf16.msrb.mxu2 %v6620_v20 }
 0x3e0   : > { %v4273_v37 = vpop.f32.mrf.mxu2 }
 0x3e1   : > { %v4274_v9 = vadd.f32 %v4273_v37, %v10282_v44  ;;  %v4311_v35 = vpop.f32.mrf.mxu3  ;;  %v6811_v44 = vld [vmem:[%s11246_s1 + $0xaf0] sm:$0xf]  ;;  %v5026_v37 = vmax.f32 %v9979_v10, 0.0 }
 0x3e2   : > { %v4351_v24 = vpop.f32.mrf.mxu0  ;;  %v6812_v56 = vor.u32 %v7469_v32, %v6811_v44  ;;  %v7463_v32 = vld [vmem:[%s11246_s1 + $0xad4] sm:$0xf0] }
 0x3e3   : > { %v4312_v42 = vadd.f32 %v4311_v35, %v4274_v9  ;;  %v4352_v19 = vadd.f32 %v4351_v24, %v10470_v55  ;;  %v7130_v9 = vld [vmem:[%s11246_s1 + $0x74] sm:$0xf]  ;;  %v5469_v35 = vld [vmem:[%s11246_s1 + $0x88] sm:$0xf0]  ;;  %v6595_v24 = vld [vmem:[%s11246_s1 + $0x940] sm:$0xf] }
 0x3e4   : > { %v4389_v60 = vpop.f32.mrf.mxu1  ;;  %4611 = vmatpush.bf16.msrb.mxu3 %v6812_v56  ;;  %v5472_v11 = vor.u32 %v7130_v9, %v5469_v35  ;;  %v11485_v56 = vld [vmem:[#allocation25_spill] sm:$0xff]  ;;  %v7505_v9 = vld [vmem:[%s11246_s1 + $0xc24] sm:$0xf0] }
 0x3e5   : > { %v5027_v1 = vmax.f32 %v4312_v42, 0.0  ;;  %v10508_v39 = vadd.f32 %v4389_v60, %v4352_v19  ;;  %v5032_v19 = vmax.f32 %v10009_v27, 0.0  ;;  %v6955_v27 = vld [vmem:[%s11246_s1 + $0xc10] sm:$0xf] }
 0x3e6   : > { %4687 = vmatpush.bf16.msrb.mxu1 %v5472_v11 }
 0x3e7   : > { %v5091_v57 = vpack.c.bf16 %v5027_v1, %v5026_v37 }
 0x3e8   : > { %v4275_v15 = vpop.f32.mrf.mxu2 }
 0x3e9   : > { %5124 = vst [vmem:[%s9257_s25 + $0x8] sm:$0xff] %v5091_v57  ;;  %v4276_v30 = vadd.f32 %v4275_v15, %v10296_v2  ;;  %v4313_v4 = vpop.f32.mrf.mxu3  ;;  %v7415_v57 = vld [vmem:[%s11246_s1 + $0x954] sm:$0xf0]  ;;  %v6787_v15 = vld [vmem:[%s11246_s1 + $0xac0] sm:$0xf] }
 0x3ea   : > { %v4354_v10 = vpop.f32.mrf.mxu0  ;;  %v6596_v44 = vor.u32 %v7415_v57, %v6595_v24  ;;  %v6788_v42 = vor.u32 %v7463_v32, %v6787_v15  ;;  %v5038_v15 = vmax.f32 %v10025_v21, 0.0  ;;  %v7409_v21 = vld [vmem:[%s11246_s1 + $0x924] sm:$0xf0] }
 0x3eb   : > { %v4314_v2 = vadd.f32 %v4313_v4, %v4276_v30  ;;  %v4355_v31 = vadd.f32 %v4354_v10, %v10470_v55  ;;  %v6956_v10 = vor.u32 %v7505_v9, %v6955_v27 }
 0x3ec   : > { %v4392_v38 = vpop.f32.mrf.mxu1  ;;  %4574 = vmatpush.bf16.msrb.mxu2 %v6596_v44  ;;  %4612 = vmatpush.bf16.msrb.mxu3 %v6788_v42  ;;  %v5445_v44 = vld [vmem:[%s11246_s1 + $0x58] sm:$0xf0] }
 0x3ed   : > { %v5033_v60 = vmax.f32 %v4314_v2, 0.0  ;;  %v10532_v20 = vadd.f32 %v4392_v38, %v4355_v31  ;;  %4439 = vmatmul.bf16.gmra.mxu2 %v11485_v56  ;;  %4515 = vmatmul.bf16.gmra.mxu0 %v11452_v49  ;;  %v7124_v38 = vld [vmem:[%s11246_s1 + $0x44] sm:$0xf] }
 0x3ee   : > { %4477 = vmatmul.bf16.gmra.mxu3 %v8155_v18  ;;  %4651 = vmatpush.bf16.msrb.mxu0 %v6956_v10  ;;  %v5448_v42 = vor.u32 %v7124_v38, %v5445_v44  ;;  %v11486_v38 = vld [vmem:[#allocation28_spill] sm:$0xff]  ;;  %v11487_v44 = vld [vmem:[#allocation30_spill] sm:$0xff] }
 0x3ef   : > { %4553 = vmatmul.bf16.gmra.mxu1 %v11427_v40  ;;  %v5094_v30 = vpack.c.bf16 %v5033_v60, %v5032_v19  ;;  %v6571_v19 = vld [vmem:[%s11246_s1 + $0x910] sm:$0xf] }
 0x3f0   : > { %v4278_v4 = vpop.f32.mrf.mxu2  ;;  %v6763_v60 = vld [vmem:[%s11246_s1 + $0xa90] sm:$0xf]  ;;  %4688 = vmatpush.bf16.msrb.mxu1 %v5448_v42 }
 0x3f1   : > { %5127 = vst [vmem:[%s9257_s25 + $0x20] sm:$0xff] %v5094_v30  ;;  %v4279_v37 = vadd.f32 %v4278_v4, %v10317_v62  ;;  %v4316_v1 = vpop.f32.mrf.mxu3 }
 0x3f2   : > { %v4356_v35 = vpop.f32.mrf.mxu0 }
 0x3f3   : > { %v4317_v11 = vadd.f32 %v4316_v1, %v4279_v37  ;;  %v4357_v24 = vadd.f32 %v4356_v35, %v10470_v55  ;;  %v6572_v37 = vor.u32 %v7409_v21, %v6571_v19  ;;  %v7457_v1 = vld [vmem:[%s11246_s1 + $0xaa4] sm:$0xf0] }
 0x3f4   : > { %v4394_v57 = vpop.f32.mrf.mxu1  ;;  %v6764_v9 = vor.u32 %v7457_v1, %v6763_v60  ;;  %v7256_v1 = vld [vmem:[%s11246_s1 + $0x464] sm:$0xf] }
 0x3f5   : > { %v5039_v62 = vmax.f32 %v4317_v11, 0.0  ;;  %v10548_v2 = vadd.f32 %v4394_v57, %v4357_v24  ;;  %4575 = vmatpush.bf16.msrb.mxu2 %v6572_v37  ;;  %v7118_v24 = vld [vmem:[%s11246_s1 + $0x14] sm:$0xf] }
 0x3f6   : > { %4613 = vmatpush.bf16.msrb.mxu3 %v6764_v9 }
 0x3f7   : > { %v5097_v31 = vpack.c.bf16 %v5039_v62, %v5038_v15  ;;  %v5044_v15 = vmax.f32 %v10043_v33, 0.0  ;;  %v7208_v33 = vld [vmem:[%s11246_s1 + $0x2e4] sm:$0xf] }
 0x3f8   : > { %v4280_v32 = vpop.f32.mrf.mxu2 }
 0x3f9   : > { %5130 = vst [vmem:[%s9257_s25 + $0x38] sm:$0xff] %v5097_v31  ;;  %v4281_v30 = vadd.f32 %v4280_v32, %v10349_v34  ;;  %v4318_v4 = vpop.f32.mrf.mxu3  ;;  %v5421_v34 = vld [vmem:[%s11246_s1 + $0x28] sm:$0xf0] }
 0x3fa   : > { %v4359_v27 = vpop.f32.mrf.mxu0  ;;  %v5424_v57 = vor.u32 %v7118_v24, %v5421_v34  ;;  %v11488_v32 = vld [vmem:[#allocation31_spill] sm:$0xff] }
 0x3fb   : > { %v4319_v35 = vadd.f32 %v4318_v4, %v4281_v30  ;;  %v4360_v10 = vadd.f32 %v4359_v27, %v10470_v55  ;;  %v5781_v30 = vld [vmem:[%s11246_s1 + $0x2f8] sm:$0xf0] }
 0x3fc   : > { %v4397_v11 = vpop.f32.mrf.mxu1  ;;  %4689 = vmatpush.bf16.msrb.mxu1 %v5424_v57  ;;  %v5784_v37 = vor.u32 %v7208_v33, %v5781_v30 }
 0x3fd   : > { %v5045_v62 = vmax.f32 %v4319_v35, 0.0  ;;  %v10578_v31 = vadd.f32 %v4397_v11, %v4360_v10  ;;  %4444 = vmatmul.bf16.gmra.mxu2 %v11486_v38  ;;  %4520 = vmatmul.bf16.gmra.mxu0 %v11453_v25  ;;  %v11489_v11 = vld [vmem:[#allocation7_spill] sm:$0xff] }
 0x3fe   : > { %4482 = vmatmul.bf16.gmra.mxu3 %v11487_v44  ;;  %4720 = vmatpush.bf16.msra.mxu2 %v5784_v37  ;;  %v5050_v24 = vmax.f32 %v11489_v11, 0.0  ;;  %v11493_v11 = vld [vmem:[#allocation35_spill] sm:$0xff] }
 0x3ff   : > { %4558 = vmatmul.bf16.gmra.mxu1 %v11488_v32  ;;  %v5100_v42 = vpack.c.bf16 %v5045_v62, %v5044_v15 }
 0x400   : > { %v4283_v19 = vpop.f32.mrf.mxu2 }
 0x401   : > { %5133 = vst [vmem:[%s9257_s25 + $0x50] sm:$0xff] %v5100_v42  ;;  %v4284_v21 = vadd.f32 %v4283_v19, %v10358_v58  ;;  %v4321_v60 = vpop.f32.mrf.mxu3  ;;  %v5973_v58 = vld [vmem:[%s11246_s1 + $0x478] sm:$0xf0] }
 0x402   : > { %v4361_v4 = vpop.f32.mrf.mxu0  ;;  %v5976_v10 = vor.u32 %v7256_v1, %v5973_v58  ;;  %v11490_v58 = vld [vmem:[#allocation11_spill] sm:$0xff] }
 0x403   : > { %v4322_v27 = vadd.f32 %v4321_v60, %v4284_v21  ;;  %v4362_v9 = vadd.f32 %v4361_v4, %v10470_v55  ;;  %v7304_v21 = vld [vmem:[%s11246_s1 + $0x5e4] sm:$0xf]  ;;  %v6165_v60 = vld [vmem:[%s11246_s1 + $0x5f8] sm:$0xf0] }
 0x404   : > { %v4399_v35 = vpop.f32.mrf.mxu1  ;;  %4758 = vmatpush.bf16.msra.mxu3 %v5976_v10  ;;  %v6168_v30 = vor.u32 %v7304_v21, %v6165_v60  ;;  %v11492_v10 = vld [vmem:[#allocation34_spill] sm:$0xff] }
 0x405   : > { %v5051_v34 = vmax.f32 %v4322_v27, 0.0  ;;  %v10600_v57 = vadd.f32 %v4399_v35, %v4362_v9  ;;  %v5056_v27 = vmax.f32 %v11490_v58, 0.0  ;;  %v11491_v35 = vld [vmem:[#allocation32_spill] sm:$0xff] }
 0x406   : > { %4796 = vmatpush.bf16.msra.mxu0 %v6168_v30  ;;  %v5757_v30 = vld [vmem:[%s11246_s1 + $0x2c8] sm:$0xf0] }
 0x407   : > { %v5103_v15 = vpack.c.bf16 %v5051_v34, %v5050_v24 }
 0x408   : > { %v4285_v62 = vpop.f32.mrf.mxu2 }
 0x409   : > { %5136 = vst [vmem:[%s9257_s25 + $0x68] sm:$0xff] %v5103_v15  ;;  %v4286_v42 = vadd.f32 %v4285_v62, %v10384_v47  ;;  %v4323_v19 = vpop.f32.mrf.mxu3 }
 0x40a   : > { %v4364_v33 = vpop.f32.mrf.mxu0 }
 0x40b   : > { %v4324_v4 = vadd.f32 %v4323_v19, %v4286_v42  ;;  %v4365_v37 = vadd.f32 %v4364_v33, %v10470_v55  ;;  %v7352_v42 = vld [vmem:[%s11246_s1 + $0x764] sm:$0xf]  ;;  %v6357_v19 = vld [vmem:[%s11246_s1 + $0x778] sm:$0xf0]  ;;  %v7202_v33 = vld [vmem:[%s11246_s1 + $0x2b4] sm:$0xf] }
 0x40c   : > { %v4402_v1 = vpop.f32.mrf.mxu1  ;;  %v6360_v60 = vor.u32 %v7352_v42, %v6357_v19  ;;  %v5760_v58 = vor.u32 %v7202_v33, %v5757_v30 }
 0x40d   : > { %v5057_v47 = vmax.f32 %v4324_v4, 0.0  ;;  %v10612_v9 = vadd.f32 %v4402_v1, %v4365_v37  ;;  %4449 = vmatmul.bf16.gmra.mxu2 %v11491_v35  ;;  %4525 = vmatmul.bf16.gmra.mxu0 %v11468_v46 }
 0x40e   : > { %4487 = vmatmul.bf16.gmra.mxu3 %v11492_v10  ;;  %4834 = vmatpush.bf16.msra.mxu1 %v6360_v60  ;;  %v6141_v60 = vld [vmem:[%s11246_s1 + $0x5c8] sm:$0xf0] }
 0x40f   : > { %4563 = vmatmul.bf16.gmra.mxu1 %v11493_v11  ;;  %v5106_v24 = vpack.c.bf16 %v5057_v47, %v5056_v27  ;;  %v5949_v27 = vld [vmem:[%s11246_s1 + $0x448] sm:$0xf0]  ;;  %4721 = vmatpush.bf16.msra.mxu2 %v5760_v58  ;;  %v5733_v58 = vld [vmem:[%s11246_s1 + $0x298] sm:$0xf0] }
 0x410   : > { %v4288_v34 = vpop.f32.mrf.mxu2 }
 0x411   : > { %5139 = vst [vmem:[%s9257_s25 + $0x80] sm:$0xff] %v5106_v24  ;;  %v4289_v15 = vadd.f32 %v4288_v34, %v10405_v0  ;;  %v4326_v62 = vpop.f32.mrf.mxu3  ;;  %v7250_v0 = vld [vmem:[%s11246_s1 + $0x434] sm:$0xf]  ;;  %v11494_v24 = vld [vmem:[#allocation2_spill] sm:$0xff] }
 0x412   : > { %v4366_v21 = vpop.f32.mrf.mxu0  ;;  %v5952_v47 = vor.u32 %v7250_v0, %v5949_v27  ;;  %v5062_v34 = vmax.f32 %v11494_v24, 0.0  ;;  %v7346_v0 = vld [vmem:[%s11246_s1 + $0x734] sm:$0xf]  ;;  %v7244_v27 = vld [vmem:[%s11246_s1 + $0x404] sm:$0xf] }
 0x413   : > { %v4327_v4 = vadd.f32 %v4326_v62, %v4289_v15  ;;  %v4367_v37 = vadd.f32 %v4366_v21, %v10470_v55  ;;  %v7298_v21 = vld [vmem:[%s11246_s1 + $0x5b4] sm:$0xf] }
 0x414   : > { %v4404_v1 = vpop.f32.mrf.mxu1  ;;  %4759 = vmatpush.bf16.msra.mxu3 %v5952_v47  ;;  %v6144_v30 = vor.u32 %v7298_v21, %v6141_v60  ;;  %v5925_v47 = vld [vmem:[%s11246_s1 + $0x418] sm:$0xf0]  ;;  %v11496_v60 = vld [vmem:[#allocation36_spill] sm:$0xff] }
 0x415   : > { %v5063_v42 = vmax.f32 %v4327_v4, 0.0  ;;  %v10640_v19 = vadd.f32 %v4404_v1, %v4367_v37 }
 0x416   : > { %4797 = vmatpush.bf16.msra.mxu0 %v6144_v30  ;;  %v7292_v30 = vld [vmem:[%s11246_s1 + $0x584] sm:$0xf] }
 0x417   : > { %v5109_v11 = vpack.c.bf16 %v5063_v42, %v5062_v34  ;;  %v5928_v34 = vor.u32 %v7244_v27, %v5925_v47  ;;  %v11495_v42 = vld [vmem:[#allocation10_spill] sm:$0xff] }
 0x418   : > { %v4290_v32 = vpop.f32.mrf.mxu2 }
 0x419   : > { %5142 = vst [vmem:[%s9257_s25 + $0x98] sm:$0xff] %v5109_v11  ;;  %v4291_v15 = vadd.f32 %v4290_v32, %v10418_v6  ;;  %v4328_v62 = vpop.f32.mrf.mxu3  ;;  %v6333_v11 = vld [vmem:[%s11246_s1 + $0x748] sm:$0xf0]  ;;  %v7196_v6 = vld [vmem:[%s11246_s1 + $0x284] sm:$0xf]  ;;  %4760 = vmatpush.bf16.msra.mxu3 %v5928_v34 }
 0x41a   : > { %v4369_v33 = vpop.f32.mrf.mxu0  ;;  %v6336_v1 = vor.u32 %v7346_v0, %v6333_v11  ;;  %v5736_v24 = vor.u32 %v7196_v6, %v5733_v58  ;;  %v11498_v0 = vld [vmem:[#allocation38_spill] sm:$0xff]  ;;  %v11499_v11 = vld [vmem:[#allocation3_spill] sm:$0xff]  ;;  %v6117_v6 = vld [vmem:[%s11246_s1 + $0x598] sm:$0xf0] }
 0x41b   : > { %v4329_v32 = vadd.f32 %v4328_v62, %v4291_v15  ;;  %v4370_v4 = vadd.f32 %v4369_v33, %v10470_v55  ;;  %v5068_v15 = vmax.f32 %v11495_v42, 0.0  ;;  %v11497_v33 = vld [vmem:[#allocation37_spill] sm:$0xff]  ;;  %v7190_v34 = vld [vmem:[%s11246_s1 + $0x254] sm:$0xf] }
 0x41c   : > { %v4407_v37 = vpop.f32.mrf.mxu1  ;;  %4835 = vmatpush.bf16.msra.mxu1 %v6336_v1  ;;  %4722 = vmatpush.bf16.msra.mxu2 %v5736_v24  ;;  %v7340_v1 = vld [vmem:[%s11246_s1 + $0x704] sm:$0xf] }
 0x41d   : > { %v5069_v62 = vmax.f32 %v4329_v32, 0.0  ;;  %v10670_v21 = vadd.f32 %v4407_v37, %v4370_v4  ;;  %4576 = vmatmul.bf16.vlgmr.msrb.gmra.mxu2 %v11496_v60  ;;  %7057 = vmatmul.msk.bf16.vlgmr.msrb.gmra.mxu0 %vm2953_vm0, %v11497_v33  ;;  %v6120_v4 = vor.u32 %v7292_v30, %v6117_v6  ;;  %v11500_v33 = vld [vmem:[#allocation15_spill] sm:$0xff] }
 0x41e   : > { %4614 = vmatmul.bf16.vlgmr.msrb.gmra.mxu3 %v11498_v0  ;;  %v5074_v60 = vmax.f32 %v11500_v33, 0.0  ;;  %v5901_v6 = vld [vmem:[%s11246_s1 + $0x3e8] sm:$0xf0] }
 0x41f   : > { %4690 = vmatmul.bf16.vlgmr.msrb.gmra.mxu1 %v11499_v11  ;;  %v5112_v32 = vpack.c.bf16 %v5069_v62, %v5068_v15  ;;  %4798 = vmatpush.bf16.msra.mxu0 %v6120_v4  ;;  %v5709_v62 = vld [vmem:[%s11246_s1 + $0x268] sm:$0xf0] }
 0x420   : > { %v4293_v37 = vpop.f32.mrf.mxu2  ;;  %v5712_v30 = vor.u32 %v7190_v34, %v5709_v62  ;;  %v6285_v34 = vld [vmem:[%s11246_s1 + $0x6e8] sm:$0xf0]  ;;  %v7184_v62 = vld [vmem:[%s11246_s1 + $0x224] sm:$0xf] }
 0x421   : > { %5145 = vst [vmem:[%s9257_s25 + $0xb0] sm:$0xff] %v5112_v32  ;;  %v4294_v58 = vadd.f32 %v4293_v37, %v10421_v29  ;;  %v4331_v27 = vpop.f32.mrf.mxu3  ;;  %v6309_v29 = vld [vmem:[%s11246_s1 + $0x718] sm:$0xf0] }
 0x422   : > { %v4371_v47 = vpop.f32.mrf.mxu0  ;;  %v6312_v24 = vor.u32 %v7340_v1, %v6309_v29  ;;  %4723 = vmatpush.bf16.msra.mxu2 %v5712_v30  ;;  %v11501_v29 = vld [vmem:[#allocation39_spill] sm:$0xff]  ;;  %v5685_v30 = vld [vmem:[%s11246_s1 + $0x238] sm:$0xf0] }
 0x423   : > { %v4332_v42 = vadd.f32 %v4331_v27, %v4294_v58  ;;  %v4372_v11 = vadd.f32 %v4371_v47, %v10470_v55 }
 0x424   : > { %v4409_v40 = vpop.f32.mrf.mxu1  ;;  %4836 = vmatpush.bf16.msra.mxu1 %v6312_v24  ;;  %v6093_v24 = vld [vmem:[%s11246_s1 + $0x568] sm:$0xf0] }
 0x425   : > { %v5075_v0 = vmax.f32 %v4332_v42, 0.0  ;;  %v10687_v15 = vadd.f32 %v4409_v40, %v4372_v11  ;;  %v7238_v40 = vld [vmem:[%s11246_s1 + $0x3d4] sm:$0xf] }
 0x426   : > { %v5904_v4 = vor.u32 %v7238_v40, %v5901_v6  ;;  %v5877_v6 = vld [vmem:[%s11246_s1 + $0x3b8] sm:$0xf0] }
 0x427   : > { %v5115_v33 = vpack.c.bf16 %v5075_v0, %v5074_v60  ;;  %v5080_v60 = vmax.f32 %v10188_v52, 0.0 }
 0x428   : > { %v4295_v32 = vpop.f32.mrf.mxu2  ;;  %4761 = vmatpush.bf16.msra.mxu3 %v5904_v4  ;;  %v5688_v4 = vor.u32 %v7184_v62, %v5685_v30  ;;  %v6261_v30 = vld [vmem:[%s11246_s1 + $0x6b8] sm:$0xf0] }
 0x429   : > { %5148 = vst [vmem:[%s9257_s25 + $0xc8] sm:$0xff] %v5115_v33  ;;  %v4296_v37 = vadd.f32 %v4295_v32, %v10446_v13  ;;  %v4333_v58 = vpop.f32.mrf.mxu3  ;;  %v7286_v13 = vld [vmem:[%s11246_s1 + $0x554] sm:$0xf] }
 0x42a   : > { %v4374_v27 = vpop.f32.mrf.mxu0  ;;  %v6096_v52 = vor.u32 %v7286_v13, %v6093_v24  ;;  %4724 = vmatpush.bf16.msra.mxu2 %v5688_v4  ;;  %v7280_v13 = vld [vmem:[%s11246_s1 + $0x524] sm:$0xf]  ;;  %v6069_v24 = vld [vmem:[%s11246_s1 + $0x538] sm:$0xf0]  ;;  %v7226_v4 = vld [vmem:[%s11246_s1 + $0x374] sm:$0xf] }
 0x42b   : > { %v4334_v47 = vadd.f32 %v4333_v58, %v4296_v37  ;;  %v4375_v42 = vadd.f32 %v4374_v27, %v10470_v55  ;;  %v7334_v55 = vld [vmem:[%s11246_s1 + $0x6d4] sm:$0xf] }
 0x42c   : > { %v4412_v11 = vpop.f32.mrf.mxu1  ;;  %v6288_v33 = vor.u32 %v7334_v55, %v6285_v34  ;;  %4799 = vmatpush.bf16.msra.mxu0 %v6096_v52 }
 0x42d   : > { %v5081_v0 = vmax.f32 %v4334_v47, 0.0  ;;  %v10711_v1 = vadd.f32 %v4412_v11, %v4375_v42  ;;  %4581 = vmatmul.bf16.gmra.mxu2 %v11501_v29  ;;  %7058 = vmatmul.msk.bf16.gmra.mxu0 %vm2953_vm0, %v11458_v5 }
 0x42e   : > { %4619 = vmatmul.bf16.gmra.mxu3 %v11477_v41  ;;  %4837 = vmatpush.bf16.msra.mxu1 %v6288_v33  ;;  %v11502_v33 = vld [vmem:[#allocation42_spill] sm:$0xff] }
 0x42f   : > { %4695 = vmatmul.bf16.gmra.mxu1 %v11431_v54  ;;  %v5118_v40 = vpack.c.bf16 %v5081_v0, %v5080_v60  ;;  %v7232_v54 = vld [vmem:[%s11246_s1 + $0x3a4] sm:$0xf]  ;;  %v5086_v60 = vmax.f32 %v10223_v48, 0.0 }
 0x430   : > { %v4298_v32 = vpop.f32.mrf.mxu2  ;;  %v5880_v37 = vor.u32 %v7232_v54, %v5877_v6  ;;  %v7328_v48 = vld [vmem:[%s11246_s1 + $0x6a4] sm:$0xf]  ;;  %v7178_v54 = vld [vmem:[%s11246_s1 + $0x1f4] sm:$0xf] }
 0x431   : > { %5151 = vst [vmem:[%s9257_s25 + $0xe0] sm:$0xff] %v5118_v40  ;;  %v4299_v58 = vadd.f32 %v4298_v32, %v10472_v12  ;;  %v4336_v27 = vpop.f32.mrf.mxu3  ;;  %v6072_v12 = vor.u32 %v7280_v13, %v6069_v24  ;;  %v6264_v6 = vor.u32 %v7328_v48, %v6261_v30  ;;  %v5661_v32 = vld [vmem:[%s11246_s1 + $0x208] sm:$0xf0]  ;;  %v7274_v24 = vld [vmem:[%s11246_s1 + $0x4f4] sm:$0xf] }
 0x432   : > { %v4376_v47 = vpop.f32.mrf.mxu0  ;;  %4762 = vmatpush.bf16.msra.mxu3 %v5880_v37  ;;  %v5853_v37 = vld [vmem:[%s11246_s1 + $0x388] sm:$0xf0] }
 0x433   : > { %v4337_v42 = vadd.f32 %v4336_v27, %v4299_v58  ;;  %4800 = vmatpush.bf16.msra.mxu0 %v6072_v12  ;;  %v5664_v58 = vor.u32 %v7178_v54, %v5661_v32  ;;  %v5856_v27 = vor.u32 %v7226_v4, %v5853_v37  ;;  %4838 = vmatpush.bf16.msra.mxu1 %v6264_v6  ;;  %v6045_v12 = vld [vmem:[%s11246_s1 + $0x508] sm:$0xf0]  ;;  %v7220_v54 = vld [vmem:[%s11246_s1 + $0x344] sm:$0xf]  ;;  %v5829_v6 = vld [vmem:[%s11246_s1 + $0x358] sm:$0xf0] }
 0x434   : > { %v4414_v11 = vpop.f32.mrf.mxu1  ;;  %v5832_v37 = vor.u32 %v7220_v54, %v5829_v6  ;;  %v7214_v6 = vld [vmem:[%s11246_s1 + $0x314] sm:$0xf] }
 0x435   : > { %v5087_v0 = vmax.f32 %v4337_v42, 0.0  ;;  %4725 = vmatpush.bf16.msra.mxu2 %v5664_v58 }
 0x436   : > { %4763 = vmatpush.bf16.msra.mxu3 %v5856_v27 }
 0x437   : > { %v5121_v52 = vpack.c.bf16 %v5087_v0, %v5086_v60 }
 0x438   : > { %v4300_v55 = vpop.f32.mrf.mxu2 }
 0x439   : > { %5154 = vst [vmem:[%s9257_s25 + $0xf8] sm:$0xff] %v5121_v52  ;;  %v4338_v34 = vpop.f32.mrf.mxu3  ;;  %v7322_v52 = vld [vmem:[%s11246_s1 + $0x674] sm:$0xf]  ;;  %v6237_v55 = vld [vmem:[%s11246_s1 + $0x688] sm:$0xf0] }
 0x43a   : > { %v4501_v62 = vpop.f32.mrf.mxu0  ;;  %v7172_v34 = vld [vmem:[%s11246_s1 + $0x1c4] sm:$0xf]  ;;  %v6240_v48 = vor.u32 %v7322_v52, %v6237_v55  ;;  %4764 = vmatpush.bf16.msra.mxu3 %v5832_v37 }
 0x43c   : > { %v4539_v40 = vpop.f32.mrf.mxu1  ;;  %4839 = vmatpush.bf16.msra.mxu1 %v6240_v48  ;;  %v7316_v48 = vld [vmem:[%s11246_s1 + $0x644] sm:$0xf] }
 0x43d   : > { %4586 = vmatmul.bf16.gmra.mxu2 %v11502_v33  ;;  %7059 = vmatmul.msk.bf16.gmra.mxu0 %vm2953_vm0, %v11459_v51 }
 0x43e   : > { %4624 = vmatmul.bf16.gmra.mxu3 %v11478_v63 }
 0x43f   : > { %4700 = vmatmul.bf16.gmra.mxu1 %v11432_v3 }
 0x440   : > { %v4425_v47 = vpop.f32.mrf.mxu2 }
 0x441   : > { %v4426_v42 = vadd.f32 %v4425_v47, %v10481_v16  ;;  %v4463_v3 = vpop.f32.mrf.mxu3  ;;  %v6048_v16 = vor.u32 %v7274_v24, %v6045_v12  ;;  %v11503_v24 = vld [vmem:[#allocation45_spill] sm:$0xff] }
 0x442   : > { %v4503_v11 = vpop.f32.mrf.mxu0 }
 0x443   : > { %v4464_v60 = vadd.f32 %v4463_v3, %v4426_v42  ;;  %4801 = vmatpush.bf16.msra.mxu0 %v6048_v16 }
 0x444   : > { %v4541_v0 = vpop.f32.mrf.mxu1 }
 0x445   : > { %v4502_v13 = vadd.f32 %v4501_v62, %v4464_v60  ;;  %v5637_v62 = vld [vmem:[%s11246_s1 + $0x1d8] sm:$0xf0] }
 0x446   : > { %v5640_v30 = vor.u32 %v7172_v34, %v5637_v62 }
 0x447   : > { %v10800_v32 = vadd.f32 %v4539_v40, %v4502_v13  ;;  %v6021_v40 = vld [vmem:[%s11246_s1 + $0x4d8] sm:$0xf0] }
 0x448   : > { %v4427_v4 = vpop.f32.mrf.mxu2  ;;  %4726 = vmatpush.bf16.msra.mxu2 %v5640_v30  ;;  %v6213_v30 = vld [vmem:[%s11246_s1 + $0x658] sm:$0xf0] }
 0x449   : > { %v4428_v58 = vadd.f32 %v4427_v4, %v10508_v39  ;;  %v4465_v27 = vpop.f32.mrf.mxu3  ;;  %v7268_v39 = vld [vmem:[%s11246_s1 + $0x4c4] sm:$0xf]  ;;  %v6216_v54 = vor.u32 %v7316_v48, %v6213_v30  ;;  %v5805_v4 = vld [vmem:[%s11246_s1 + $0x328] sm:$0xf0]  ;;  %v11504_v48 = vld [vmem:[#allocation48_spill] sm:$0xff] }
 0x44a   : > { %v4506_v47 = vpop.f32.mrf.mxu0  ;;  %v6024_v13 = vor.u32 %v7268_v39, %v6021_v40  ;;  %v7262_v40 = vld [vmem:[%s11246_s1 + $0x494] sm:$0xf]  ;;  %v11505_v30 = vld [vmem:[#allocation6_spill] sm:$0xff] }
 0x44b   : > { %v4466_v42 = vadd.f32 %v4465_v27, %v4428_v58  ;;  %v5808_v58 = vor.u32 %v7214_v6, %v5805_v4  ;;  %4840 = vmatpush.bf16.msra.mxu1 %v6216_v54  ;;  %v6549_v54 = vld [vmem:[%s11246_s1 + $0x8f8] sm:$0xf0] }
 0x44c   : > { %v4544_v3 = vpop.f32.mrf.mxu1  ;;  %4802 = vmatpush.bf16.msra.mxu0 %v6024_v13  ;;  %v5997_v13 = vld [vmem:[%s11246_s1 + $0x4a8] sm:$0xf0]  ;;  %v6741_v6 = vld [vmem:[%s11246_s1 + $0xa78] sm:$0xf0] }
 0x44d   : > { %v4504_v60 = vadd.f32 %v4503_v11, %v4466_v42  ;;  %4591 = vmatmul.bf16.gmra.mxu2 %v11503_v24  ;;  %7060 = vmatmul.msk.bf16.gmra.mxu0 %vm2953_vm0, %v11460_v43 }
 0x44e   : > { %4629 = vmatmul.bf16.gmra.mxu3 %v11479_v7 }
 0x44f   : > { %4705 = vmatmul.bf16.gmra.mxu1 %v11433_v36  ;;  %v10814_v12 = vadd.f32 %v4541_v0, %v4504_v60  ;;  %v7166_v0 = vld [vmem:[%s11246_s1 + $0x194] sm:$0xf]  ;;  %4765 = vmatpush.bf16.msra.mxu3 %v5808_v58 }
 0x450   : > { %v4430_v11 = vpop.f32.mrf.mxu2 }
 0x451   : > { %v4431_v52 = vadd.f32 %v4430_v11, %v10532_v20  ;;  %v4468_v16 = vpop.f32.mrf.mxu3  ;;  %v5613_v20 = vld [vmem:[%s11246_s1 + $0x1a8] sm:$0xf0] }
 0x452   : > { %v4508_v55 = vpop.f32.mrf.mxu0  ;;  %v5616_v37 = vor.u32 %v7166_v0, %v5613_v20  ;;  %v7400_v0 = vld [vmem:[%s11246_s1 + $0x8e4] sm:$0xf] }
 0x453   : > { %v4469_v34 = vadd.f32 %v4468_v16, %v4431_v52  ;;  %v7310_v16 = vld [vmem:[%s11246_s1 + $0x614] sm:$0xf]  ;;  %v6552_v20 = vor.u32 %v7400_v0, %v6549_v54 }
 0x454   : > { %v4546_v62 = vpop.f32.mrf.mxu1  ;;  %4727 = vmatpush.bf16.msra.mxu2 %v5616_v37 }
 0x455   : > { %v4507_v36 = vadd.f32 %v4506_v47, %v4469_v34 }
 0x457   : > { %v10835_v27 = vadd.f32 %v4544_v3, %v4507_v36  ;;  %v6000_v3 = vor.u32 %v7262_v40, %v5997_v13 }
 0x458   : > { %v4432_v47 = vpop.f32.mrf.mxu2  ;;  %4872 = vmatpush.bf16.msrb.mxu2 %v6552_v20  ;;  %v7520_v20 = vld [vmem:[%s11246_s1 + $0xca4] sm:$0xf] }
 0x459   : > { %v4433_v42 = vadd.f32 %v4432_v47, %v10548_v2  ;;  %v4470_v60 = vpop.f32.mrf.mxu3  ;;  %v6189_v2 = vld [vmem:[%s11246_s1 + $0x628] sm:$0xf0]  ;;  %4803 = vmatpush.bf16.msra.mxu0 %v6000_v3  ;;  %v7496_v3 = vld [vmem:[%s11246_s1 + $0xbe4] sm:$0xf] }
 0x45a   : > { %v4511_v39 = vpop.f32.mrf.mxu0  ;;  %v6192_v34 = vor.u32 %v7310_v16, %v6189_v2 }
 0x45b   : > { %v4471_v11 = vadd.f32 %v4470_v60, %v4433_v42 }
 0x45c   : > { %v4549_v52 = vpop.f32.mrf.mxu1  ;;  %4841 = vmatpush.bf16.msra.mxu1 %v6192_v34 }
 0x45d   : > { %v4509_v36 = vadd.f32 %v4508_v55, %v4471_v11  ;;  %4596 = vmatmul.bf16.gmra.mxu2 %v11504_v48  ;;  %7061 = vmatmul.msk.bf16.gmra.mxu0 %vm2953_vm0, %v11461_v23  ;;  %v7448_v55 = vld [vmem:[%s11246_s1 + $0xa64] sm:$0xf] }
 0x45e   : > { %4634 = vmatmul.bf16.gmra.mxu3 %v11480_v50  ;;  %v6744_v58 = vor.u32 %v7448_v55, %v6741_v6  ;;  %v11506_v55 = vld [vmem:[#allocation51_spill] sm:$0xff] }
 0x45f   : > { %4710 = vmatmul.bf16.gmra.mxu1 %v11505_v30  ;;  %v10867_v4 = vadd.f32 %v4546_v62, %v4509_v36  ;;  %v6933_v62 = vld [vmem:[%s11246_s1 + $0xbf8] sm:$0xf0] }
 0x460   : > { %v4435_v37 = vpop.f32.mrf.mxu2  ;;  %4910 = vmatpush.bf16.msrb.mxu3 %v6744_v58  ;;  %v6936_v16 = vor.u32 %v7496_v3, %v6933_v62  ;;  %v7442_v58 = vld [vmem:[%s11246_s1 + $0xa34] sm:$0xf] }
 0x461   : > { %v4436_v47 = vadd.f32 %v4435_v37, %v10578_v31  ;;  %v4473_v42 = vpop.f32.mrf.mxu3  ;;  %v6525_v37 = vld [vmem:[%s11246_s1 + $0x8c8] sm:$0xf0] }
 0x462   : > { %v4513_v60 = vpop.f32.mrf.mxu0  ;;  %4948 = vmatpush.bf16.msrb.mxu0 %v6936_v16 }
 0x463   : > { %v4474_v40 = vadd.f32 %v4473_v42, %v4436_v47  ;;  %v6717_v47 = vld [vmem:[%s11246_s1 + $0xa48] sm:$0xf0] }
 0x464   : > { %v4551_v13 = vpop.f32.mrf.mxu1 }
 0x465   : > { %v4512_v11 = vadd.f32 %v4511_v39, %v4474_v40 }
 0x467   : > { %v10876_v2 = vadd.f32 %v4549_v52, %v4512_v11  ;;  %v7029_v52 = vld [vmem:[%s11246_s1 + $0xcb8] sm:$0xf0] }
 0x468   : > { %v4437_v34 = vpop.f32.mrf.mxu2  ;;  %v7032_v6 = vor.u32 %v7520_v20, %v7029_v52  ;;  %v6693_v20 = vld [vmem:[%s11246_s1 + $0xa18] sm:$0xf0] }
 0x469   : > { %v4438_v31 = vadd.f32 %v4437_v34, %v10600_v57  ;;  %v4475_v36 = vpop.f32.mrf.mxu3  ;;  %v7394_v57 = vld [vmem:[%s11246_s1 + $0x8b4] sm:$0xf] }
 0x46a   : > { %v4516_v30 = vpop.f32.mrf.mxu0  ;;  %v6528_v42 = vor.u32 %v7394_v57, %v6525_v37  ;;  %4990 = vmatpush.bf16.msrb.mxu1 %v7032_v6 }
 0x46b   : > { %v4476_v0 = vadd.f32 %v4475_v36, %v4438_v31  ;;  %v7490_v36 = vld [vmem:[%s11246_s1 + $0xbb4] sm:$0xf] }
 0x46c   : > { %v4554_v54 = vpop.f32.mrf.mxu1  ;;  %4873 = vmatpush.bf16.msrb.mxu2 %v6528_v42 }
 0x46d   : > { %v4514_v39 = vadd.f32 %v4513_v60, %v4476_v0  ;;  %4601 = vmatmul.bf16.gmra.mxu2 %v11506_v55  ;;  %7062 = vmatmul.msk.bf16.gmra.mxu0 %vm2953_vm0, %v11462_v61  ;;  %v6720_v60 = vor.u32 %v7442_v58, %v6717_v47  ;;  %v7388_v0 = vld [vmem:[%s11246_s1 + $0x884] sm:$0xf] }
 0x46e   : > { %4639 = vmatmul.bf16.gmra.mxu3 %v11481_v14 }
 0x46f   : > { %4715 = vmatmul.bf16.gmra.mxu1 %v11435_v53  ;;  %v10902_v40 = vadd.f32 %v4551_v13, %v4514_v39  ;;  %4911 = vmatpush.bf16.msrb.mxu3 %v6720_v60  ;;  %v6909_v13 = vld [vmem:[%s11246_s1 + $0xbc8] sm:$0xf0]  ;;  %v6501_v39 = vld [vmem:[%s11246_s1 + $0x898] sm:$0xf0] }
 0x470   : > { %v4440_v11 = vpop.f32.mrf.mxu2  ;;  %v6504_v52 = vor.u32 %v7388_v0, %v6501_v39  ;;  %v7005_v39 = vld [vmem:[%s11246_s1 + $0xc88] sm:$0xf0] }
 0x471   : > { %v4441_v53 = vadd.f32 %v4440_v11, %v10612_v9  ;;  %v4478_v3 = vpop.f32.mrf.mxu3  ;;  %v6912_v9 = vor.u32 %v7490_v36, %v6909_v13 }
 0x472   : > { %v4518_v62 = vpop.f32.mrf.mxu0  ;;  %4874 = vmatpush.bf16.msrb.mxu2 %v6504_v52  ;;  %v6477_v52 = vld [vmem:[%s11246_s1 + $0x868] sm:$0xf0] }
 0x473   : > { %v4479_v16 = vadd.f32 %v4478_v3, %v4441_v53  ;;  %4949 = vmatpush.bf16.msrb.mxu0 %v6912_v9  ;;  %v11507_v3 = vld [vmem:[#allocation5_spill] sm:$0xff]  ;;  %v7514_v9 = vld [vmem:[%s11246_s1 + $0xc74] sm:$0xf] }
 0x474   : > { %v4556_v34 = vpop.f32.mrf.mxu1 }
 0x475   : > { %v4517_v31 = vadd.f32 %v4516_v30, %v4479_v16  ;;  %v7436_v30 = vld [vmem:[%s11246_s1 + $0xa04] sm:$0xf] }
 0x476   : > { %v6696_v57 = vor.u32 %v7436_v30, %v6693_v20  ;;  %v7008_v20 = vor.u32 %v7514_v9, %v7005_v39 }
 0x477   : > { %v10923_v6 = vadd.f32 %v4554_v54, %v4517_v31  ;;  %v7484_v54 = vld [vmem:[%s11246_s1 + $0xb84] sm:$0xf] }
 0x478   : > { %v4442_v37 = vpop.f32.mrf.mxu2  ;;  %4912 = vmatpush.bf16.msrb.mxu3 %v6696_v57  ;;  %v7430_v57 = vld [vmem:[%s11246_s1 + $0x9d4] sm:$0xf]  ;;  %4991 = vmatpush.bf16.msrb.mxu1 %v7008_v20 }
 0x479   : > { %v4443_v58 = vadd.f32 %v4442_v37, %v10640_v19  ;;  %v4480_v47 = vpop.f32.mrf.mxu3  ;;  %v6885_v19 = vld [vmem:[%s11246_s1 + $0xb98] sm:$0xf0]  ;;  %v6669_v37 = vld [vmem:[%s11246_s1 + $0x9e8] sm:$0xf0] }
 0x47a   : > { %v4521_v42 = vpop.f32.mrf.mxu0  ;;  %v6888_v16 = vor.u32 %v7484_v54, %v6885_v19  ;;  %v11508_v19 = vld [vmem:[#allocation9_spill] sm:$0xff] }
 0x47b   : > { %v4481_v60 = vadd.f32 %v4480_v47, %v4443_v58 }
 0x47c   : > { %v4559_v11 = vpop.f32.mrf.mxu1  ;;  %4950 = vmatpush.bf16.msrb.mxu0 %v6888_v16  ;;  %v6861_v16 = vld [vmem:[%s11246_s1 + $0xb68] sm:$0xf0] }
 0x47d   : > { %v4519_v53 = vadd.f32 %v4518_v62, %v4481_v60  ;;  %4728 = vmatmul.bf16.vlgmr.msra.gmra.mxu2 %v11507_v3  ;;  %4804 = vmatmul.bf16.vlgmr.msra.gmra.mxu0 %v11463_v28  ;;  %v6672_v60 = vor.u32 %v7430_v57, %v6669_v37  ;;  %v6837_v57 = vld [vmem:[%s11246_s1 + $0xb38] sm:$0xf0] }
 0x47e   : > { %4766 = vmatmul.bf16.vlgmr.msra.gmra.mxu3 %v11482_v8 }
 0x47f   : > { %4842 = vmatmul.bf16.vlgmr.msra.gmra.mxu1 %v11436_v22  ;;  %v10936_v31 = vadd.f32 %v4556_v34, %v4519_v53  ;;  %v7382_v34 = vld [vmem:[%s11246_s1 + $0x854] sm:$0xf]  ;;  %4913 = vmatpush.bf16.msrb.mxu3 %v6672_v60 }
 0x480   : > { %v4445_v62 = vpop.f32.mrf.mxu2 }
 0x481   : > { %v4446_v36 = vadd.f32 %v4445_v62, %v10670_v21  ;;  %v4483_v13 = vpop.f32.mrf.mxu3  ;;  %v7376_v62 = vld [vmem:[%s11246_s1 + $0x824] sm:$0xf] }
 0x482   : > { %v4523_v28 = vpop.f32.mrf.mxu0 }
 0x483   : > { %v4484_v8 = vadd.f32 %v4483_v13, %v4446_v36 }
 0x484   : > { %v4561_v0 = vpop.f32.mrf.mxu1 }
 0x485   : > { %v4522_v22 = vadd.f32 %v4521_v42, %v4484_v8  ;;  %v6480_v42 = vor.u32 %v7382_v34, %v6477_v52  ;;  %v7472_v52 = vld [vmem:[%s11246_s1 + $0xb24] sm:$0xf] }
 0x487   : > { %v10948_v30 = vadd.f32 %v4559_v11, %v4522_v22  ;;  %4875 = vmatpush.bf16.msrb.mxu2 %v6480_v42 }
 0x488   : > { %v4447_v21 = vpop.f32.mrf.mxu2 }
 0x489   : > { %v4448_v58 = vadd.f32 %v4447_v21, %v10687_v15  ;;  %v4485_v47 = vpop.f32.mrf.mxu3  ;;  %v7478_v15 = vld [vmem:[%s11246_s1 + $0xb54] sm:$0xf] }
 0x48a   : > { %v4526_v11 = vpop.f32.mrf.mxu0 }
 0x48b   : > { %v4486_v53 = vadd.f32 %v4485_v47, %v4448_v58  ;;  %v6840_v58 = vor.u32 %v7472_v52, %v6837_v57  ;;  %v7364_v52 = vld [vmem:[%s11246_s1 + $0x7c4] sm:$0xf]  ;;  %v6405_v57 = vld [vmem:[%s11246_s1 + $0x7d8] sm:$0xf0] }
 0x48c   : > { %v4564_v3 = vpop.f32.mrf.mxu1 }
 0x48d   : > { %v4524_v54 = vadd.f32 %v4523_v28, %v4486_v53  ;;  %4733 = vmatmul.bf16.gmra.mxu2 %v11508_v19  ;;  %4809 = vmatmul.bf16.gmra.mxu0 %v11464_v17  ;;  %v6864_v17 = vor.u32 %v7478_v15, %v6861_v16  ;;  %v6645_v28 = vld [vmem:[%s11246_s1 + $0x9b8] sm:$0xf0]  ;;  %v7370_v15 = vld [vmem:[%s11246_s1 + $0x7f4] sm:$0xf] }
 0x48e   : > { %4771 = vmatmul.bf16.gmra.mxu3 %v11483_v26  ;;  %v7424_v26 = vld [vmem:[%s11246_s1 + $0x9a4] sm:$0xf]  ;;  %v11509_v53 = vld [vmem:[#allocation13_spill] sm:$0xff] }
 0x48f   : > { %4847 = vmatmul.bf16.gmra.mxu1 %v11442_v59  ;;  %v10973_v36 = vadd.f32 %v4561_v0, %v4524_v54  ;;  %v6453_v59 = vld [vmem:[%s11246_s1 + $0x838] sm:$0xf0]  ;;  %v6648_v0 = vor.u32 %v7424_v26, %v6645_v28  ;;  %4951 = vmatpush.bf16.msrb.mxu0 %v6864_v17  ;;  %v11511_v54 = vld [vmem:[#allocation23_spill] sm:$0xff] }
 0x490   : > { %v4450_v13 = vpop.f32.mrf.mxu2  ;;  %v6456_v9 = vor.u32 %v7376_v62, %v6453_v59  ;;  %v6981_v19 = vld [vmem:[%s11246_s1 + $0xc58] sm:$0xf0]  ;;  %v6621_v17 = vld [vmem:[%s11246_s1 + $0x988] sm:$0xf0] }
 0x491   : > { %v4451_v8 = vadd.f32 %v4450_v13, %v10711_v1  ;;  %v4488_v22 = vpop.f32.mrf.mxu3  ;;  %4914 = vmatpush.bf16.msrb.mxu3 %v6648_v0  ;;  %v7418_v13 = vld [vmem:[%s11246_s1 + $0x974] sm:$0xf] }
 0x492   : > { %v4528_v39 = vpop.f32.mrf.mxu0  ;;  %4876 = vmatpush.bf16.msrb.mxu2 %v6456_v9 }
 0x493   : > { %v4489_v34 = vadd.f32 %v4488_v22, %v4451_v8  ;;  %4952 = vmatpush.bf16.msrb.mxu0 %v6840_v58  ;;  %v6624_v8 = vor.u32 %v7418_v13, %v6621_v17 }
 0x494   : > { %v4566_v21 = vpop.f32.mrf.mxu1 }
 0x495   : > { %v4527_v20 = vadd.f32 %v4526_v11, %v4489_v34  ;;  %v11510_v11 = vld [vmem:[#allocation22_spill] sm:$0xff]  ;;  %4915 = vmatpush.bf16.msrb.mxu3 %v6624_v8  ;;  %v7466_v34 = vld [vmem:[%s11246_s1 + $0xaf4] sm:$0xf]  ;;  %v6957_v8 = vld [vmem:[%s11246_s1 + $0xc28] sm:$0xf0] }
 0x497   : > { %v10991_v37 = vadd.f32 %v4564_v3, %v4527_v20  ;;  %v7508_v3 = vld [vmem:[%s11246_s1 + $0xc44] sm:$0xf] }
 0x498   : > { %v4452_v1 = vpop.f32.mrf.mxu2  ;;  %v6984_v62 = vor.u32 %v7508_v3, %v6981_v19 }
 0x499   : > { %v4490_v47 = vpop.f32.mrf.mxu3  ;;  %v7412_v1 = vld [vmem:[%s11246_s1 + $0x944] sm:$0xf] }
 0x49a   : > { %v4653_v42 = vpop.f32.mrf.mxu0  ;;  %4992 = vmatpush.bf16.msrb.mxu1 %v6984_v62  ;;  %v6789_v62 = vld [vmem:[%s11246_s1 + $0xad8] sm:$0xf0] }
 0x49c   : > { %v10993_v60 = vpop.f32.mrf.mxu1 }
 0x49d   : > { %4738 = vmatmul.bf16.gmra.mxu2 %v11509_v53  ;;  %4814 = vmatmul.bf16.gmra.mxu0 %v8117_v45  ;;  %v6429_v45 = vld [vmem:[%s11246_s1 + $0x808] sm:$0xf0]  ;;  %v6597_v53 = vld [vmem:[%s11246_s1 + $0x958] sm:$0xf0] }
 0x49e   : > { %4776 = vmatmul.bf16.gmra.mxu3 %v11510_v11  ;;  %v6432_v28 = vor.u32 %v7370_v15, %v6429_v45 }
 0x49f   : > { %4852 = vmatmul.bf16.gmra.mxu1 %v11511_v54  ;;  %v6600_v54 = vor.u32 %v7412_v1, %v6597_v53 }
 0x4a0   : > { %v4577_v16 = vpop.f32.mrf.mxu2  ;;  %4877 = vmatpush.bf16.msrb.mxu2 %v6432_v28 }
 0x4a1   : > { %v4578_v59 = vadd.f32 %v4577_v16, %v10800_v32  ;;  %v4615_v26 = vpop.f32.mrf.mxu3  ;;  %v6813_v32 = vld [vmem:[%s11246_s1 + $0xb08] sm:$0xf0]  ;;  %4916 = vmatpush.bf16.msrb.mxu3 %v6600_v54  ;;  %v11512_v16 = vld [vmem:[#allocation4_spill] sm:$0xff] }
 0x4a2   : > { %v4655_v22 = vpop.f32.mrf.mxu0  ;;  %v6816_v20 = vor.u32 %v7466_v34, %v6813_v32  ;;  %v6381_v34 = vld [vmem:[%s11246_s1 + $0x7a8] sm:$0xf0]  ;;  %v7406_v32 = vld [vmem:[%s11246_s1 + $0x914] sm:$0xf] }
 0x4a3   : > { %v4616_v9 = vadd.f32 %v4615_v26, %v4578_v59 }
 0x4a4   : > { %v11018_v0 = vpop.f32.mrf.mxu1  ;;  %4953 = vmatpush.bf16.msrb.mxu0 %v6816_v20 }
 0x4a5   : > { %v11020_v39 = vadd.f32 %v4653_v42, %v4616_v9  ;;  %v6408_v42 = vor.u32 %v7364_v52, %v6405_v57  ;;  %v6573_v57 = vld [vmem:[%s11246_s1 + $0x928] sm:$0xf0] }
 0x4a7   : > { %4878 = vmatpush.bf16.msrb.mxu2 %v6408_v42  ;;  %v6765_v42 = vld [vmem:[%s11246_s1 + $0xaa8] sm:$0xf0] }
 0x4a8   : > { %v4579_v21 = vpop.f32.mrf.mxu2 }
 0x4a9   : > { %v4580_v58 = vadd.f32 %v4579_v21, %v10814_v12  ;;  %v4617_v47 = vpop.f32.mrf.mxu3  ;;  %v7460_v12 = vld [vmem:[%s11246_s1 + $0xac4] sm:$0xf] }
 0x4aa   : > { %v4658_v11 = vpop.f32.mrf.mxu0  ;;  %v6792_v13 = vor.u32 %v7460_v12, %v6789_v62 }
 0x4ab   : > { %v4618_v3 = vadd.f32 %v4617_v47, %v4580_v58  ;;  %v6576_v58 = vor.u32 %v7406_v32, %v6573_v57  ;;  %v7454_v47 = vld [vmem:[%s11246_s1 + $0xa94] sm:$0xf] }
 0x4ac   : > { %v11041_v19 = vpop.f32.mrf.mxu1  ;;  %4954 = vmatpush.bf16.msrb.mxu0 %v6792_v13 }
 0x4ad   : > { %v11043_v15 = vadd.f32 %v4655_v22, %v4618_v3  ;;  %4743 = vmatmul.bf16.gmra.mxu2 %v11512_v16  ;;  %4819 = vmatmul.bf16.gmra.mxu0 %v8155_v18  ;;  %v11513_v3 = vld [vmem:[#allocation8_spill] sm:$0xff] }
 0x4ae   : > { %4781 = vmatmul.bf16.gmra.mxu3 %v11485_v56 }
 0x4af   : > { %4857 = vmatmul.bf16.gmra.mxu1 %v11452_v49  ;;  %v7502_v49 = vld [vmem:[%s11246_s1 + $0xc14] sm:$0xf]  ;;  %4917 = vmatpush.bf16.msrb.mxu3 %v6576_v58 }
 0x4b0   : > { %v4582_v45 = vpop.f32.mrf.mxu2  ;;  %v6960_v9 = vor.u32 %v7502_v49, %v6957_v8 }
 0x4b1   : > { %v4583_v17 = vadd.f32 %v4582_v45, %v10835_v27  ;;  %v4620_v59 = vpop.f32.mrf.mxu3  ;;  %v7358_v27 = vld [vmem:[%s11246_s1 + $0x794] sm:$0xf] }
 0x4b2   : > { %v4660_v26 = vpop.f32.mrf.mxu0  ;;  %v6384_v52 = vor.u32 %v7358_v27, %v6381_v34  ;;  %4993 = vmatpush.bf16.msrb.mxu1 %v6960_v9 }
 0x4b3   : > { %v4621_v18 = vadd.f32 %v4620_v59, %v4583_v17 }
 0x4b4   : > { %v11056_v28 = vpop.f32.mrf.mxu1  ;;  %4879 = vmatpush.bf16.msrb.mxu2 %v6384_v52 }
 0x4b5   : > { %v11058_v56 = vadd.f32 %v4658_v11, %v4621_v18 }
 0x4b8   : > { %v4584_v22 = vpop.f32.mrf.mxu2 }
 0x4b9   : > { %v4585_v21 = vadd.f32 %v4584_v22, %v10867_v4  ;;  %v4622_v20 = vpop.f32.mrf.mxu3  ;;  %v6768_v4 = vor.u32 %v7454_v47, %v6765_v42  ;;  %v11514_v22 = vld [vmem:[#allocation12_spill] sm:$0xff]  ;;  %v11518_v42 = vld [vmem:[#allocation37_spill] sm:$0xff] }
 0x4ba   : > { %v4663_v1 = vpop.f32.mrf.mxu0  ;;  %v11517_v47 = vld [vmem:[#allocation36_spill] sm:$0xff] }
 0x4bb   : > { %v4623_v53 = vadd.f32 %v4622_v20, %v4585_v21  ;;  %4955 = vmatpush.bf16.msrb.mxu0 %v6768_v4 }
 0x4bc   : > { %v11085_v11 = vpop.f32.mrf.mxu1 }
 0x4bd   : > { %v11087_v54 = vadd.f32 %v4660_v26, %v4623_v53  ;;  %4748 = vmatmul.bf16.gmra.mxu2 %v11513_v3  ;;  %4824 = vmatmul.bf16.gmra.mxu0 %v11487_v44 }
 0x4be   : > { %4786 = vmatmul.bf16.gmra.mxu3 %v11486_v38 }
 0x4bf   : > { %4862 = vmatmul.bf16.gmra.mxu1 %v11453_v25 }
 0x4c0   : > { %v4587_v16 = vpop.f32.mrf.mxu2 }
 0x4c1   : > { %v4588_v12 = vadd.f32 %v4587_v16, %v10876_v2  ;;  %v4625_v62 = vpop.f32.mrf.mxu3 }
 0x4c2   : > { %v4665_v45 = vpop.f32.mrf.mxu0 }
 0x4c3   : > { %v4626_v13 = vadd.f32 %v4625_v62, %v4588_v12 }
 0x4c4   : > { %v11094_v17 = vpop.f32.mrf.mxu1 }
 0x4c5   : > { %v11096_v59 = vadd.f32 %v4663_v1, %v4626_v13 }
 0x4c8   : > { %v4589_v26 = vpop.f32.mrf.mxu2 }
 0x4c9   : > { %v4590_v18 = vadd.f32 %v4589_v26, %v10902_v40  ;;  %v4627_v49 = vpop.f32.mrf.mxu3 }
 0x4ca   : > { %v4668_v44 = vpop.f32.mrf.mxu0 }
 0x4cb   : > { %v4628_v8 = vadd.f32 %v4627_v49, %v4590_v18 }
 0x4cc   : > { %v11099_v38 = vpop.f32.mrf.mxu1 }
 0x4cd   : > { %v11101_v25 = vadd.f32 %v4665_v45, %v4628_v8  ;;  %4753 = vmatmul.bf16.gmra.mxu2 %v11514_v22  ;;  %4829 = vmatmul.bf16.gmra.mxu0 %v11492_v10  ;;  %v11519_v22 = vld [vmem:[#allocation21_spill] sm:$0xff] }
 0x4ce   : > { %4791 = vmatmul.bf16.gmra.mxu3 %v11491_v35 }
 0x4cf   : > { %4867 = vmatmul.bf16.gmra.mxu1 %v11468_v46  ;;  %v11515_v46 = vld [vmem:[#allocation17_spill] sm:$0xff] }
 0x4d0   : > { %v4592_v2 = vpop.f32.mrf.mxu2 }
 0x4d1   : > { %v4593_v9 = vadd.f32 %v4592_v2, %v10923_v6  ;;  %v4630_v27 = vpop.f32.mrf.mxu3  ;;  %v11516_v6 = vld [vmem:[#allocation38_spill] sm:$0xff] }
 0x4d2   : > { %v4670_v40 = vpop.f32.mrf.mxu0 }
 0x4d3   : > { %v4631_v34 = vadd.f32 %v4630_v27, %v4593_v9 }
 0x4d4   : > { %v11108_v32 = vpop.f32.mrf.mxu1 }
 0x4d5   : > { %v11110_v21 = vadd.f32 %v4668_v44, %v4631_v34 }
 0x4d8   : > { %v4594_v20 = vpop.f32.mrf.mxu2 }
 0x4d9   : > { %v4595_v52 = vadd.f32 %v4594_v20, %v10936_v31  ;;  %v4632_v57 = vpop.f32.mrf.mxu3 }
 0x4da   : > { %v4673_v1 = vpop.f32.mrf.mxu0 }
 0x4db   : > { %v4633_v10 = vadd.f32 %v4632_v57, %v4595_v52 }
 0x4dc   : > { %v11113_v58 = vpop.f32.mrf.mxu1 }
 0x4dd   : > { %v11115_v35 = vadd.f32 %v4670_v40, %v4633_v10  ;;  %4880 = vmatmul.bf16.vlgmr.msrb.gmra.mxu2 %v11515_v46  ;;  %4956 = vmatmul.bf16.vlgmr.msrb.gmra.mxu0 %v11516_v6 }
 0x4de   : > { %4918 = vmatmul.bf16.vlgmr.msrb.gmra.mxu3 %v11517_v47 }
 0x4df   : > { %7063 = vmatmul.msk.bf16.vlgmr.msrb.gmra.mxu1 %vm2953_vm0, %v11518_v42 }
 0x4e0   : > { %v4597_v53 = vpop.f32.mrf.mxu2 }
 0x4e1   : > { %v4598_v4 = vadd.f32 %v4597_v53, %v10948_v30  ;;  %v4635_v31 = vpop.f32.mrf.mxu3 }
 0x4e2   : > { %v4675_v3 = vpop.f32.mrf.mxu0 }
 0x4e3   : > { %v4636_v16 = vadd.f32 %v4635_v31, %v4598_v4 }
 0x4e4   : > { %v11123_v12 = vpop.f32.mrf.mxu1 }
 0x4e5   : > { %v11125_v62 = vadd.f32 %v4673_v1, %v4636_v16 }
 0x4e8   : > { %v4599_v45 = vpop.f32.mrf.mxu2 }
 0x4e9   : > { %v4600_v13 = vadd.f32 %v4599_v45, %v10973_v36  ;;  %v4637_v26 = vpop.f32.mrf.mxu3 }
 0x4ea   : > { %v4678_v18 = vpop.f32.mrf.mxu0 }
 0x4eb   : > { %v4638_v49 = vadd.f32 %v4637_v26, %v4600_v13 }
 0x4ec   : > { %v11128_v44 = vpop.f32.mrf.mxu1 }
 0x4ed   : > { %v11130_v8 = vadd.f32 %v4675_v3, %v4638_v49  ;;  %4885 = vmatmul.bf16.gmra.mxu2 %v11519_v22  ;;  %4961 = vmatmul.bf16.gmra.mxu0 %v11477_v41  ;;  %v7553_v41 = vld [vmem:[%s11247_s2] sm:$0x3f] }
 0x4ee   : > { %4923 = vmatmul.bf16.gmra.mxu3 %v11501_v29  ;;  %v11143_v29 = vperm.slane %v7553_v41, 5 }
 0x4ef   : > { %7064 = vmatmul.msk.bf16.gmra.mxu1 %vm2953_vm0, %v11458_v5  ;;  %v11520_v5 = vld [vmem:[#allocation24_spill] sm:$0xff] }
 0x4f0   : > { %v4602_v30 = vpop.f32.mrf.mxu2  ;;  %v4694_v31 = vadd.f32 %v11018_v0, %v11143_v29  ;;  %v4697_v0 = vadd.f32 %v11041_v19, %v11143_v29 }
 0x4f1   : > { %v4603_v2 = vadd.f32 %v4602_v30, %v10991_v37  ;;  %v4640_v36 = vpop.f32.mrf.mxu3  ;;  %v4692_v37 = vadd.f32 %v10993_v60, %v11143_v29  ;;  %v11521_v60 = vld [vmem:[#allocation27_spill] sm:$0xff] }
 0x4f2   : > { %v4680_v9 = vpop.f32.mrf.mxu0 }
 0x4f3   : > { %v4641_v27 = vadd.f32 %v4640_v36, %v4603_v2 }
 0x4f4   : > { %v4718_v40 = vpop.f32.mrf.mxu1 }
 0x4f5   : > { %v11138_v34 = vadd.f32 %v4678_v18, %v4641_v27 }
 0x4f8   : > { %v4604_v20 = vpop.f32.mrf.mxu2 }
 0x4f9   : > { %v4642_v52 = vpop.f32.mrf.mxu3 }
 0x4fa   : > { %v4805_v57 = vpop.f32.mrf.mxu0 }
 0x4fc   : > { %v4843_v1 = vpop.f32.mrf.mxu1 }
 0x4fd   : > { %4890 = vmatmul.bf16.gmra.mxu2 %v11520_v5  ;;  %4966 = vmatmul.bf16.gmra.mxu0 %v11478_v63 }
 0x4fe   : > { %4928 = vmatmul.bf16.gmra.mxu3 %v11502_v33 }
 0x4ff   : > { %7065 = vmatmul.msk.bf16.gmra.mxu1 %vm2953_vm0, %v11459_v51 }
 0x500   : > { %v4729_v10 = vpop.f32.mrf.mxu2 }
 0x501   : > { %v4730_v46 = vadd.f32 %v4729_v10, %v4692_v37  ;;  %v4767_v6 = vpop.f32.mrf.mxu3 }
 0x502   : > { %v4807_v47 = vpop.f32.mrf.mxu0 }
 0x503   : > { %v4768_v42 = vadd.f32 %v4767_v6, %v4730_v46 }
 0x504   : > { %v4845_v53 = vpop.f32.mrf.mxu1 }
 0x505   : > { %v4806_v4 = vadd.f32 %v4805_v57, %v4768_v42 }
 0x507   : > { %v11154_v3 = vadd.f32 %v4843_v1, %v4806_v4  ;;  %v11522_v1 = vld [vmem:[#allocation31_spill] sm:$0xff] }
 0x508   : > { %v4731_v63 = vpop.f32.mrf.mxu2 }
 0x509   : > { %v4732_v33 = vadd.f32 %v4731_v63, %v4694_v31  ;;  %v4769_v16 = vpop.f32.mrf.mxu3 }
 0x50a   : > { %v4810_v45 = vpop.f32.mrf.mxu0 }
 0x50b   : > { %v4770_v51 = vadd.f32 %v4769_v16, %v4732_v33 }
 0x50c   : > { %v4848_v13 = vpop.f32.mrf.mxu1 }
 0x50d   : > { %v4808_v26 = vadd.f32 %v4807_v47, %v4770_v51  ;;  %4895 = vmatmul.bf16.gmra.mxu2 %v11521_v60  ;;  %4971 = vmatmul.bf16.gmra.mxu0 %v11479_v7  ;;  %v4699_v7 = vadd.f32 %v11056_v28, %v11143_v29  ;;  %v4702_v28 = vadd.f32 %v11085_v11, %v11143_v29 }
 0x50e   : > { %4933 = vmatmul.bf16.gmra.mxu3 %v11503_v24 }
 0x50f   : > { %7066 = vmatmul.msk.bf16.gmra.mxu1 %vm2953_vm0, %v11460_v43  ;;  %v11163_v18 = vadd.f32 %v4845_v53, %v4808_v26 }
 0x510   : > { %v4734_v49 = vpop.f32.mrf.mxu2 }
 0x511   : > { %v4735_v22 = vadd.f32 %v4734_v49, %v4697_v0  ;;  %v4772_v30 = vpop.f32.mrf.mxu3 }
 0x512   : > { %v4812_v2 = vpop.f32.mrf.mxu0 }
 0x513   : > { %v4773_v36 = vadd.f32 %v4772_v30, %v4735_v22 }
 0x514   : > { %v4850_v9 = vpop.f32.mrf.mxu1 }
 0x515   : > { %v4811_v27 = vadd.f32 %v4810_v45, %v4773_v36  ;;  %v11523_v45 = vld [vmem:[#allocation35_spill] sm:$0xff] }
 0x517   : > { %v11167_v40 = vadd.f32 %v4848_v13, %v4811_v27 }
 0x518   : > { %v4736_v24 = vpop.f32.mrf.mxu2 }
 0x519   : > { %v4737_v20 = vadd.f32 %v4736_v24, %v4699_v7  ;;  %v4774_v43 = vpop.f32.mrf.mxu3  ;;  %v4712_v24 = vadd.f32 %v11113_v58, %v11143_v29 }
 0x51a   : > { %v4815_v52 = vpop.f32.mrf.mxu0 }
 0x51b   : > { %v4775_v57 = vadd.f32 %v4774_v43, %v4737_v20 }
 0x51c   : > { %v4853_v19 = vpop.f32.mrf.mxu1 }
 0x51d   : > { %v4813_v41 = vadd.f32 %v4812_v2, %v4775_v57  ;;  %4900 = vmatmul.bf16.gmra.mxu2 %v11522_v1  ;;  %4976 = vmatmul.bf16.gmra.mxu0 %v11480_v50  ;;  %v4704_v50 = vadd.f32 %v11094_v17, %v11143_v29  ;;  %v4707_v17 = vadd.f32 %v11099_v38, %v11143_v29 }
 0x51e   : > { %4938 = vmatmul.bf16.gmra.mxu3 %v11504_v48 }
 0x51f   : > { %7067 = vmatmul.msk.bf16.gmra.mxu1 %vm2953_vm0, %v11461_v23  ;;  %v11176_v5 = vadd.f32 %v4850_v9, %v4813_v41 }
 0x520   : > { %v4739_v37 = vpop.f32.mrf.mxu2 }
 0x521   : > { %v4740_v10 = vadd.f32 %v4739_v37, %v4702_v28  ;;  %v4777_v46 = vpop.f32.mrf.mxu3  ;;  %v4714_v28 = vadd.f32 %v11123_v12, %v11143_v29 }
 0x522   : > { %v4817_v6 = vpop.f32.mrf.mxu0 }
 0x523   : > { %v4778_v47 = vadd.f32 %v4777_v46, %v4740_v10 }
 0x524   : > { %v4855_v42 = vpop.f32.mrf.mxu1 }
 0x525   : > { %v4816_v53 = vadd.f32 %v4815_v52, %v4778_v47 }
 0x527   : > { %v11180_v4 = vadd.f32 %v4853_v19, %v4816_v53 }
 0x528   : > { %v4741_v48 = vpop.f32.mrf.mxu2 }
 0x529   : > { %v4742_v31 = vadd.f32 %v4741_v48, %v4704_v50  ;;  %v4779_v23 = vpop.f32.mrf.mxu3  ;;  %v4717_v50 = vadd.f32 %v11128_v44, %v11143_v29 }
 0x52a   : > { %v4820_v63 = vpop.f32.mrf.mxu0 }
 0x52b   : > { %v4780_v33 = vadd.f32 %v4779_v23, %v4742_v31 }
 0x52c   : > { %v4858_v11 = vpop.f32.mrf.mxu1 }
 0x52d   : > { %v4818_v16 = vadd.f32 %v4817_v6, %v4780_v33  ;;  %4905 = vmatmul.bf16.gmra.mxu2 %v11523_v45  ;;  %4981 = vmatmul.bf16.gmra.mxu0 %v11481_v14  ;;  %v4709_v14 = vadd.f32 %v11108_v32, %v11143_v29 }
 0x52e   : > { %4943 = vmatmul.bf16.gmra.mxu3 %v11506_v55 }
 0x52f   : > { %7068 = vmatmul.msk.bf16.gmra.mxu1 %vm2953_vm0, %v11462_v61  ;;  %v11189_v51 = vadd.f32 %v4855_v42, %v4818_v16 }
 0x530   : > { %v4744_v13 = vpop.f32.mrf.mxu2 }
 0x531   : > { %v4745_v26 = vadd.f32 %v4744_v13, %v4707_v17  ;;  %v4782_v60 = vpop.f32.mrf.mxu3 }
 0x532   : > { %v4822_v0 = vpop.f32.mrf.mxu0 }
 0x533   : > { %v4783_v49 = vadd.f32 %v4782_v60, %v4745_v26 }
 0x534   : > { %v4860_v22 = vpop.f32.mrf.mxu1 }
 0x535   : > { %v4821_v30 = vadd.f32 %v4820_v63, %v4783_v49 }
 0x537   : > { %v11193_v2 = vadd.f32 %v4858_v11, %v4821_v30 }
 0x538   : > { %v4746_v55 = vpop.f32.mrf.mxu2 }
 0x539   : > { %v4747_v36 = vadd.f32 %v4746_v55, %v4709_v14  ;;  %v4784_v61 = vpop.f32.mrf.mxu3 }
 0x53a   : > { %v4825_v9 = vpop.f32.mrf.mxu0 }
 0x53b   : > { %v4785_v27 = vadd.f32 %v4784_v61, %v4747_v36  ;;  %v5028_v61 = vmax.f32 %v11020_v39, 0.0 }
 0x53c   : > { %v4863_v38 = vpop.f32.mrf.mxu1 }
 0x53d   : > { %v4823_v7 = vadd.f32 %v4822_v0, %v4785_v27 }
 0x53f   : > { %v11197_v20 = vadd.f32 %v4860_v22, %v4823_v7 }
 0x540   : > { %v4749_v43 = vpop.f32.mrf.mxu2 }
 0x541   : > { %v4750_v52 = vadd.f32 %v4749_v43, %v4712_v24  ;;  %v4787_v57 = vpop.f32.mrf.mxu3 }
 0x542   : > { %v4827_v19 = vpop.f32.mrf.mxu0 }
 0x543   : > { %v4788_v41 = vadd.f32 %v4787_v57, %v4750_v52 }
 0x544   : > { %v4865_v32 = vpop.f32.mrf.mxu1 }
 0x545   : > { %v4826_v1 = vadd.f32 %v4825_v9, %v4788_v41  ;;  %v5034_v41 = vmax.f32 %v11043_v15, 0.0 }
 0x547   : > { %v11201_v37 = vadd.f32 %v4863_v38, %v4826_v1 }
 0x548   : > { %v4751_v10 = vpop.f32.mrf.mxu2 }
 0x549   : > { %v4752_v46 = vadd.f32 %v4751_v10, %v4714_v28  ;;  %v4789_v6 = vpop.f32.mrf.mxu3 }
 0x54a   : > { %v4830_v47 = vpop.f32.mrf.mxu0 }
 0x54b   : > { %v4790_v42 = vadd.f32 %v4789_v6, %v4752_v46 }
 0x54c   : > { %v4868_v58 = vpop.f32.mrf.mxu1 }
 0x54d   : > { %v4828_v53 = vadd.f32 %v4827_v19, %v4790_v42 }
 0x54f   : > { %v11205_v48 = vadd.f32 %v4865_v32, %v4828_v53 }
 0x550   : > { %v4754_v31 = vpop.f32.mrf.mxu2 }
 0x551   : > { %v4755_v23 = vadd.f32 %v4754_v31, %v4717_v50  ;;  %v4792_v63 = vpop.f32.mrf.mxu3 }
 0x552   : > { %v4832_v33 = vpop.f32.mrf.mxu0 }
 0x553   : > { %v4793_v11 = vadd.f32 %v4792_v63, %v4755_v23 }
 0x554   : > { %v4870_v12 = vpop.f32.mrf.mxu1 }
 0x555   : > { %v4831_v16 = vadd.f32 %v4830_v47, %v4793_v11 }
 0x557   : > { %v11207_v45 = vadd.f32 %v4868_v58, %v4831_v16  ;;  %v5040_v58 = vmax.f32 %v11058_v56, 0.0  ;;  %v5046_v16 = vmax.f32 %v11087_v54, 0.0 }
 0x558   : > { %v4756_v17 = vpop.f32.mrf.mxu2 }
 0x559   : > { %v4794_v13 = vpop.f32.mrf.mxu3 }
 0x55a   : > { %v4957_v26 = vpop.f32.mrf.mxu0 }
 0x55c   : > { %v4995_v60 = vpop.f32.mrf.mxu1 }
 0x560   : > { %v4881_v0 = vpop.f32.mrf.mxu2 }
 0x561   : > { %v4882_v49 = vadd.f32 %v4881_v0, %v11154_v3  ;;  %v4919_v44 = vpop.f32.mrf.mxu3 }
 0x562   : > { %v4959_v29 = vpop.f32.mrf.mxu0 }
 0x563   : > { %v4920_v22 = vadd.f32 %v4919_v44, %v4882_v49 }
 0x564   : > { %v4997_v30 = vpop.f32.mrf.mxu1 }
 0x565   : > { %v4958_v14 = vadd.f32 %v4957_v26, %v4920_v22  ;;  %v5052_v22 = vmax.f32 %v11096_v59, 0.0 }
 0x567   : > { %v4996_v55 = vadd.f32 %v4995_v60, %v4958_v14 }
 0x568   : > { %v4883_v36 = vpop.f32.mrf.mxu2 }
 0x569   : > { %v5029_v9 = vmax.f32 %v4996_v55, 0.0  ;;  %v4884_v27 = vadd.f32 %v4883_v36, %v11163_v18  ;;  %v4921_v38 = vpop.f32.mrf.mxu3 }
 0x56a   : > { %v4962_v7 = vpop.f32.mrf.mxu0 }
 0x56b   : > { %v5092_v24 = vpack.c.bf16 %v5029_v9, %v5028_v61  ;;  %v4922_v43 = vadd.f32 %v4921_v38, %v4884_v27 }
 0x56c   : > { %v5000_v52 = vpop.f32.mrf.mxu1 }
 0x56d   : > { %5125 = vst [vmem:[%s9257_s25 + $0x10] sm:$0xff] %v5092_v24  ;;  %v4960_v3 = vadd.f32 %v4959_v29, %v4922_v43 }
 0x56f   : > { %v4998_v57 = vadd.f32 %v4997_v30, %v4960_v3 }
 0x570   : > { %v4886_v19 = vpop.f32.mrf.mxu2 }
 0x571   : > { %v5035_v32 = vmax.f32 %v4998_v57, 0.0  ;;  %v4887_v1 = vadd.f32 %v4886_v19, %v11167_v40  ;;  %v4924_v28 = vpop.f32.mrf.mxu3 }
 0x572   : > { %v4964_v39 = vpop.f32.mrf.mxu0 }
 0x573   : > { %v5095_v10 = vpack.c.bf16 %v5035_v32, %v5034_v41  ;;  %v4925_v18 = vadd.f32 %v4924_v28, %v4887_v1  ;;  %v5064_v1 = vmax.f32 %v11110_v21, 0.0 }
 0x574   : > { %v5002_v46 = vpop.f32.mrf.mxu1 }
 0x575   : > { %5128 = vst [vmem:[%s9257_s25 + $0x28] sm:$0xff] %v5095_v10  ;;  %v4963_v6 = vadd.f32 %v4962_v7, %v4925_v18  ;;  %v5058_v7 = vmax.f32 %v11101_v25, 0.0 }
 0x577   : > { %v5001_v47 = vadd.f32 %v5000_v52, %v4963_v6 }
 0x578   : > { %v4888_v42 = vpop.f32.mrf.mxu2 }
 0x579   : > { %v5041_v53 = vmax.f32 %v5001_v47, 0.0  ;;  %v4889_v50 = vadd.f32 %v4888_v42, %v11176_v5  ;;  %v4926_v31 = vpop.f32.mrf.mxu3 }
 0x57a   : > { %v4967_v15 = vpop.f32.mrf.mxu0 }
 0x57b   : > { %v5098_v23 = vpack.c.bf16 %v5041_v53, %v5040_v58  ;;  %v4927_v40 = vadd.f32 %v4926_v31, %v4889_v50  ;;  %v5070_v58 = vmax.f32 %v11115_v35, 0.0 }
 0x57c   : > { %v5005_v63 = vpop.f32.mrf.mxu1 }
 0x57d   : > { %5131 = vst [vmem:[%s9257_s25 + $0x40] sm:$0xff] %v5098_v23  ;;  %v4965_v33 = vadd.f32 %v4964_v39, %v4927_v40 }
 0x57f   : > { %v5003_v11 = vadd.f32 %v5002_v46, %v4965_v33 }
 0x580   : > { %v4891_v12 = vpop.f32.mrf.mxu2 }
 0x581   : > { %v5047_v17 = vmax.f32 %v5003_v11, 0.0  ;;  %v4892_v13 = vadd.f32 %v4891_v12, %v11180_v4  ;;  %v4929_v26 = vpop.f32.mrf.mxu3  ;;  %v5076_v11 = vmax.f32 %v11125_v62, 0.0 }
 0x582   : > { %v4969_v56 = vpop.f32.mrf.mxu0 }
 0x583   : > { %v5101_v60 = vpack.c.bf16 %v5047_v17, %v5046_v16  ;;  %v4930_v5 = vadd.f32 %v4929_v26, %v4892_v13 }
 0x584   : > { %v5007_v0 = vpop.f32.mrf.mxu1 }
 0x585   : > { %5134 = vst [vmem:[%s9257_s25 + $0x58] sm:$0xff] %v5101_v60  ;;  %v4968_v49 = vadd.f32 %v4967_v15, %v4930_v5 }
 0x587   : > { %v5006_v44 = vadd.f32 %v5005_v63, %v4968_v49 }
 0x588   : > { %v4893_v29 = vpop.f32.mrf.mxu2 }
 0x589   : > { %v5053_v30 = vmax.f32 %v5006_v44, 0.0  ;;  %v4894_v14 = vadd.f32 %v4893_v29, %v11189_v51  ;;  %v4931_v55 = vpop.f32.mrf.mxu3 }
 0x58a   : > { %v4972_v54 = vpop.f32.mrf.mxu0 }
 0x58b   : > { %v5104_v36 = vpack.c.bf16 %v5053_v30, %v5052_v22  ;;  %v4932_v4 = vadd.f32 %v4931_v55, %v4894_v14 }
 0x58c   : > { %v5010_v61 = vpop.f32.mrf.mxu1 }
 0x58d   : > { %5137 = vst [vmem:[%s9257_s25 + $0x70] sm:$0xff] %v5104_v36  ;;  %v4970_v9 = vadd.f32 %v4969_v56, %v4932_v4  ;;  %v5088_v36 = vmax.f32 %v11138_v34, 0.0 }
 0x58f   : > { %v5008_v27 = vadd.f32 %v5007_v0, %v4970_v9  ;;  %v5082_v0 = vmax.f32 %v11130_v8, 0.0 }
 0x590   : > { %v4896_v38 = vpop.f32.mrf.mxu2 }
 0x591   : > { %v5059_v24 = vmax.f32 %v5008_v27, 0.0  ;;  %v4897_v43 = vadd.f32 %v4896_v38, %v11193_v2  ;;  %v4934_v52 = vpop.f32.mrf.mxu3 }
 0x592   : > { %v4974_v59 = vpop.f32.mrf.mxu0 }
 0x593   : > { %v5107_v3 = vpack.c.bf16 %v5059_v24, %v5058_v7  ;;  %v4935_v51 = vadd.f32 %v4934_v52, %v4897_v43 }
 0x594   : > { %v5012_v57 = vpop.f32.mrf.mxu1 }
 0x595   : > { %5140 = vst [vmem:[%s9257_s25 + $0x88] sm:$0xff] %v5107_v3  ;;  %v4973_v19 = vadd.f32 %v4972_v54, %v4935_v51 }
 0x597   : > { %v5011_v41 = vadd.f32 %v5010_v61, %v4973_v19 }
 0x598   : > { %v4898_v32 = vpop.f32.mrf.mxu2 }
 0x599   : > { %v5065_v28 = vmax.f32 %v5011_v41, 0.0  ;;  %v4899_v39 = vadd.f32 %v4898_v32, %v11197_v20  ;;  %v4936_v10 = vpop.f32.mrf.mxu3 }
 0x59a   : > { %v4977_v25 = vpop.f32.mrf.mxu0 }
 0x59b   : > { %v5110_v18 = vpack.c.bf16 %v5065_v28, %v5064_v1  ;;  %v4937_v2 = vadd.f32 %v4936_v10, %v4899_v39 }
 0x59c   : > { %v5015_v46 = vpop.f32.mrf.mxu1 }
 0x59d   : > { %5143 = vst [vmem:[%s9257_s25 + $0xa0] sm:$0xff] %v5110_v18  ;;  %v4975_v6 = vadd.f32 %v4974_v59, %v4937_v2 }
 0x59f   : > { %v5013_v47 = vadd.f32 %v5012_v57, %v4975_v6 }
 0x5a0   : > { %v4901_v42 = vpop.f32.mrf.mxu2 }
 0x5a1   : > { %v5071_v53 = vmax.f32 %v5013_v47, 0.0  ;;  %v4902_v50 = vadd.f32 %v4901_v42, %v11201_v37  ;;  %v4939_v31 = vpop.f32.mrf.mxu3 }
 0x5a2   : > { %v4979_v21 = vpop.f32.mrf.mxu0 }
 0x5a3   : > { %v5113_v15 = vpack.c.bf16 %v5071_v53, %v5070_v58  ;;  %v4940_v20 = vadd.f32 %v4939_v31, %v4902_v50 }
 0x5a4   : > { %v5017_v23 = vpop.f32.mrf.mxu1 }
 0x5a5   : > { %5146 = vst [vmem:[%s9257_s25 + $0xb8] sm:$0xff] %v5113_v15  ;;  %v4978_v40 = vadd.f32 %v4977_v25, %v4940_v20 }
 0x5a7   : > { %v5016_v63 = vadd.f32 %v5015_v46, %v4978_v40 }
 0x5a8   : > { %v4903_v33 = vpop.f32.mrf.mxu2 }
 0x5a9   : > { %v5077_v12 = vmax.f32 %v5016_v63, 0.0  ;;  %v4904_v16 = vadd.f32 %v4903_v33, %v11205_v48  ;;  %v4941_v17 = vpop.f32.mrf.mxu3 }
 0x5aa   : > { %v4982_v35 = vpop.f32.mrf.mxu0 }
 0x5ab   : > { %v5116_v13 = vpack.c.bf16 %v5077_v12, %v5076_v11  ;;  %v4942_v37 = vadd.f32 %v4941_v17, %v4904_v16 }
 0x5ac   : > { %v5020_v26 = vpop.f32.mrf.mxu1 }
 0x5ad   : > { %5149 = vst [vmem:[%s9257_s25 + $0xd0] sm:$0xff] %v5116_v13  ;;  %v4980_v56 = vadd.f32 %v4979_v21, %v4942_v37 }
 0x5af   : > { %v5018_v60 = vadd.f32 %v5017_v23, %v4980_v56 }
 0x5b0   : > { %v4906_v5 = vpop.f32.mrf.mxu2 }
 0x5b1   : > { %v5083_v49 = vmax.f32 %v5018_v60, 0.0  ;;  %v4907_v44 = vadd.f32 %v4906_v5, %v11207_v45  ;;  %v4944_v62 = vpop.f32.mrf.mxu3 }
 0x5b2   : > { %v4984_v29 = vpop.f32.mrf.mxu0 }
 0x5b3   : > { %v5119_v22 = vpack.c.bf16 %v5083_v49, %v5082_v0  ;;  %v4945_v48 = vadd.f32 %v4944_v62, %v4907_v44 }
 0x5b4   : > { %v5022_v30 = vpop.f32.mrf.mxu1 }
 0x5b5   : > { %5152 = vst [vmem:[%s9257_s25 + $0xe8] sm:$0xff] %v5119_v22  ;;  %v4983_v14 = vadd.f32 %v4982_v35, %v4945_v48 }
 0x5b7   : > { %v5021_v55 = vadd.f32 %v5020_v26, %v4983_v14 }
 0x5b8   : > { %v4908_v54 = vpop.f32.mrf.mxu2 }
 0x5b9   : > { %v5089_v4 = vmax.f32 %v5021_v55, 0.0  ;;  %v4946_v61 = vpop.f32.mrf.mxu3 }
 0x5bb   : > { %v5122_v9 = vpack.c.bf16 %v5089_v4, %v5088_v36 }
 0x5bd   : > { %5155 = vst [vmem:[%s9257_s25 + $0x100] sm:$0xff] %v5122_v9 }
 0x5be PF: > { %s13_s12 = sadd.s32 1, %s7560_s12  }
 0x5bf   : > { %p10_p4 = scmp.ge.s32.totalorder %s13_s12, 4  }
 0x5c1   :  { %12 = sbr.rel (!%p10_p4) target bundleno = 1 (0x1), region = 62 }

// kernel: mixed_7a.4
= control target key start
LH: loop header
LB: loop body
LE: loop exit
PB: predicated region body
PF: predicated region fallthrough
CT: control target
= control target key end

     0   :  { %s1647_s12 = smov 0   ;;  %s1649_s13 = smov 0   ;;  %s1934_s0 = inlined_call_operand.vmem [shape: bf16[9,176,256], index: 0, kind: input, shape index: {}]   ;;  %s1935_s1 = inlined_call_operand.vmem [shape: bf16[9,256,384], index: 1, kind: input, shape index: {}]   ;;  %s1936_s2 = inlined_call_operand.vmem [shape: f32[1,384], index: 2, kind: input, shape index: {}]   ;;  %s1937_s3 = inlined_call_operand.vmem [shape: bf16[176,384], index: 3, kind: output, shape index: {}]  }
   0x1   :  { %s1651_s14 = smov 0   ;;  %s1653_s15 = smov 0  }
   0x2   :  { %s1655_s16 = smov 0  }
   0x3 LB: > { %s22_s17 = sadd.s32 1, %s1616_s14  ;;  %s25_s18 = sadd.s32 1, %s1620_s15  ;;  %s1624_s16 = sphi %s1655_s16, %s13_s16   ;;  %s1620_s15 = sphi %s1653_s15, %s1941_s15   ;;  %s1616_s14 = sphi %s1651_s14, %s1940_s14   ;;  %s1612_s13 = sphi %s1649_s13, %s1939_s13   ;;  %s1608_s12 = sphi %s1647_s12, %s1938_s12  }
   0x4   : > { %p23_p0 = scmp.ge.s32.totalorder %s22_s17, 9  ;;  %p1227_p1 = scmp.ge.s32.totalorder %s1624_s16, 1 }
   0x5   : > { %p167_p2 = scmp.lt.s32.totalorder %s1624_s16, 19 }
   0x6   : > { %s1943_s17 = smov (%p23_p0, %s22_s17), 0  ;;  %s1945_s18 = smov (!%p23_p0, %s25_s18), %s1620_s15 }
   0x7   : > { %p168_p3 = pnand %p1227_p1, %p167_p2  ;;  %p27_p4 = scmp.ge.s32.totalorder %s1945_s18, 2 }
   0x8   : > { %s202_s19 = smul.u32 (!%p168_p3), 11, %s1612_s13  ;;  %p203_p5 = scmp.lt.s32.totalorder (!%p168_p3), %s1608_s12, 8 }
   0x9   : > { %s1947_s18 = smov (%p27_p4, %s1945_s18), 0  ;;  %171 = sbr.rel (%p168_p3) target bundleno = 397 (0x18d), region = 32 }
   0xa   : > { %p205_p6 = scmp.lt.s32.totalorder (!%p168_p3), %s202_s19, 21  ;;  %p1232_p7 = scmp.ne.s32.totalorder (!%p168_p3), %s1608_s12, 0 }
   0xe   : > { %s204_s20 = scalar_select %p203_p5, %s1608_s12, 8 }
   0xf   : > { %s1949_s19 = smov (!%p205_p6, %s202_s19), 21 }
  0x10   : > { %s1542_s21 = smul.u32 44, %s204_s20  ;;  %s1228_s23 = sshll.u32 %s1949_s19, 1 }
  0x11   : > { %s1543_s22 = smul.u32 384, %s204_s20 }
  0x12   : > { %s1544_s24 = smul.u32 12, %s1949_s19  ;;  %s209_s25 = sadd.s32 %s1542_s21, %s1228_s23 }
  0x13   : > { %s1684_s28 = scalar_lea.vmem %s1935_s1, %s1543_s22  ;;  %s1229_s29 = sshll.u32 %s209_s25, 2 }
  0x14   : > { %s1689_s5 = scalar_lea.vmem %s1937_s3, %s1544_s24  ;;  %s1694_s8 = scalar_lea.vmem %s1934_s0, %s1229_s29 }
  0x15   : > { %228 = sbr.rel (%p1232_p7) target bundleno = 60 (0x3c), region = 36 }
  0x1a   : > { %v1626_v0 = vmov 0.0  }
  0x1b   : > { %229 = vst [vmem:[#allocation2 + $0xb0] sm:$0xff] %v1626_v0 }
  0x1c   : > { %230 = vst [vmem:[#allocation2] sm:$0xff] %v1626_v0 }
  0x1d   : > { %231 = vst [vmem:[#allocation2 + $0xd8] sm:$0xff] %v1626_v0 }
  0x1e   : > { %232 = vst [vmem:[#allocation2 + $0x18] sm:$0xff] %v1626_v0 }
  0x1f   : > { %233 = vst [vmem:[#allocation2 + $0x50] sm:$0xff] %v1626_v0 }
  0x20   : > { %234 = vst [vmem:[#allocation2 + $0x68] sm:$0xff] %v1626_v0 }
  0x21   : > { %235 = vst [vmem:[#allocation2 + $0x30] sm:$0xff] %v1626_v0 }
  0x22   : > { %236 = vst [vmem:[#allocation2 + $0x48] sm:$0xff] %v1626_v0 }
  0x23   : > { %237 = vst [vmem:[#allocation2 + $0x80] sm:$0xff] %v1626_v0 }
  0x24   : > { %238 = vst [vmem:[#allocation2 + $0x88] sm:$0xff] %v1626_v0 }
  0x25   : > { %239 = vst [vmem:[#allocation2 + $0xe8] sm:$0xff] %v1626_v0 }
  0x26   : > { %240 = vst [vmem:[#allocation2 + $0x100] sm:$0xff] %v1626_v0 }
  0x27   : > { %241 = vst [vmem:[#allocation2 + $0xc0] sm:$0xff] %v1626_v0 }
  0x28   : > { %242 = vst [vmem:[#allocation2 + $0x28] sm:$0xff] %v1626_v0 }
  0x29   : > { %243 = vst [vmem:[#allocation2 + $0xf8] sm:$0xff] %v1626_v0 }
  0x2a   : > { %244 = vst [vmem:[#allocation2 + $0xb8] sm:$0xff] %v1626_v0 }
  0x2b   : > { %245 = vst [vmem:[#allocation2 + $0x40] sm:$0xff] %v1626_v0 }
  0x2c   : > { %246 = vst [vmem:[#allocation2 + $0x90] sm:$0xff] %v1626_v0 }
  0x2d   : > { %247 = vst [vmem:[#allocation2 + $0x60] sm:$0xff] %v1626_v0 }
  0x2e   : > { %248 = vst [vmem:[#allocation2 + $0x38] sm:$0xff] %v1626_v0 }
  0x2f   : > { %249 = vst [vmem:[#allocation2 + $0xd0] sm:$0xff] %v1626_v0 }
  0x30   : > { %250 = vst [vmem:[#allocation2 + $0x20] sm:$0xff] %v1626_v0 }
  0x31   : > { %251 = vst [vmem:[#allocation2 + $0x98] sm:$0xff] %v1626_v0 }
  0x32   : > { %252 = vst [vmem:[#allocation2 + $0x78] sm:$0xff] %v1626_v0 }
  0x33   : > { %253 = vst [vmem:[#allocation2 + $0xc8] sm:$0xff] %v1626_v0 }
  0x34   : > { %254 = vst [vmem:[#allocation2 + $0x8] sm:$0xff] %v1626_v0 }
  0x35   : > { %255 = vst [vmem:[#allocation2 + $0x10] sm:$0xff] %v1626_v0 }
  0x36   : > { %256 = vst [vmem:[#allocation2 + $0xe0] sm:$0xff] %v1626_v0 }
  0x37   : > { %257 = vst [vmem:[#allocation2 + $0x70] sm:$0xff] %v1626_v0 }
  0x38   : > { %258 = vst [vmem:[#allocation2 + $0xa8] sm:$0xff] %v1626_v0 }
  0x39   : > { %259 = vst [vmem:[#allocation2 + $0x58] sm:$0xff] %v1626_v0 }
  0x3a   : > { %260 = vst [vmem:[#allocation2 + $0xf0] sm:$0xff] %v1626_v0 }
  0x3b   : > { %261 = vst [vmem:[#allocation2 + $0xa0] sm:$0xff] %v1626_v0 }
  0x3c PF: > { %v1359_v1 = vld [vmem:[%s1684_s28 + $0xa8] sm:$0xf]  ;;  %v1500_v2 = vld [vmem:[%s1684_s28 + $0xb0] sm:$0xf0]  ;;  %v1347_v6 = vld [vmem:[%s1684_s28 + $0x90] sm:$0xf] }
  0x3d   : > { %v1455_v3 = vld [vmem:[%s1684_s28 + $0x168] sm:$0xf]  ;;  %v1360_v4 = vor.u32 %v1500_v2, %v1359_v1  ;;  %v1524_v5 = vld [vmem:[%s1684_s28 + $0x170] sm:$0xf0]  ;;  %v1497_v7 = vld [vmem:[%s1684_s28 + $0x98] sm:$0xf0] }
  0x3e   : > { %v1456_v8 = vor.u32 %v1524_v5, %v1455_v3  ;;  %v1443_v9 = vld [vmem:[%s1684_s28 + $0x150] sm:$0xf]  ;;  %v1521_v10 = vld [vmem:[%s1684_s28 + $0x158] sm:$0xf0]  ;;  %v1348_v11 = vor.u32 %v1497_v7, %v1347_v6  ;;  %v1335_v13 = vld [vmem:[%s1684_s28 + $0x78] sm:$0xf] }
  0x3f   : > { %683 = vmatpush.bf16.msra.mxu0 %v1360_v4  ;;  %1526 = vmatpush.bf16.msra.mxu2 %v1360_v4  ;;  %v1444_v12 = vor.u32 %v1521_v10, %v1443_v9  ;;  %v1494_v14 = vld [vmem:[%s1684_s28 + $0x80] sm:$0xf0]  ;;  %v1431_v15 = vld [vmem:[%s1684_s28 + $0x138] sm:$0xf]  ;;  %v1323_v19 = vld [vmem:[%s1684_s28 + $0x60] sm:$0xf] }
  0x40   : > { %721 = vmatpush.bf16.msra.mxu1 %v1456_v8  ;;  %1534 = vmatpush.bf16.msra.mxu3 %v1456_v8  ;;  %v1518_v16 = vld [vmem:[%s1684_s28 + $0x140] sm:$0xf0]  ;;  %v1336_v17 = vor.u32 %v1494_v14, %v1335_v13  ;;  %v1491_v20 = vld [vmem:[%s1684_s28 + $0x68] sm:$0xf0]  ;;  %v1419_v21 = vld [vmem:[%s1684_s28 + $0x120] sm:$0xf] }
  0x41   : > { %v1432_v18 = vor.u32 %v1518_v16, %v1431_v15  ;;  %v1515_v22 = vld [vmem:[%s1684_s28 + $0x128] sm:$0xf0]  ;;  %v1324_v23 = vor.u32 %v1491_v20, %v1323_v19  ;;  %v1311_v25 = vld [vmem:[%s1684_s28 + $0x48] sm:$0xf]  ;;  %v1488_v26 = vld [vmem:[%s1684_s28 + $0x50] sm:$0xf0] }
  0x42   : > { %v1420_v24 = vor.u32 %v1515_v22, %v1419_v21  ;;  %v1407_v27 = vld [vmem:[%s1684_s28 + $0x108] sm:$0xf]  ;;  %v1512_v28 = vld [vmem:[%s1684_s28 + $0x110] sm:$0xf0]  ;;  %v1312_v29 = vor.u32 %v1488_v26, %v1311_v25  ;;  %v1299_v31 = vld [vmem:[%s1684_s28 + $0x30] sm:$0xf] }
  0x43   : > { %684 = vmatpush.bf16.msra.mxu0 %v1348_v11  ;;  %1527 = vmatpush.bf16.msra.mxu2 %v1348_v11  ;;  %v1408_v30 = vor.u32 %v1512_v28, %v1407_v27  ;;  %v1485_v32 = vld [vmem:[%s1684_s28 + $0x38] sm:$0xf0]  ;;  %v1395_v33 = vld [vmem:[%s1684_s28 + $0xf0] sm:$0xf]  ;;  %v1287_v37 = vld [vmem:[%s1684_s28 + $0x18] sm:$0xf] }
  0x44   : > { %722 = vmatpush.bf16.msra.mxu1 %v1444_v12  ;;  %1535 = vmatpush.bf16.msra.mxu3 %v1444_v12  ;;  %v1509_v34 = vld [vmem:[%s1684_s28 + $0xf8] sm:$0xf0]  ;;  %v1300_v35 = vor.u32 %v1485_v32, %v1299_v31  ;;  %v1482_v38 = vld [vmem:[%s1684_s28 + $0x20] sm:$0xf0]  ;;  %v1383_v39 = vld [vmem:[%s1684_s28 + $0xd8] sm:$0xf] }
  0x45   : > { %v1396_v36 = vor.u32 %v1509_v34, %v1395_v33  ;;  %v1506_v40 = vld [vmem:[%s1684_s28 + $0xe0] sm:$0xf0]  ;;  %v1288_v41 = vor.u32 %v1482_v38, %v1287_v37  ;;  %v1275_v42 = vld [vmem:[%s1684_s28] sm:$0xf]  ;;  %v1479_v44 = vld [vmem:[%s1684_s28 + $0x8] sm:$0xf0] }
  0x46   : > { %v1384_v43 = vor.u32 %v1506_v40, %v1383_v39  ;;  %v1371_v45 = vld [vmem:[%s1684_s28 + $0xc0] sm:$0xf]  ;;  %v1503_v46 = vld [vmem:[%s1684_s28 + $0xc8] sm:$0xf0]  ;;  %v1469_v48 = vld [vmem:[%s1694_s8 + $0x4] sm:$0xf0]  ;;  %v1276_v55 = vor.u32 %v1479_v44, %v1275_v42 }
  0x47   : > { %685 = vmatpush.bf16.msra.mxu0 %v1336_v17  ;;  %1528 = vmatpush.bf16.msra.mxu2 %v1336_v17  ;;  %v1235_v47 = vld [vmem:[%s1694_s8] sm:$0xf]  ;;  %v1259_v49 = vld [vmem:[%s1694_s8 + $0x30] sm:$0xf]  ;;  %v1475_v50 = vld [vmem:[%s1694_s8 + $0x34] sm:$0xf0]  ;;  %v1372_v59 = vor.u32 %v1503_v46, %v1371_v45 }
  0x48   : > { %723 = vmatpush.bf16.msra.mxu1 %v1432_v18  ;;  %1536 = vmatpush.bf16.msra.mxu3 %v1432_v18  ;;  %v1499_v51 = vld [vmem:[%s1684_s28 + $0xac] sm:$0xf]  ;;  %v1361_v52 = vld [vmem:[%s1684_s28 + $0xb4] sm:$0xf0]  ;;  %v1468_v56 = vld [vmem:[%s1694_s8 + $0x4] sm:$0xf]  ;;  %v1746_v4 = vor.u32 %v1469_v48, %v1235_v47  ;;  %v1748_v5 = vor.u32 %v1475_v50, %v1259_v49 }
  0x49   : > { %v1523_v53 = vld [vmem:[%s1684_s28 + $0x16c] sm:$0xf]  ;;  %v1457_v54 = vld [vmem:[%s1684_s28 + $0x174] sm:$0xf0]  ;;  %v1474_v58 = vld [vmem:[%s1694_s8 + $0x34] sm:$0xf]  ;;  %v1364_v63 = vor.u32 %v1499_v51, %v1361_v52 }
  0x4a   : > { %v1237_v57 = vld [vmem:[%s1694_s8 + $0x8] sm:$0xf0]  ;;  %v1261_v60 = vld [vmem:[%s1694_s8 + $0x38] sm:$0xf0]  ;;  %v1496_v61 = vld [vmem:[%s1684_s28 + $0x94] sm:$0xf]  ;;  %v1460_v0 = vor.u32 %v1523_v53, %v1457_v54 }
  0x4b   : > { %686 = vmatpush.bf16.msra.mxu0 %v1324_v23  ;;  %1529 = vmatpush.bf16.msra.mxu2 %v1324_v23  ;;  %v1367_v62 = vld [vmem:[%s1684_s28 + $0xb0] sm:$0xf]  ;;  %v1501_v1 = vld [vmem:[%s1684_s28 + $0xb8] sm:$0xf0]  ;;  %v1349_v6 = vld [vmem:[%s1684_s28 + $0x9c] sm:$0xf0]  ;;  %v1753_v9 = vor.u32 %v1468_v56, %v1237_v57  ;;  %v1755_v10 = vor.u32 %v1474_v58, %v1261_v60 }
  0x4c   : > { %724 = vmatpush.bf16.msra.mxu1 %v1420_v24  ;;  %1537 = vmatpush.bf16.msra.mxu3 %v1420_v24  ;;  %v1463_v2 = vld [vmem:[%s1684_s28 + $0x170] sm:$0xf]  ;;  %v1525_v3 = vld [vmem:[%s1684_s28 + $0x178] sm:$0xf0]  ;;  %v1520_v7 = vld [vmem:[%s1684_s28 + $0x154] sm:$0xf]  ;;  %v1368_v11 = vor.u32 %v1501_v1, %v1367_v62  ;;  %v1352_v15 = vor.u32 %v1496_v61, %v1349_v6 }
  0x4d   : > { %v1445_v8 = vld [vmem:[%s1684_s28 + $0x15c] sm:$0xf0]  ;;  %v1464_v12 = vor.u32 %v1525_v3, %v1463_v2  ;;  %v1493_v13 = vld [vmem:[%s1684_s28 + $0x7c] sm:$0xf]  ;;  %v1355_v14 = vld [vmem:[%s1684_s28 + $0x98] sm:$0xf] }
  0x4e   : > { %v1448_v16 = vor.u32 %v1520_v7, %v1445_v8  ;;  %v1498_v17 = vld [vmem:[%s1684_s28 + $0xa0] sm:$0xf0]  ;;  %v1451_v18 = vld [vmem:[%s1684_s28 + $0x158] sm:$0xf]  ;;  %v1337_v20 = vld [vmem:[%s1684_s28 + $0x84] sm:$0xf0] }
  0x4f   : > { %687 = vmatpush.bf16.msra.mxu0 %v1312_v29  ;;  %1530 = vmatpush.bf16.msra.mxu2 %v1312_v29  ;;  %v1522_v19 = vld [vmem:[%s1684_s28 + $0x160] sm:$0xf0]  ;;  %v1517_v21 = vld [vmem:[%s1684_s28 + $0x13c] sm:$0xf]  ;;  %v1433_v22 = vld [vmem:[%s1684_s28 + $0x144] sm:$0xf0]  ;;  %v1356_v23 = vor.u32 %v1498_v17, %v1355_v14  ;;  %v1340_v27 = vor.u32 %v1493_v13, %v1337_v20 }
  0x50   : > { %725 = vmatpush.bf16.msra.mxu1 %v1408_v30  ;;  %1538 = vmatpush.bf16.msra.mxu3 %v1408_v30  ;;  %v1452_v24 = vor.u32 %v1522_v19, %v1451_v18  ;;  %v1490_v25 = vld [vmem:[%s1684_s28 + $0x64] sm:$0xf]  ;;  %v1343_v26 = vld [vmem:[%s1684_s28 + $0x80] sm:$0xf]  ;;  %v1436_v28 = vor.u32 %v1517_v21, %v1433_v22  ;;  %v1495_v29 = vld [vmem:[%s1684_s28 + $0x88] sm:$0xf0] }
  0x51   : > { %v1439_v30 = vld [vmem:[%s1684_s28 + $0x140] sm:$0xf]  ;;  %v1519_v31 = vld [vmem:[%s1684_s28 + $0x148] sm:$0xf0]  ;;  %v1325_v32 = vld [vmem:[%s1684_s28 + $0x6c] sm:$0xf0] }
  0x52   : > { %v1514_v33 = vld [vmem:[%s1684_s28 + $0x124] sm:$0xf]  ;;  %v1421_v34 = vld [vmem:[%s1684_s28 + $0x12c] sm:$0xf0]  ;;  %v1487_v37 = vld [vmem:[%s1684_s28 + $0x4c] sm:$0xf] }
  0x53   : > { %688 = vmatpush.bf16.msra.mxu0 %v1300_v35  ;;  %1531 = vmatpush.bf16.msra.mxu2 %v1300_v35  ;;  %v1344_v35 = vor.u32 %v1495_v29, %v1343_v26  ;;  %v1331_v38 = vld [vmem:[%s1684_s28 + $0x68] sm:$0xf]  ;;  %v1243_v39 = vld [vmem:[%s1694_s8 + $0x10] sm:$0xf]  ;;  %v1471_v40 = vld [vmem:[%s1694_s8 + $0x14] sm:$0xf0]  ;;  %v1424_v44 = vor.u32 %v1514_v33, %v1421_v34 }
  0x54   : > { %726 = vmatpush.bf16.msra.mxu1 %v1396_v36  ;;  %1539 = vmatpush.bf16.msra.mxu3 %v1396_v36  ;;  %v1440_v36 = vor.u32 %v1519_v31, %v1439_v30  ;;  %v1477_v42 = vld [vmem:[%s1694_s8 + $0x44] sm:$0xf0]  ;;  %v1492_v45 = vld [vmem:[%s1684_s28 + $0x70] sm:$0xf0]  ;;  %v1313_v48 = vld [vmem:[%s1684_s28 + $0x54] sm:$0xf0] }
  0x55   : > { %v1427_v46 = vld [vmem:[%s1684_s28 + $0x128] sm:$0xf]  ;;  %v1516_v47 = vld [vmem:[%s1684_s28 + $0x130] sm:$0xf0]  ;;  %v1511_v49 = vld [vmem:[%s1684_s28 + $0x10c] sm:$0xf] }
  0x56   : > { %v1409_v50 = vld [vmem:[%s1684_s28 + $0x114] sm:$0xf0]  ;;  %v1470_v51 = vld [vmem:[%s1694_s8 + $0x14] sm:$0xf]  ;;  %v1245_v52 = vld [vmem:[%s1694_s8 + $0x18] sm:$0xf0]  ;;  %v1428_v56 = vor.u32 %v1516_v47, %v1427_v46 }
  0x57   : > { %689 = vmatpush.bf16.msra.mxu0 %v1288_v41  ;;  %1532 = vmatpush.bf16.msra.mxu2 %v1288_v41  ;;  %v1267_v41 = vld [vmem:[%s1694_s8 + $0x40] sm:$0xf]  ;;  %v1476_v53 = vld [vmem:[%s1694_s8 + $0x44] sm:$0xf]  ;;  %v1269_v54 = vld [vmem:[%s1694_s8 + $0x48] sm:$0xf0]  ;;  %v1412_v60 = vor.u32 %v1511_v49, %v1409_v50  ;;  %v1805_v7 = vor.u32 %v1470_v51, %v1245_v52 }
  0x58   : > { %727 = vmatpush.bf16.msra.mxu1 %v1384_v43  ;;  %1540 = vmatpush.bf16.msra.mxu3 %v1384_v43  ;;  %v1328_v43 = vor.u32 %v1490_v25, %v1325_v32  ;;  %v1484_v57 = vld [vmem:[%s1684_s28 + $0x34] sm:$0xf]  ;;  %v1319_v58 = vld [vmem:[%s1684_s28 + $0x50] sm:$0xf]  ;;  %v1489_v61 = vld [vmem:[%s1684_s28 + $0x58] sm:$0xf0]  ;;  %v1800_v1 = vor.u32 %v1477_v42, %v1267_v41  ;;  %v1807_v8 = vor.u32 %v1476_v53, %v1269_v54 }
  0x59   : > { %v1415_v62 = vld [vmem:[%s1684_s28 + $0x110] sm:$0xf]  ;;  %v1301_v2 = vld [vmem:[%s1684_s28 + $0x3c] sm:$0xf0]  ;;  %v1508_v3 = vld [vmem:[%s1684_s28 + $0xf4] sm:$0xf] }
  0x5a   : > { %v1397_v6 = vld [vmem:[%s1684_s28 + $0xfc] sm:$0xf0]  ;;  %v1481_v13 = vld [vmem:[%s1684_s28 + $0x1c] sm:$0xf]  ;;  %v1307_v14 = vld [vmem:[%s1684_s28 + $0x38] sm:$0xf] }
  0x5b   : > { %690 = vmatpush.bf16.msra.mxu0 %v1276_v55  ;;  %1533 = vmatpush.bf16.msra.mxu2 %v1276_v55  ;;  %v1332_v55 = vor.u32 %v1492_v45, %v1331_v38  ;;  %v1486_v17 = vld [vmem:[%s1684_s28 + $0x40] sm:$0xf0]  ;;  %v1403_v18 = vld [vmem:[%s1684_s28 + $0xf8] sm:$0xf]  ;;  %v1289_v20 = vld [vmem:[%s1684_s28 + $0x24] sm:$0xf0] }
  0x5c   : > { %728 = vmatpush.bf16.msra.mxu1 %v1372_v59  ;;  %1541 = vmatpush.bf16.msra.mxu3 %v1372_v59  ;;  %v1316_v59 = vor.u32 %v1487_v37, %v1313_v48  ;;  %v1510_v19 = vld [vmem:[%s1684_s28 + $0x100] sm:$0xf0]  ;;  %v1505_v21 = vld [vmem:[%s1684_s28 + $0xdc] sm:$0xf]  ;;  %v1385_v22 = vld [vmem:[%s1684_s28 + $0xe4] sm:$0xf0] }
  0x5d   : > { %v1295_v25 = vld [vmem:[%s1684_s28 + $0x20] sm:$0xf]  ;;  %v1483_v26 = vld [vmem:[%s1684_s28 + $0x28] sm:$0xf0]  ;;  %v1478_v31 = vld [vmem:[%s1684_s28 + $0x4] sm:$0xf] }
  0x5e   : > { %691 = vmatmul.bf16.vlgmr.msra.gmra.mxu0 %v1746_v4  ;;  %706 = vmatmul.bf16.vlgmr.msra.gmra.mxu2 %v1748_v5  ;;  %v1391_v29 = vld [vmem:[%s1684_s28 + $0xe0] sm:$0xf]  ;;  %v1507_v30 = vld [vmem:[%s1684_s28 + $0xe8] sm:$0xf0]  ;;  %v1277_v32 = vld [vmem:[%s1684_s28 + $0xc] sm:$0xf0] }
  0x5f   : > { %759 = vmatpush.bf16.msrb.mxu2 %v1364_v63  ;;  %729 = vmatmul.bf16.vlgmr.msra.gmra.mxu1 %v1753_v9  ;;  %v1513_v63 = vld [vmem:[%s1684_s28 + $0x118] sm:$0xf0]  ;;  %v1502_v33 = vld [vmem:[%s1684_s28 + $0xc4] sm:$0xf]  ;;  %v1373_v34 = vld [vmem:[%s1684_s28 + $0xcc] sm:$0xf0]  ;;  %v1392_v37 = vor.u32 %v1507_v30, %v1391_v29 }
  0x60   : > { %797 = vmatpush.bf16.msrb.mxu3 %v1460_v0  ;;  %835 = vmatpush.bf16.msrb.mxu0 %v1368_v11  ;;  %v1798_v0 = vor.u32 %v1471_v40, %v1243_v39  ;;  %v1320_v11 = vor.u32 %v1489_v61, %v1319_v58  ;;  %v1283_v38 = vld [vmem:[%s1684_s28 + $0x8] sm:$0xf]  ;;  %v1280_v39 = vor.u32 %v1478_v31, %v1277_v32  ;;  %v1480_v41 = vld [vmem:[%s1684_s28 + $0x10] sm:$0xf0]  ;;  %v1251_v45 = vld [vmem:[%s1694_s8 + $0x20] sm:$0xf] }
  0x61   : > { %744 = vmatmul.bf16.vlgmr.msra.gmra.mxu3 %v1755_v10  ;;  %873 = vmatpush.bf16.msrb.mxu1 %v1464_v12  ;;  %v1416_v12 = vor.u32 %v1513_v63, %v1415_v62  ;;  %v1376_v40 = vor.u32 %v1502_v33, %v1373_v34  ;;  %v1379_v42 = vld [vmem:[%s1684_s28 + $0xc8] sm:$0xf]  ;;  %v1472_v48 = vld [vmem:[%s1694_s8 + $0x24] sm:$0xf]  ;;  %v1253_v49 = vld [vmem:[%s1694_s8 + $0x28] sm:$0xf0]  ;;  %v1284_v50 = vor.u32 %v1480_v41, %v1283_v38 }
  0x62   : > { %v1473_v46 = vld [vmem:[%s1694_s8 + $0x24] sm:$0xf0]  ;;  %v1256_v54 = vor.u32 %v1472_v48, %v1253_v49  ;;  %v265_v62 = vld [vmem:[#allocation2 + $0x18] sm:$0xff]  ;;  %v274_v32 = vld [vmem:[#allocation2 + $0xc0] sm:$0xff]  ;;  %p1465_p8 = scmp.ne.s32.totalorder %s1608_s12, 8 }
  0x63   : > { %760 = vmatpush.bf16.msrb.mxu2 %v1352_v15  ;;  %v1304_v15 = vor.u32 %v1484_v57, %v1301_v2  ;;  %v1252_v52 = vor.u32 %v1473_v46, %v1251_v45  ;;  %v292_v38 = vld [vmem:[#allocation2 + $0x58] sm:$0xff] }
  0x64   : > { %798 = vmatpush.bf16.msrb.mxu3 %v1448_v16  ;;  %836 = vmatpush.bf16.msrb.mxu0 %v1356_v23  ;;  %v1400_v16 = vor.u32 %v1508_v3, %v1397_v6  ;;  %v1308_v23 = vor.u32 %v1486_v17, %v1307_v14  ;;  %v283_v6 = vld [vmem:[#allocation2 + $0x20] sm:$0xff] }
  0x65   : > { %874 = vmatpush.bf16.msrb.mxu1 %v1452_v24  ;;  %v1404_v24 = vor.u32 %v1510_v19, %v1403_v18  ;;  %v286_v18 = vld [vmem:[#allocation2 + $0xc8] sm:$0xff] }
  0x67   : > { %761 = vmatpush.bf16.msrb.mxu2 %v1340_v27  ;;  %v1292_v27 = vor.u32 %v1481_v13, %v1289_v20 }
  0x68   : > { %799 = vmatpush.bf16.msrb.mxu3 %v1436_v28  ;;  %837 = vmatpush.bf16.msrb.mxu0 %v1344_v35  ;;  %v1388_v28 = vor.u32 %v1505_v21, %v1385_v22  ;;  %v305_v35 = vld [vmem:[%s1694_s8 + $0x50] sm:$0xff]  ;;  %v271_v22 = vld [vmem:[#allocation2 + $0x88] sm:$0xff] }
  0x69   : > { %875 = vmatpush.bf16.msrb.mxu1 %v1440_v36  ;;  %v1296_v36 = vor.u32 %v1483_v26, %v1295_v25  ;;  %v402_v47 = vunpack.c.h.b16 %v305_v35 }
  0x6b   : > { %762 = vmatpush.bf16.msrb.mxu2 %v1328_v43  ;;  %v1504_v43 = vld [vmem:[%s1684_s28 + $0xd0] sm:$0xf0] }
  0x6c   : > { %800 = vmatpush.bf16.msrb.mxu3 %v1424_v44  ;;  %838 = vmatpush.bf16.msrb.mxu0 %v1332_v55  ;;  %v401_v44 = vunpack.c.l.b16 %v305_v35  ;;  %v1380_v51 = vor.u32 %v1504_v43, %v1379_v42  ;;  %v414_v55 = vpack.c.b16 %v402_v47, %v402_v47  ;;  %v277_v42 = vld [vmem:[#allocation2 + $0xb8] sm:$0xff] }
  0x6d   : > { %876 = vmatpush.bf16.msrb.mxu1 %v1428_v56 }
  0x6e   : > { %696 = vmatmul.bf16.gmra.mxu0 %v1798_v0  ;;  %711 = vmatmul.bf16.gmra.mxu2 %v1800_v1  ;;  %v413_v53 = vpack.c.b16 %v401_v44, %v401_v44 }
  0x6f   : > { %763 = vmatpush.bf16.msrb.mxu2 %v1316_v59  ;;  %734 = vmatmul.bf16.gmra.mxu1 %v1805_v7 }
  0x70   : > { %801 = vmatpush.bf16.msrb.mxu3 %v1412_v60  ;;  %839 = vmatpush.bf16.msrb.mxu0 %v1320_v11 }
  0x71   : > { %749 = vmatmul.bf16.gmra.mxu3 %v1807_v8  ;;  %877 = vmatpush.bf16.msrb.mxu1 %v1416_v12  ;;  %v268_v12 = vld [vmem:[#allocation2 + $0x30] sm:$0xff] }
  0x73   : > { %764 = vmatpush.bf16.msrb.mxu2 %v1304_v15 }
  0x74   : > { %802 = vmatpush.bf16.msrb.mxu3 %v1400_v16  ;;  %840 = vmatpush.bf16.msrb.mxu0 %v1308_v23 }
  0x75   : > { %878 = vmatpush.bf16.msrb.mxu1 %v1404_v24 }
  0x77   : > { %765 = vmatpush.bf16.msrb.mxu2 %v1292_v27 }
  0x78   : > { %803 = vmatpush.bf16.msrb.mxu3 %v1388_v28  ;;  %841 = vmatpush.bf16.msrb.mxu0 %v1296_v36  ;;  %v289_v28 = vld [vmem:[#allocation2 + $0xe0] sm:$0xff] }
  0x79   : > { %879 = vmatpush.bf16.msrb.mxu1 %v1392_v37 }
  0x7b   : > { %766 = vmatpush.bf16.msrb.mxu2 %v1280_v39 }
  0x7c   : > { %804 = vmatpush.bf16.msrb.mxu3 %v1376_v40  ;;  %842 = vmatpush.bf16.msrb.mxu0 %v1284_v50  ;;  %v264_v50 = vld [vmem:[#allocation2 + $0xd8] sm:$0xff] }
  0x7d   : > { %880 = vmatpush.bf16.msrb.mxu1 %v1380_v51 }
  0x7e   : > { %701 = vmatmul.bf16.gmra.mxu0 %v1252_v52  ;;  %716 = vmatmul.bf16.gmra.mxu2 %v413_v53 }
  0x7f   : > { %739 = vmatmul.bf16.gmra.mxu1 %v1256_v54 }
  0x81   : > { %754 = vmatmul.bf16.gmra.mxu3 %v414_v55 }
  0x8e   : > { %767 = vmatmul.bf16.vlgmr.msrb.gmra.mxu2 %v1746_v4  ;;  %843 = vmatmul.bf16.vlgmr.msrb.gmra.mxu0 %v1746_v4 }
  0x8f   : > { %881 = vmatmul.bf16.vlgmr.msrb.gmra.mxu1 %v1753_v9 }
  0x91   : > { %805 = vmatmul.bf16.vlgmr.msrb.gmra.mxu3 %v1753_v9  ;;  %v262_v9 = vld [vmem:[#allocation2 + $0xb0] sm:$0xff] }
  0x9e   : > { %772 = vmatmul.bf16.gmra.mxu2 %v1798_v0  ;;  %848 = vmatmul.bf16.gmra.mxu0 %v1798_v0 }
  0x9f   : > { %886 = vmatmul.bf16.gmra.mxu1 %v1805_v7 }
  0xa1   : > { %810 = vmatmul.bf16.gmra.mxu3 %v1805_v7 }
  0xae   : > { %777 = vmatmul.bf16.gmra.mxu2 %v1252_v52  ;;  %853 = vmatmul.bf16.gmra.mxu0 %v1252_v52 }
  0xaf   : > { %891 = vmatmul.bf16.gmra.mxu1 %v1256_v54 }
  0xb1   : > { %815 = vmatmul.bf16.gmra.mxu3 %v1256_v54 }
  0xbe   : > { %782 = vmatmul.bf16.gmra.mxu2 %v1748_v5  ;;  %858 = vmatmul.bf16.gmra.mxu0 %v1748_v5 }
  0xbf   : > { %896 = vmatmul.bf16.gmra.mxu1 %v1755_v10 }
  0xc1   : > { %820 = vmatmul.bf16.gmra.mxu3 %v1755_v10  ;;  %v280_v10 = vld [vmem:[#allocation2 + $0x60] sm:$0xff] }
  0xce   : > { %787 = vmatmul.bf16.gmra.mxu2 %v1800_v1  ;;  %863 = vmatmul.bf16.gmra.mxu0 %v1800_v1 }
  0xcf   : > { %901 = vmatmul.bf16.gmra.mxu1 %v1807_v8 }
  0xd1   : > { %825 = vmatmul.bf16.gmra.mxu3 %v1807_v8 }
  0xdb   : > { %v692_v4 = vpop.f32.mrf.mxu0 }
  0xdc   : > { %v730_v56 = vpop.f32.mrf.mxu1 }
  0xdd   : > { %v731_v57 = vadd.f32 %v730_v56, %v692_v4 }
  0xde   : > { %792 = vmatmul.bf16.gmra.mxu2 %v413_v53  ;;  %868 = vmatmul.bf16.gmra.mxu0 %v413_v53 }
  0xdf   : > { %v911_v58 = vadd.f32 %v731_v57, %v262_v9  ;;  %906 = vmatmul.bf16.gmra.mxu1 %v414_v55  ;;  %v267_v57 = vld [vmem:[#allocation2 + $0x68] sm:$0xff] }
  0xe1   : > { %830 = vmatmul.bf16.gmra.mxu3 %v414_v55  ;;  %944 = vst [vmem:[#allocation2 + $0xb0] sm:$0xff] %v911_v58  ;;  %v707_v5 = vpop.f32.mrf.mxu2  ;;  %v263_v55 = vld [vmem:[#allocation2] sm:$0xff] }
  0xe3   : > { %v694_v61 = vpop.f32.mrf.mxu0 }
  0xe4   : > { %v745_v59 = vpop.f32.mrf.mxu3  ;;  %v732_v63 = vpop.f32.mrf.mxu1 }
  0xe5   : > { %v746_v60 = vadd.f32 %v745_v59, %v707_v5  ;;  %v733_v1 = vadd.f32 %v732_v63, %v694_v61  ;;  %v266_v61 = vld [vmem:[#allocation2 + $0x50] sm:$0xff] }
  0xe7   : > { %v929_v0 = vadd.f32 %v746_v60, %v280_v10  ;;  %v914_v2 = vadd.f32 %v733_v1, %v265_v62  ;;  %v270_v1 = vld [vmem:[#allocation2 + $0x80] sm:$0xff] }
  0xe9   : > { %962 = vst [vmem:[#allocation2 + $0x60] sm:$0xff] %v929_v0  ;;  %v709_v3 = vpop.f32.mrf.mxu2 }
  0xea   : > { %947 = vst [vmem:[#allocation2 + $0x18] sm:$0xff] %v914_v2 }
  0xeb   : > { %v697_v11 = vpop.f32.mrf.mxu0 }
  0xec   : > { %v747_v7 = vpop.f32.mrf.mxu3  ;;  %v735_v13 = vpop.f32.mrf.mxu1 }
  0xed   : > { %v748_v8 = vadd.f32 %v747_v7, %v709_v3  ;;  %v736_v15 = vadd.f32 %v735_v13, %v697_v11  ;;  %v269_v11 = vld [vmem:[#allocation2 + $0x48] sm:$0xff] }
  0xef   : > { %v932_v14 = vadd.f32 %v748_v8, %v283_v6  ;;  %v917_v16 = vadd.f32 %v736_v15, %v268_v12  ;;  %v273_v15 = vld [vmem:[#allocation2 + $0x100] sm:$0xff] }
  0xf1   : > { %965 = vst [vmem:[#allocation2 + $0x20] sm:$0xff] %v932_v14  ;;  %v712_v17 = vpop.f32.mrf.mxu2 }
  0xf2   : > { %950 = vst [vmem:[#allocation2 + $0x30] sm:$0xff] %v917_v16 }
  0xf3   : > { %v699_v21 = vpop.f32.mrf.mxu0 }
  0xf4   : > { %v750_v19 = vpop.f32.mrf.mxu3  ;;  %v737_v23 = vpop.f32.mrf.mxu1 }
  0xf5   : > { %v751_v20 = vadd.f32 %v750_v19, %v712_v17  ;;  %v738_v25 = vadd.f32 %v737_v23, %v699_v21  ;;  %v272_v21 = vld [vmem:[#allocation2 + $0xe8] sm:$0xff] }
  0xf7   : > { %v935_v24 = vadd.f32 %v751_v20, %v286_v18  ;;  %v920_v26 = vadd.f32 %v738_v25, %v271_v22  ;;  %v276_v25 = vld [vmem:[#allocation2 + $0xf8] sm:$0xff] }
  0xf9   : > { %968 = vst [vmem:[#allocation2 + $0xc8] sm:$0xff] %v935_v24  ;;  %v714_v27 = vpop.f32.mrf.mxu2 }
  0xfa   : > { %953 = vst [vmem:[#allocation2 + $0x88] sm:$0xff] %v920_v26 }
  0xfb   : > { %v702_v31 = vpop.f32.mrf.mxu0 }
  0xfc   : > { %v752_v29 = vpop.f32.mrf.mxu3  ;;  %v740_v33 = vpop.f32.mrf.mxu1 }
  0xfd   : > { %v753_v30 = vadd.f32 %v752_v29, %v714_v27  ;;  %v741_v35 = vadd.f32 %v740_v33, %v702_v31  ;;  %v275_v31 = vld [vmem:[#allocation2 + $0x28] sm:$0xff] }
  0xff   : > { %v938_v34 = vadd.f32 %v753_v30, %v289_v28  ;;  %v923_v36 = vadd.f32 %v741_v35, %v274_v32  ;;  %v279_v35 = vld [vmem:[#allocation2 + $0x90] sm:$0xff] }
 0x101   : > { %971 = vst [vmem:[#allocation2 + $0xe0] sm:$0xff] %v938_v34  ;;  %v717_v37 = vpop.f32.mrf.mxu2 }
 0x102   : > { %956 = vst [vmem:[#allocation2 + $0xc0] sm:$0xff] %v923_v36 }
 0x103   : > { %v704_v41 = vpop.f32.mrf.mxu0 }
 0x104   : > { %v755_v39 = vpop.f32.mrf.mxu3  ;;  %v742_v43 = vpop.f32.mrf.mxu1 }
 0x105   : > { %v756_v40 = vadd.f32 %v755_v39, %v717_v37  ;;  %v743_v45 = vadd.f32 %v742_v43, %v704_v41  ;;  %v278_v41 = vld [vmem:[#allocation2 + $0x40] sm:$0xff] }
 0x107   : > { %v941_v44 = vadd.f32 %v756_v40, %v292_v38  ;;  %v926_v46 = vadd.f32 %v743_v45, %v277_v42  ;;  %v282_v45 = vld [vmem:[#allocation2 + $0xd0] sm:$0xff] }
 0x109   : > { %974 = vst [vmem:[#allocation2 + $0x58] sm:$0xff] %v941_v44  ;;  %v719_v47 = vpop.f32.mrf.mxu2 }
 0x10a   : > { %959 = vst [vmem:[#allocation2 + $0xb8] sm:$0xff] %v926_v46 }
 0x10b   : > { %v844_v49 = vpop.f32.mrf.mxu0 }
 0x10c   : > { %v757_v48 = vpop.f32.mrf.mxu3  ;;  %v882_v51 = vpop.f32.mrf.mxu1 }
 0x10d   : > { %v883_v52 = vadd.f32 %v882_v51, %v844_v49  ;;  %v281_v51 = vld [vmem:[#allocation2 + $0x38] sm:$0xff] }
 0x10f   : > { %v913_v53 = vadd.f32 %v883_v52, %v264_v50 }
 0x111   : > { %946 = vst [vmem:[#allocation2 + $0xd8] sm:$0xff] %v913_v53  ;;  %v768_v54 = vpop.f32.mrf.mxu2 }
 0x113   : > { %v846_v56 = vpop.f32.mrf.mxu0 }
 0x114   : > { %v806_v4 = vpop.f32.mrf.mxu3  ;;  %v884_v58 = vpop.f32.mrf.mxu1 }
 0x115   : > { %v807_v9 = vadd.f32 %v806_v4, %v768_v54  ;;  %v885_v10 = vadd.f32 %v884_v58, %v846_v56 }
 0x117   : > { %v912_v5 = vadd.f32 %v807_v9, %v263_v55  ;;  %v916_v59 = vadd.f32 %v885_v10, %v267_v57  ;;  %v285_v55 = vld [vmem:[#allocation2 + $0x78] sm:$0xff] }
 0x119   : > { %945 = vst [vmem:[#allocation2] sm:$0xff] %v912_v5  ;;  %v770_v60 = vpop.f32.mrf.mxu2  ;;  %v284_v5 = vld [vmem:[#allocation2 + $0x98] sm:$0xff] }
 0x11a   : > { %949 = vst [vmem:[#allocation2 + $0x68] sm:$0xff] %v916_v59 }
 0x11b   : > { %v849_v0 = vpop.f32.mrf.mxu0 }
 0x11c   : > { %v808_v62 = vpop.f32.mrf.mxu3  ;;  %v887_v2 = vpop.f32.mrf.mxu1 }
 0x11d   : > { %v809_v63 = vadd.f32 %v808_v62, %v770_v60  ;;  %v888_v6 = vadd.f32 %v887_v2, %v849_v0 }
 0x11f   : > { %v915_v3 = vadd.f32 %v809_v63, %v266_v61  ;;  %v919_v7 = vadd.f32 %v888_v6, %v270_v1  ;;  %v288_v61 = vld [vmem:[#allocation2 + $0x10] sm:$0xff] }
 0x121   : > { %948 = vst [vmem:[#allocation2 + $0x50] sm:$0xff] %v915_v3  ;;  %v773_v8 = vpop.f32.mrf.mxu2  ;;  %v287_v3 = vld [vmem:[#allocation2 + $0x8] sm:$0xff] }
 0x122   : > { %952 = vst [vmem:[#allocation2 + $0x80] sm:$0xff] %v919_v7 }
 0x123   : > { %v851_v14 = vpop.f32.mrf.mxu0 }
 0x124   : > { %v811_v12 = vpop.f32.mrf.mxu3  ;;  %v889_v16 = vpop.f32.mrf.mxu1 }
 0x125   : > { %v812_v13 = vadd.f32 %v811_v12, %v773_v8  ;;  %v890_v18 = vadd.f32 %v889_v16, %v851_v14 }
 0x127   : > { %v918_v17 = vadd.f32 %v812_v13, %v269_v11  ;;  %v922_v19 = vadd.f32 %v890_v18, %v273_v15  ;;  %v291_v11 = vld [vmem:[#allocation2 + $0xa8] sm:$0xff] }
 0x129   : > { %951 = vst [vmem:[#allocation2 + $0x48] sm:$0xff] %v918_v17  ;;  %v775_v20 = vpop.f32.mrf.mxu2  ;;  %v290_v17 = vld [vmem:[#allocation2 + $0x70] sm:$0xff] }
 0x12a   : > { %955 = vst [vmem:[#allocation2 + $0x100] sm:$0xff] %v922_v19 }
 0x12b   : > { %v854_v24 = vpop.f32.mrf.mxu0 }
 0x12c   : > { %v813_v22 = vpop.f32.mrf.mxu3  ;;  %v892_v26 = vpop.f32.mrf.mxu1 }
 0x12d   : > { %v814_v23 = vadd.f32 %v813_v22, %v775_v20  ;;  %v893_v28 = vadd.f32 %v892_v26, %v854_v24 }
 0x12f   : > { %v921_v27 = vadd.f32 %v814_v23, %v272_v21  ;;  %v925_v29 = vadd.f32 %v893_v28, %v276_v25  ;;  %v294_v21 = vld [vmem:[#allocation2 + $0xa0] sm:$0xff] }
 0x131   : > { %954 = vst [vmem:[#allocation2 + $0xe8] sm:$0xff] %v921_v27  ;;  %v778_v30 = vpop.f32.mrf.mxu2  ;;  %v293_v27 = vld [vmem:[#allocation2 + $0xf0] sm:$0xff] }
 0x132   : > { %958 = vst [vmem:[#allocation2 + $0xf8] sm:$0xff] %v925_v29 }
 0x133   : > { %v856_v34 = vpop.f32.mrf.mxu0 }
 0x134   : > { %v816_v32 = vpop.f32.mrf.mxu3  ;;  %v894_v36 = vpop.f32.mrf.mxu1 }
 0x135   : > { %v817_v33 = vadd.f32 %v816_v32, %v778_v30  ;;  %v895_v38 = vadd.f32 %v894_v36, %v856_v34 }
 0x137   : > { %v924_v37 = vadd.f32 %v817_v33, %v275_v31  ;;  %v928_v39 = vadd.f32 %v895_v38, %v279_v35 }
 0x139   : > { %957 = vst [vmem:[#allocation2 + $0x28] sm:$0xff] %v924_v37  ;;  %v780_v40 = vpop.f32.mrf.mxu2 }
 0x13a   : > { %961 = vst [vmem:[#allocation2 + $0x90] sm:$0xff] %v928_v39 }
 0x13b   : > { %v859_v44 = vpop.f32.mrf.mxu0 }
 0x13c   : > { %v818_v42 = vpop.f32.mrf.mxu3  ;;  %v897_v46 = vpop.f32.mrf.mxu1 }
 0x13d   : > { %v819_v43 = vadd.f32 %v818_v42, %v780_v40  ;;  %v898_v48 = vadd.f32 %v897_v46, %v859_v44 }
 0x13f   : > { %v927_v47 = vadd.f32 %v819_v43, %v278_v41  ;;  %v931_v49 = vadd.f32 %v898_v48, %v282_v45 }
 0x141   : > { %960 = vst [vmem:[#allocation2 + $0x40] sm:$0xff] %v927_v47  ;;  %v783_v50 = vpop.f32.mrf.mxu2 }
 0x142   : > { %964 = vst [vmem:[#allocation2 + $0xd0] sm:$0xff] %v931_v49 }
 0x143   : > { %v861_v54 = vpop.f32.mrf.mxu0 }
 0x144   : > { %v821_v52 = vpop.f32.mrf.mxu3  ;;  %v899_v4 = vpop.f32.mrf.mxu1 }
 0x145   : > { %v822_v53 = vadd.f32 %v821_v52, %v783_v50  ;;  %v900_v56 = vadd.f32 %v899_v4, %v861_v54 }
 0x147   : > { %v930_v9 = vadd.f32 %v822_v53, %v281_v51  ;;  %v934_v57 = vadd.f32 %v900_v56, %v285_v55 }
 0x149   : > { %963 = vst [vmem:[#allocation2 + $0x38] sm:$0xff] %v930_v9  ;;  %v785_v58 = vpop.f32.mrf.mxu2 }
 0x14a   : > { %967 = vst [vmem:[#allocation2 + $0x78] sm:$0xff] %v934_v57 }
 0x14b   : > { %v864_v60 = vpop.f32.mrf.mxu0 }
 0x14c   : > { %v823_v10 = vpop.f32.mrf.mxu3  ;;  %v902_v62 = vpop.f32.mrf.mxu1 }
 0x14d   : > { %v824_v59 = vadd.f32 %v823_v10, %v785_v58  ;;  %v903_v0 = vadd.f32 %v902_v62, %v864_v60 }
 0x14f   : > { %v933_v63 = vadd.f32 %v824_v59, %v284_v5  ;;  %v937_v1 = vadd.f32 %v903_v0, %v288_v61 }
 0x151   : > { %966 = vst [vmem:[#allocation2 + $0x98] sm:$0xff] %v933_v63  ;;  %v788_v2 = vpop.f32.mrf.mxu2 }
 0x152   : > { %970 = vst [vmem:[#allocation2 + $0x10] sm:$0xff] %v937_v1 }
 0x153   : > { %v866_v8 = vpop.f32.mrf.mxu0 }
 0x154   : > { %v826_v6 = vpop.f32.mrf.mxu3  ;;  %v904_v12 = vpop.f32.mrf.mxu1 }
 0x155   : > { %v827_v7 = vadd.f32 %v826_v6, %v788_v2  ;;  %v905_v14 = vadd.f32 %v904_v12, %v866_v8 }
 0x157   : > { %v936_v13 = vadd.f32 %v827_v7, %v287_v3  ;;  %v940_v15 = vadd.f32 %v905_v14, %v291_v11 }
 0x159   : > { %969 = vst [vmem:[#allocation2 + $0x8] sm:$0xff] %v936_v13  ;;  %v790_v16 = vpop.f32.mrf.mxu2 }
 0x15a   : > { %973 = vst [vmem:[#allocation2 + $0xa8] sm:$0xff] %v940_v15 }
 0x15b   : > { %v869_v20 = vpop.f32.mrf.mxu0 }
 0x15c   : > { %v828_v18 = vpop.f32.mrf.mxu3  ;;  %v907_v22 = vpop.f32.mrf.mxu1 }
 0x15d   : > { %v829_v19 = vadd.f32 %v828_v18, %v790_v16  ;;  %v908_v24 = vadd.f32 %v907_v22, %v869_v20 }
 0x15f   : > { %v939_v23 = vadd.f32 %v829_v19, %v290_v17  ;;  %v943_v25 = vadd.f32 %v908_v24, %v294_v21 }
 0x161   : > { %972 = vst [vmem:[#allocation2 + $0x70] sm:$0xff] %v939_v23  ;;  %v793_v26 = vpop.f32.mrf.mxu2 }
 0x162   : > { %976 = vst [vmem:[#allocation2 + $0xa0] sm:$0xff] %v943_v25 }
 0x163   : > { %v871_v30 = vpop.f32.mrf.mxu0 }
 0x164   : > { %v831_v28 = vpop.f32.mrf.mxu3  ;;  %v909_v31 = vpop.f32.mrf.mxu1 }
 0x165   : > { %v832_v29 = vadd.f32 %v831_v28, %v793_v26 }
 0x167   : > { %v942_v32 = vadd.f32 %v832_v29, %v293_v27 }
 0x168   : > { %980 = sbr.rel (%p1465_p8) target bundleno = 397 (0x18d), region = 40 }
 0x169   : > { %975 = vst [vmem:[#allocation2 + $0xf0] sm:$0xff] %v942_v32  ;;  %v795_v33 = vpop.f32.mrf.mxu2 }
 0x16c   : > { %v833_v34 = vpop.f32.mrf.mxu3 }
 0x16d   : > { %v981_v35 = vld [vmem:[#allocation2 + $0xb0] sm:$0xff]  ;;  %v982_v36 = vld [vmem:[#allocation2] sm:$0xff]  ;;  %v983_v40 = vld [vmem:[#allocation2 + $0xd8] sm:$0xff] }
 0x16e   : > { %v1014_v37 = vld [vmem:[%s1936_s2] sm:$0x7]  ;;  %v984_v42 = vld [vmem:[#allocation2 + $0x18] sm:$0xff]  ;;  %v985_v43 = vld [vmem:[#allocation2 + $0x50] sm:$0xff] }
 0x16f   : > { %v1858_v38 = vperm.slane %v1014_v37, 0  ;;  %v1860_v39 = vperm.slane %v1014_v37, 1  ;;  %v1862_v41 = vperm.slane %v1014_v37, 2  ;;  %v986_v44 = vld [vmem:[#allocation2 + $0x68] sm:$0xff]  ;;  %v987_v45 = vld [vmem:[#allocation2 + $0x30] sm:$0xff]  ;;  %v989_v55 = vld [vmem:[#allocation2 + $0x80] sm:$0xff] }
 0x170   : > { %v988_v46 = vld [vmem:[#allocation2 + $0x48] sm:$0xff]  ;;  %v992_v62 = vld [vmem:[#allocation2 + $0x100] sm:$0xff]  ;;  %v995_v7 = vld [vmem:[#allocation2 + $0xf8] sm:$0xff] }
 0x171   : > { %v1022_v47 = vadd.f32 %v1858_v38, %v981_v35  ;;  %v1023_v48 = vadd.f32 %v1860_v39, %v982_v36  ;;  %v1024_v49 = vadd.f32 %v1862_v41, %v983_v40  ;;  %v1025_v50 = vadd.f32 %v1858_v38, %v984_v42  ;;  %v990_v4 = vld [vmem:[#allocation2 + $0x88] sm:$0xff]  ;;  %v993_v63 = vld [vmem:[#allocation2 + $0xc0] sm:$0xff]  ;;  %v996_v8 = vld [vmem:[#allocation2 + $0xb8] sm:$0xff] }
 0x172   : > { %v1026_v51 = vadd.f32 %v1860_v39, %v985_v43  ;;  %v1027_v52 = vadd.f32 %v1862_v41, %v986_v44  ;;  %v1028_v53 = vadd.f32 %v1858_v38, %v987_v45  ;;  %v1029_v54 = vadd.f32 %v1860_v39, %v988_v46  ;;  %v991_v5 = vld [vmem:[#allocation2 + $0xe8] sm:$0xff]  ;;  %v997_v15 = vld [vmem:[#allocation2 + $0x40] sm:$0xff]  ;;  %v998_v24 = vld [vmem:[#allocation2 + $0x90] sm:$0xff] }
 0x173   : > { %v1055_v9 = vmax.f32 %v1022_v47, 0.0  ;;  %v1056_v56 = vmax.f32 %v1023_v48, 0.0  ;;  %v1057_v57 = vmax.f32 %v1024_v49, 0.0  ;;  %v1058_v58 = vmax.f32 %v1025_v50, 0.0  ;;  %v994_v6 = vld [vmem:[#allocation2 + $0x28] sm:$0xff]  ;;  %v999_v25 = vld [vmem:[#allocation2 + $0x60] sm:$0xff] }
 0x174   : > { %v1059_v10 = vmax.f32 %v1026_v51, 0.0  ;;  %v1060_v59 = vmax.f32 %v1027_v52, 0.0  ;;  %v1061_v60 = vmax.f32 %v1028_v53, 0.0  ;;  %v1062_v61 = vmax.f32 %v1029_v54, 0.0  ;;  %v1000_v30 = vld [vmem:[#allocation2 + $0x38] sm:$0xff]  ;;  %v1001_v31 = vld [vmem:[#allocation2 + $0xd0] sm:$0xff] }
 0x175   : > { %v1088_v0 = vpack.c.bf16 %v1056_v56, %v1055_v9  ;;  %v1089_v1 = vpack.c.bf16 %v1057_v57, %v1057_v57  ;;  %v1030_v2 = vadd.f32 %v1862_v41, %v989_v55  ;;  %v1031_v3 = vadd.f32 %v1858_v38, %v990_v4  ;;  %v1002_v36 = vld [vmem:[#allocation2 + $0x20] sm:$0xff]  ;;  %v1003_v44 = vld [vmem:[#allocation2 + $0x98] sm:$0xff]  ;;  %v1005_v50 = vld [vmem:[#allocation2 + $0xc8] sm:$0xff] }
 0x176   : > { %v1090_v11 = vpack.c.bf16 %v1059_v10, %v1058_v58  ;;  %v1091_v12 = vpack.c.bf16 %v1060_v59, %v1060_v59  ;;  %v1092_v13 = vpack.c.bf16 %v1062_v61, %v1061_v60  ;;  %v1032_v14 = vadd.f32 %v1860_v39, %v991_v5  ;;  %v1004_v45 = vld [vmem:[#allocation2 + $0x78] sm:$0xff]  ;;  %v1006_v51 = vld [vmem:[#allocation2 + $0x8] sm:$0xff]  ;;  %v1007_v58 = vld [vmem:[#allocation2 + $0x10] sm:$0xff] }
 0x177   : > { %1110 = vst [vmem:[%s1689_s5] sm:$0xff] %v1088_v0  ;;  %v1063_v16 = vmax.f32 %v1030_v2, 0.0  ;;  %v1064_v17 = vmax.f32 %v1031_v3, 0.0  ;;  %v1033_v18 = vadd.f32 %v1862_v41, %v992_v62  ;;  %v1034_v19 = vadd.f32 %v1858_v38, %v993_v63  ;;  %v1008_v5 = vld [vmem:[#allocation2 + $0xe0] sm:$0xff]  ;;  %v1009_v62 = vld [vmem:[#allocation2 + $0x70] sm:$0xff]  ;;  %v1010_v63 = vld [vmem:[#allocation2 + $0xa8] sm:$0xff] }
 0x178   : > { %1111 = vst [vmem:[%s1689_s5 + $0x8] sm:$0xf] %v1089_v1  ;;  %v1065_v20 = vmax.f32 %v1032_v14, 0.0  ;;  %v1035_v21 = vadd.f32 %v1860_v39, %v994_v6  ;;  %v1036_v22 = vadd.f32 %v1862_v41, %v995_v7  ;;  %v1037_v23 = vadd.f32 %v1858_v38, %v996_v8  ;;  %v1011_v6 = vld [vmem:[#allocation2 + $0x58] sm:$0xff]  ;;  %v1013_v14 = vld [vmem:[#allocation2 + $0xa0] sm:$0xff] }
 0x179   : > { %1112 = vst [vmem:[%s1689_s5 + $0xc] sm:$0xff] %v1090_v11  ;;  %v1093_v26 = vpack.c.bf16 %v1063_v16, %v1063_v16  ;;  %v1066_v27 = vmax.f32 %v1033_v18, 0.0  ;;  %v1067_v28 = vmax.f32 %v1034_v19, 0.0  ;;  %v1038_v29 = vadd.f32 %v1860_v39, %v997_v15 }
 0x17a   : > { %1113 = vst [vmem:[%s1689_s5 + $0x14] sm:$0xf] %v1091_v12  ;;  %v1094_v32 = vpack.c.bf16 %v1065_v20, %v1064_v17  ;;  %v1068_v33 = vmax.f32 %v1035_v21, 0.0  ;;  %v1069_v34 = vmax.f32 %v1036_v22, 0.0  ;;  %v1070_v35 = vmax.f32 %v1037_v23, 0.0 }
 0x17b   : > { %1114 = vst [vmem:[%s1689_s5 + $0x18] sm:$0xff] %v1092_v13  ;;  %v1095_v37 = vpack.c.bf16 %v1066_v27, %v1066_v27  ;;  %v1071_v40 = vmax.f32 %v1038_v29, 0.0  ;;  %v1039_v42 = vadd.f32 %v1862_v41, %v998_v24  ;;  %v1040_v43 = vadd.f32 %v1858_v38, %v999_v25  ;;  %v1012_v13 = vld [vmem:[#allocation2 + $0xf0] sm:$0xff] }
 0x17c   : > { %1115 = vst [vmem:[%s1689_s5 + $0x20] sm:$0xf] %v1093_v26  ;;  %v1096_v46 = vpack.c.bf16 %v1068_v33, %v1067_v28  ;;  %v1097_v47 = vpack.c.bf16 %v1069_v34, %v1069_v34  ;;  %v1041_v48 = vadd.f32 %v1860_v39, %v1000_v30  ;;  %v1042_v49 = vadd.f32 %v1862_v41, %v1001_v31 }
 0x17d   : > { %1116 = vst [vmem:[%s1689_s5 + $0x24] sm:$0xff] %v1094_v32  ;;  %v1098_v52 = vpack.c.bf16 %v1071_v40, %v1070_v35  ;;  %v1072_v53 = vmax.f32 %v1039_v42, 0.0  ;;  %v1073_v54 = vmax.f32 %v1040_v43, 0.0  ;;  %v1043_v55 = vadd.f32 %v1858_v38, %v1002_v36 }
 0x17e   : > { %1117 = vst [vmem:[%s1689_s5 + $0x2c] sm:$0xf] %v1095_v37  ;;  %v1074_v4 = vmax.f32 %v1041_v48, 0.0  ;;  %v1075_v9 = vmax.f32 %v1042_v49, 0.0  ;;  %v1044_v56 = vadd.f32 %v1860_v39, %v1003_v44  ;;  %v1045_v57 = vadd.f32 %v1862_v41, %v1004_v45 }
 0x17f   : > { %1118 = vst [vmem:[%s1689_s5 + $0x30] sm:$0xff] %v1096_v46  ;;  %v1099_v10 = vpack.c.bf16 %v1072_v53, %v1072_v53  ;;  %v1076_v59 = vmax.f32 %v1043_v55, 0.0  ;;  %v1046_v60 = vadd.f32 %v1858_v38, %v1005_v50  ;;  %v1047_v61 = vadd.f32 %v1860_v39, %v1006_v51 }
 0x180   : > { %1119 = vst [vmem:[%s1689_s5 + $0x38] sm:$0xf] %v1097_v47  ;;  %v1100_v0 = vpack.c.bf16 %v1074_v4, %v1073_v54  ;;  %v1101_v1 = vpack.c.bf16 %v1075_v9, %v1075_v9  ;;  %v1077_v2 = vmax.f32 %v1044_v56, 0.0  ;;  %v1078_v3 = vmax.f32 %v1045_v57, 0.0 }
 0x181   : > { %1120 = vst [vmem:[%s1689_s5 + $0x3c] sm:$0xff] %v1098_v52  ;;  %v1079_v7 = vmax.f32 %v1046_v60, 0.0  ;;  %v1080_v8 = vmax.f32 %v1047_v61, 0.0  ;;  %v1048_v11 = vadd.f32 %v1862_v41, %v1007_v58  ;;  %v1049_v12 = vadd.f32 %v1858_v38, %v1008_v5 }
 0x182   : > { %1121 = vst [vmem:[%s1689_s5 + $0x44] sm:$0xf] %v1099_v10  ;;  %v1102_v15 = vpack.c.bf16 %v1077_v2, %v1076_v59  ;;  %v1103_v16 = vpack.c.bf16 %v1078_v3, %v1078_v3  ;;  %v1050_v17 = vadd.f32 %v1860_v39, %v1009_v62  ;;  %v1051_v18 = vadd.f32 %v1862_v41, %v1010_v63 }
 0x183   : > { %1122 = vst [vmem:[%s1689_s5 + $0x48] sm:$0xff] %v1100_v0  ;;  %v1104_v19 = vpack.c.bf16 %v1080_v8, %v1079_v7  ;;  %v1081_v20 = vmax.f32 %v1048_v11, 0.0  ;;  %v1082_v21 = vmax.f32 %v1049_v12, 0.0  ;;  %v1052_v22 = vadd.f32 %v1858_v38, %v1011_v6 }
 0x184   : > { %1123 = vst [vmem:[%s1689_s5 + $0x50] sm:$0xf] %v1101_v1  ;;  %v1083_v23 = vmax.f32 %v1050_v17, 0.0  ;;  %v1084_v24 = vmax.f32 %v1051_v18, 0.0  ;;  %v1053_v25 = vadd.f32 %v1860_v39, %v1012_v13  ;;  %v1054_v26 = vadd.f32 %v1862_v41, %v1013_v14 }
 0x185   : > { %1124 = vst [vmem:[%s1689_s5 + $0x54] sm:$0xff] %v1102_v15  ;;  %v1105_v27 = vpack.c.bf16 %v1081_v20, %v1081_v20  ;;  %v1085_v28 = vmax.f32 %v1052_v22, 0.0 }
 0x186   : > { %1125 = vst [vmem:[%s1689_s5 + $0x5c] sm:$0xf] %v1103_v16  ;;  %v1106_v29 = vpack.c.bf16 %v1083_v23, %v1082_v21  ;;  %v1107_v30 = vpack.c.bf16 %v1084_v24, %v1084_v24  ;;  %v1086_v31 = vmax.f32 %v1053_v25, 0.0  ;;  %v1087_v32 = vmax.f32 %v1054_v26, 0.0 }
 0x187   : > { %1126 = vst [vmem:[%s1689_s5 + $0x60] sm:$0xff] %v1104_v19 }
 0x188   : > { %1127 = vst [vmem:[%s1689_s5 + $0x68] sm:$0xf] %v1105_v27  ;;  %v1108_v38 = vpack.c.bf16 %v1086_v31, %v1085_v28  ;;  %v1109_v33 = vpack.c.bf16 %v1087_v32, %v1087_v32 }
 0x189   : > { %1128 = vst [vmem:[%s1689_s5 + $0x6c] sm:$0xff] %v1106_v29 }
 0x18a   : > { %1129 = vst [vmem:[%s1689_s5 + $0x74] sm:$0xf] %v1107_v30 }
 0x18b   : > { %1130 = vst [vmem:[%s1689_s5 + $0x78] sm:$0xff] %v1108_v38 }
 0x18c   : > { %1131 = vst [vmem:[%s1689_s5 + $0x80] sm:$0xf] %v1109_v33 }
 0x18d PF: > { %s13_s16 = sadd.s32 1, %s1624_s16   ;;  %s1938_s12 = smov %s1616_s14 }
 0x18e   : > { %p10_p9 = scmp.ge.s32.totalorder %s13_s16, 20   ;;  %s1939_s13 = smov %s1620_s15 }
 0x18f   : > { %s1940_s14 = smov %s1943_s17  ;;  %s1941_s15 = smov %s1947_s18 }
 0x190   :  { %12 = sbr.rel (!%p10_p9) target bundleno = 3 (0x3), region = 73 }

// kernel: mixed_7a.5
= control target key start
LH: loop header
LB: loop body
LE: loop exit
PB: predicated region body
PF: predicated region fallthrough
CT: control target
= control target key end

     0   :  { %s3698_s13 = smov 0   ;;  %s3700_s14 = smov 0   ;;  %s4323_s0 = inlined_call_operand.vmem [shape: bf16[9,32,512], index: 0, kind: input, shape index: {}]   ;;  %s4324_s1 = inlined_call_operand.vmem [shape: bf16[9,32,384], index: 1, kind: input, shape index: {}]   ;;  %s4325_s2 = inlined_call_operand.vmem [shape: bf16[9,256,384], index: 2, kind: input, shape index: {}]   ;;  %s4326_s3 = inlined_call_operand.vmem [shape: bf16[9,256,288], index: 3, kind: input, shape index: {}]   ;;  %s4327_s4 = inlined_call_operand.vmem [shape: bf16[9,384,320], index: 4, kind: input, shape index: {}]   ;;  %s4328_s5 = inlined_call_operand.vmem [shape: f32[1,384], index: 5, kind: input, shape index: {}]   ;;  %s4329_s6 = inlined_call_operand.vmem [shape: f32[1,288], index: 6, kind: input, shape index: {}]   ;;  %s4330_s7 = inlined_call_operand.vmem [shape: f32[1,320], index: 7, kind: input, shape index: {}]   ;;  %s4331_s8 = inlined_call_operand.vmem [shape: f32[32,384], index: 8, kind: output, shape index: {0}]   ;;  %s4332_s9 = inlined_call_operand.vmem [shape: f32[32,288], index: 9, kind: output, shape index: {1}]   ;;  %s4333_s10 = inlined_call_operand.vmem [shape: f32[32,320], index: 10, kind: output, shape index: {2}]  }
   0x1   :  { %s3702_s15 = smov 0  }
   0x2 LB: > { %s30_s16 = sadd.s32 1, %s3636_s14  ;;  %p2654_p0 = scmp.ge.s32.totalorder %s3640_s15, 1  ;;  %s3640_s15 = sphi %s3702_s15, %s21_s15   ;;  %s3636_s14 = sphi %s3700_s14, %s4337_s14   ;;  %s3632_s13 = sphi %s3698_s13, %s4336_s13  }
   0x3   : > { %p31_p1 = scmp.ge.s32.totalorder %s30_s16, 9  ;;  %p385_p2 = scmp.lt.s32.totalorder %s3640_s15, 10 }
   0x5   : > { %s4339_s16 = smov (%p31_p1, %s30_s16), 0  ;;  %p386_p3 = pnand %p2654_p0, %p385_p2 }
   0x6   : > { %4334 = sst [smem:[#allocation5_spill]] %s4339_s16  ;;  %p467_p4 = scmp.lt.s32.totalorder (!%p386_p3), %s3632_s13, 8 }
   0x7   : > { %389 = sbr.rel (%p386_p3) target bundleno = 437 (0x1b5), region = 52  ;;  %p2661_p5 = scmp.ne.s32.totalorder (!%p386_p3), %s3632_s13, 0 }
   0xc   : > { %s468_s17 = scalar_select %p467_p4, %s3632_s13, 8 }
   0xe   : > { %s3399_s18 = sshll.u32 %s468_s17, 6  ;;  %s3590_s19 = smul.u32 48, %s468_s17 }
   0xf   : > { %s3723_s22 = scalar_lea.vmem %s4323_s0, %s3399_s18  ;;  %s3591_s23 = smul.u32 384, %s468_s17 }
  0x10   : > { %s3728_s26 = scalar_lea.vmem %s4324_s1, %s3590_s19  ;;  %s3592_s27 = smul.u32 576, %s468_s17 }
  0x11   : > { %s3733_s30 = scalar_lea.vmem %s4325_s2, %s3591_s23  ;;  %s3738_s16 = scalar_lea.vmem %s4326_s3, %s3591_s23 }
  0x12   : > { %s3743_s21 = scalar_lea.vmem %s4327_s4, %s3592_s27  ;;  %527 = sbr.rel (%p2661_p5) target bundleno = 60 (0x3c), region = 56 }
  0x17   : > { %v3642_v0 = vmov 0.0   ;;  %vm542_vm0 = vcmask 261120   ;;  %vm555_vm1 = vcmask 523264  }
  0x18   : > { %528 = vst [vmem:[#allocation2 + $0x30] sm:$0xff] %v3642_v0 }
  0x19   : > { %529 = vst [vmem:[#allocation2] sm:$0xff] %v3642_v0 }
  0x1a   : > { %530 = vst [vmem:[#allocation2 + $0x58] sm:$0xff] %v3642_v0 }
  0x1b   : > { %531 = vst [vmem:[#allocation2 + $0x18] sm:$0xff] %v3642_v0 }
  0x1c   : > { %532 = vst [vmem:[#allocation2 + $0x50] sm:$0xff] %v3642_v0 }
  0x1d   : > { %533 = vst [vmem:[#allocation2 + $0x20] sm:$0xff] %v3642_v0 }
  0x1e   : > { %534 = vst [vmem:[#allocation2 + $0x8] sm:$0xff] %v3642_v0 }
  0x1f   : > { %535 = vst [vmem:[#allocation2 + $0x38] sm:$0xff] %v3642_v0 }
  0x20   : > { %536 = vst [vmem:[#allocation2 + $0x28] sm:$0xff] %v3642_v0 }
  0x21   : > { %537 = vst [vmem:[#allocation2 + $0x48] sm:$0xff] %v3642_v0 }
  0x22   : > { %538 = vst [vmem:[#allocation2 + $0x10] sm:$0xff] %v3642_v0 }
  0x23   : > { %539 = vst [vmem:[#allocation2 + $0x40] sm:$0xff] %v3642_v0 }
  0x24   : > { %540 = vst [vmem:[#allocation3] sm:$0xff] %v3642_v0 }
  0x25   : > { %541 = vst [vmem:[#allocation3 + $0x8] sm:$0xff] %v3642_v0 }
  0x26   : > { %544 = vst [vmem:[#allocation3 + $0x18] sm:$0xff] %v3642_v0 }
  0x27   : > { %545 = vst [vmem:[#allocation3 + $0x20] sm:$0xff] %v3642_v0 }
  0x28   : > { %547 = vst [vmem:[#allocation3 + $0x30] sm:$0xff] %v3642_v0 }
  0x29   : > { %548 = vst [vmem:[#allocation3 + $0x38] sm:$0xff] %v3642_v0 }
  0x2a   : > { %550 = vst [vmem:[#allocation3 + $0x48] sm:$0xff] %v3642_v0 }
  0x2b   : > { %551 = vst [vmem:[#allocation3 + $0x50] sm:$0xff] %v3642_v0 }
  0x2c   : > { %553 = vst [vmem:[#allocation4] sm:$0xff] %v3642_v0 }
  0x2d   : > { %554 = vst [vmem:[#allocation4 + $0x8] sm:$0xff] %v3642_v0 }
  0x2e   : > { %557 = vst [vmem:[#allocation4 + $0x18] sm:$0xff] %v3642_v0 }
  0x2f   : > { %558 = vst [vmem:[#allocation4 + $0x20] sm:$0xff] %v3642_v0 }
  0x30   : > { %560 = vst [vmem:[#allocation4 + $0x30] sm:$0xff] %v3642_v0 }
  0x31   : > { %561 = vst [vmem:[#allocation4 + $0x38] sm:$0xff] %v3642_v0 }
  0x32   : > { %563 = vst [vmem:[#allocation4 + $0x48] sm:$0xff] %v3642_v0 }
  0x33   : > { %564 = vst [vmem:[#allocation4 + $0x50] sm:$0xff] %v3642_v0 }
  0x34   : > { %543 = vst.msk [vmem:[#allocation3 + $0x10] sm:$0xff] %vm542_vm0, %v3642_v0 }
  0x35   : > { %546 = vst.msk [vmem:[#allocation3 + $0x28] sm:$0xff] %vm542_vm0, %v3642_v0 }
  0x36   : > { %549 = vst.msk [vmem:[#allocation3 + $0x40] sm:$0xff] %vm542_vm0, %v3642_v0 }
  0x37   : > { %552 = vst.msk [vmem:[#allocation3 + $0x58] sm:$0xff] %vm542_vm0, %v3642_v0 }
  0x38   : > { %556 = vst.msk [vmem:[#allocation4 + $0x10] sm:$0xff] %vm555_vm1, %v3642_v0 }
  0x39   : > { %559 = vst.msk [vmem:[#allocation4 + $0x28] sm:$0xff] %vm555_vm1, %v3642_v0 }
  0x3a   : > { %562 = vst.msk [vmem:[#allocation4 + $0x40] sm:$0xff] %vm555_vm1, %v3642_v0 }
  0x3b   : > { %565 = vst.msk [vmem:[#allocation4 + $0x58] sm:$0xff] %vm555_vm1, %v3642_v0 }
  0x3c PF: > { %v2764_v1 = vld [vmem:[%s3733_s30 + $0xa8] sm:$0xf]  ;;  %v3430_v2 = vld [vmem:[%s3733_s30 + $0xb0] sm:$0xf0]  ;;  %v3429_v6 = vld [vmem:[%s3733_s30 + $0xac] sm:$0xf] }
  0x3d   : > { %v2860_v3 = vld [vmem:[%s3733_s30 + $0x168] sm:$0xf]  ;;  %v2765_v4 = vor.u32 %v3430_v2, %v2764_v1  ;;  %v3454_v5 = vld [vmem:[%s3733_s30 + $0x170] sm:$0xf0]  ;;  %v2766_v7 = vld [vmem:[%s3733_s30 + $0xb4] sm:$0xf0] }
  0x3e   : > { %v2861_v8 = vor.u32 %v3454_v5, %v2860_v3  ;;  %v2769_v9 = vor.u32 %v3429_v6, %v2766_v7  ;;  %v3453_v10 = vld [vmem:[%s3733_s30 + $0x16c] sm:$0xf]  ;;  %v2862_v11 = vld [vmem:[%s3733_s30 + $0x174] sm:$0xf0]  ;;  %v2752_v12 = vld [vmem:[%s3733_s30 + $0x90] sm:$0xf] }
  0x3f   : > { %926 = vmatpush.bf16.msra.mxu0 %v2765_v4  ;;  %v2865_v13 = vor.u32 %v3453_v10, %v2862_v11  ;;  %v3427_v14 = vld [vmem:[%s3733_s30 + $0x98] sm:$0xf0]  ;;  %v2848_v15 = vld [vmem:[%s3733_s30 + $0x150] sm:$0xf]  ;;  %v3426_v19 = vld [vmem:[%s3733_s30 + $0x94] sm:$0xf] }
  0x40   : > { %v3451_v16 = vld [vmem:[%s3733_s30 + $0x158] sm:$0xf0]  ;;  %945 = vmatpush.bf16.msra.mxu1 %v2861_v8  ;;  %964 = vmatpush.bf16.msra.mxu2 %v2769_v9  ;;  %v2753_v17 = vor.u32 %v3427_v14, %v2752_v12  ;;  %v2754_v20 = vld [vmem:[%s3733_s30 + $0x9c] sm:$0xf0]  ;;  %v3450_v21 = vld [vmem:[%s3733_s30 + $0x154] sm:$0xf] }
  0x41   : > { %v2849_v18 = vor.u32 %v3451_v16, %v2848_v15  ;;  %983 = vmatpush.bf16.msra.mxu3 %v2865_v13  ;;  %v2757_v22 = vor.u32 %v3426_v19, %v2754_v20  ;;  %v2850_v23 = vld [vmem:[%s3733_s30 + $0x15c] sm:$0xf0]  ;;  %v2740_v24 = vld [vmem:[%s3733_s30 + $0x78] sm:$0xf]  ;;  %v3424_v25 = vld [vmem:[%s3733_s30 + $0x80] sm:$0xf0] }
  0x42   : > { %v2853_v26 = vor.u32 %v3450_v21, %v2850_v23  ;;  %v2836_v27 = vld [vmem:[%s3733_s30 + $0x138] sm:$0xf]  ;;  %v3448_v28 = vld [vmem:[%s3733_s30 + $0x140] sm:$0xf0]  ;;  %v3423_v29 = vld [vmem:[%s3733_s30 + $0x7c] sm:$0xf]  ;;  %v2741_v30 = vor.u32 %v3424_v25, %v2740_v24 }
  0x43   : > { %927 = vmatpush.bf16.msra.mxu0 %v2753_v17  ;;  %v2742_v31 = vld [vmem:[%s3733_s30 + $0x84] sm:$0xf0]  ;;  %v3447_v32 = vld [vmem:[%s3733_s30 + $0x13c] sm:$0xf]  ;;  %v2837_v34 = vor.u32 %v3448_v28, %v2836_v27  ;;  %v2728_v36 = vld [vmem:[%s3733_s30 + $0x60] sm:$0xf] }
  0x44   : > { %v2838_v33 = vld [vmem:[%s3733_s30 + $0x144] sm:$0xf0]  ;;  %946 = vmatpush.bf16.msra.mxu1 %v2849_v18  ;;  %965 = vmatpush.bf16.msra.mxu2 %v2757_v22  ;;  %v2745_v35 = vor.u32 %v3423_v29, %v2742_v31  ;;  %v3421_v37 = vld [vmem:[%s3733_s30 + $0x68] sm:$0xf0]  ;;  %v2824_v38 = vld [vmem:[%s3733_s30 + $0x120] sm:$0xf] }
  0x45   : > { %984 = vmatpush.bf16.msra.mxu3 %v2853_v26  ;;  %v2841_v39 = vor.u32 %v3447_v32, %v2838_v33  ;;  %v3445_v40 = vld [vmem:[%s3733_s30 + $0x128] sm:$0xf0]  ;;  %v3420_v41 = vld [vmem:[%s3733_s30 + $0x64] sm:$0xf]  ;;  %v2730_v42 = vld [vmem:[%s3733_s30 + $0x6c] sm:$0xf0]  ;;  %v2729_v45 = vor.u32 %v3421_v37, %v2728_v36 }
  0x46   : > { %v3444_v43 = vld [vmem:[%s3733_s30 + $0x124] sm:$0xf]  ;;  %v2826_v44 = vld [vmem:[%s3733_s30 + $0x12c] sm:$0xf0]  ;;  %v2825_v46 = vor.u32 %v3445_v40, %v2824_v38  ;;  %v2733_v47 = vor.u32 %v3420_v41, %v2730_v42  ;;  %v2716_v48 = vld [vmem:[%s3733_s30 + $0x48] sm:$0xf] }
  0x47   : > { %928 = vmatpush.bf16.msra.mxu0 %v2741_v30  ;;  %v3418_v49 = vld [vmem:[%s3733_s30 + $0x50] sm:$0xf0]  ;;  %v2812_v50 = vld [vmem:[%s3733_s30 + $0x108] sm:$0xf]  ;;  %v2829_v51 = vor.u32 %v3444_v43, %v2826_v44  ;;  %v3417_v53 = vld [vmem:[%s3733_s30 + $0x4c] sm:$0xf] }
  0x48   : > { %947 = vmatpush.bf16.msra.mxu1 %v2837_v34  ;;  %966 = vmatpush.bf16.msra.mxu2 %v2745_v35  ;;  %v3442_v52 = vld [vmem:[%s3733_s30 + $0x110] sm:$0xf0]  ;;  %v2718_v54 = vld [vmem:[%s3733_s30 + $0x54] sm:$0xf0]  ;;  %v3441_v55 = vld [vmem:[%s3733_s30 + $0x10c] sm:$0xf]  ;;  %v2717_v57 = vor.u32 %v3418_v49, %v2716_v48 }
  0x49   : > { %985 = vmatpush.bf16.msra.mxu3 %v2841_v39  ;;  %v2814_v56 = vld [vmem:[%s3733_s30 + $0x114] sm:$0xf0]  ;;  %v2813_v58 = vor.u32 %v3442_v52, %v2812_v50  ;;  %v2721_v59 = vor.u32 %v3417_v53, %v2718_v54  ;;  %v2704_v60 = vld [vmem:[%s3733_s30 + $0x30] sm:$0xf]  ;;  %v3415_v61 = vld [vmem:[%s3733_s30 + $0x38] sm:$0xf0] }
  0x4a   : > { %v2800_v62 = vld [vmem:[%s3733_s30 + $0xf0] sm:$0xf]  ;;  %v2817_v63 = vor.u32 %v3441_v55, %v2814_v56  ;;  %v3439_v0 = vld [vmem:[%s3733_s30 + $0xf8] sm:$0xf0]  ;;  %v3414_v1 = vld [vmem:[%s3733_s30 + $0x34] sm:$0xf]  ;;  %v2705_v5 = vor.u32 %v3415_v61, %v2704_v60 }
  0x4b   : > { %929 = vmatpush.bf16.msra.mxu0 %v2729_v45  ;;  %v2706_v2 = vld [vmem:[%s3733_s30 + $0x3c] sm:$0xf0]  ;;  %v3438_v3 = vld [vmem:[%s3733_s30 + $0xf4] sm:$0xf]  ;;  %v2801_v6 = vor.u32 %v3439_v0, %v2800_v62  ;;  %v2692_v8 = vld [vmem:[%s3733_s30 + $0x18] sm:$0xf] }
  0x4c   : > { %948 = vmatpush.bf16.msra.mxu1 %v2825_v46  ;;  %967 = vmatpush.bf16.msra.mxu2 %v2733_v47  ;;  %v2802_v4 = vld [vmem:[%s3733_s30 + $0xfc] sm:$0xf0]  ;;  %v2709_v7 = vor.u32 %v3414_v1, %v2706_v2  ;;  %v3412_v9 = vld [vmem:[%s3733_s30 + $0x20] sm:$0xf0]  ;;  %v2788_v10 = vld [vmem:[%s3733_s30 + $0xd8] sm:$0xf] }
  0x4d   : > { %986 = vmatpush.bf16.msra.mxu3 %v2829_v51  ;;  %v2805_v11 = vor.u32 %v3438_v3, %v2802_v4  ;;  %v3436_v12 = vld [vmem:[%s3733_s30 + $0xe0] sm:$0xf0]  ;;  %v3411_v13 = vld [vmem:[%s3733_s30 + $0x1c] sm:$0xf]  ;;  %v2694_v14 = vld [vmem:[%s3733_s30 + $0x24] sm:$0xf0]  ;;  %v2693_v17 = vor.u32 %v3412_v9, %v2692_v8 }
  0x4e   : > { %v3435_v15 = vld [vmem:[%s3733_s30 + $0xdc] sm:$0xf]  ;;  %v2790_v16 = vld [vmem:[%s3733_s30 + $0xe4] sm:$0xf0]  ;;  %v2680_v18 = vld [vmem:[%s3733_s30] sm:$0xf]  ;;  %v2789_v20 = vor.u32 %v3436_v12, %v2788_v10  ;;  %v2697_v21 = vor.u32 %v3411_v13, %v2694_v14 }
  0x4f   : > { %930 = vmatpush.bf16.msra.mxu0 %v2717_v57  ;;  %v3409_v19 = vld [vmem:[%s3733_s30 + $0x8] sm:$0xf0]  ;;  %v2776_v22 = vld [vmem:[%s3733_s30 + $0xc0] sm:$0xf]  ;;  %v3408_v24 = vld [vmem:[%s3733_s30 + $0x4] sm:$0xf]  ;;  %v2793_v25 = vor.u32 %v3435_v15, %v2790_v16 }
  0x50   : > { %949 = vmatpush.bf16.msra.mxu1 %v2813_v58  ;;  %968 = vmatpush.bf16.msra.mxu2 %v2721_v59  ;;  %v3433_v23 = vld [vmem:[%s3733_s30 + $0xc8] sm:$0xf0]  ;;  %v2682_v26 = vld [vmem:[%s3733_s30 + $0xc] sm:$0xf0]  ;;  %v3432_v27 = vld [vmem:[%s3733_s30 + $0xc4] sm:$0xf]  ;;  %v2681_v32 = vor.u32 %v3409_v19, %v2680_v18 }
  0x51   : > { %987 = vmatpush.bf16.msra.mxu3 %v2817_v63  ;;  %v2778_v28 = vld [vmem:[%s3733_s30 + $0xcc] sm:$0xf0]  ;;  %v2664_v29 = vld [vmem:[%s3723_s22] sm:$0xf]  ;;  %v3431_v31 = vld [vmem:[%s3733_s30 + $0xb8] sm:$0xf0]  ;;  %v2777_v36 = vor.u32 %v3433_v23, %v2776_v22  ;;  %v2685_v37 = vor.u32 %v3408_v24, %v2682_v26 }
  0x52   : > { %v2772_v30 = vld [vmem:[%s3733_s30 + $0xb0] sm:$0xf]  ;;  %v3455_v35 = vld [vmem:[%s3733_s30 + $0x178] sm:$0xf0]  ;;  %v3400_v38 = vld [vmem:[%s3723_s22 + $0x4] sm:$0xf]  ;;  %v2781_v40 = vor.u32 %v3432_v27, %v2778_v28 }
  0x53   : > { %931 = vmatpush.bf16.msra.mxu0 %v2705_v5  ;;  %v3402_v33 = vld [vmem:[%s3723_s22 + $0xc] sm:$0xf0]  ;;  %v2666_v39 = vld [vmem:[%s3723_s22 + $0x10] sm:$0xf0]  ;;  %v2773_v41 = vor.u32 %v3431_v31, %v2772_v30  ;;  %v2972_v42 = vld [vmem:[%s3738_s16 + $0xa8] sm:$0xf] }
  0x54   : > { %950 = vmatpush.bf16.msra.mxu1 %v2801_v6  ;;  %969 = vmatpush.bf16.msra.mxu2 %v2709_v7  ;;  %v2868_v34 = vld [vmem:[%s3733_s30 + $0x170] sm:$0xf]  ;;  %v3478_v43 = vld [vmem:[%s3738_s16 + $0xb0] sm:$0xf0]  ;;  %v3068_v44 = vld [vmem:[%s3738_s16 + $0x168] sm:$0xf]  ;;  %v3821_v45 = vor.u32 %v3402_v33, %v2664_v29  ;;  %v3826_v50 = vor.u32 %v3400_v38, %v2666_v39 }
  0x55   : > { %988 = vmatpush.bf16.msra.mxu3 %v2805_v11  ;;  %v2869_v46 = vor.u32 %v3455_v35, %v2868_v34  ;;  %v3502_v47 = vld [vmem:[%s3738_s16 + $0x170] sm:$0xf0]  ;;  %v2760_v48 = vld [vmem:[%s3733_s30 + $0x98] sm:$0xf]  ;;  %v3428_v49 = vld [vmem:[%s3733_s30 + $0xa0] sm:$0xf0]  ;;  %v2973_v53 = vor.u32 %v3478_v43, %v2972_v42 }
  0x56   : > { %v2856_v51 = vld [vmem:[%s3733_s30 + $0x158] sm:$0xf]  ;;  %v3452_v52 = vld [vmem:[%s3733_s30 + $0x160] sm:$0xf0]  ;;  %v3069_v54 = vor.u32 %v3502_v47, %v3068_v44  ;;  %v2761_v55 = vor.u32 %v3428_v49, %v2760_v48  ;;  %v2960_v56 = vld [vmem:[%s3738_s16 + $0x90] sm:$0xf] }
  0x57   : > { %932 = vmatpush.bf16.msra.mxu0 %v2693_v17  ;;  %v3475_v57 = vld [vmem:[%s3738_s16 + $0x98] sm:$0xf0]  ;;  %v3056_v58 = vld [vmem:[%s3738_s16 + $0x150] sm:$0xf]  ;;  %v2857_v59 = vor.u32 %v3452_v52, %v2856_v51  ;;  %v2748_v61 = vld [vmem:[%s3733_s30 + $0x80] sm:$0xf] }
  0x58   : > { %951 = vmatpush.bf16.msra.mxu1 %v2789_v20  ;;  %970 = vmatpush.bf16.msra.mxu2 %v2697_v21  ;;  %v3499_v60 = vld [vmem:[%s3738_s16 + $0x158] sm:$0xf0]  ;;  %v3425_v62 = vld [vmem:[%s3733_s30 + $0x88] sm:$0xf0]  ;;  %v2844_v63 = vld [vmem:[%s3733_s30 + $0x140] sm:$0xf]  ;;  %v2961_v1 = vor.u32 %v3475_v57, %v2960_v56 }
  0x59   : > { %989 = vmatpush.bf16.msra.mxu3 %v2793_v25  ;;  %v3449_v0 = vld [vmem:[%s3733_s30 + $0x148] sm:$0xf0]  ;;  %v3057_v2 = vor.u32 %v3499_v60, %v3056_v58  ;;  %v2749_v3 = vor.u32 %v3425_v62, %v2748_v61  ;;  %v2948_v4 = vld [vmem:[%s3738_s16 + $0x78] sm:$0xf]  ;;  %v3472_v5 = vld [vmem:[%s3738_s16 + $0x80] sm:$0xf0] }
  0x5a   : > { %v3044_v6 = vld [vmem:[%s3738_s16 + $0x138] sm:$0xf]  ;;  %v2845_v7 = vor.u32 %v3449_v0, %v2844_v63  ;;  %v3496_v8 = vld [vmem:[%s3738_s16 + $0x140] sm:$0xf0]  ;;  %v2736_v9 = vld [vmem:[%s3733_s30 + $0x68] sm:$0xf]  ;;  %v2949_v13 = vor.u32 %v3472_v5, %v2948_v4 }
  0x5b   : > { %933 = vmatpush.bf16.msra.mxu0 %v2681_v32  ;;  %v3422_v10 = vld [vmem:[%s3733_s30 + $0x70] sm:$0xf0]  ;;  %v2832_v11 = vld [vmem:[%s3733_s30 + $0x128] sm:$0xf]  ;;  %v2936_v14 = vld [vmem:[%s3738_s16 + $0x60] sm:$0xf]  ;;  %v3045_v15 = vor.u32 %v3496_v8, %v3044_v6 }
  0x5c   : > { %952 = vmatpush.bf16.msra.mxu1 %v2777_v36  ;;  %971 = vmatpush.bf16.msra.mxu2 %v2685_v37  ;;  %v3446_v12 = vld [vmem:[%s3733_s30 + $0x130] sm:$0xf0]  ;;  %v2737_v16 = vor.u32 %v3422_v10, %v2736_v9  ;;  %v3469_v17 = vld [vmem:[%s3738_s16 + $0x68] sm:$0xf0]  ;;  %v3032_v18 = vld [vmem:[%s3738_s16 + $0x120] sm:$0xf] }
  0x5d   : > { %990 = vmatpush.bf16.msra.mxu3 %v2781_v40  ;;  %v3493_v19 = vld [vmem:[%s3738_s16 + $0x128] sm:$0xf0]  ;;  %v2833_v20 = vor.u32 %v3446_v12, %v2832_v11  ;;  %v2672_v21 = vld [vmem:[%s3723_s22 + $0x20] sm:$0xf]  ;;  %v2724_v22 = vld [vmem:[%s3733_s30 + $0x50] sm:$0xf]  ;;  %v2937_v27 = vor.u32 %v3469_v17, %v2936_v14 }
  0x5e   : > { %934 = vmatmul.bf16.vlgmr.msra.gmra.mxu0 %v3821_v45  ;;  %v3419_v23 = vld [vmem:[%s3733_s30 + $0x58] sm:$0xf0]  ;;  %v3406_v24 = vld [vmem:[%s3723_s22 + $0x2c] sm:$0xf0]  ;;  %v3404_v28 = vld [vmem:[%s3723_s22 + $0x24] sm:$0xf]  ;;  %v3033_v30 = vor.u32 %v3493_v19, %v3032_v18 }
  0x5f   : > { %1002 = vmatpush.bf16.msrb.mxu0 %v2773_v41  ;;  %953 = vmatmul.bf16.vlgmr.msra.gmra.mxu1 %v3826_v50  ;;  %v2820_v25 = vld [vmem:[%s3733_s30 + $0x110] sm:$0xf]  ;;  %v3443_v26 = vld [vmem:[%s3733_s30 + $0x118] sm:$0xf0]  ;;  %v2674_v29 = vld [vmem:[%s3723_s22 + $0x30] sm:$0xf0]  ;;  %v2725_v31 = vor.u32 %v3419_v23, %v2724_v22  ;;  %v3865_v35 = vor.u32 %v3406_v24, %v2672_v21 }
  0x60   : > { %1021 = vmatpush.bf16.msrb.mxu1 %v2869_v46  ;;  %972 = vmatmul.bf16.vlgmr.msra.gmra.mxu2 %v3821_v45  ;;  %v2924_v32 = vld [vmem:[%s3738_s16 + $0x48] sm:$0xf]  ;;  %v3466_v33 = vld [vmem:[%s3738_s16 + $0x50] sm:$0xf0]  ;;  %v2821_v36 = vor.u32 %v3443_v26, %v2820_v25  ;;  %v2712_v38 = vld [vmem:[%s3733_s30 + $0x38] sm:$0xf]  ;;  %v3870_v40 = vor.u32 %v3404_v28, %v2674_v29 }
  0x61   : > { %991 = vmatmul.bf16.vlgmr.msra.gmra.mxu3 %v3826_v50  ;;  %1416 = vmatpush.bf16.msrb.mxu2 %v2973_v53  ;;  %v3020_v34 = vld [vmem:[%s3738_s16 + $0x108] sm:$0xf]  ;;  %v3490_v37 = vld [vmem:[%s3738_s16 + $0x110] sm:$0xf0]  ;;  %v3416_v39 = vld [vmem:[%s3733_s30 + $0x40] sm:$0xf0]  ;;  %v2925_v43 = vor.u32 %v3466_v33, %v2924_v32 }
  0x62   : > { %1435 = vmatpush.bf16.msrb.mxu3 %v3069_v54  ;;  %v2808_v41 = vld [vmem:[%s3733_s30 + $0xf8] sm:$0xf]  ;;  %v3440_v42 = vld [vmem:[%s3733_s30 + $0x100] sm:$0xf0]  ;;  %v3021_v44 = vor.u32 %v3490_v37, %v3020_v34  ;;  %v2713_v46 = vor.u32 %v3416_v39, %v2712_v38  ;;  %v2912_v47 = vld [vmem:[%s3738_s16 + $0x30] sm:$0xf] }
  0x63   : > { %1003 = vmatpush.bf16.msrb.mxu0 %v2761_v55  ;;  %v3463_v48 = vld [vmem:[%s3738_s16 + $0x38] sm:$0xf0]  ;;  %v3008_v49 = vld [vmem:[%s3738_s16 + $0xf0] sm:$0xf]  ;;  %v2809_v51 = vor.u32 %v3440_v42, %v2808_v41  ;;  %v2700_v53 = vld [vmem:[%s3733_s30 + $0x20] sm:$0xf] }
  0x64   : > { %1022 = vmatpush.bf16.msrb.mxu1 %v2857_v59  ;;  %v3487_v52 = vld [vmem:[%s3738_s16 + $0xf8] sm:$0xf0]  ;;  %v3413_v54 = vld [vmem:[%s3733_s30 + $0x28] sm:$0xf0]  ;;  %v2796_v55 = vld [vmem:[%s3733_s30 + $0xe0] sm:$0xf]  ;;  %v2913_v57 = vor.u32 %v3463_v48, %v2912_v47 }
  0x65   : > { %1417 = vmatpush.bf16.msrb.mxu2 %v2961_v1  ;;  %v3437_v56 = vld [vmem:[%s3733_s30 + $0xe8] sm:$0xf0]  ;;  %v2900_v58 = vld [vmem:[%s3738_s16 + $0x18] sm:$0xf]  ;;  %v3009_v59 = vor.u32 %v3487_v52, %v3008_v49  ;;  %v2701_v60 = vor.u32 %v3413_v54, %v2700_v53  ;;  %v3460_v61 = vld [vmem:[%s3738_s16 + $0x20] sm:$0xf0] }
  0x66   : > { %1436 = vmatpush.bf16.msrb.mxu3 %v3057_v2  ;;  %v2996_v62 = vld [vmem:[%s3738_s16 + $0xd8] sm:$0xf]  ;;  %v3484_v63 = vld [vmem:[%s3738_s16 + $0xe0] sm:$0xf0]  ;;  %v2797_v0 = vor.u32 %v3437_v56, %v2796_v55  ;;  %v2688_v1 = vld [vmem:[%s3733_s30 + $0x8] sm:$0xf] }
  0x67   : > { %1004 = vmatpush.bf16.msrb.mxu0 %v2749_v3  ;;  %v3410_v2 = vld [vmem:[%s3733_s30 + $0x10] sm:$0xf0]  ;;  %v2784_v3 = vld [vmem:[%s3733_s30 + $0xc8] sm:$0xf]  ;;  %v3477_v5 = vld [vmem:[%s3738_s16 + $0xac] sm:$0xf]  ;;  %v2997_v10 = vor.u32 %v3484_v63, %v2996_v62 }
  0x68   : > { %1023 = vmatpush.bf16.msrb.mxu1 %v2845_v7  ;;  %v3434_v4 = vld [vmem:[%s3733_s30 + $0xd0] sm:$0xf0]  ;;  %v2974_v6 = vld [vmem:[%s3738_s16 + $0xb4] sm:$0xf0]  ;;  %v2901_v7 = vor.u32 %v3460_v61, %v2900_v58  ;;  %v3501_v8 = vld [vmem:[%s3738_s16 + $0x16c] sm:$0xf]  ;;  %v2689_v11 = vor.u32 %v3410_v2, %v2688_v1 }
  0x69   : > { %1418 = vmatpush.bf16.msrb.mxu2 %v2949_v13  ;;  %v3070_v9 = vld [vmem:[%s3738_s16 + $0x174] sm:$0xf0]  ;;  %v2888_v12 = vld [vmem:[%s3738_s16] sm:$0xf]  ;;  %v3457_v13 = vld [vmem:[%s3738_s16 + $0x8] sm:$0xf0]  ;;  %v2977_v17 = vor.u32 %v3477_v5, %v2974_v6 }
  0x6a   : > { %1437 = vmatpush.bf16.msrb.mxu3 %v3045_v15  ;;  %v2984_v14 = vld [vmem:[%s3738_s16 + $0xc0] sm:$0xf]  ;;  %v2785_v15 = vor.u32 %v3434_v4, %v2784_v3  ;;  %v2980_v18 = vld [vmem:[%s3738_s16 + $0xb0] sm:$0xf]  ;;  %v3479_v19 = vld [vmem:[%s3738_s16 + $0xb8] sm:$0xf0]  ;;  %v3073_v21 = vor.u32 %v3501_v8, %v3070_v9  ;;  %v2889_v24 = vor.u32 %v3457_v13, %v2888_v12 }
  0x6b   : > { %1005 = vmatpush.bf16.msrb.mxu0 %v2737_v16  ;;  %v3481_v16 = vld [vmem:[%s3738_s16 + $0xc8] sm:$0xf0]  ;;  %v3076_v22 = vld [vmem:[%s3738_s16 + $0x170] sm:$0xf]  ;;  %v3503_v23 = vld [vmem:[%s3738_s16 + $0x178] sm:$0xf0]  ;;  %v2981_v29 = vor.u32 %v3479_v19, %v2980_v18 }
  0x6c   : > { %1024 = vmatpush.bf16.msrb.mxu1 %v2833_v20  ;;  %v2872_v20 = vld [vmem:[%s3723_s22 + $0x8] sm:$0xf]  ;;  %v3403_v25 = vld [vmem:[%s3723_s22 + $0x14] sm:$0xf0]  ;;  %v3401_v26 = vld [vmem:[%s3723_s22 + $0xc] sm:$0xf]  ;;  %v2985_v28 = vor.u32 %v3481_v16, %v2984_v14  ;;  %v3077_v33 = vor.u32 %v3503_v23, %v3076_v22 }
  0x6d   : > { %1419 = vmatpush.bf16.msrb.mxu2 %v2937_v27  ;;  %v2874_v27 = vld [vmem:[%s3723_s22 + $0x18] sm:$0xf0]  ;;  %v3498_v32 = vld [vmem:[%s3738_s16 + $0x154] sm:$0xf]  ;;  %v3058_v34 = vld [vmem:[%s3738_s16 + $0x15c] sm:$0xf0]  ;;  %v3916_v38 = vor.u32 %v3403_v25, %v2872_v20 }
  0x6e   : > { %1438 = vmatpush.bf16.msrb.mxu3 %v3033_v30  ;;  %939 = vmatmul.bf16.gmra.mxu0 %v3865_v35  ;;  %v3474_v30 = vld [vmem:[%s3738_s16 + $0x94] sm:$0xf]  ;;  %v3476_v37 = vld [vmem:[%s3738_s16 + $0xa0] sm:$0xf0]  ;;  %v3064_v39 = vld [vmem:[%s3738_s16 + $0x158] sm:$0xf]  ;;  %v3920_v42 = vor.u32 %v3401_v26, %v2874_v27 }
  0x6f   : > { %1006 = vmatpush.bf16.msrb.mxu0 %v2725_v31  ;;  %958 = vmatmul.bf16.gmra.mxu1 %v3870_v40  ;;  %v2962_v31 = vld [vmem:[%s3738_s16 + $0x9c] sm:$0xf0]  ;;  %v3500_v41 = vld [vmem:[%s3738_s16 + $0x160] sm:$0xf0]  ;;  %v3471_v47 = vld [vmem:[%s3738_s16 + $0x7c] sm:$0xf] }
  0x70   : > { %1025 = vmatpush.bf16.msrb.mxu1 %v2821_v36  ;;  %977 = vmatmul.bf16.gmra.mxu2 %v3865_v35  ;;  %v2968_v36 = vld [vmem:[%s3738_s16 + $0x98] sm:$0xf]  ;;  %v2950_v48 = vld [vmem:[%s3738_s16 + $0x84] sm:$0xf0]  ;;  %v3495_v49 = vld [vmem:[%s3738_s16 + $0x13c] sm:$0xf] }
  0x71   : > { %996 = vmatmul.bf16.gmra.mxu3 %v3870_v40  ;;  %1420 = vmatpush.bf16.msrb.mxu2 %v2925_v43  ;;  %v2965_v43 = vor.u32 %v3474_v30, %v2962_v31  ;;  %v3046_v52 = vld [vmem:[%s3738_s16 + $0x144] sm:$0xf0]  ;;  %v2956_v53 = vld [vmem:[%s3738_s16 + $0x80] sm:$0xf]  ;;  %v3473_v54 = vld [vmem:[%s3738_s16 + $0x88] sm:$0xf0] }
  0x72   : > { %1439 = vmatpush.bf16.msrb.mxu3 %v3021_v44  ;;  %v3061_v44 = vor.u32 %v3498_v32, %v3058_v34  ;;  %v3052_v55 = vld [vmem:[%s3738_s16 + $0x140] sm:$0xf]  ;;  %v3497_v56 = vld [vmem:[%s3738_s16 + $0x148] sm:$0xf0]  ;;  %v2957_v58 = vor.u32 %v3473_v54, %v2956_v53  ;;  %v3034_v62 = vld [vmem:[%s3738_s16 + $0x12c] sm:$0xf0] }
  0x73   : > { %1007 = vmatpush.bf16.msrb.mxu0 %v2713_v46  ;;  %v2969_v46 = vor.u32 %v3476_v37, %v2968_v36  ;;  %v3053_v61 = vor.u32 %v3497_v56, %v3052_v55  ;;  %v2944_v63 = vld [vmem:[%s3738_s16 + $0x68] sm:$0xf]  ;;  %v3494_v2 = vld [vmem:[%s3738_s16 + $0x130] sm:$0xf0]  ;;  %v3465_v6 = vld [vmem:[%s3738_s16 + $0x4c] sm:$0xf] }
  0x74   : > { %1026 = vmatpush.bf16.msrb.mxu1 %v2809_v51  ;;  %v3065_v51 = vor.u32 %v3500_v41, %v3064_v39  ;;  %v3040_v1 = vld [vmem:[%s3738_s16 + $0x128] sm:$0xf]  ;;  %v3489_v8 = vld [vmem:[%s3738_s16 + $0x10c] sm:$0xf]  ;;  %v3467_v12 = vld [vmem:[%s3738_s16 + $0x58] sm:$0xf0] }
  0x75   : > { %1421 = vmatpush.bf16.msrb.mxu2 %v2913_v57  ;;  %v3049_v57 = vor.u32 %v3495_v49, %v3046_v52  ;;  %v3041_v9 = vor.u32 %v3494_v2, %v3040_v1  ;;  %v2880_v13 = vld [vmem:[%s3723_s22 + $0x28] sm:$0xf]  ;;  %v3028_v14 = vld [vmem:[%s3738_s16 + $0x110] sm:$0xf]  ;;  %v3407_v16 = vld [vmem:[%s3723_s22 + $0x34] sm:$0xf0] }
  0x76   : > { %1440 = vmatpush.bf16.msrb.mxu3 %v3009_v59  ;;  %v3468_v59 = vld [vmem:[%s3738_s16 + $0x64] sm:$0xf]  ;;  %v2882_v18 = vld [vmem:[%s3723_s22 + $0x38] sm:$0xf0]  ;;  %v3462_v22 = vld [vmem:[%s3738_s16 + $0x34] sm:$0xf] }
  0x77   : > { %1008 = vmatpush.bf16.msrb.mxu0 %v2701_v60  ;;  %v3492_v60 = vld [vmem:[%s3738_s16 + $0x124] sm:$0xf]  ;;  %v2914_v23 = vld [vmem:[%s3738_s16 + $0x3c] sm:$0xf0]  ;;  %v2920_v27 = vld [vmem:[%s3738_s16 + $0x38] sm:$0xf] }
  0x78   : > { %1027 = vmatpush.bf16.msrb.mxu1 %v2797_v0  ;;  %v3470_v0 = vld [vmem:[%s3738_s16 + $0x70] sm:$0xf0]  ;;  %v3037_v4 = vor.u32 %v3492_v60, %v3034_v62  ;;  %v3010_v26 = vld [vmem:[%s3738_s16 + $0xfc] sm:$0xf0]  ;;  %v3016_v30 = vld [vmem:[%s3738_s16 + $0xf8] sm:$0xf] }
  0x79   : > { %1422 = vmatpush.bf16.msrb.mxu2 %v2901_v7  ;;  %v2945_v5 = vor.u32 %v3470_v0, %v2944_v63  ;;  %v2926_v7 = vld [vmem:[%s3738_s16 + $0x54] sm:$0xf0]  ;;  %v3488_v31 = vld [vmem:[%s3738_s16 + $0x100] sm:$0xf0]  ;;  %v3459_v37 = vld [vmem:[%s3738_s16 + $0x1c] sm:$0xf] }
  0x7a   : > { %1441 = vmatpush.bf16.msrb.mxu3 %v2997_v10  ;;  %v3022_v10 = vld [vmem:[%s3738_s16 + $0x114] sm:$0xf0]  ;;  %v2929_v19 = vor.u32 %v3465_v6, %v2926_v7  ;;  %v2902_v39 = vld [vmem:[%s3738_s16 + $0x24] sm:$0xf0]  ;;  %v3483_v41 = vld [vmem:[%s3738_s16 + $0xdc] sm:$0xf] }
  0x7b   : > { %1009 = vmatpush.bf16.msrb.mxu0 %v2689_v11  ;;  %v2932_v11 = vld [vmem:[%s3738_s16 + $0x50] sm:$0xf]  ;;  %v3025_v20 = vor.u32 %v3489_v8, %v3022_v10  ;;  %v3485_v49 = vld [vmem:[%s3738_s16 + $0xe8] sm:$0xf0]  ;;  %v3480_v54 = vld [vmem:[%s3738_s16 + $0xc4] sm:$0xf] }
  0x7c   : > { %1028 = vmatpush.bf16.msrb.mxu1 %v2785_v15  ;;  %v3491_v15 = vld [vmem:[%s3738_s16 + $0x118] sm:$0xf0]  ;;  %v2890_v52 = vld [vmem:[%s3738_s16 + $0xc] sm:$0xf0]  ;;  %v2896_v56 = vld [vmem:[%s3738_s16 + $0x8] sm:$0xf] }
  0x7d   : > { %1423 = vmatpush.bf16.msrb.mxu2 %v2889_v24  ;;  %v3486_v24 = vld [vmem:[%s3738_s16 + $0xf4] sm:$0xf]  ;;  %v3029_v25 = vor.u32 %v3491_v15, %v3028_v14  ;;  %v2986_v55 = vld [vmem:[%s3738_s16 + $0xcc] sm:$0xf0]  ;;  %v3380_v0 = vld [vmem:[%s3743_s21 + $0x228] sm:$0xf] }
  0x7e   : > { %1442 = vmatpush.bf16.msrb.mxu3 %v2985_v28  ;;  %1010 = vmatmul.bf16.vlgmr.msrb.gmra.mxu0 %v3821_v45  ;;  %v2953_v45 = vor.u32 %v3471_v47, %v2950_v48  ;;  %v3464_v28 = vld [vmem:[%s3738_s16 + $0x40] sm:$0xf0]  ;;  %v3013_v34 = vor.u32 %v3486_v24, %v3010_v26  ;;  %v3461_v47 = vld [vmem:[%s3738_s16 + $0x28] sm:$0xf0]  ;;  %v3004_v48 = vld [vmem:[%s3738_s16 + $0xe0] sm:$0xf]  ;;  %v2989_v2 = vor.u32 %v3480_v54, %v2986_v55 }
  0x7f   : > { %1454 = vmatpush.bf16.msra.mxu0 %v2977_v17  ;;  %1029 = vmatmul.bf16.vlgmr.msrb.gmra.mxu1 %v3826_v50  ;;  %v2938_v50 = vld [vmem:[%s3738_s16 + $0x6c] sm:$0xf0]  ;;  %v3405_v17 = vld [vmem:[%s3723_s22 + $0x2c] sm:$0xf]  ;;  %v2921_v36 = vor.u32 %v3464_v28, %v2920_v27  ;;  %v3532_v60 = vld [vmem:[%s3743_s21 + $0xb0] sm:$0xf0] }
  0x80   : > { %1473 = vmatpush.bf16.msra.mxu1 %v3073_v21  ;;  %1424 = vmatmul.bf16.vlgmr.msrb.gmra.mxu2 %v3916_v38  ;;  %v2941_v3 = vor.u32 %v3468_v59, %v2938_v50  ;;  %v2933_v21 = vor.u32 %v3467_v12, %v2932_v11  ;;  %v3964_v32 = vor.u32 %v3405_v17, %v2882_v18  ;;  %v3482_v59 = vld [vmem:[%s3738_s16 + $0xd0] sm:$0xf0]  ;;  %v3188_v50 = vld [vmem:[%s3743_s21 + $0xa8] sm:$0xf]  ;;  %v3176_v11 = vld [vmem:[%s3743_s21 + $0x90] sm:$0xf] }
  0x81   : > { %1492 = vmatpush.bf16.msra.mxu2 %v2981_v29  ;;  %1443 = vmatmul.bf16.vlgmr.msrb.gmra.mxu3 %v3920_v42  ;;  %v3960_v29 = vor.u32 %v3407_v16, %v2880_v13  ;;  %v3556_v63 = vld [vmem:[%s3743_s21 + $0x170] sm:$0xf0]  ;;  %v3189_v7 = vor.u32 %v3532_v60, %v3188_v50  ;;  %v3529_v12 = vld [vmem:[%s3743_s21 + $0x98] sm:$0xf0]  ;;  %v3272_v13 = vld [vmem:[%s3743_s21 + $0x150] sm:$0xf] }
  0x82   : > { %1511 = vmatpush.bf16.msra.mxu3 %v3077_v33  ;;  %v2917_v33 = vor.u32 %v3462_v22, %v2914_v23  ;;  %v3580_v1 = vld [vmem:[%s3743_s21 + $0x230] sm:$0xf0]  ;;  %v3553_v14 = vld [vmem:[%s3743_s21 + $0x158] sm:$0xf0]  ;;  %v3368_v15 = vld [vmem:[%s3743_s21 + $0x210] sm:$0xf] }
  0x83   : > { %1455 = vmatpush.bf16.msra.mxu0 %v2965_v43  ;;  %v3017_v43 = vor.u32 %v3488_v31, %v3016_v30  ;;  %v3577_v16 = vld [vmem:[%s3743_s21 + $0x218] sm:$0xf0]  ;;  %v3528_v17 = vld [vmem:[%s3743_s21 + $0x94] sm:$0xf]  ;;  %v3178_v18 = vld [vmem:[%s3743_s21 + $0x9c] sm:$0xf0] }
  0x84   : > { %1474 = vmatpush.bf16.msra.mxu1 %v3061_v44  ;;  %v2998_v44 = vld [vmem:[%s3738_s16 + $0xe4] sm:$0xf0]  ;;  %v3164_v22 = vld [vmem:[%s3743_s21 + $0x78] sm:$0xf]  ;;  %v3526_v23 = vld [vmem:[%s3743_s21 + $0x80] sm:$0xf0] }
  0x85   : > { %1493 = vmatpush.bf16.msra.mxu2 %v2969_v46  ;;  %v2908_v46 = vld [vmem:[%s3738_s16 + $0x20] sm:$0xf]  ;;  %v3260_v24 = vld [vmem:[%s3743_s21 + $0x138] sm:$0xf]  ;;  %v3550_v26 = vld [vmem:[%s3743_s21 + $0x140] sm:$0xf0] }
  0x86   : > { %1512 = vmatpush.bf16.msra.mxu3 %v3065_v51  ;;  %v3456_v51 = vld [vmem:[%s3738_s16 + $0x4] sm:$0xf]  ;;  %v2909_v53 = vor.u32 %v3461_v47, %v2908_v46  ;;  %v3356_v27 = vld [vmem:[%s3743_s21 + $0x1f8] sm:$0xf]  ;;  %v3525_v30 = vld [vmem:[%s3743_s21 + $0x7c] sm:$0xf] }
  0x87   : > { %1456 = vmatpush.bf16.msra.mxu0 %v2953_v45  ;;  %v3005_v45 = vor.u32 %v3485_v49, %v3004_v48  ;;  %v2893_v62 = vor.u32 %v3456_v51, %v2890_v52  ;;  %v3574_v28 = vld [vmem:[%s3743_s21 + $0x200] sm:$0xf0]  ;;  %v3166_v31 = vld [vmem:[%s3743_s21 + $0x84] sm:$0xf0]  ;;  %v3154_v47 = vld [vmem:[%s3743_s21 + $0x6c] sm:$0xf0] }
  0x88   : > { %1475 = vmatpush.bf16.msra.mxu1 %v3049_v57  ;;  %v3458_v57 = vld [vmem:[%s3738_s16 + $0x10] sm:$0xf0]  ;;  %v3522_v46 = vld [vmem:[%s3743_s21 + $0x64] sm:$0xf]  ;;  %v3140_v51 = vld [vmem:[%s3743_s21 + $0x48] sm:$0xf] }
  0x89   : > { %1494 = vmatpush.bf16.msra.mxu2 %v2957_v58  ;;  %v2992_v58 = vld [vmem:[%s3738_s16 + $0xc8] sm:$0xf]  ;;  %v3520_v52 = vld [vmem:[%s3743_s21 + $0x50] sm:$0xf0]  ;;  %v3128_v60 = vld [vmem:[%s3743_s21 + $0x30] sm:$0xf] }
  0x8a   : > { %1513 = vmatpush.bf16.msra.mxu3 %v3053_v61  ;;  %v3284_v61 = vld [vmem:[%s3743_s21 + $0x168] sm:$0xf]  ;;  %v2993_v6 = vor.u32 %v3482_v59, %v2992_v58  ;;  %v3544_v54 = vld [vmem:[%s3743_s21 + $0x110] sm:$0xf0]  ;;  %v3141_v58 = vor.u32 %v3520_v52, %v3140_v51  ;;  %vm1544_vm2 = vcmask 261120   ;;  %vm2272_vm3 = vcmask 523264  }
  0x8b   : > { %1457 = vmatpush.bf16.msra.mxu0 %v2941_v3  ;;  %v2897_v3 = vor.u32 %v3458_v57, %v2896_v56  ;;  %v3285_v8 = vor.u32 %v3556_v63, %v3284_v61  ;;  %v3332_v55 = vld [vmem:[%s3743_s21 + $0x1c8] sm:$0xf]  ;;  %v3568_v56 = vld [vmem:[%s3743_s21 + $0x1d0] sm:$0xf0]  ;;  %v3142_v57 = vld [vmem:[%s3743_s21 + $0x54] sm:$0xf0] }
  0x8c   : > { %1476 = vmatpush.bf16.msra.mxu1 %v3037_v4  ;;  %v3531_v4 = vld [vmem:[%s3743_s21 + $0xac] sm:$0xf]  ;;  %v3333_v50 = vor.u32 %v3568_v56, %v3332_v55  ;;  %v3517_v61 = vld [vmem:[%s3743_s21 + $0x38] sm:$0xf0]  ;;  %v3088_v51 = vld [vmem:[%s3728_s26 + $0x8] sm:$0xf] }
  0x8d   : > { %1495 = vmatpush.bf16.msra.mxu2 %v2945_v5  ;;  %v3190_v5 = vld [vmem:[%s3743_s21 + $0xb4] sm:$0xf0]  ;;  %v3506_v52 = vld [vmem:[%s3728_s26 + $0x10] sm:$0xf0]  ;;  %p3390_p6 = scmp.ne.s32.totalorder %s3632_s13, 8 }
  0x8e   : > { %1514 = vmatpush.bf16.msra.mxu3 %v3041_v9  ;;  %1015 = vmatmul.bf16.gmra.mxu0 %v3865_v35  ;;  %v2905_v35 = vor.u32 %v3459_v37, %v2902_v39  ;;  %v3381_v9 = vor.u32 %v3580_v1, %v3380_v0  ;;  %v3193_v10 = vor.u32 %v3531_v4, %v3190_v5  ;;  %v3152_v37 = vld [vmem:[%s3743_s21 + $0x60] sm:$0xf]  ;;  %v3523_v39 = vld [vmem:[%s3743_s21 + $0x68] sm:$0xf0]  ;;  %v3541_v0 = vld [vmem:[%s3743_s21 + $0xf8] sm:$0xf0] }
  0x8f   : > { %1458 = vmatpush.bf16.msra.mxu0 %v2929_v19  ;;  %1034 = vmatmul.bf16.gmra.mxu1 %v3870_v40  ;;  %v3001_v40 = vor.u32 %v3483_v41, %v2998_v44  ;;  %v3177_v19 = vor.u32 %v3529_v12, %v3176_v11  ;;  %v3248_v41 = vld [vmem:[%s3743_s21 + $0x120] sm:$0xf]  ;;  %v3153_v48 = vor.u32 %v3523_v39, %v3152_v37  ;;  %v3320_v1 = vld [vmem:[%s3743_s21 + $0x1b0] sm:$0xf]  ;;  %v3538_v12 = vld [vmem:[%s3743_s21 + $0xe0] sm:$0xf0] }
  0x90   : > { %1477 = vmatpush.bf16.msra.mxu1 %v3025_v20  ;;  %1429 = vmatmul.bf16.gmra.mxu2 %v3960_v29  ;;  %v3273_v20 = vor.u32 %v3553_v14, %v3272_v13  ;;  %v3344_v44 = vld [vmem:[%s3743_s21 + $0x1e0] sm:$0xf]  ;;  %v3129_v5 = vor.u32 %v3517_v61, %v3128_v60  ;;  %v3308_v13 = vld [vmem:[%s3743_s21 + $0x198] sm:$0xf]  ;;  %v3562_v14 = vld [vmem:[%s3743_s21 + $0x1a0] sm:$0xf0] }
  0x91   : > { %1496 = vmatpush.bf16.msra.mxu2 %v2933_v21  ;;  %1448 = vmatmul.bf16.gmra.mxu3 %v3964_v32  ;;  %v3369_v21 = vor.u32 %v3577_v16, %v3368_v15  ;;  %v3130_v4 = vld [vmem:[%s3743_s21 + $0x3c] sm:$0xf0]  ;;  %v3513_v15 = vld [vmem:[%s3743_s21 + $0x1c] sm:$0xf]  ;;  %v3118_v16 = vld [vmem:[%s3743_s21 + $0x24] sm:$0xf0] }
  0x92   : > { %1515 = vmatpush.bf16.msra.mxu3 %v3029_v25  ;;  %v3181_v25 = vor.u32 %v3528_v17, %v3178_v18  ;;  %v3104_v18 = vld [vmem:[%s3743_s21] sm:$0xf]  ;;  %v3576_v55 = vld [vmem:[%s3743_s21 + $0x214] sm:$0xf]  ;;  %v3280_v60 = vld [vmem:[%s3743_s21 + $0x158] sm:$0xf] }
  0x93   : > { %1459 = vmatpush.bf16.msra.mxu0 %v2917_v33  ;;  %v3165_v33 = vor.u32 %v3526_v23, %v3164_v22  ;;  %v3535_v22 = vld [vmem:[%s3743_s21 + $0xc8] sm:$0xf0]  ;;  %v3296_v23 = vld [vmem:[%s3743_s21 + $0x180] sm:$0xf]  ;;  %v3554_v61 = vld [vmem:[%s3743_s21 + $0x160] sm:$0xf0] }
  0x94   : > { %1478 = vmatpush.bf16.msra.mxu1 %v3013_v34  ;;  %v3261_v34 = vor.u32 %v3550_v26, %v3260_v24  ;;  %v3559_v24 = vld [vmem:[%s3743_s21 + $0x188] sm:$0xf0]  ;;  %v3106_v26 = vld [vmem:[%s3743_s21 + $0xc] sm:$0xf0] }
  0x95   : > { %1497 = vmatpush.bf16.msra.mxu2 %v2921_v36  ;;  %v3357_v36 = vor.u32 %v3574_v28, %v3356_v27  ;;  %v3555_v27 = vld [vmem:[%s3743_s21 + $0x16c] sm:$0xf]  ;;  %v3286_v28 = vld [vmem:[%s3743_s21 + $0x174] sm:$0xf0]  ;;  %v3297_v39 = vor.u32 %v3559_v24, %v3296_v23  ;;  %v3508_v24 = vld [vmem:[%s3728_s26 + $0x20] sm:$0xf0] }
  0x96   : > { %1516 = vmatpush.bf16.msra.mxu3 %v3017_v43  ;;  %v3547_v43 = vld [vmem:[%s3743_s21 + $0x128] sm:$0xf0] }
  0x97   : > { %1460 = vmatpush.bf16.msra.mxu0 %v2905_v35  ;;  %v3249_v49 = vor.u32 %v3547_v43, %v3248_v41  ;;  %v3292_v41 = vld [vmem:[%s3743_s21 + $0x170] sm:$0xf] }
  0x98   : > { %1479 = vmatpush.bf16.msra.mxu1 %v3001_v40  ;;  %v3236_v40 = vld [vmem:[%s3743_s21 + $0x108] sm:$0xf] }
  0x99   : > { %1498 = vmatpush.bf16.msra.mxu2 %v2909_v53  ;;  %v3157_v53 = vor.u32 %v3522_v46, %v3154_v47  ;;  %v3237_v59 = vor.u32 %v3544_v54, %v3236_v40  ;;  %v3505_v46 = vld [vmem:[%s3728_s26 + $0x8] sm:$0xf0]  ;;  %v3504_v47 = vld [vmem:[%s3728_s26 + $0x4] sm:$0xf]  ;;  %v3274_v54 = vld [vmem:[%s3743_s21 + $0x15c] sm:$0xf0] }
  0x9a   : > { %1517 = vmatpush.bf16.msra.mxu3 %v3005_v45  ;;  %v3519_v45 = vld [vmem:[%s3743_s21 + $0x4c] sm:$0xf] }
  0x9b   : > { %1461 = vmatpush.bf16.msra.mxu0 %v2893_v62  ;;  %v3224_v62 = vld [vmem:[%s3743_s21 + $0xf0] sm:$0xf]  ;;  %v3145_v63 = vor.u32 %v3519_v45, %v3142_v57  ;;  %v3370_v45 = vld [vmem:[%s3743_s21 + $0x21c] sm:$0xf0]  ;;  %v3184_v57 = vld [vmem:[%s3743_s21 + $0x98] sm:$0xf] }
  0x9c   : > { %1480 = vmatpush.bf16.msra.mxu1 %v2989_v2  ;;  %v3565_v2 = vld [vmem:[%s3743_s21 + $0x1b8] sm:$0xf0] }
  0x9d   : > { %1499 = vmatpush.bf16.msra.mxu2 %v2897_v3  ;;  %v3516_v3 = vld [vmem:[%s3743_s21 + $0x34] sm:$0xf] }
  0x9e   : > { %1518 = vmatpush.bf16.msra.mxu3 %v2993_v6  ;;  %1462 = vmatmul.bf16.vlgmr.msra.gmra.mxu0 %v3916_v38  ;;  %v3225_v6 = vor.u32 %v3541_v0, %v3224_v62  ;;  %v3133_v11 = vor.u32 %v3516_v3, %v3130_v4  ;;  %v3573_v3 = vld [vmem:[%s3743_s21 + $0x1fc] sm:$0xf]  ;;  %v3281_v4 = vor.u32 %v3554_v61, %v3280_v60 }
  0x9f   : > { %2087 = vmatpush.bf16.msrb.mxu0 %v3189_v7  ;;  %1481 = vmatmul.bf16.vlgmr.msra.gmra.mxu1 %v3920_v42  ;;  %v3321_v7 = vor.u32 %v3565_v2, %v3320_v1  ;;  %v3549_v1 = vld [vmem:[%s3743_s21 + $0x13c] sm:$0xf]  ;;  %v3262_v2 = vld [vmem:[%s3743_s21 + $0x144] sm:$0xf0] }
  0xa0   : > { %2106 = vmatpush.bf16.msrb.mxu1 %v3285_v8  ;;  %1500 = vmatmul.bf16.vlgmr.msra.gmra.mxu2 %v3916_v38  ;;  %v3169_v38 = vor.u32 %v3525_v30, %v3166_v31  ;;  %v3116_v8 = vld [vmem:[%s3743_s21 + $0x18] sm:$0xf]  ;;  %v3579_v30 = vld [vmem:[%s3743_s21 + $0x22c] sm:$0xf]  ;;  %v3537_v61 = vld [vmem:[%s3743_s21 + $0xdc] sm:$0xf] }
  0xa1   : > { %2125 = vmatpush.bf16.msrb.mxu2 %v3381_v9  ;;  %1519 = vmatmul.bf16.vlgmr.msra.gmra.mxu3 %v3920_v42  ;;  %v3571_v42 = vld [vmem:[%s3743_s21 + $0x1e8] sm:$0xf0]  ;;  %v3514_v9 = vld [vmem:[%s3743_s21 + $0x20] sm:$0xf0] }
  0xa2   : > { %2144 = vmatpush.bf16.msrb.mxu3 %v3193_v10  ;;  %v3345_v35 = vor.u32 %v3571_v42, %v3344_v44  ;;  %v3212_v10 = vld [vmem:[%s3743_s21 + $0xd8] sm:$0xf]  ;;  %v3117_v17 = vor.u32 %v3514_v9, %v3116_v8  ;;  %v3289_v44 = vor.u32 %v3555_v27, %v3286_v28  ;;  %v3080_v42 = vld [vmem:[%s3728_s26] sm:$0xf]  ;;  %v3551_v9 = vld [vmem:[%s3743_s21 + $0x148] sm:$0xf0] }
  0xa3   : > { %2088 = vmatpush.bf16.msrb.mxu0 %v3177_v19  ;;  %v3511_v19 = vld [vmem:[%s3743_s21 + $0x8] sm:$0xf0]  ;;  %v4075_v56 = vor.u32 %v3505_v46, %v3080_v42  ;;  %v3268_v8 = vld [vmem:[%s3743_s21 + $0x140] sm:$0xf]  ;;  %v3540_v46 = vld [vmem:[%s3743_s21 + $0xf4] sm:$0xf] }
  0xa4   : > { %2107 = vmatpush.bf16.msrb.mxu1 %v3273_v20  ;;  %v3213_v20 = vor.u32 %v3538_v12, %v3212_v10  ;;  %v3105_v31 = vor.u32 %v3511_v19, %v3104_v18  ;;  %v3265_v10 = vor.u32 %v3549_v1, %v3262_v2  ;;  %v3160_v18 = vld [vmem:[%s3743_s21 + $0x68] sm:$0xf]  ;;  %v3524_v19 = vld [vmem:[%s3743_s21 + $0x70] sm:$0xf0]  ;;  %v3567_v27 = vld [vmem:[%s3743_s21 + $0x1cc] sm:$0xf] }
  0xa5   : > { %2126 = vmatpush.bf16.msrb.mxu2 %v3369_v21  ;;  %v3200_v21 = vld [vmem:[%s3743_s21 + $0xc0] sm:$0xf]  ;;  %v3161_v23 = vor.u32 %v3524_v19, %v3160_v18  ;;  %v3310_v1 = vld [vmem:[%s3743_s21 + $0x1a4] sm:$0xf0]  ;;  %v3388_v18 = vld [vmem:[%s3743_s21 + $0x230] sm:$0xf] }
  0xa6   : > { %2145 = vmatpush.bf16.msrb.mxu3 %v3181_v25  ;;  %v3510_v25 = vld [vmem:[%s3743_s21 + $0x4] sm:$0xf]  ;;  %v3201_v37 = vor.u32 %v3535_v22, %v3200_v21  ;;  %v3124_v2 = vld [vmem:[%s3743_s21 + $0x20] sm:$0xf]  ;;  %v3581_v19 = vld [vmem:[%s3743_s21 + $0x238] sm:$0xf0] }
  0xa7   : > { %2089 = vmatpush.bf16.msrb.mxu0 %v3165_v33  ;;  %v3382_v33 = vld [vmem:[%s3743_s21 + $0x234] sm:$0xf0]  ;;  %v3109_v43 = vor.u32 %v3510_v25, %v3106_v26  ;;  %v3543_v25 = vld [vmem:[%s3743_s21 + $0x10c] sm:$0xf] }
  0xa8   : > { %2108 = vmatpush.bf16.msrb.mxu1 %v3261_v34  ;;  %v3196_v34 = vld [vmem:[%s3743_s21 + $0xb0] sm:$0xf]  ;;  %v3238_v26 = vld [vmem:[%s3743_s21 + $0x114] sm:$0xf0] }
  0xa9   : > { %2127 = vmatpush.bf16.msrb.mxu2 %v3357_v36  ;;  %v3533_v36 = vld [vmem:[%s3743_s21 + $0xb8] sm:$0xf0] }
  0xaa   : > { %2146 = vmatpush.bf16.msrb.mxu3 %v3169_v38  ;;  %v3557_v38 = vld [vmem:[%s3743_s21 + $0x178] sm:$0xf0] }
  0xab   : > { %2090 = vmatpush.bf16.msrb.mxu0 %v3153_v48  ;;  %v3385_v48 = vor.u32 %v3579_v30, %v3382_v33  ;;  %v3293_v40 = vor.u32 %v3557_v38, %v3292_v41  ;;  %v3334_v30 = vld [vmem:[%s3743_s21 + $0x1d4] sm:$0xf0]  ;;  %v3521_v33 = vld [vmem:[%s3743_s21 + $0x58] sm:$0xf0]  ;;  %v3100_v41 = vld [vmem:[%s3728_s26 + $0x20] sm:$0xf] }
  0xac   : > { %2109 = vmatpush.bf16.msrb.mxu1 %v3249_v49  ;;  %v3197_v49 = vor.u32 %v3533_v36, %v3196_v34  ;;  %v3507_v34 = vld [vmem:[%s3728_s26 + $0x1c] sm:$0xf]  ;;  %v3244_v36 = vld [vmem:[%s3743_s21 + $0x110] sm:$0xf]  ;;  %v3509_v38 = vld [vmem:[%s3728_s26 + $0x28] sm:$0xf0] }
  0xad   : > { %2128 = vmatpush.bf16.msrb.mxu2 %v3345_v35  ;;  %v3082_v35 = vld [vmem:[%s3728_s26 + $0xc] sm:$0xf0] }
  0xae   : > { %2147 = vmatpush.bf16.msrb.mxu3 %v3157_v53  ;;  %1467 = vmatmul.bf16.gmra.mxu0 %v3960_v29  ;;  %v3552_v53 = vld [vmem:[%s3743_s21 + $0x154] sm:$0xf] }
  0xaf   : > { %2091 = vmatpush.bf16.msrb.mxu0 %v3141_v58  ;;  %1486 = vmatmul.bf16.gmra.mxu1 %v3964_v32  ;;  %v3530_v58 = vld [vmem:[%s3743_s21 + $0xa0] sm:$0xf0]  ;;  %v3277_v62 = vor.u32 %v3552_v53, %v3274_v54  ;;  %v4130_v54 = vor.u32 %v3509_v38, %v3100_v41 }
  0xb0   : > { %2110 = vmatpush.bf16.msrb.mxu1 %v3237_v59  ;;  %1505 = vmatmul.bf16.gmra.mxu2 %v3960_v29  ;;  %v3309_v29 = vor.u32 %v3562_v14, %v3308_v13  ;;  %v4080_v59 = vor.u32 %v3504_v47, %v3082_v35  ;;  %v3185_v0 = vor.u32 %v3530_v58, %v3184_v57  ;;  %v3546_v13 = vld [vmem:[%s3743_s21 + $0x124] sm:$0xf]  ;;  %v3250_v14 = vld [vmem:[%s3743_s21 + $0x12c] sm:$0xf0]  ;;  %v3226_v47 = vld [vmem:[%s3743_s21 + $0xfc] sm:$0xf0] }
  0xb1   : > { %2129 = vmatpush.bf16.msrb.mxu2 %v3333_v50  ;;  %1524 = vmatmul.bf16.gmra.mxu3 %v3964_v32  ;;  %v3121_v32 = vor.u32 %v3513_v15, %v3118_v16  ;;  %v4082_v50 = vor.u32 %v3506_v52, %v3088_v51  ;;  %v3570_v15 = vld [vmem:[%s3743_s21 + $0x1e4] sm:$0xf]  ;;  %v3269_v16 = vor.u32 %v3551_v9, %v3268_v8  ;;  %v3322_v51 = vld [vmem:[%s3743_s21 + $0x1bc] sm:$0xf0]  ;;  %v3136_v52 = vld [vmem:[%s3743_s21 + $0x38] sm:$0xf] }
  0xb2   : > { %2148 = vmatpush.bf16.msrb.mxu3 %v3145_v63  ;;  %v3373_v63 = vor.u32 %v3576_v55, %v3370_v45  ;;  %v3253_v21 = vor.u32 %v3546_v13, %v3250_v14  ;;  %v3232_v55 = vld [vmem:[%s3743_s21 + $0xf8] sm:$0xf]  ;;  %v3542_v45 = vld [vmem:[%s3743_s21 + $0x100] sm:$0xf0]  ;;  %v3229_v57 = vor.u32 %v3540_v46, %v3226_v47  ;;  %v3112_v14 = vld [vmem:[%s3743_s21 + $0x8] sm:$0xf] }
  0xb3   : > { %2092 = vmatpush.bf16.msrb.mxu0 %v3129_v5  ;;  %v3358_v5 = vld [vmem:[%s3743_s21 + $0x204] sm:$0xf0]  ;;  %v575_v38 = vld [vmem:[#allocation2] sm:$0xff]  ;;  %v577_v46 = vld [vmem:[#allocation2 + $0x18] sm:$0xff] }
  0xb4   : > { %2111 = vmatpush.bf16.msrb.mxu1 %v3225_v6  ;;  %v3172_v6 = vld [vmem:[%s3743_s21 + $0x80] sm:$0xf] }
  0xb5   : > { %2130 = vmatpush.bf16.msrb.mxu2 %v3321_v7  ;;  %v3527_v7 = vld [vmem:[%s3743_s21 + $0x88] sm:$0xf0] }
  0xb6   : > { %2149 = vmatpush.bf16.msrb.mxu3 %v3133_v11  ;;  %v3361_v11 = vor.u32 %v3573_v3, %v3358_v5  ;;  %v3173_v12 = vor.u32 %v3527_v7, %v3172_v6  ;;  %v3515_v3 = vld [vmem:[%s3743_s21 + $0x28] sm:$0xf0]  ;;  %v3534_v7 = vld [vmem:[%s3743_s21 + $0xc4] sm:$0xf] }
  0xb7   : > { %2093 = vmatpush.bf16.msrb.mxu0 %v3117_v17  ;;  %v3346_v17 = vld [vmem:[%s3743_s21 + $0x1ec] sm:$0xf0]  ;;  %v3539_v5 = vld [vmem:[%s3743_s21 + $0xe8] sm:$0xf0]  ;;  %v3125_v9 = vor.u32 %v3515_v3, %v3124_v2  ;;  %v3316_v3 = vld [vmem:[%s3743_s21 + $0x1a0] sm:$0xf] }
  0xb8   : > { %2112 = vmatpush.bf16.msrb.mxu1 %v3213_v20  ;;  %v3256_v20 = vld [vmem:[%s3743_s21 + $0x128] sm:$0xf]  ;;  %v3349_v22 = vor.u32 %v3570_v15, %v3346_v17  ;;  %v3512_v15 = vld [vmem:[%s3743_s21 + $0x10] sm:$0xf0] }
  0xb9   : > { %2131 = vmatpush.bf16.msrb.mxu2 %v3309_v29  ;;  %v3548_v29 = vld [vmem:[%s3743_s21 + $0x130] sm:$0xf0] }
  0xba   : > { %2150 = vmatpush.bf16.msrb.mxu3 %v3121_v32  ;;  %v3092_v32 = vld [vmem:[%s3728_s26 + $0x18] sm:$0xf]  ;;  %v3257_v28 = vor.u32 %v3548_v29, %v3256_v20  ;;  %v3536_v17 = vld [vmem:[%s3743_s21 + $0xd0] sm:$0xf0] }
  0xbb   : > { %2094 = vmatpush.bf16.msrb.mxu0 %v3105_v31  ;;  %v3148_v31 = vld [vmem:[%s3743_s21 + $0x50] sm:$0xf] }
  0xbc   : > { %2113 = vmatpush.bf16.msrb.mxu1 %v3201_v37  ;;  %v3545_v37 = vld [vmem:[%s3743_s21 + $0x118] sm:$0xf0]  ;;  %v3149_v42 = vor.u32 %v3521_v33, %v3148_v31  ;;  %v3364_v31 = vld [vmem:[%s3743_s21 + $0x200] sm:$0xf]  ;;  %v3575_v33 = vld [vmem:[%s3743_s21 + $0x208] sm:$0xf0] }
  0xbd   : > { %2132 = vmatpush.bf16.msrb.mxu2 %v3297_v39  ;;  %v3094_v39 = vld [vmem:[%s3728_s26 + $0x24] sm:$0xf0]  ;;  %v3245_v35 = vor.u32 %v3545_v37, %v3244_v36  ;;  %v3365_v36 = vor.u32 %v3575_v33, %v3364_v31 }
  0xbe   : > { %2151 = vmatpush.bf16.msrb.mxu3 %v3109_v43  ;;  %2095 = vmatmul.bf16.vlgmr.msrb.gmra.mxu0 %v4075_v56  ;;  %v3241_v43 = vor.u32 %v3543_v25, %v3238_v26  ;;  %v4128_v53 = vor.u32 %v3507_v34, %v3094_v39  ;;  %v574_v26 = vld [vmem:[#allocation2 + $0x30] sm:$0xff]  ;;  %v3352_v37 = vld [vmem:[%s3743_s21 + $0x1e8] sm:$0xf] }
  0xbf   : > { %2163 = vmatpush.bf16.msra.mxu0 %v3289_v44  ;;  %2114 = vmatmul.bf16.vlgmr.msrb.gmra.mxu1 %v4080_v59  ;;  %v3337_v44 = vor.u32 %v3567_v27, %v3334_v30  ;;  %v3572_v39 = vld [vmem:[%s3743_s21 + $0x1f0] sm:$0xf0] }
  0xc0   : > { %2182 = vmatpush.bf16.msra.mxu1 %v3385_v48  ;;  %2133 = vmatmul.bf16.vlgmr.msrb.gmra.mxu2 %v4082_v50  ;;  %v3564_v48 = vld [vmem:[%s3743_s21 + $0x1b4] sm:$0xf] }
  0xc1   : > { %2201 = vmatpush.bf16.msra.mxu2 %v3197_v49  ;;  %2152 = vmatmul.bf16.vlgmr.msrb.gmra.mxu3 %v4075_v56  ;;  %v4123_v49 = vor.u32 %v3508_v24, %v3092_v32  ;;  %v3325_v58 = vor.u32 %v3564_v48, %v3322_v51  ;;  %v3376_v32 = vld [vmem:[%s3743_s21 + $0x218] sm:$0xf]  ;;  %v3578_v24 = vld [vmem:[%s3743_s21 + $0x220] sm:$0xf0]  ;;  %v3340_v48 = vld [vmem:[%s3743_s21 + $0x1d0] sm:$0xf] }
  0xc2   : > { %2220 = vmatpush.bf16.msra.mxu3 %v3293_v40  ;;  %v3518_v40 = vld [vmem:[%s3743_s21 + $0x40] sm:$0xf0] }
  0xc3   : > { %2164 = vmatpush.bf16.msra.mxu0 %v3277_v62  ;;  %v3137_v60 = vor.u32 %v3518_v40, %v3136_v52  ;;  %v3214_v62 = vld [vmem:[%s3743_s21 + $0xe4] sm:$0xf0] }
  0xc4   : > { %2183 = vmatpush.bf16.msra.mxu1 %v3373_v63  ;;  %v3561_v63 = vld [vmem:[%s3743_s21 + $0x19c] sm:$0xf]  ;;  %v3217_v6 = vor.u32 %v3537_v61, %v3214_v62 }
  0xc5   : > { %2202 = vmatpush.bf16.msra.mxu2 %v3185_v0  ;;  %v3233_v0 = vor.u32 %v3542_v45, %v3232_v55  ;;  %v3313_v8 = vor.u32 %v3561_v63, %v3310_v1  ;;  %v3328_v55 = vld [vmem:[%s3743_s21 + $0x1b8] sm:$0xf]  ;;  %v3566_v45 = vld [vmem:[%s3743_s21 + $0x1c0] sm:$0xf0]  ;;  %v580_v63 = vld [vmem:[#allocation2 + $0x8] sm:$0xff] }
  0xc6   : > { %2221 = vmatpush.bf16.msra.mxu3 %v3281_v4  ;;  %v3220_v4 = vld [vmem:[%s3743_s21 + $0xe0] sm:$0xf]  ;;  %v3329_v1 = vor.u32 %v3566_v45, %v3328_v55 }
  0xc7   : > { %2165 = vmatpush.bf16.msra.mxu0 %v3265_v10  ;;  %v3202_v10 = vld [vmem:[%s3743_s21 + $0xcc] sm:$0xf0]  ;;  %v3221_v13 = vor.u32 %v3539_v5, %v3220_v4  ;;  %v3563_v4 = vld [vmem:[%s3743_s21 + $0x1a8] sm:$0xf0]  ;;  %v585_v55 = vld [vmem:[#allocation2 + $0x40] sm:$0xff] }
  0xc8   : > { %2184 = vmatpush.bf16.msra.mxu1 %v3361_v11  ;;  %v3558_v11 = vld [vmem:[%s3743_s21 + $0x184] sm:$0xf]  ;;  %v3205_v20 = vor.u32 %v3534_v7, %v3202_v10  ;;  %v3317_v7 = vor.u32 %v3563_v4, %v3316_v3 }
  0xc9   : > { %2203 = vmatpush.bf16.msra.mxu2 %v3173_v12  ;;  %v3298_v12 = vld [vmem:[%s3743_s21 + $0x18c] sm:$0xf0] }
  0xca   : > { %2222 = vmatpush.bf16.msra.mxu3 %v3269_v16  ;;  %v3208_v16 = vld [vmem:[%s3743_s21 + $0xc8] sm:$0xf]  ;;  %v3301_v29 = vor.u32 %v3558_v11, %v3298_v12  ;;  %v581_v11 = vld [vmem:[#allocation2 + $0x38] sm:$0xff] }
  0xcb   : > { %2166 = vmatpush.bf16.msra.mxu0 %v3253_v21  ;;  %v3113_v21 = vor.u32 %v3512_v15, %v3112_v14  ;;  %v583_v15 = vld [vmem:[#allocation2 + $0x48] sm:$0xff] }
  0xcc   : > { %2185 = vmatpush.bf16.msra.mxu1 %v3349_v22  ;;  %v3209_v22 = vor.u32 %v3536_v17, %v3208_v16 }
  0xcd   : > { %2204 = vmatpush.bf16.msra.mxu2 %v3161_v23  ;;  %v3389_v23 = vor.u32 %v3581_v19, %v3388_v18 }
  0xce   : > { %2223 = vmatpush.bf16.msra.mxu3 %v3257_v28  ;;  %2100 = vmatmul.bf16.gmra.mxu0 %v4123_v49  ;;  %v3377_v28 = vor.u32 %v3578_v24, %v3376_v32 }
  0xcf   : > { %2167 = vmatpush.bf16.msra.mxu0 %v3241_v43  ;;  %2119 = vmatmul.bf16.gmra.mxu1 %v4128_v53 }
  0xd0   : > { %2186 = vmatpush.bf16.msra.mxu1 %v3337_v44  ;;  %2138 = vmatmul.bf16.gmra.mxu2 %v4130_v54 }
  0xd1   : > { %2205 = vmatpush.bf16.msra.mxu2 %v3149_v42  ;;  %2157 = vmatmul.bf16.gmra.mxu3 %v4123_v49 }
  0xd2   : > { %2224 = vmatpush.bf16.msra.mxu3 %v3245_v35  ;;  %v3569_v35 = vld [vmem:[%s3743_s21 + $0x1d8] sm:$0xf0] }
  0xd3   : > { %2168 = vmatpush.bf16.msra.mxu0 %v3229_v57  ;;  %v3341_v40 = vor.u32 %v3569_v35, %v3340_v48  ;;  %v1070_v35 = vld [vmem:[#allocation3 + $0x30] sm:$0xff] }
  0xd4   : > { %2187 = vmatpush.bf16.msra.mxu1 %v3325_v58  ;;  %v578_v58 = vld [vmem:[#allocation2 + $0x50] sm:$0xff] }
  0xd5   : > { %2206 = vmatpush.bf16.msra.mxu2 %v3137_v60 }
  0xd6   : > { %2225 = vmatpush.bf16.msra.mxu3 %v3233_v0 }
  0xd7   : > { %2169 = vmatpush.bf16.msra.mxu0 %v3217_v6 }
  0xd8   : > { %2188 = vmatpush.bf16.msra.mxu1 %v3313_v8  ;;  %v3304_v8 = vld [vmem:[%s3743_s21 + $0x188] sm:$0xf] }
  0xd9   : > { %2207 = vmatpush.bf16.msra.mxu2 %v3125_v9  ;;  %v3560_v9 = vld [vmem:[%s3743_s21 + $0x190] sm:$0xf0] }
  0xda   : > { %2226 = vmatpush.bf16.msra.mxu3 %v3221_v13  ;;  %v3305_v17 = vor.u32 %v3560_v9, %v3304_v8  ;;  %v1066_v8 = vld [vmem:[#allocation3 + $0x10] sm:$0xff] }
  0xdb   : > { %2170 = vmatpush.bf16.msra.mxu0 %v3205_v20  ;;  %v935_v25 = vpop.f32.mrf.mxu0  ;;  %v584_v20 = vld [vmem:[#allocation2 + $0x10] sm:$0xff] }
  0xdc   : > { %2189 = vmatpush.bf16.msra.mxu1 %v3301_v29  ;;  %v954_v27 = vpop.f32.mrf.mxu1 }
  0xdd   : > { %2208 = vmatpush.bf16.msra.mxu2 %v3113_v21  ;;  %v955_v30 = vadd.f32 %v954_v27, %v935_v25 }
  0xde   : > { %2227 = vmatpush.bf16.msra.mxu3 %v3209_v22  ;;  %2171 = vmatmul.bf16.vlgmr.msra.gmra.mxu0 %v4080_v59 }
  0xdf   : > { %2239 = vmatpush.bf16.msrb.mxu0 %v3389_v23  ;;  %v1040_v34 = vadd.f32 %v955_v30, %v574_v26  ;;  %2190 = vmatmul.bf16.vlgmr.msra.gmra.mxu1 %v4082_v50 }
  0xe0   : > { %3582 = vmatpush.bf16.msrb.mxu1 %v3389_v23  ;;  %2209 = vmatmul.bf16.vlgmr.msra.gmra.mxu2 %v4075_v56  ;;  %v3353_v56 = vor.u32 %v3572_v39, %v3352_v37  ;;  %v576_v23 = vld [vmem:[#allocation2 + $0x58] sm:$0xff] }
  0xe1   : > { %2228 = vmatmul.bf16.vlgmr.msra.gmra.mxu3 %v4080_v59  ;;  %1052 = vst [vmem:[#allocation2 + $0x30] sm:$0xff] %v1040_v34  ;;  %v579_v34 = vld [vmem:[#allocation2 + $0x20] sm:$0xff] }
  0xe3   : > { %2240 = vmatpush.bf16.msrb.mxu0 %v3377_v28  ;;  %v973_v41 = vpop.f32.mrf.mxu2  ;;  %v937_v44 = vpop.f32.mrf.mxu0 }
  0xe4   : > { %3583 = vmatpush.bf16.msrb.mxu1 %v3377_v28  ;;  %v992_v43 = vpop.f32.mrf.mxu3  ;;  %v956_v47 = vpop.f32.mrf.mxu1  ;;  %v1064_v28 = vld [vmem:[#allocation3] sm:$0xff] }
  0xe5   : > { %v993_v42 = vadd.f32 %v992_v43, %v973_v41  ;;  %v957_v59 = vadd.f32 %v956_v47, %v937_v44  ;;  %v1067_v43 = vld [vmem:[#allocation3 + $0x18] sm:$0xff] }
  0xe7   : > { %2241 = vmatpush.bf16.msrb.mxu0 %v3365_v36  ;;  %v1041_v51 = vadd.f32 %v993_v42, %v575_v38  ;;  %v1043_v52 = vadd.f32 %v957_v59, %v577_v46 }
  0xe8   : > { %3584 = vmatpush.bf16.msrb.mxu1 %v3365_v36 }
  0xe9   : > { %1053 = vst [vmem:[#allocation2] sm:$0xff] %v1041_v51 }
  0xea   : > { %1055 = vst [vmem:[#allocation2 + $0x18] sm:$0xff] %v1043_v52 }
  0xeb   : > { %2242 = vmatpush.bf16.msrb.mxu0 %v3353_v56  ;;  %v975_v57 = vpop.f32.mrf.mxu2  ;;  %v940_v61 = vpop.f32.mrf.mxu0 }
  0xec   : > { %3585 = vmatpush.bf16.msrb.mxu1 %v3353_v56  ;;  %v994_v60 = vpop.f32.mrf.mxu3  ;;  %v959_v0 = vpop.f32.mrf.mxu1 }
  0xed   : > { %v995_v62 = vadd.f32 %v994_v60, %v975_v57  ;;  %v960_v2 = vadd.f32 %v959_v0, %v940_v61 }
  0xee   : > { %2176 = vmatmul.bf16.gmra.mxu0 %v4128_v53 }
  0xef   : > { %2243 = vmatpush.bf16.msrb.mxu0 %v3341_v40  ;;  %v1044_v5 = vadd.f32 %v995_v62, %v578_v58  ;;  %v1046_v6 = vadd.f32 %v960_v2, %v580_v63  ;;  %2195 = vmatmul.bf16.gmra.mxu1 %v4130_v54  ;;  %v1073_v62 = vld [vmem:[#allocation3 + $0x48] sm:$0xff] }
  0xf0   : > { %3586 = vmatpush.bf16.msrb.mxu1 %v3341_v40  ;;  %2214 = vmatmul.bf16.gmra.mxu2 %v4123_v49  ;;  %v1065_v2 = vld [vmem:[#allocation3 + $0x8] sm:$0xff] }
  0xf1   : > { %1056 = vst [vmem:[#allocation2 + $0x50] sm:$0xff] %v1044_v5  ;;  %2233 = vmatmul.bf16.gmra.mxu3 %v4128_v53 }
  0xf2   : > { %1058 = vst [vmem:[#allocation2 + $0x8] sm:$0xff] %v1046_v6 }
  0xf3   : > { %2244 = vmatpush.bf16.msrb.mxu0 %v3329_v1  ;;  %v978_v10 = vpop.f32.mrf.mxu2  ;;  %v942_v13 = vpop.f32.mrf.mxu0 }
  0xf4   : > { %3587 = vmatpush.bf16.msrb.mxu1 %v3329_v1  ;;  %v997_v12 = vpop.f32.mrf.mxu3  ;;  %v961_v16 = vpop.f32.mrf.mxu1 }
  0xf5   : > { %v998_v14 = vadd.f32 %v997_v12, %v978_v10  ;;  %v962_v18 = vadd.f32 %v961_v16, %v942_v13  ;;  %v1068_v12 = vld [vmem:[#allocation3 + $0x20] sm:$0xff] }
  0xf7   : > { %2245 = vmatpush.bf16.msrb.mxu0 %v3317_v7  ;;  %v1047_v49 = vadd.f32 %v998_v14, %v581_v11  ;;  %v1049_v19 = vadd.f32 %v962_v18, %v583_v15  ;;  %v1069_v18 = vld [vmem:[#allocation3 + $0x28] sm:$0xff] }
  0xf8   : > { %3588 = vmatpush.bf16.msrb.mxu1 %v3317_v7 }
  0xf9   : > { %1059 = vst [vmem:[#allocation2 + $0x38] sm:$0xff] %v1047_v49 }
  0xfa   : > { %1061 = vst [vmem:[#allocation2 + $0x48] sm:$0xff] %v1049_v19 }
  0xfb   : > { %2246 = vmatpush.bf16.msrb.mxu0 %v3305_v17  ;;  %v980_v53 = vpop.f32.mrf.mxu2  ;;  %v1011_v21 = vpop.f32.mrf.mxu0 }
  0xfc   : > { %3589 = vmatpush.bf16.msrb.mxu1 %v3305_v17  ;;  %v999_v29 = vpop.f32.mrf.mxu3  ;;  %v1030_v32 = vpop.f32.mrf.mxu1 }
  0xfd   : > { %v1000_v22 = vadd.f32 %v999_v29, %v980_v53  ;;  %v1031_v24 = vadd.f32 %v1030_v32, %v1011_v21 }
  0xfe   : > { %2247 = vmatmul.bf16.vlgmr.msrb.gmra.mxu0 %v4082_v50 }
  0xff   : > { %v1050_v25 = vadd.f32 %v1000_v22, %v584_v20  ;;  %v1042_v26 = vadd.f32 %v1031_v24, %v576_v23  ;;  %2252 = vmatmul.bf16.vlgmr.msrb.gmra.mxu1 %v4130_v54  ;;  %v582_v54 = vld [vmem:[#allocation2 + $0x28] sm:$0xff]  ;;  %v1071_v20 = vld [vmem:[#allocation3 + $0x38] sm:$0xff]  ;;  %v1072_v24 = vld [vmem:[#allocation3 + $0x40] sm:$0xff] }
 0x101   : > { %1062 = vst [vmem:[#allocation2 + $0x10] sm:$0xff] %v1050_v25 }
 0x102   : > { %1054 = vst [vmem:[#allocation2 + $0x58] sm:$0xff] %v1042_v26 }
 0x103   : > { %v1425_v27 = vpop.f32.mrf.mxu2  ;;  %v1013_v31 = vpop.f32.mrf.mxu0 }
 0x104   : > { %v1444_v30 = vpop.f32.mrf.mxu3  ;;  %v1032_v36 = vpop.f32.mrf.mxu1 }
 0x105   : > { %v1445_v33 = vadd.f32 %v1444_v30, %v1425_v27  ;;  %v1033_v37 = vadd.f32 %v1032_v36, %v1013_v31 }
 0x107   : > { %v1530_v39 = vadd.f32 %v1445_v33, %v1064_v28  ;;  %v1045_v41 = vadd.f32 %v1033_v37, %v579_v34  ;;  %v1074_v28 = vld [vmem:[#allocation3 + $0x50] sm:$0xff]  ;;  %v1075_v37 = vld [vmem:[#allocation3 + $0x58] sm:$0xff] }
 0x109   : > { %1542 = vst [vmem:[#allocation3] sm:$0xff] %v1530_v39 }
 0x10a   : > { %1057 = vst [vmem:[#allocation2 + $0x20] sm:$0xff] %v1045_v41 }
 0x10b   : > { %v1427_v38 = vpop.f32.mrf.mxu2  ;;  %v1016_v44 = vpop.f32.mrf.mxu0 }
 0x10c   : > { %v1446_v50 = vpop.f32.mrf.mxu3  ;;  %v1035_v46 = vpop.f32.mrf.mxu1 }
 0x10d   : > { %v1447_v42 = vadd.f32 %v1446_v50, %v1427_v38  ;;  %v1036_v47 = vadd.f32 %v1035_v46, %v1016_v44 }
 0x10f   : > { %v1533_v56 = vadd.f32 %v1447_v42, %v1067_v43  ;;  %v1048_v59 = vadd.f32 %v1036_v47, %v582_v54  ;;  %v1555_v42 = vld [vmem:[#allocation4] sm:$0xff] }
 0x111   : > { %1546 = vst [vmem:[#allocation3 + $0x18] sm:$0xff] %v1533_v56 }
 0x112   : > { %1060 = vst [vmem:[#allocation2 + $0x28] sm:$0xff] %v1048_v59 }
 0x113   : > { %v1430_v48 = vpop.f32.mrf.mxu2  ;;  %v1018_v52 = vpop.f32.mrf.mxu0 }
 0x114   : > { %v1449_v51 = vpop.f32.mrf.mxu3  ;;  %v1037_v45 = vpop.f32.mrf.mxu1 }
 0x115   : > { %v1450_v40 = vadd.f32 %v1449_v51, %v1430_v48  ;;  %v1038_v57 = vadd.f32 %v1037_v45, %v1018_v52  ;;  %v1558_v51 = vld [vmem:[#allocation4 + $0x18] sm:$0xff] }
 0x117   : > { %v1536_v58 = vadd.f32 %v1450_v40, %v1070_v35  ;;  %v1051_v60 = vadd.f32 %v1038_v57, %v585_v55 }
 0x119   : > { %1549 = vst [vmem:[#allocation3 + $0x30] sm:$0xff] %v1536_v58 }
 0x11a   : > { %1063 = vst [vmem:[#allocation2 + $0x40] sm:$0xff] %v1051_v60 }
 0x11b   : > { %v1432_v61 = vpop.f32.mrf.mxu2  ;;  %v1463_v0 = vpop.f32.mrf.mxu0 }
 0x11c   : > { %v1451_v63 = vpop.f32.mrf.mxu3  ;;  %v1482_v3 = vpop.f32.mrf.mxu1 }
 0x11d   : > { %v1452_v1 = vadd.f32 %v1451_v63, %v1432_v61  ;;  %v1483_v4 = vadd.f32 %v1482_v3, %v1463_v0  ;;  %v1561_v61 = vld [vmem:[#allocation4 + $0x30] sm:$0xff] }
 0x11f   : > { %v1539_v5 = vadd.f32 %v1452_v1, %v1073_v62  ;;  %v1531_v6 = vadd.f32 %v1483_v4, %v1065_v2 }
 0x121   : > { %1552 = vst [vmem:[#allocation3 + $0x48] sm:$0xff] %v1539_v5  ;;  %v1564_v5 = vld [vmem:[#allocation4 + $0x48] sm:$0xff] }
 0x122   : > { %1543 = vst [vmem:[#allocation3 + $0x8] sm:$0xff] %v1531_v6 }
 0x123   : > { %v1501_v7 = vpop.f32.mrf.mxu2  ;;  %v1465_v10 = vpop.f32.mrf.mxu0 }
 0x124   : > { %v1520_v9 = vpop.f32.mrf.mxu3  ;;  %v1484_v13 = vpop.f32.mrf.mxu1 }
 0x125   : > { %v1521_v11 = vadd.f32 %v1520_v9, %v1501_v7  ;;  %v1485_v14 = vadd.f32 %v1484_v13, %v1465_v10  ;;  %v1556_v13 = vld [vmem:[#allocation4 + $0x8] sm:$0xff] }
 0x127   : > { %v1532_v15 = vadd.f32 %v1521_v11, %v1066_v8  ;;  %v1534_v16 = vadd.f32 %v1485_v14, %v1068_v12 }
 0x129   : > { %1545 = vst.msk [vmem:[#allocation3 + $0x10] sm:$0xff] %vm1544_vm2, %v1532_v15 }
 0x12a   : > { %1547 = vst [vmem:[#allocation3 + $0x20] sm:$0xff] %v1534_v16 }
 0x12b   : > { %v1503_v17 = vpop.f32.mrf.mxu2  ;;  %v1468_v19 = vpop.f32.mrf.mxu0 }
 0x12c   : > { %v1522_v49 = vpop.f32.mrf.mxu3  ;;  %v1487_v29 = vpop.f32.mrf.mxu1 }
 0x12d   : > { %v1523_v53 = vadd.f32 %v1522_v49, %v1503_v17  ;;  %v1488_v21 = vadd.f32 %v1487_v29, %v1468_v19 }
 0x12f   : > { %v1535_v22 = vadd.f32 %v1523_v53, %v1069_v18  ;;  %v1537_v23 = vadd.f32 %v1488_v21, %v1071_v20  ;;  %v1559_v53 = vld [vmem:[#allocation4 + $0x20] sm:$0xff] }
 0x131   : > { %1548 = vst.msk [vmem:[#allocation3 + $0x28] sm:$0xff] %vm1544_vm2, %v1535_v22 }
 0x132   : > { %1550 = vst [vmem:[#allocation3 + $0x38] sm:$0xff] %v1537_v23 }
 0x133   : > { %v1506_v32 = vpop.f32.mrf.mxu2  ;;  %v1470_v26 = vpop.f32.mrf.mxu0 }
 0x134   : > { %v1525_v25 = vpop.f32.mrf.mxu3  ;;  %v1489_v30 = vpop.f32.mrf.mxu1 }
 0x135   : > { %v1526_v27 = vadd.f32 %v1525_v25, %v1506_v32  ;;  %v1490_v31 = vadd.f32 %v1489_v30, %v1470_v26  ;;  %v1562_v25 = vld [vmem:[#allocation4 + $0x38] sm:$0xff] }
 0x137   : > { %v1538_v33 = vadd.f32 %v1526_v27, %v1072_v24  ;;  %v1540_v34 = vadd.f32 %v1490_v31, %v1074_v28 }
 0x139   : > { %1551 = vst.msk [vmem:[#allocation3 + $0x40] sm:$0xff] %vm1544_vm2, %v1538_v33  ;;  %v1565_v33 = vld [vmem:[#allocation4 + $0x50] sm:$0xff] }
 0x13a   : > { %1553 = vst [vmem:[#allocation3 + $0x50] sm:$0xff] %v1540_v34 }
 0x13b   : > { %v1508_v36 = vpop.f32.mrf.mxu2  ;;  %v2096_v41 = vpop.f32.mrf.mxu0 }
 0x13c   : > { %v1527_v39 = vpop.f32.mrf.mxu3  ;;  %v2115_v43 = vpop.f32.mrf.mxu1 }
 0x13d   : > { %v1528_v38 = vadd.f32 %v1527_v39, %v1508_v36  ;;  %v2116_v44 = vadd.f32 %v2115_v43, %v2096_v41  ;;  %v1557_v43 = vld [vmem:[#allocation4 + $0x10] sm:$0xff] }
 0x13f   : > { %v1541_v50 = vadd.f32 %v1528_v38, %v1075_v37 }
 0x141   : > { %1554 = vst.msk [vmem:[#allocation3 + $0x58] sm:$0xff] %vm1544_vm2, %v1541_v50 }
 0x143   : > { %v2134_v54 = vpop.f32.mrf.mxu2  ;;  %v2098_v56 = vpop.f32.mrf.mxu0 }
 0x144   : > { %v2135_v46 = vadd.f32 %v2134_v54, %v2116_v44  ;;  %v2153_v47 = vpop.f32.mrf.mxu3  ;;  %v2117_v59 = vpop.f32.mrf.mxu1 }
 0x145   : > { %v2118_v35 = vadd.f32 %v2117_v59, %v2098_v56 }
 0x146   : > { %v2258_v48 = vadd.f32 %v2135_v46, %v1555_v42  ;;  %v1563_v42 = vld [vmem:[#allocation4 + $0x40] sm:$0xff] }
 0x148   : > { %2270 = vst [vmem:[#allocation4] sm:$0xff] %v2258_v48 }
 0x14b   : > { %v2136_v52 = vpop.f32.mrf.mxu2  ;;  %v2101_v45 = vpop.f32.mrf.mxu0 }
 0x14c   : > { %v2137_v40 = vadd.f32 %v2136_v52, %v2118_v35  ;;  %v2155_v55 = vpop.f32.mrf.mxu3  ;;  %v2120_v57 = vpop.f32.mrf.mxu1  ;;  %v1560_v52 = vld [vmem:[#allocation4 + $0x28] sm:$0xff] }
 0x14d   : > { %v2121_v60 = vadd.f32 %v2120_v57, %v2101_v45  ;;  %v1566_v45 = vld [vmem:[#allocation4 + $0x58] sm:$0xff] }
 0x14e   : > { %v2261_v58 = vadd.f32 %v2137_v40, %v1558_v51 }
 0x150   : > { %2274 = vst [vmem:[#allocation4 + $0x18] sm:$0xff] %v2261_v58 }
 0x153   : > { %v2139_v62 = vpop.f32.mrf.mxu2  ;;  %v2103_v1 = vpop.f32.mrf.mxu0 }
 0x154   : > { %v2140_v63 = vadd.f32 %v2139_v62, %v2121_v60  ;;  %v2158_v0 = vpop.f32.mrf.mxu3  ;;  %v2122_v2 = vpop.f32.mrf.mxu1 }
 0x155   : > { %v2123_v4 = vadd.f32 %v2122_v2, %v2103_v1 }
 0x156   : > { %v2264_v3 = vadd.f32 %v2140_v63, %v1561_v61 }
 0x158   : > { %2277 = vst [vmem:[#allocation4 + $0x30] sm:$0xff] %v2264_v3 }
 0x15b   : > { %v2141_v6 = vpop.f32.mrf.mxu2  ;;  %v2172_v9 = vpop.f32.mrf.mxu0 }
 0x15c   : > { %v2142_v7 = vadd.f32 %v2141_v6, %v2123_v4  ;;  %v2160_v8 = vpop.f32.mrf.mxu3  ;;  %v2173_v10 = vadd.f32 %v2172_v9, %v2153_v47  ;;  %v2191_v11 = vpop.f32.mrf.mxu1 }
 0x15e   : > { %v2267_v12 = vadd.f32 %v2142_v7, %v1564_v5  ;;  %v2192_v14 = vadd.f32 %v2191_v11, %v2173_v10 }
 0x160   : > { %2280 = vst [vmem:[#allocation4 + $0x48] sm:$0xff] %v2267_v12  ;;  %v2259_v15 = vadd.f32 %v2192_v14, %v1556_v13 }
 0x162   : > { %2271 = vst [vmem:[#allocation4 + $0x8] sm:$0xff] %v2259_v15 }
 0x163   : > { %v2210_v16 = vpop.f32.mrf.mxu2  ;;  %v2174_v18 = vpop.f32.mrf.mxu0 }
 0x164   : > { %v2229_v17 = vpop.f32.mrf.mxu3  ;;  %v2175_v49 = vadd.f32 %v2174_v18, %v2155_v55  ;;  %v2193_v19 = vpop.f32.mrf.mxu1 }
 0x165   : > { %v2230_v38 = vadd.f32 %v2229_v17, %v2210_v16 }
 0x166   : > { %v2194_v20 = vadd.f32 %v2193_v19, %v2175_v49 }
 0x168   : > { %v2262_v29 = vadd.f32 %v2194_v20, %v1559_v53 }
 0x16a   : > { %2275 = vst [vmem:[#allocation4 + $0x20] sm:$0xff] %v2262_v29 }
 0x16b   : > { %v2212_v21 = vpop.f32.mrf.mxu2  ;;  %v2177_v22 = vpop.f32.mrf.mxu0 }
 0x16c   : > { %v2231_v23 = vpop.f32.mrf.mxu3  ;;  %v2178_v32 = vadd.f32 %v2177_v22, %v2158_v0  ;;  %v2196_v24 = vpop.f32.mrf.mxu1 }
 0x16d   : > { %v2232_v35 = vadd.f32 %v2231_v23, %v2212_v21 }
 0x16e   : > { %v2197_v26 = vadd.f32 %v2196_v24, %v2178_v32 }
 0x170   : > { %v2265_v27 = vadd.f32 %v2197_v26, %v1562_v25 }
 0x172   : > { %2278 = vst [vmem:[#allocation4 + $0x38] sm:$0xff] %v2265_v27 }
 0x173   : > { %v2179_v28 = vpop.f32.mrf.mxu0  ;;  %v2215_v34 = vpop.f32.mrf.mxu2 }
 0x174   : > { %v2180_v30 = vadd.f32 %v2179_v28, %v2160_v8  ;;  %v2198_v31 = vpop.f32.mrf.mxu1  ;;  %v2234_v36 = vpop.f32.mrf.mxu3 }
 0x175   : > { %v2235_v41 = vadd.f32 %v2234_v36, %v2215_v34 }
 0x176   : > { %v2199_v37 = vadd.f32 %v2198_v31, %v2180_v30 }
 0x178   : > { %v2268_v39 = vadd.f32 %v2199_v37, %v1565_v33 }
 0x17a   : > { %2281 = vst [vmem:[#allocation4 + $0x50] sm:$0xff] %v2268_v39 }
 0x17b   : > { %v2248_v50 = vpop.f32.mrf.mxu0  ;;  %v2217_v59 = vpop.f32.mrf.mxu2 }
 0x17c   : > { %v2249_v44 = vadd.f32 %v2248_v50, %v2230_v38  ;;  %v2253_v54 = vpop.f32.mrf.mxu1  ;;  %v2236_v48 = vpop.f32.mrf.mxu3 }
 0x17d   : > { %v2254_v46 = vadd.f32 %v2253_v54, %v2235_v41  ;;  %v2237_v51 = vadd.f32 %v2236_v48, %v2217_v59 }
 0x17e   : > { %v2260_v47 = vadd.f32 %v2249_v44, %v1557_v43 }
 0x17f   : > { %v2266_v56 = vadd.f32 %v2254_v46, %v1563_v42 }
 0x180   : > { %2273 = vst.msk [vmem:[#allocation4 + $0x10] sm:$0xff] %vm2272_vm3, %v2260_v47 }
 0x181   : > { %2279 = vst.msk [vmem:[#allocation4 + $0x40] sm:$0xff] %vm2272_vm3, %v2266_v56 }
 0x183   : > { %v2250_v40 = vpop.f32.mrf.mxu0 }
 0x184   : > { %v2251_v55 = vadd.f32 %v2250_v40, %v2232_v35  ;;  %v2255_v57 = vpop.f32.mrf.mxu1 }
 0x185   : > { %v2256_v58 = vadd.f32 %v2255_v57, %v2237_v51  ;;  %2286 = sbr.rel (%p3390_p6) target bundleno = 437 (0x1b5), region = 60 }
 0x186   : > { %v2263_v60 = vadd.f32 %v2251_v55, %v1560_v52 }
 0x187   : > { %v2269_v61 = vadd.f32 %v2256_v58, %v1566_v45 }
 0x188   : > { %2276 = vst.msk [vmem:[#allocation4 + $0x28] sm:$0xff] %vm2272_vm3, %v2263_v60 }
 0x189   : > { %2282 = vst.msk [vmem:[#allocation4 + $0x58] sm:$0xff] %vm2272_vm3, %v2269_v61 }
 0x18a   : > { %v2287_v62 = vld [vmem:[#allocation2 + $0x30] sm:$0xff]  ;;  %v2299_v63 = vld [vmem:[%s4328_s5] sm:$0x7]  ;;  %v2289_v3 = vld [vmem:[#allocation2 + $0x58] sm:$0xff] }
 0x18b   : > { %v2288_v0 = vld [vmem:[#allocation2] sm:$0xff]  ;;  %v2301_v1 = vperm.slane %v2299_v63, 0  ;;  %v2302_v2 = vperm.slane %v2299_v63, 1  ;;  %v2303_v4 = vperm.slane %v2299_v63, 2  ;;  %v2290_v5 = vld [vmem:[#allocation2 + $0x18] sm:$0xff]  ;;  %v2291_v6 = vld [vmem:[#allocation2 + $0x50] sm:$0xff] }
 0x18c   : > { %v2292_v7 = vld [vmem:[#allocation2 + $0x20] sm:$0xff]  ;;  %v2293_v8 = vld [vmem:[#allocation2 + $0x8] sm:$0xff]  ;;  %v2294_v13 = vld [vmem:[#allocation2 + $0x38] sm:$0xff] }
 0x18d   : > { %v2307_v9 = vadd.f32 %v2301_v1, %v2287_v62  ;;  %v2308_v10 = vadd.f32 %v2302_v2, %v2288_v0  ;;  %v2309_v11 = vadd.f32 %v2303_v4, %v2289_v3  ;;  %v2310_v12 = vadd.f32 %v2301_v1, %v2290_v5  ;;  %v2295_v16 = vld [vmem:[#allocation2 + $0x28] sm:$0xff]  ;;  %v2355_v20 = vld [vmem:[%s4329_s6] sm:$0x7]  ;;  %v2297_v22 = vld [vmem:[#allocation2 + $0x10] sm:$0xff] }
 0x18e   : > { %v2311_v14 = vadd.f32 %v2302_v2, %v2291_v6  ;;  %v2312_v15 = vadd.f32 %v2303_v4, %v2292_v7  ;;  %v2313_v19 = vadd.f32 %v2301_v1, %v2293_v8  ;;  %v2296_v53 = vld [vmem:[#allocation2 + $0x48] sm:$0xff]  ;;  %v2314_v21 = vadd.f32 %v2302_v2, %v2294_v13  ;;  %v2298_v24 = vld [vmem:[#allocation2 + $0x40] sm:$0xff]  ;;  %v2345_v41 = vld [vmem:[#allocation3 + $0x10] sm:$0xff] }
 0x18f   : > { %v2319_v17 = vmax.f32 %v2307_v9, 0.0  ;;  %v2320_v18 = vmax.f32 %v2308_v10, 0.0  ;;  %v2321_v49 = vmax.f32 %v2309_v11, 0.0  ;;  %v2322_v29 = vmax.f32 %v2310_v12, 0.0  ;;  %v2343_v27 = vld [vmem:[#allocation3] sm:$0xff]  ;;  %v2344_v34 = vld [vmem:[#allocation3 + $0x8] sm:$0xff] }
 0x190   : > { %v2323_v23 = vmax.f32 %v2311_v14, 0.0  ;;  %v2315_v32 = vadd.f32 %v2303_v4, %v2295_v16  ;;  %v2324_v25 = vmax.f32 %v2312_v15, 0.0  ;;  %v2316_v26 = vadd.f32 %v2301_v1, %v2296_v53  ;;  %v2346_v50 = vld [vmem:[#allocation3 + $0x18] sm:$0xff]  ;;  %v2347_v54 = vld [vmem:[#allocation3 + $0x20] sm:$0xff]  ;;  %v2348_v56 = vld [vmem:[#allocation3 + $0x28] sm:$0xff] }
 0x191   : > { %2331 = vst [vmem:[%s4331_s8] sm:$0xff] %v2319_v17  ;;  %v2357_v28 = vperm.slane %v2355_v20, 0  ;;  %v2358_v30 = vperm.slane %v2355_v20, 1  ;;  %v2325_v31 = vmax.f32 %v2313_v19, 0.0  ;;  %v2317_v33 = vadd.f32 %v2302_v2, %v2297_v22  ;;  %v2349_v35 = vld [vmem:[#allocation3 + $0x30] sm:$0xff]  ;;  %v2350_v40 = vld [vmem:[#allocation3 + $0x38] sm:$0xff]  ;;  %v2351_v57 = vld [vmem:[#allocation3 + $0x40] sm:$0xff] }
 0x192   : > { %2332 = vst [vmem:[%s4331_s8 + $0x8] sm:$0xff] %v2320_v18  ;;  %v2359_v36 = vperm.slane %v2355_v20, 2  ;;  %v2326_v37 = vmax.f32 %v2314_v21, 0.0  ;;  %v2318_v39 = vadd.f32 %v2303_v4, %v2298_v24  ;;  %v2327_v38 = vmax.f32 %v2315_v32, 0.0  ;;  %v2411_v58 = vld [vmem:[%s4330_s7] sm:$0x7] }
 0x193   : > { %2333 = vst [vmem:[%s4331_s8 + $0x10] sm:$0xff] %v2321_v49  ;;  %v2363_v43 = vadd.f32 %v2357_v28, %v2343_v27  ;;  %v2328_v44 = vmax.f32 %v2316_v26, 0.0  ;;  %v2364_v42 = vadd.f32 %v2358_v30, %v2344_v34  ;;  %v2329_v46 = vmax.f32 %v2317_v33, 0.0  ;;  %v2352_v62 = vld [vmem:[#allocation3 + $0x48] sm:$0xff]  ;;  %v2353_v1 = vld [vmem:[#allocation3 + $0x50] sm:$0xff]  ;;  %v2354_v4 = vld [vmem:[#allocation3 + $0x58] sm:$0xff] }
 0x194   : > { %2334 = vst [vmem:[%s4331_s8 + $0x18] sm:$0xff] %v2322_v29  ;;  %v2365_v47 = vadd.f32 %v2359_v36, %v2345_v41  ;;  %v2330_v59 = vmax.f32 %v2318_v39, 0.0  ;;  %v2366_v48 = vadd.f32 %v2357_v28, %v2346_v50  ;;  %v2367_v52 = vadd.f32 %v2358_v30, %v2347_v54  ;;  %v2399_v8 = vld [vmem:[#allocation4] sm:$0xff]  ;;  %v2400_v12 = vld [vmem:[#allocation4 + $0x8] sm:$0xff]  ;;  %v2401_v16 = vld [vmem:[#allocation4 + $0x10] sm:$0xff] }
 0x195   : > { %2335 = vst [vmem:[%s4331_s8 + $0x20] sm:$0xff] %v2323_v23  ;;  %v2375_v51 = vmax.f32 %v2363_v43, 0.0  ;;  %v2376_v55 = vmax.f32 %v2364_v42, 0.0  ;;  %v2368_v45 = vadd.f32 %v2359_v36, %v2348_v56  ;;  %v2369_v61 = vadd.f32 %v2357_v28, %v2349_v35  ;;  %v2402_v49 = vld [vmem:[#allocation4 + $0x18] sm:$0xff]  ;;  %v2403_v20 = vld [vmem:[#allocation4 + $0x20] sm:$0xff]  ;;  %v2404_v22 = vld [vmem:[#allocation4 + $0x28] sm:$0xff] }
 0x196   : > { %2336 = vst [vmem:[%s4331_s8 + $0x28] sm:$0xff] %v2324_v25  ;;  %v2377_v60 = vmax.f32 %v2365_v47, 0.0  ;;  %v2378_v63 = vmax.f32 %v2366_v48, 0.0  ;;  %v2370_v0 = vadd.f32 %v2358_v30, %v2350_v40  ;;  %v2379_v2 = vmax.f32 %v2367_v52, 0.0  ;;  %v2405_v24 = vld [vmem:[#allocation4 + $0x30] sm:$0xff]  ;;  %v2406_v27 = vld [vmem:[#allocation4 + $0x38] sm:$0xff] }
 0x197   : > { %2337 = vst [vmem:[%s4331_s8 + $0x30] sm:$0xff] %v2325_v31  ;;  %v2371_v3 = vadd.f32 %v2359_v36, %v2351_v57  ;;  %v2413_v5 = vperm.slane %v2411_v58, 0  ;;  %v2380_v6 = vmax.f32 %v2368_v45, 0.0  ;;  %v2372_v7 = vadd.f32 %v2357_v28, %v2352_v62  ;;  %v2407_v31 = vld [vmem:[#allocation4 + $0x40] sm:$0xff]  ;;  %v2409_v41 = vld [vmem:[#allocation4 + $0x50] sm:$0xff]  ;;  %v2410_v50 = vld [vmem:[#allocation4 + $0x58] sm:$0xff] }
 0x198   : > { %2338 = vst [vmem:[%s4331_s8 + $0x38] sm:$0xff] %v2326_v37  ;;  %v2414_v9 = vperm.slane %v2411_v58, 1  ;;  %v2381_v10 = vmax.f32 %v2369_v61, 0.0  ;;  %v2373_v11 = vadd.f32 %v2358_v30, %v2353_v1  ;;  %v2415_v13 = vperm.slane %v2411_v58, 2 }
 0x199   : > { %2339 = vst [vmem:[%s4331_s8 + $0x40] sm:$0xff] %v2327_v38  ;;  %v2382_v14 = vmax.f32 %v2370_v0, 0.0  ;;  %v2374_v15 = vadd.f32 %v2359_v36, %v2354_v4  ;;  %v2383_v17 = vmax.f32 %v2371_v3, 0.0  ;;  %v2419_v18 = vadd.f32 %v2413_v5, %v2399_v8  ;;  %v2408_v36 = vld [vmem:[#allocation4 + $0x48] sm:$0xff] }
 0x19a   : > { %2340 = vst [vmem:[%s4331_s8 + $0x48] sm:$0xff] %v2328_v44  ;;  %v2384_v19 = vmax.f32 %v2372_v7, 0.0  ;;  %v2420_v53 = vadd.f32 %v2414_v9, %v2400_v12  ;;  %v2385_v29 = vmax.f32 %v2373_v11, 0.0  ;;  %v2421_v21 = vadd.f32 %v2415_v13, %v2401_v16 }
 0x19b   : > { %2341 = vst [vmem:[%s4331_s8 + $0x50] sm:$0xff] %v2329_v46  ;;  %v2386_v23 = vmax.f32 %v2374_v15, 0.0  ;;  %v2422_v32 = vadd.f32 %v2413_v5, %v2402_v49  ;;  %v2431_v25 = vmax.f32 %v2419_v18, 0.0  ;;  %v2423_v26 = vadd.f32 %v2414_v9, %v2403_v20 }
 0x19c   : > { %2342 = vst [vmem:[%s4331_s8 + $0x58] sm:$0xff] %v2330_v59  ;;  %v2432_v28 = vmax.f32 %v2420_v53, 0.0  ;;  %v2424_v30 = vadd.f32 %v2415_v13, %v2404_v22  ;;  %v2433_v33 = vmax.f32 %v2421_v21, 0.0  ;;  %v2425_v34 = vadd.f32 %v2413_v5, %v2405_v24 }
 0x19d   : > { %2387 = vst [vmem:[%s4332_s9] sm:$0xff] %v2375_v51  ;;  %v2434_v37 = vmax.f32 %v2422_v32, 0.0  ;;  %v2426_v39 = vadd.f32 %v2414_v9, %v2406_v27  ;;  %v2435_v38 = vmax.f32 %v2423_v26, 0.0  ;;  %v2427_v43 = vadd.f32 %v2415_v13, %v2407_v31 }
 0x19e   : > { %2388 = vst [vmem:[%s4332_s9 + $0x8] sm:$0xff] %v2376_v55  ;;  %v2436_v44 = vmax.f32 %v2424_v30, 0.0  ;;  %v2428_v42 = vadd.f32 %v2413_v5, %v2408_v36  ;;  %v2437_v54 = vmax.f32 %v2425_v34, 0.0  ;;  %v2429_v46 = vadd.f32 %v2414_v9, %v2409_v41 }
 0x19f   : > { %2389 = vst.msk [vmem:[%s4332_s9 + $0x10] sm:$0xff] %vm1544_vm2, %v2377_v60  ;;  %v2438_v47 = vmax.f32 %v2426_v39, 0.0  ;;  %v2430_v56 = vadd.f32 %v2415_v13, %v2410_v50  ;;  %v2439_v59 = vmax.f32 %v2427_v43, 0.0 }
 0x1a0   : > { %2390 = vst [vmem:[%s4332_s9 + $0x18] sm:$0xff] %v2378_v63  ;;  %v2440_v48 = vmax.f32 %v2428_v42, 0.0  ;;  %v2441_v35 = vmax.f32 %v2429_v46, 0.0 }
 0x1a1   : > { %2391 = vst [vmem:[%s4332_s9 + $0x20] sm:$0xff] %v2379_v2  ;;  %v2442_v51 = vmax.f32 %v2430_v56, 0.0 }
 0x1a2   : > { %2392 = vst.msk [vmem:[%s4332_s9 + $0x28] sm:$0xff] %vm1544_vm2, %v2380_v6 }
 0x1a3   : > { %2393 = vst [vmem:[%s4332_s9 + $0x30] sm:$0xff] %v2381_v10 }
 0x1a4   : > { %2394 = vst [vmem:[%s4332_s9 + $0x38] sm:$0xff] %v2382_v14 }
 0x1a5   : > { %2395 = vst.msk [vmem:[%s4332_s9 + $0x40] sm:$0xff] %vm1544_vm2, %v2383_v17 }
 0x1a6   : > { %2396 = vst [vmem:[%s4332_s9 + $0x48] sm:$0xff] %v2384_v19 }
 0x1a7   : > { %2397 = vst [vmem:[%s4332_s9 + $0x50] sm:$0xff] %v2385_v29 }
 0x1a8   : > { %2398 = vst.msk [vmem:[%s4332_s9 + $0x58] sm:$0xff] %vm1544_vm2, %v2386_v23 }
 0x1a9   : > { %2443 = vst [vmem:[%s4333_s10] sm:$0xff] %v2431_v25 }
 0x1aa   : > { %2444 = vst [vmem:[%s4333_s10 + $0x8] sm:$0xff] %v2432_v28 }
 0x1ab   : > { %2445 = vst.msk [vmem:[%s4333_s10 + $0x10] sm:$0xff] %vm2272_vm3, %v2433_v33 }
 0x1ac   : > { %2446 = vst [vmem:[%s4333_s10 + $0x18] sm:$0xff] %v2434_v37 }
 0x1ad   : > { %2447 = vst [vmem:[%s4333_s10 + $0x20] sm:$0xff] %v2435_v38 }
 0x1ae   : > { %2448 = vst.msk [vmem:[%s4333_s10 + $0x28] sm:$0xff] %vm2272_vm3, %v2436_v44 }
 0x1af   : > { %2449 = vst [vmem:[%s4333_s10 + $0x30] sm:$0xff] %v2437_v54 }
 0x1b0   : > { %2450 = vst [vmem:[%s4333_s10 + $0x38] sm:$0xff] %v2438_v47 }
 0x1b1   : > { %2451 = vst.msk [vmem:[%s4333_s10 + $0x40] sm:$0xff] %vm2272_vm3, %v2439_v59 }
 0x1b2   : > { %2452 = vst [vmem:[%s4333_s10 + $0x48] sm:$0xff] %v2440_v48 }
 0x1b3   : > { %2453 = vst [vmem:[%s4333_s10 + $0x50] sm:$0xff] %v2441_v35 }
 0x1b4   : > { %2454 = vst.msk [vmem:[%s4333_s10 + $0x58] sm:$0xff] %vm2272_vm3, %v2442_v51 }
 0x1b5 PF: > { %s21_s15 = sadd.s32 1, %s3640_s15   ;;  %s4335_s24 = sld [smem:[#allocation5_spill]] }
 0x1b6   : > { %p18_p7 = scmp.ge.s32.totalorder %s21_s15, 11   ;;  %s4336_s13 = smov %s3636_s14 }
 0x1b8   :  { %20 = sbr.rel (!%p18_p7) target bundleno = 2 (0x2), region = 126 }
 0x1bb   : > { %s4337_s14 = smov %s4335_s24 }

</bundles_post_ra>
